<compile_context>
chip_gen: v5e
topology: v5e:2x2
jax: 0.10.0
libtpu: 0.0.40
codegen_flags: <defaults>
</compile_context>

<pallas_src>
import functools

import jax
import jax.numpy as jnp
from jax.experimental import pallas as pl
from jax.experimental.pallas import tpu as pltpu


# ----------------------------------------------------------------------------- kernel
def _tnet64_kernel(x_ref,
                   W1, b1, W2, b2, W3, b3,          # conv1/2/3 (BN folded)
                   Wf1, bf1, Wf2, bf2, Wf3, bf3,    # fc1/2 (BN folded), fc3 (+identity in bias)
                   out_ref, *, bb, n_pts):
    # x_ref: (bb * n_pts, k) bf16 -- BB point clouds stacked along rows, channels on lanes.

    def dense_relu_bf16(h, w_ref, b_ref):
        y = jnp.dot(h, w_ref[...], preferred_element_type=jnp.float32) + b_ref[...]
        return jnp.maximum(y, 0.0).astype(jnp.bfloat16)

    # ---- pointwise convs (shared MLP over all bb*n_pts points) ----
    h = dense_relu_bf16(x_ref[...], W1, b1)                                   # (bb*N, 64)
    h = dense_relu_bf16(h, W2, b2)                                            # (bb*N, 128)
    h = jnp.dot(h, W3[...], preferred_element_type=jnp.float32) + b3[...]     # (bb*N, 1024) f32
    h = jnp.maximum(h, 0.0)

    # ---- per-cloud max pooling over the point axis ----
    g = jnp.max(h.reshape(bb, n_pts, 1024), axis=1)                           # (bb, 1024) f32
    g = g.astype(jnp.bfloat16)

    # ---- FC head (batched over the bb clouds of this grid step) ----
    g = dense_relu_bf16(g, Wf1, bf1)                                          # (bb, 512)
    g = dense_relu_bf16(g, Wf2, bf2)                                          # (bb, 256)
    # fc3; the flattened k x k identity is already folded into bf3 on the host.
    out_ref[0] = jnp.dot(g, Wf3[...], preferred_element_type=jnp.float32) + bf3[...]


# ----------------------------------------------------------------------------- params
def _fold_bn(W, b, eps=1e-5):
    """Fold an eval-mode BatchNorm1d (default untrained stats: gamma=1, beta=0,
    running_mean=0, running_var=1) into the preceding matmul's weight/bias."""
    # TODO(synk): matches a freshly-initialized eval-mode PyTorch model; trained
    # running stats would have to be substituted here.
    c_out = W.shape[1]
    gamma = jnp.ones((c_out,), jnp.float32)
    beta = jnp.zeros((c_out,), jnp.float32)
    mean = jnp.zeros((c_out,), jnp.float32)
    var = jnp.ones((c_out,), jnp.float32)
    scale = gamma / jnp.sqrt(var + eps)
    shift = beta - mean * scale
    return W * scale[None, :], b * scale[None, :] + shift[None, :]


def make_params(key, k=64):
    def lin(kk, cin, cout, s=0.05):
        kw, kb = jax.random.split(kk)
        W = s * jax.random.normal(kw, (cin, cout), jnp.float32)
        b = s * jax.random.normal(kb, (1, cout), jnp.float32)
        return W, b

    keys = jax.random.split(key, 6)
    W1, b1 = _fold_bn(*lin(keys[0], k, 64))
    W2, b2 = _fold_bn(*lin(keys[1], 64, 128))
    W3, b3 = _fold_bn(*lin(keys[2], 128, 1024))
    Wf1, bf1 = _fold_bn(*lin(keys[3], 1024, 512))
    Wf2, bf2 = _fold_bn(*lin(keys[4], 512, 256))
    Wf3, bf3 = lin(keys[5], 256, k * k)

    # PyTorch: x = fc3(...) + eye(k).flatten()  -> fold the identity into the fc3 bias.
    bf3 = bf3 + jnp.eye(k, dtype=jnp.float32).reshape(1, k * k)

    ws = [W1, W2, W3, Wf1, Wf2, Wf3]
    bs = [b1, b2, b3, bf1, bf2, bf3]
    params = []
    for W, b in zip(ws, bs):
        params.append(W.astype(jnp.bfloat16))   # weights: bf16 (MXU-native)
        params.append(b.astype(jnp.float32))    # biases / folded shifts: f32
    return params


# ----------------------------------------------------------------------------- wrapper
def tnet64_forward(x_nkw, params, *, bb=2):
    """x_nkw: (B, k, N) float32, PyTorch Conv1d layout. Returns the (B, k, k) transform."""
    B, k, N = x_nkw.shape
    assert B % bb == 0, "batch must be divisible by the per-step block size bb"

    # (B, k, N) -> (B*N, k): channels on lanes, bb*N points per grid step.
    x = jnp.transpose(x_nkw, (0, 2, 1)).reshape(B * N, k).astype(jnp.bfloat16)

    kernel = functools.partial(_tnet64_kernel, bb=bb, n_pts=N)

    in_specs = [pl.BlockSpec((bb * N, k), lambda i: (i, 0))]
    for p in params:  # weights / biases: whole array, resident across the batch grid
        in_specs.append(pl.BlockSpec(p.shape, lambda i, _r=p.ndim: (0,) * _r))

    out = pl.pallas_call(
        kernel,
        out_shape=jax.ShapeDtypeStruct((B // bb, bb, k * k), jnp.float32),
        grid=(B // bb,),
        in_specs=in_specs,
        out_specs=pl.BlockSpec((1, bb, k * k), lambda i: (i, 0, 0)),
        compiler_params=pltpu.CompilerParams(
            dimension_semantics=("parallel",),
            vmem_limit_bytes=32 * 1024 * 1024),
    )(x, *params)

    return out.reshape(B, k, k)


# ----------------------------------------------------------------------------- main
if __name__ == "__main__":
    B, k, N = 4, 64, 128          # k=64 is fixed by the TNet64 architecture
    key = jax.random.PRNGKey(0)
    kx, kp = jax.random.split(key)

    x = jax.random.normal(kx, (B, k, N), jnp.float32)   # PyTorch NCW layout
    params = make_params(kp, k=k)

    trans = tnet64_forward(x, params, bb=2)              # grid length 2 (even -> both TCs on v7x)
    trans = jax.block_until_ready(trans)

    assert trans.shape == (B, k, k)
    assert bool(jnp.all(jnp.isfinite(trans)))
    print("KERNEL_OK")
</pallas_src>

<mosaic_0001>
module attributes {stable_mosaic.version = 11 : i64} {
  func.func @_tnet64_kernel(%arg0: i32, %arg1: memref<256x64xbf16, #tpu.memory_space<vmem>>, %arg2: memref<64x64xbf16, #tpu.memory_space<vmem>>, %arg3: memref<1x64xf32, #tpu.memory_space<vmem>>, %arg4: memref<64x128xbf16, #tpu.memory_space<vmem>>, %arg5: memref<1x128xf32, #tpu.memory_space<vmem>>, %arg6: memref<128x1024xbf16, #tpu.memory_space<vmem>>, %arg7: memref<1x1024xf32, #tpu.memory_space<vmem>>, %arg8: memref<1024x512xbf16, #tpu.memory_space<vmem>>, %arg9: memref<1x512xf32, #tpu.memory_space<vmem>>, %arg10: memref<512x256xbf16, #tpu.memory_space<vmem>>, %arg11: memref<1x256xf32, #tpu.memory_space<vmem>>, %arg12: memref<256x4096xbf16, #tpu.memory_space<vmem>>, %arg13: memref<1x4096xf32, #tpu.memory_space<vmem>>, %arg14: memref<1x2x4096xf32, #tpu.memory_space<vmem>>) attributes {dimension_semantics = [#tpu.dimension_semantics<parallel>], iteration_bounds = array<i64: 2>, scalar_prefetch = 0 : i64, scratch_operands = 0 : i64, tpu.core_type = #tpu.core_type<tc>, window_params = [{transform_indices = @transform_0, window_bounds = array<i64: 256, 64>}, {pipeline_mode = #tpu.pipeline_mode<synchronous>, transform_indices = @transform_1, window_bounds = array<i64: 64, 64>}, {pipeline_mode = #tpu.pipeline_mode<synchronous>, transform_indices = @transform_2, window_bounds = array<i64: 1, 64>}, {pipeline_mode = #tpu.pipeline_mode<synchronous>, transform_indices = @transform_3, window_bounds = array<i64: 64, 128>}, {pipeline_mode = #tpu.pipeline_mode<synchronous>, transform_indices = @transform_4, window_bounds = array<i64: 1, 128>}, {pipeline_mode = #tpu.pipeline_mode<synchronous>, transform_indices = @transform_5, window_bounds = array<i64: 128, 1024>}, {pipeline_mode = #tpu.pipeline_mode<synchronous>, transform_indices = @transform_6, window_bounds = array<i64: 1, 1024>}, {pipeline_mode = #tpu.pipeline_mode<synchronous>, transform_indices = @transform_7, window_bounds = array<i64: 1024, 512>}, {pipeline_mode = #tpu.pipeline_mode<synchronous>, transform_indices = @transform_8, window_bounds = array<i64: 1, 512>}, {pipeline_mode = #tpu.pipeline_mode<synchronous>, transform_indices = @transform_9, window_bounds = array<i64: 512, 256>}, {pipeline_mode = #tpu.pipeline_mode<synchronous>, transform_indices = @transform_10, window_bounds = array<i64: 1, 256>}, {pipeline_mode = #tpu.pipeline_mode<synchronous>, transform_indices = @transform_11, window_bounds = array<i64: 256, 4096>}, {pipeline_mode = #tpu.pipeline_mode<synchronous>, transform_indices = @transform_12, window_bounds = array<i64: 1, 4096>}, {transform_indices = @transform_13, window_bounds = array<i64: 1, 2, 4096>}]} {
    %c0 = arith.constant 0 : index
    %c0_0 = arith.constant 0 : index
    %0 = vector.load %arg1[%c0, %c0_0] : memref<256x64xbf16, #tpu.memory_space<vmem>>, vector<256x64xbf16>
    %c0_1 = arith.constant 0 : index
    %c0_2 = arith.constant 0 : index
    %1 = vector.load %arg2[%c0_1, %c0_2] : memref<64x64xbf16, #tpu.memory_space<vmem>>, vector<64x64xbf16>
    %cst = arith.constant dense<0.000000e+00> : vector<256x64xf32>
    %2 = tpu.matmul %0, %1, %cst {dimension_numbers = #tpu.dot_dimension_numbers<[1], [0], [0], [1], [0, 0, 1, 1], [], []>} : vector<256x64xbf16>, vector<64x64xbf16>, vector<256x64xf32> -> vector<256x64xf32>
    %c0_3 = arith.constant 0 : index
    %c0_4 = arith.constant 0 : index
    %3 = vector.load %arg3[%c0_3, %c0_4] : memref<1x64xf32, #tpu.memory_space<vmem>>, vector<1x64xf32>
    %4 = vector.broadcast %3 : vector<1x64xf32> to vector<256x64xf32>
    %5 = arith.addf %2, %4 : vector<256x64xf32>
    %cst_5 = arith.constant 0.000000e+00 : f32
    %6 = vector.broadcast %cst_5 : f32 to vector<256x64xf32>
    %7 = arith.maximumf %5, %6 : vector<256x64xf32>
    %8 = arith.truncf %7 : vector<256x64xf32> to vector<256x64xbf16>
    %c0_6 = arith.constant 0 : index
    %c0_7 = arith.constant 0 : index
    %9 = vector.load %arg4[%c0_6, %c0_7] : memref<64x128xbf16, #tpu.memory_space<vmem>>, vector<64x128xbf16>
    %cst_8 = arith.constant dense<0.000000e+00> : vector<256x128xf32>
    %10 = tpu.matmul %8, %9, %cst_8 {dimension_numbers = #tpu.dot_dimension_numbers<[1], [0], [0], [1], [0, 0, 1, 1], [], []>} : vector<256x64xbf16>, vector<64x128xbf16>, vector<256x128xf32> -> vector<256x128xf32>
    %c0_9 = arith.constant 0 : index
    %c0_10 = arith.constant 0 : index
    %11 = vector.load %arg5[%c0_9, %c0_10] : memref<1x128xf32, #tpu.memory_space<vmem>>, vector<1x128xf32>
    %12 = vector.broadcast %11 : vector<1x128xf32> to vector<256x128xf32>
    %13 = arith.addf %10, %12 : vector<256x128xf32>
    %cst_11 = arith.constant 0.000000e+00 : f32
    %14 = vector.broadcast %cst_11 : f32 to vector<256x128xf32>
    %15 = arith.maximumf %13, %14 : vector<256x128xf32>
    %16 = arith.truncf %15 : vector<256x128xf32> to vector<256x128xbf16>
    %c0_12 = arith.constant 0 : index
    %c0_13 = arith.constant 0 : index
    %17 = vector.load %arg6[%c0_12, %c0_13] : memref<128x1024xbf16, #tpu.memory_space<vmem>>, vector<128x1024xbf16>
    %cst_14 = arith.constant dense<0.000000e+00> : vector<256x1024xf32>
    %18 = tpu.matmul %16, %17, %cst_14 {dimension_numbers = #tpu.dot_dimension_numbers<[1], [0], [0], [1], [0, 0, 1, 1], [], []>} : vector<256x128xbf16>, vector<128x1024xbf16>, vector<256x1024xf32> -> vector<256x1024xf32>
    %c0_15 = arith.constant 0 : index
    %c0_16 = arith.constant 0 : index
    %19 = vector.load %arg7[%c0_15, %c0_16] : memref<1x1024xf32, #tpu.memory_space<vmem>>, vector<1x1024xf32>
    %20 = vector.broadcast %19 : vector<1x1024xf32> to vector<256x1024xf32>
    %21 = arith.addf %18, %20 : vector<256x1024xf32>
    %cst_17 = arith.constant 0.000000e+00 : f32
    %22 = vector.broadcast %cst_17 : f32 to vector<256x1024xf32>
    %23 = arith.maximumf %21, %22 : vector<256x1024xf32>
    %24 = vector.shape_cast %23 : vector<256x1024xf32> to vector<2x128x1024xf32>
    %cst_18 = arith.constant dense<0xFF800000> : vector<2x1024xf32>
    %25 = vector.multi_reduction <maximumf>, %24, %cst_18 [1] : vector<2x128x1024xf32> to vector<2x1024xf32>
    %26 = arith.truncf %25 : vector<2x1024xf32> to vector<2x1024xbf16>
    %c0_19 = arith.constant 0 : index
    %c0_20 = arith.constant 0 : index
    %27 = vector.load %arg8[%c0_19, %c0_20] : memref<1024x512xbf16, #tpu.memory_space<vmem>>, vector<1024x512xbf16>
    %cst_21 = arith.constant dense<0.000000e+00> : vector<2x512xf32>
    %28 = tpu.matmul %26, %27, %cst_21 {dimension_numbers = #tpu.dot_dimension_numbers<[1], [0], [0], [1], [0, 0, 1, 1], [], []>} : vector<2x1024xbf16>, vector<1024x512xbf16>, vector<2x512xf32> -> vector<2x512xf32>
    %c0_22 = arith.constant 0 : index
    %c0_23 = arith.constant 0 : index
    %29 = vector.load %arg9[%c0_22, %c0_23] : memref<1x512xf32, #tpu.memory_space<vmem>>, vector<1x512xf32>
    %30 = vector.broadcast %29 : vector<1x512xf32> to vector<2x512xf32>
    %31 = arith.addf %28, %30 : vector<2x512xf32>
    %cst_24 = arith.constant 0.000000e+00 : f32
    %32 = vector.broadcast %cst_24 : f32 to vector<2x512xf32>
    %33 = arith.maximumf %31, %32 : vector<2x512xf32>
    %34 = arith.truncf %33 : vector<2x512xf32> to vector<2x512xbf16>
    %c0_25 = arith.constant 0 : index
    %c0_26 = arith.constant 0 : index
    %35 = vector.load %arg10[%c0_25, %c0_26] : memref<512x256xbf16, #tpu.memory_space<vmem>>, vector<512x256xbf16>
    %cst_27 = arith.constant dense<0.000000e+00> : vector<2x256xf32>
    %36 = tpu.matmul %34, %35, %cst_27 {dimension_numbers = #tpu.dot_dimension_numbers<[1], [0], [0], [1], [0, 0, 1, 1], [], []>} : vector<2x512xbf16>, vector<512x256xbf16>, vector<2x256xf32> -> vector<2x256xf32>
    %c0_28 = arith.constant 0 : index
    %c0_29 = arith.constant 0 : index
    %37 = vector.load %arg11[%c0_28, %c0_29] : memref<1x256xf32, #tpu.memory_space<vmem>>, vector<1x256xf32>
    %38 = vector.broadcast %37 : vector<1x256xf32> to vector<2x256xf32>
    %39 = arith.addf %36, %38 : vector<2x256xf32>
    %cst_30 = arith.constant 0.000000e+00 : f32
    %40 = vector.broadcast %cst_30 : f32 to vector<2x256xf32>
    %41 = arith.maximumf %39, %40 : vector<2x256xf32>
    %42 = arith.truncf %41 : vector<2x256xf32> to vector<2x256xbf16>
    %c0_31 = arith.constant 0 : index
    %c0_32 = arith.constant 0 : index
    %43 = vector.load %arg12[%c0_31, %c0_32] : memref<256x4096xbf16, #tpu.memory_space<vmem>>, vector<256x4096xbf16>
    %cst_33 = arith.constant dense<0.000000e+00> : vector<2x4096xf32>
    %44 = tpu.matmul %42, %43, %cst_33 {dimension_numbers = #tpu.dot_dimension_numbers<[1], [0], [0], [1], [0, 0, 1, 1], [], []>} : vector<2x256xbf16>, vector<256x4096xbf16>, vector<2x4096xf32> -> vector<2x4096xf32>
    %c0_34 = arith.constant 0 : index
    %c0_35 = arith.constant 0 : index
    %45 = vector.load %arg13[%c0_34, %c0_35] : memref<1x4096xf32, #tpu.memory_space<vmem>>, vector<1x4096xf32>
    %46 = vector.broadcast %45 : vector<1x4096xf32> to vector<2x4096xf32>
    %47 = arith.addf %44, %46 : vector<2x4096xf32>
    %c0_36 = arith.constant 0 : index
    %c0_37 = arith.constant 0 : index
    %c0_38 = arith.constant 0 : index
    %48 = vector.load %arg14[%c0_36, %c0_37, %c0_38] : memref<1x2x4096xf32, #tpu.memory_space<vmem>>, vector<1x2x4096xf32>
    %49 = vector.shape_cast %48 : vector<1x2x4096xf32> to vector<2x4096xf32>
    %50 = vector.shape_cast %47 : vector<2x4096xf32> to vector<1x2x4096xf32>
    tpu.vector_store %arg14[%c0_36, %c0_37, %c0_38], %50 {strides = array<i32>} : memref<1x2x4096xf32, #tpu.memory_space<vmem>>, vector<1x2x4096xf32>,
    return
  }
  func.func @transform_0(%arg0: i32) -> (i32, i32) {
    %c0_i32 = arith.constant 0 : i32
    %c0_i32_0 = arith.constant 0 : i32
    return %arg0, %c0_i32 : i32, i32
  }
  func.func @transform_1(%arg0: i32) -> (i32, i32) {
    %c0_i32 = arith.constant 0 : i32
    %c0_i32_0 = arith.constant 0 : i32
    %c0_i32_1 = arith.constant 0 : i32
    return %c0_i32, %c0_i32_0 : i32, i32
  }
  func.func @transform_2(%arg0: i32) -> (i32, i32) {
    %c0_i32 = arith.constant 0 : i32
    %c0_i32_0 = arith.constant 0 : i32
    %c0_i32_1 = arith.constant 0 : i32
    return %c0_i32, %c0_i32_0 : i32, i32
  }
  func.func @transform_3(%arg0: i32) -> (i32, i32) {
    %c0_i32 = arith.constant 0 : i32
    %c0_i32_0 = arith.constant 0 : i32
    %c0_i32_1 = arith.constant 0 : i32
    return %c0_i32, %c0_i32_0 : i32, i32
  }
  func.func @transform_4(%arg0: i32) -> (i32, i32) {
    %c0_i32 = arith.constant 0 : i32
    %c0_i32_0 = arith.constant 0 : i32
    %c0_i32_1 = arith.constant 0 : i32
    return %c0_i32, %c0_i32_0 : i32, i32
  }
  func.func @transform_5(%arg0: i32) -> (i32, i32) {
    %c0_i32 = arith.constant 0 : i32
    %c0_i32_0 = arith.constant 0 : i32
    %c0_i32_1 = arith.constant 0 : i32
    return %c0_i32, %c0_i32_0 : i32, i32
  }
  func.func @transform_6(%arg0: i32) -> (i32, i32) {
    %c0_i32 = arith.constant 0 : i32
    %c0_i32_0 = arith.constant 0 : i32
    %c0_i32_1 = arith.constant 0 : i32
    return %c0_i32, %c0_i32_0 : i32, i32
  }
  func.func @transform_7(%arg0: i32) -> (i32, i32) {
    %c0_i32 = arith.constant 0 : i32
    %c0_i32_0 = arith.constant 0 : i32
    %c0_i32_1 = arith.constant 0 : i32
    return %c0_i32, %c0_i32_0 : i32, i32
  }
  func.func @transform_8(%arg0: i32) -> (i32, i32) {
    %c0_i32 = arith.constant 0 : i32
    %c0_i32_0 = arith.constant 0 : i32
    %c0_i32_1 = arith.constant 0 : i32
    return %c0_i32, %c0_i32_0 : i32, i32
  }
  func.func @transform_9(%arg0: i32) -> (i32, i32) {
    %c0_i32 = arith.constant 0 : i32
    %c0_i32_0 = arith.constant 0 : i32
    %c0_i32_1 = arith.constant 0 : i32
    return %c0_i32, %c0_i32_0 : i32, i32
  }
  func.func @transform_10(%arg0: i32) -> (i32, i32) {
    %c0_i32 = arith.constant 0 : i32
    %c0_i32_0 = arith.constant 0 : i32
    %c0_i32_1 = arith.constant 0 : i32
    return %c0_i32, %c0_i32_0 : i32, i32
  }
  func.func @transform_11(%arg0: i32) -> (i32, i32) {
    %c0_i32 = arith.constant 0 : i32
    %c0_i32_0 = arith.constant 0 : i32
    %c0_i32_1 = arith.constant 0 : i32
    return %c0_i32, %c0_i32_0 : i32, i32
  }
  func.func @transform_12(%arg0: i32) -> (i32, i32) {
    %c0_i32 = arith.constant 0 : i32
    %c0_i32_0 = arith.constant 0 : i32
    %c0_i32_1 = arith.constant 0 : i32
    return %c0_i32, %c0_i32_0 : i32, i32
  }
  func.func @transform_13(%arg0: i32) -> (i32, i32, i32) {
    %c0_i32 = arith.constant 0 : i32
    %c0_i32_0 = arith.constant 0 : i32
    %c0_i32_1 = arith.constant 0 : i32
    return %arg0, %c0_i32, %c0_i32_0 : i32, i32, i32
  }
}

</mosaic_0001>

<bundles_post_ra>
// kernel: tpu_custom_call.1
= control target key start
LH: loop header
LB: loop body
LE: loop exit
PB: predicated region body
PF: predicated region fallthrough
CT: control target
= control target key end

     0   :  { %s16429_s0 = inlined_call_operand.vmem [shape: bf16[512,64], index: 0, kind: input, shape index: {}]   ;;  %s16430_s1 = inlined_call_operand.hbm [shape: bf16[64,64], index: 1, kind: input, shape index: {}]   ;;  %s16431_s2 = inlined_call_operand.hbm [shape: f32[1,64], index: 2, kind: input, shape index: {}]   ;;  %s16432_s3 = inlined_call_operand.hbm [shape: bf16[64,128], index: 3, kind: input, shape index: {}]   ;;  %s16433_s4 = inlined_call_operand.hbm [shape: f32[1,128], index: 4, kind: input, shape index: {}]   ;;  %s16434_s5 = inlined_call_operand.hbm [shape: bf16[128,1024], index: 5, kind: input, shape index: {}]   ;;  %s16435_s6 = inlined_call_operand.hbm [shape: f32[1,1024], index: 6, kind: input, shape index: {}]   ;;  %s16436_s7 = inlined_call_operand.hbm [shape: bf16[1024,512], index: 7, kind: input, shape index: {}]   ;;  %s16437_s8 = inlined_call_operand.hbm [shape: f32[1,512], index: 8, kind: input, shape index: {}]   ;;  %s16438_s9 = inlined_call_operand.hbm [shape: bf16[512,256], index: 9, kind: input, shape index: {}]   ;;  %s16439_s10 = inlined_call_operand.hbm [shape: f32[1,256], index: 10, kind: input, shape index: {}]   ;;  %s16440_s11 = inlined_call_operand.hbm [shape: bf16[256,4096], index: 11, kind: input, shape index: {}]   ;;  %s16441_s12 = inlined_call_operand.hbm [shape: f32[1,4096], index: 12, kind: input, shape index: {}]   ;;  %s16442_s13 = inlined_call_operand.hbm [shape: f32[2,2,4096], index: 13, kind: output, shape index: {}]  }
   0x1   :  { %16448 = sst [smem:[#allocation36_spill]] %s16430_s1 }
   0x2   :  { %16449 = sst [smem:[#allocation37_spill]] %s16431_s2 }
   0x3   :  { %16450 = sst [smem:[#allocation38_spill]] %s16433_s4 }
   0x4   :  { %16451 = sst [smem:[#allocation39_spill]] %s16435_s6 }
   0x5   :  { %18 = vsyncpa [#allocation3], 0 }
   0x6   :  { %19 = vsyncpa [#allocation6], 0 }
   0x7   :  { %20 = vsyncpa [#allocation9], 0 }
   0x8   :  { %21 = vsyncpa [#allocation12], 0 }
   0x9   :  { %22 = vsyncpa [#allocation15], 0 }
   0xa   :  { %23 = vsyncpa [#allocation18], 0 }
   0xb   :  { %24 = vsyncpa [#allocation21], 0 }
   0xc   :  { %25 = vsyncpa [#allocation4], 0 }
   0xd   :  { %27 = vsyncpa [#allocation4 + $0x1], 0  ;;  %s15084_s25 = smov 0   ;;  %s15086_s26 = smov 0  }
   0xe   :  { %s15088_s27 = smov 0   ;;  %s15090_s28 = smov 0  }
   0xf LB: > { %16452 = sst [smem:[#allocation31_spill]] %s14979_s25  ;;  %s15105_s29 = sadd.s32 4294967295, %s14991_s28   ;;  %s14991_s28 = sphi %s15090_s28, %s16467_s28   ;;  %s14987_s27 = sphi %s15088_s27, %s16469_s27   ;;  %s14983_s26 = sphi %s15086_s26, %s16471_s26   ;;  %s14979_s25 = sphi %s15084_s25, %s16470_s25  }
  0x10   : > { %16453 = sst [smem:[#allocation32_spill]] %s14987_s27  ;;  %s9699_s30 = sadd.s32 4294967294, %s14991_s28  }
  0x11   : > { %s15109_s14 = sadd.s32 1, %s14991_s28   ;;  %s318_s15 = sadd.s32 1, %s14987_s27 }
  0x12   : > { %16454 = sst [smem:[#allocation33_spill]] %s15109_s14  ;;  %s315_s16 = ssub.s32 %s14991_s28, %s15109_s14 }
  0x13   : > { %p328_p0 = scmp.ne.s32.totalorder %s14987_s27, %s14983_s26  ;;  %p316_p1 = scmp.eq.s32.totalorder %s315_s16, 0 }
  0x14   : > { %p329_p2 = scmp.eq.s32.totalorder %s15105_s29, 1  ;;  %p334_p3 = scmp.ne.s32.totalorder %s14983_s26, %s14979_s25 }
  0x15   : > { %p335_p4 = scmp.eq.s32.totalorder %s9699_s30, 1  ;;  %p9700_p7 = scmp.ge.s32.totalorder %s14991_s28, 1 }
  0x16   : > { %s15120_s17 = scalar_select %p316_p1, %s14987_s27, %s318_s15  }
  0x17   : > { %p15122_p5 = por %p329_p2, %p328_p0  ;;  %p15126_p6 = por %p335_p4, %p334_p3 }
  0x18   : > { %16455 = sst [smem:[#allocation34_spill]] %s15120_s17  ;;  %p342_p8 = scmp.lt.s32.totalorder %s14991_s28, 3 }
  0x19   : > { %s16457_s19 = scalar_select %p15126_p6, 1, 0 }
  0x1a   : > { %p14459_p9 = scmp.eq.s32.totalorder %s15105_s29, 0  ;;  %p15133_p10 = pnand %p9700_p7, %p342_p8 }
  0x1b   : > { %16458 = sst [smem:[#allocation35_spill]] %s16457_s19  ;;  %s14993_s24 = smov [#allocation5]  }
  0x1c   : > { %s16460_s2 = sld [smem:[#allocation37_spill]]  ;;  %p14418_p11 = pneg %p15133_p10 }
  0x1d   : > { %s370_s30 = sshll.u32 %s14993_s24, 4  ;;  %s16461_s4 = sld [smem:[#allocation38_spill]]  ;;  %s371_s30 = int_to_ptr.vmem [resolvable:$true] %s370_s30 }
  0x1e   : > { %p15147_p12 = pnand %p14459_p9, %p14418_p11  ;;  %s16463_s6 = sld [smem:[#allocation39_spill]] }
  0x1f   : > { %s14994_s14 = smov [#allocation8]   ;;  %s14995_s19 = smov [#allocation11]  }
  0x20   : > { %s396_s24 = sshll.u32 %s14994_s14, 4  ;;  %s422_s25 = sshll.u32 %s14995_s19, 4  ;;  %s397_s24 = int_to_ptr.vmem [resolvable:$true] %s396_s24  ;;  %s423_s25 = int_to_ptr.vmem [resolvable:$true] %s422_s25 }
  0x21   : > { %s14996_s21 = smov [#allocation14]   ;;  %s16464_s1 = sld [smem:[#allocation36_spill]] }
  0x22   : > { %s368_s23 = sshll.u32 %s16460_s2, 4  ;;  %s448_s14 = sshll.u32 %s14996_s21, 4  ;;  %s369_s23 = int_to_ptr.hbm [resolvable:$true] %s368_s23  ;;  %s449_s14 = int_to_ptr.vmem [resolvable:$true] %s448_s14 }
  0x23   : > { %s394_s17 = sshll.u32 %s16461_s4, 4  ;;  %s446_s4 = sshll.u32 %s16437_s8, 4  ;;  %s395_s17 = int_to_ptr.hbm [resolvable:$true] %s394_s17  ;;  %s447_s4 = int_to_ptr.hbm [resolvable:$true] %s446_s4 }
  0x24   : > { %s420_s2 = sshll.u32 %s16463_s6, 4  ;;  %s14997_s19 = smov [#allocation17]   ;;  %s421_s2 = int_to_ptr.hbm [resolvable:$true] %s420_s2 }
  0x25   : > { %14424 = dma.hbm_to_vmem [thread:$0]  (!%p15147_p12), %s369_s23, 16, %s371_s30, [#allocation6]  }
  0x26   : > { %14430 = dma.hbm_to_vmem [thread:$0]  (!%p15147_p12), %s395_s17, 16, %s397_s24, [#allocation9]  }
  0x27   : > { %14436 = dma.hbm_to_vmem [thread:$0]  (!%p15147_p12), %s421_s2, 128, %s423_s25, [#allocation12]  }
  0x28   : > { %s472_s23 = sshll.u32 %s16439_s10, 4  ;;  %s353_s24 = sshll.u32 %s16464_s1, 4  ;;  %s473_s23 = int_to_ptr.hbm [resolvable:$true] %s472_s23  ;;  %s354_s24 = int_to_ptr.hbm [resolvable:$true] %s353_s24 }
  0x29   : > { %14442 = dma.hbm_to_vmem [thread:$0]  (!%p15147_p12), %s447_s4, 64, %s449_s14, [#allocation15]  }
  0x2a   : > { %s474_s15 = sshll.u32 %s14997_s19, 4  ;;  %s14998_s2 = smov [#allocation2]   ;;  %s475_s15 = int_to_ptr.vmem [resolvable:$true] %s474_s15 }
  0x2b   : > { %14448 = dma.hbm_to_vmem [thread:$0]  (!%p15147_p12), %s473_s23, 32, %s475_s15, [#allocation18]  }
  0x2c   : > { %s355_s25 = sshll.u32 %s14998_s2, 4  ;;  %s14999_s6 = smov 64   ;;  %s356_s25 = int_to_ptr.vmem [resolvable:$true] %s355_s25 }
  0x2d   : > { %s15000_s16 = smov 4   ;;  %s379_s14 = sshll.u32 %s16432_s3, 4  ;;  %s380_s14 = int_to_ptr.hbm [resolvable:$true] %s379_s14 }
  0x2e   : > { %14421 = dma.hbm_to_vmem [thread:$0]  (!%p15147_p12), %s354_s24, 512, %s356_s25, [#allocation3], %s14999_s6, %s14999_s6, %s15000_s16  }
  0x2f   : > { %s15001_s22 = smov [#allocation7]   ;;  %s405_s23 = sshll.u32 %s16434_s5, 4  ;;  %s406_s23 = int_to_ptr.hbm [resolvable:$true] %s405_s23 }
  0x30   : > { %s381_s17 = sshll.u32 %s15001_s22, 4  ;;  %s15002_s15 = smov [#allocation10]   ;;  %s382_s17 = int_to_ptr.vmem [resolvable:$true] %s381_s17 }
  0x31   : > { %14427 = dma.hbm_to_vmem [thread:$0]  (!%p15147_p12), %s380_s14, 512, %s382_s17, [#allocation6], %s14999_s6, %s14999_s6, %s15000_s16  }
  0x32   : > { %s407_s2 = sshll.u32 %s15002_s15, 4  ;;  %s15003_s24 = smov 512   ;;  %s408_s2 = int_to_ptr.vmem [resolvable:$true] %s407_s2 }
  0x33   : > { %s15004_s25 = smov 32   ;;  %s431_s22 = sshll.u32 %s16436_s7, 4  ;;  %s432_s22 = int_to_ptr.hbm [resolvable:$true] %s431_s22 }
  0x34   : > { %14433 = dma.hbm_to_vmem [thread:$0]  (!%p15147_p12), %s406_s23, 8192, %s408_s2, [#allocation9], %s15003_s24, %s15003_s24, %s15004_s25  }
  0x35   : > { %s15005_s1 = smov [#allocation13]   ;;  %s457_s16 = sshll.u32 %s16438_s9, 4  ;;  %s458_s16 = int_to_ptr.hbm [resolvable:$true] %s457_s16 }
  0x36   : > { %s433_s30 = sshll.u32 %s15005_s1, 4  ;;  %s15006_s14 = smov 256   ;;  %s434_s30 = int_to_ptr.vmem [resolvable:$true] %s433_s30 }
  0x37   : > { %s15007_s17 = smov 16   ;;  %s15008_s23 = smov [#allocation16]  }
  0x38   : > { %14439 = dma.hbm_to_vmem [thread:$0]  (!%p15147_p12), %s432_s22, 32768, %s434_s30, [#allocation12], %s15006_s14, %s15006_s14, %s15007_s17  }
  0x39   : > { %s459_s15 = sshll.u32 %s15008_s23, 4  ;;  %s15009_s2 = smov 128   ;;  %s460_s15 = int_to_ptr.vmem [resolvable:$true] %s459_s15 }
  0x3a   : > { %s15010_s24 = smov 8   ;;  %s483_s4 = sshll.u32 %s16440_s11, 4  ;;  %s484_s4 = int_to_ptr.hbm [resolvable:$true] %s483_s4 }
  0x3b   : > { %14445 = dma.hbm_to_vmem [thread:$0]  (!%p15147_p12), %s458_s16, 8192, %s460_s15, [#allocation15], %s15009_s2, %s15009_s2, %s15010_s24  }
  0x3c   : > { %s15011_s21 = smov [#allocation19]   ;;  %s15012_s6 = smov 2048  }
  0x3d   : > { %s485_s19 = sshll.u32 %s15011_s21, 4  ;;  %s498_s14 = sshll.u32 %s16441_s12, 4  ;;  %s486_s19 = int_to_ptr.vmem [resolvable:$true] %s485_s19  ;;  %s499_s14 = int_to_ptr.hbm [resolvable:$true] %s498_s14 }
  0x3e   : > { %14451 = dma.hbm_to_vmem [thread:$0]  (!%p15147_p12), %s484_s4, 65536, %s486_s19, [#allocation18], %s15012_s6, %s15012_s6, %s15009_s2  }
  0x3f   : > { %s15013_s17 = smov [#allocation20]   ;;  %522 = sbr.rel (%p15133_p10) target bundleno = 2257 (0x8d1), region = 72 }
  0x40   : > { %s500_s23 = sshll.u32 %s15013_s17, 4  ;;  %s501_s23 = int_to_ptr.vmem [resolvable:$true] %s500_s23 }
  0x41   : > { %14454 = dma.hbm_to_vmem [thread:$0]  (!%p15147_p12), %s499_s14, 512, %s501_s23, [#allocation21]  }
  0x44   : > { %14946 = dma.done.wait (%p14459_p9), [#allocation3], 512  }
  0x45   : > { %14948 = vsyncadd (%p14459_p9), [#allocation3], 4294966784 }
  0x46   : > { %14950 = dma.done.wait (%p14459_p9), [#allocation6], 528  }
  0x47   : > { %14952 = vsyncadd (%p14459_p9), [#allocation6], 4294966768 }
  0x48   : > { %14954 = dma.done.wait (%p14459_p9), [#allocation9], 8208  }
  0x49   : > { %14956 = vsyncadd (%p14459_p9), [#allocation9], 4294959088 }
  0x4a   : > { %14958 = dma.done.wait (%p14459_p9), [#allocation12], 32896  }
  0x4b   : > { %14960 = vsyncadd (%p14459_p9), [#allocation12], 4294934400 }
  0x4c   : > { %14962 = dma.done.wait (%p14459_p9), [#allocation15], 8256  }
  0x4d   : > { %14964 = vsyncadd (%p14459_p9), [#allocation15], 4294959040 }
  0x4e   : > { %14966 = dma.done.wait (%p14459_p9), [#allocation18], 65568  }
  0x4f   : > { %14968 = vsyncadd (%p14459_p9), [#allocation18], 4294901728 }
  0x50   : > { %14970 = dma.done.wait (%p14459_p9), [#allocation21], 512  }
  0x51   : > { %14972 = vsyncadd (%p14459_p9), [#allocation21], 4294966784  ;;  %s9728_s27 = sshll.u32 %s15105_s29, 5  ;;  %v13466_v0 = vld [vmem:[#allocation2 + $0x18] sm:$0xff]  ;;  %v13465_v1 = vld [vmem:[#allocation2 + $0x10] sm:$0xff]  ;;  %vm777_vm0 = vcmask 523264  }
  0x52   : > { %p623_p13 = scmp.lt.s32.totalorder %s9728_s27, 63  ;;  %830 = vmatpush.bf16.msra.mxu0 %v13466_v0  ;;  %v13464_v2 = vld [vmem:[#allocation2 + $0x8] sm:$0xff]  ;;  %v13463_v3 = vld [vmem:[#allocation2] sm:$0xff]  ;;  %v13469_v12 = vld [vmem:[#allocation7 + $0x10] sm:$0xff]  ;;  %vm3204_vm1 = vcmask 1041409   ;;  %s619_s24 = sand.u32 1, %s14983_s26  }
  0x53   : > { %v13470_v10 = vld [vmem:[#allocation7 + $0x18] sm:$0xff]  ;;  %v13468_v13 = vld [vmem:[#allocation7 + $0x8] sm:$0xff]  ;;  %v13467_v14 = vld [vmem:[#allocation7] sm:$0xff]  ;;  %vm9463_vm2 = vcmask 1041408   ;;  %s16215_s1 = sshll.u32 %s619_s24, 6  ;;  %vm9465_vm3 = vcmask 1045508  }
  0x54   : > { %s16473_s27 = smov (!%p623_p13, %s9728_s27), 63  ;;  %1051 = vmatpush.bf16.msra.mxu1 %v13470_v10  ;;  %v15258_v18 = vld [vmem:[#allocation5] ss:$0 sm:$0xff]  ;;  %v10084_v62 = vld [vmem:[#allocation10 + $0x1c0] sm:$0xf]  ;;  %vm9467_vm4 = vcmask 1043456  }
  0x55   : > { %s9729_s20 = sshll.u32 %s16473_s27, 2  ;;  %v13531_v63 = vld [vmem:[#allocation10 + $0x1dc] sm:$0xf0]  ;;  %v13527_v0 = vld [vmem:[#allocation10 + $0x1c4] sm:$0xf]  ;;  %s16227_s25 = scalar_lea.vmem [#allocation22], %s16215_s1 }
  0x56   : > { %831 = vmatpush.bf16.msra.mxu0 %v13465_v1  ;;  %s15239_s2 = scalar_lea.vmem %s16429_s0, %s9729_s20  ;;  %v10085_v1 = vor.u32 %v13531_v63, %v10084_v62  ;;  %v10052_v10 = vld [vmem:[#allocation10 + $0x180] sm:$0xf]  ;;  %s14367_s4 = sshll.u32 %s15105_s29, 6 }
  0x57   : > { %v13447_v4 = vld [vmem:[%s15239_s2] sm:$0xff]  ;;  %v13448_v5 = vld [vmem:[%s15239_s2 + $0x8] sm:$0xff]  ;;  %v13449_v6 = vld [vmem:[%s15239_s2 + $0x10] sm:$0xff]  ;;  %s9518_s6 = scalar_lea.hbm %s16442_s13, %s14367_s4  ;;  %s9520_s22 = sshll.u32 %s16227_s25, 4  ;;  %s9521_s22 = int_to_ptr.vmem [resolvable:$true] %s9520_s22 }
  0x58   : > { %v13450_v7 = vld [vmem:[%s15239_s2 + $0x18] sm:$0xff]  ;;  %v13451_v8 = vld [vmem:[%s15239_s2 + $0x20] sm:$0xff]  ;;  %v13452_v9 = vld [vmem:[%s15239_s2 + $0x28] sm:$0xff]  ;;  %1052 = vmatpush.bf16.msra.mxu1 %v13469_v12  ;;  %1586 = vmatpush.bf16.msra.mxu2 %v10085_v1  ;;  %s9522_s30 = sshll.u32 %s9518_s6, 4  ;;  %s9507_s29 = scalar_lea.sflag [#allocation4], %s619_s24  ;;  %s9523_s30 = int_to_ptr.hbm [resolvable:$true] %s9522_s30 }
  0x59   : > { %v13453_v11 = vld [vmem:[%s15239_s2 + $0x30] sm:$0xff]  ;;  %v13454_v15 = vld [vmem:[%s15239_s2 + $0x38] sm:$0xff]  ;;  %v13455_v16 = vld [vmem:[%s15239_s2 + $0x40] sm:$0xff]  ;;  %s14915_s14 = sshra.s32 %s9523_s30, 4  ;;  %s14921_s20 = scalar_lea.hbm %s16442_s13, 128  ;;  %s14916_s14 = int_to_ptr.hbm [resolvable:$true] %s14915_s14 }
  0x5a   : > { %832 = vmatpush.bf16.msra.mxu0 %v13464_v2  ;;  %v13456_v25 = vld [vmem:[%s15239_s2 + $0x48] sm:$0xff]  ;;  %v13457_v33 = vld [vmem:[%s15239_s2 + $0x50] sm:$0xff]  ;;  %v13458_v41 = vld [vmem:[%s15239_s2 + $0x58] sm:$0xff]  ;;  %s14917_s17 = scalar_lea.hbm %s14916_s14, 64  ;;  %p14922_p3 = scmp.lt.s32.totalorder %s14916_s14, %s16442_s13 }
  0x5b   : > { %v13459_v49 = vld [vmem:[%s15239_s2 + $0x60] sm:$0xff]  ;;  %v13460_v57 = vld [vmem:[%s15239_s2 + $0x68] sm:$0xff]  ;;  %v13462_v62 = vld [vmem:[%s15239_s2 + $0x78] sm:$0xff]  ;;  %p14918_p0 = scmp.ne.s32.totalorder %s14916_s14, %s14917_s17  ;;  %p14923_p4 = scmp.lt.s32.totalorder %s14921_s20, %s14917_s17 }
  0x5c   : > { %1053 = vmatpush.bf16.msra.mxu1 %v13468_v13  ;;  %v10086_v2 = vld [vmem:[#allocation10 + $0x1e0] sm:$0xf0] }
  0x5d   : > { %v13519_v12 = vld [vmem:[#allocation10 + $0x184] sm:$0xf]  ;;  %p14919_p1 = pnand %p14918_p0, %p15122_p5  ;;  %p14924_p7 = por %p14923_p4, %p14922_p3 }
  0x5e   : > { %833 = vmatpush.bf16.msra.mxu0 %v13463_v3  ;;  %v10092_v3 = vld [vmem:[#allocation10 + $0x1c8] sm:$0xf] }
  0x5f   : > { %p14920_p2 = pneg %p14919_p1 }
  0x60   : > { %1054 = vmatpush.bf16.msra.mxu1 %v13467_v14  ;;  %v10054_v14 = vld [vmem:[#allocation10 + $0x1a0] sm:$0xf0] }
  0x61   : > { %9810 = vmatmul.msk.bf16.vlgmr.msra.gmra.mxu0 %vm777_vm0, %v13447_v4  ;;  %v13532_v4 = vld [vmem:[#allocation10 + $0x1e4] sm:$0xf0]  ;;  %p14925_p8 = pnand %p14924_p7, %p14920_p2 }
  0x71   : > { %9811 = vmatmul.msk.bf16.gmra.mxu0 %vm777_vm0, %v13448_v5 }
  0x81   : > { %9812 = vmatmul.msk.bf16.gmra.mxu0 %vm777_vm0, %v13449_v6 }
  0x91   : > { %9813 = vmatmul.msk.bf16.gmra.mxu0 %vm777_vm0, %v13450_v7  ;;  %v10089_v7 = vor.u32 %v13527_v0, %v10086_v2  ;;  %v9892_v2 = vld [vmem:[#allocation10 + $0x40] sm:$0xf] }
  0x93   : > { %1675 = vmatpush.bf16.msra.mxu3 %v10089_v7  ;;  %v9900_v7 = vld [vmem:[#allocation10 + $0x48] sm:$0xf] }
  0xa1   : > { %9814 = vmatmul.msk.bf16.gmra.mxu0 %vm777_vm0, %v13451_v8  ;;  %v10093_v8 = vor.u32 %v13532_v4, %v10092_v3  ;;  %v13483_v3 = vld [vmem:[#allocation10 + $0x5c] sm:$0xf0]  ;;  %v13479_v4 = vld [vmem:[#allocation10 + $0x44] sm:$0xf] }
  0xa3   : > { %1764 = vmatpush.bf16.msrb.mxu0 %v10093_v8  ;;  %v13484_v8 = vld [vmem:[#allocation10 + $0x64] sm:$0xf0] }
  0xb1   : > { %9815 = vmatmul.msk.bf16.gmra.mxu0 %vm777_vm0, %v13452_v9 }
  0xc1   : > { %9816 = vmatmul.msk.bf16.gmra.mxu0 %vm777_vm0, %v13453_v11  ;;  %v13523_v11 = vld [vmem:[#allocation10 + $0x19c] sm:$0xf0] }
  0xc2   : > { %v10053_v13 = vor.u32 %v13523_v11, %v10052_v10  ;;  %v9901_v10 = vor.u32 %v13484_v8, %v9900_v7  ;;  %v9860_v11 = vld [vmem:[#allocation10] sm:$0xf] }
  0xc4   : > { %1587 = vmatpush.bf16.msra.mxu2 %v10053_v13  ;;  %v13471_v13 = vld [vmem:[#allocation10 + $0x4] sm:$0xf] }
  0xd1   : > { %9817 = vmatmul.msk.bf16.gmra.mxu0 %vm777_vm0, %v13454_v15  ;;  %v10060_v15 = vld [vmem:[#allocation10 + $0x188] sm:$0xf] }
  0xde   : > { %v835_v17 = vpop.f32.mrf.mxu0 }
  0xdf   : > { %v836_v19 = vadd.f32 %v15258_v18, %v835_v17  ;;  %v13461_v17 = vld [vmem:[%s15239_s2 + $0x70] sm:$0xff] }
  0xe1   : > { %9818 = vmatmul.msk.bf16.gmra.mxu0 %vm777_vm0, %v13455_v16  ;;  %v915_v22 = vmax.f32 %v836_v19, 0.0  ;;  %v13524_v16 = vld [vmem:[#allocation10 + $0x1a4] sm:$0xf0]  ;;  %v10057_v19 = vor.u32 %v13519_v12, %v10054_v14  ;;  %v13475_v12 = vld [vmem:[#allocation10 + $0x1c] sm:$0xf0] }
  0xe2   : > { %v9861_v14 = vor.u32 %v13475_v12, %v9860_v11 }
  0xe3   : > { %1676 = vmatpush.bf16.msra.mxu3 %v10057_v19 }
  0xe6   : > { %v837_v20 = vpop.f32.mrf.mxu0 }
  0xe7   : > { %v838_v21 = vadd.f32 %v15258_v18, %v837_v20  ;;  %v10061_v20 = vor.u32 %v13524_v16, %v10060_v15  ;;  %v9862_v15 = vld [vmem:[#allocation10 + $0x20] sm:$0xf0]  ;;  %v9868_v16 = vld [vmem:[#allocation10 + $0x8] sm:$0xf] }
  0xe9   : > { %v916_v23 = vmax.f32 %v838_v21, 0.0  ;;  %1765 = vmatpush.bf16.msrb.mxu0 %v10061_v20  ;;  %v9865_v20 = vor.u32 %v13471_v13, %v9862_v15 }
  0xeb   : > { %v947_v24 = vpack.c.bf16 %v916_v23, %v915_v22  ;;  %v10020_v22 = vld [vmem:[#allocation10 + $0x140] sm:$0xf] }
  0xec   : > { %v13515_v23 = vld [vmem:[#allocation10 + $0x15c] sm:$0xf0] }
  0xed   : > { %9842 = vmatmul.msk.bf16.vlgmr.msra.gmra.mxu1 %vm777_vm0, %v947_v24  ;;  %v13511_v24 = vld [vmem:[#allocation10 + $0x144] sm:$0xf] }
  0xee   : > { %v840_v26 = vpop.f32.mrf.mxu0 }
  0xef   : > { %v841_v27 = vadd.f32 %v15258_v18, %v840_v26  ;;  %v10022_v26 = vld [vmem:[#allocation10 + $0x160] sm:$0xf0] }
  0xf1   : > { %9819 = vmatmul.msk.bf16.gmra.mxu0 %vm777_vm0, %v13456_v25  ;;  %v917_v30 = vmax.f32 %v841_v27, 0.0  ;;  %v10021_v25 = vor.u32 %v13515_v23, %v10020_v22  ;;  %v10028_v27 = vld [vmem:[#allocation10 + $0x148] sm:$0xf] }
  0xf3   : > { %1588 = vmatpush.bf16.msra.mxu2 %v10021_v25 }
  0xf6   : > { %v842_v28 = vpop.f32.mrf.mxu0 }
  0xf7   : > { %v843_v29 = vadd.f32 %v15258_v18, %v842_v28  ;;  %v13516_v28 = vld [vmem:[#allocation10 + $0x164] sm:$0xf0] }
  0xf9   : > { %v918_v31 = vmax.f32 %v843_v29, 0.0  ;;  %v10025_v29 = vor.u32 %v13511_v24, %v10022_v26 }
  0xfb   : > { %v948_v32 = vpack.c.bf16 %v918_v31, %v917_v30  ;;  %v10029_v30 = vor.u32 %v13516_v28, %v10028_v27  ;;  %1677 = vmatpush.bf16.msra.mxu3 %v10025_v29  ;;  %v9988_v31 = vld [vmem:[#allocation10 + $0x100] sm:$0xf] }
  0xfd   : > { %9843 = vmatmul.msk.bf16.gmra.mxu1 %vm777_vm0, %v948_v32  ;;  %1766 = vmatpush.bf16.msrb.mxu0 %v10029_v30  ;;  %v13507_v32 = vld [vmem:[#allocation10 + $0x11c] sm:$0xf0] }
  0xfe   : > { %v845_v34 = vpop.f32.mrf.mxu0 }
  0xff   : > { %v846_v35 = vadd.f32 %v15258_v18, %v845_v34  ;;  %v9989_v34 = vor.u32 %v13507_v32, %v9988_v31 }
 0x101   : > { %9820 = vmatmul.msk.bf16.gmra.mxu0 %vm777_vm0, %v13457_v33  ;;  %v919_v38 = vmax.f32 %v846_v35, 0.0  ;;  %v13503_v33 = vld [vmem:[#allocation10 + $0x104] sm:$0xf]  ;;  %1589 = vmatpush.bf16.msra.mxu2 %v9989_v34 }
 0x102   : > { %v9990_v35 = vld [vmem:[#allocation10 + $0x120] sm:$0xf0] }
 0x106   : > { %v847_v36 = vpop.f32.mrf.mxu0 }
 0x107   : > { %v848_v37 = vadd.f32 %v15258_v18, %v847_v36  ;;  %v9996_v36 = vld [vmem:[#allocation10 + $0x108] sm:$0xf] }
 0x109   : > { %v920_v39 = vmax.f32 %v848_v37, 0.0  ;;  %v13508_v37 = vld [vmem:[#allocation10 + $0x124] sm:$0xf0] }
 0x10b   : > { %v949_v40 = vpack.c.bf16 %v920_v39, %v919_v38  ;;  %v9993_v39 = vor.u32 %v13503_v33, %v9990_v35  ;;  %v15301_v35 = vld [vmem:[#allocation8] ss:$0 sm:$0xff] }
 0x10d   : > { %9844 = vmatmul.msk.bf16.gmra.mxu1 %vm777_vm0, %v949_v40  ;;  %v9997_v40 = vor.u32 %v13508_v37, %v9996_v36  ;;  %1678 = vmatpush.bf16.msra.mxu3 %v9993_v39 }
 0x10e   : > { %v850_v42 = vpop.f32.mrf.mxu0 }
 0x10f   : > { %v851_v43 = vadd.f32 %v15258_v18, %v850_v42  ;;  %1767 = vmatpush.bf16.msrb.mxu0 %v9997_v40 }
 0x111   : > { %9821 = vmatmul.msk.bf16.gmra.mxu0 %vm777_vm0, %v13458_v41  ;;  %v921_v46 = vmax.f32 %v851_v43, 0.0  ;;  %v9956_v43 = vld [vmem:[#allocation10 + $0xc0] sm:$0xf] }
 0x116   : > { %v852_v44 = vpop.f32.mrf.mxu0 }
 0x117   : > { %v853_v45 = vadd.f32 %v15258_v18, %v852_v44  ;;  %v13499_v44 = vld [vmem:[#allocation10 + $0xdc] sm:$0xf0] }
 0x119   : > { %v922_v47 = vmax.f32 %v853_v45, 0.0  ;;  %v13495_v45 = vld [vmem:[#allocation10 + $0xc4] sm:$0xf] }
 0x11b   : > { %v950_v48 = vpack.c.bf16 %v922_v47, %v921_v46  ;;  %v9957_v46 = vor.u32 %v13499_v44, %v9956_v43  ;;  %v9958_v47 = vld [vmem:[#allocation10 + $0xe0] sm:$0xf0] }
 0x11d   : > { %9845 = vmatmul.msk.bf16.gmra.mxu1 %vm777_vm0, %v950_v48  ;;  %v9964_v48 = vld [vmem:[#allocation10 + $0xc8] sm:$0xf]  ;;  %1590 = vmatpush.bf16.msra.mxu2 %v9957_v46 }
 0x11e   : > { %v855_v50 = vpop.f32.mrf.mxu0 }
 0x11f   : > { %v856_v51 = vadd.f32 %v15258_v18, %v855_v50 }
 0x121   : > { %9822 = vmatmul.msk.bf16.gmra.mxu0 %vm777_vm0, %v13459_v49  ;;  %v923_v54 = vmax.f32 %v856_v51, 0.0  ;;  %v13500_v49 = vld [vmem:[#allocation10 + $0xe4] sm:$0xf0] }
 0x126   : > { %v857_v52 = vpop.f32.mrf.mxu0 }
 0x127   : > { %v858_v53 = vadd.f32 %v15258_v18, %v857_v52  ;;  %v9961_v52 = vor.u32 %v13495_v45, %v9958_v47 }
 0x129   : > { %v924_v55 = vmax.f32 %v858_v53, 0.0  ;;  %v9965_v53 = vor.u32 %v13500_v49, %v9964_v48  ;;  %1679 = vmatpush.bf16.msra.mxu3 %v9961_v52 }
 0x12b   : > { %v951_v56 = vpack.c.bf16 %v924_v55, %v923_v54  ;;  %1768 = vmatpush.bf16.msrb.mxu0 %v9965_v53  ;;  %v9924_v55 = vld [vmem:[#allocation10 + $0x80] sm:$0xf] }
 0x12d   : > { %9846 = vmatmul.msk.bf16.gmra.mxu1 %vm777_vm0, %v951_v56  ;;  %v13491_v56 = vld [vmem:[#allocation10 + $0x9c] sm:$0xf0] }
 0x12e   : > { %v860_v58 = vpop.f32.mrf.mxu0 }
 0x12f   : > { %v861_v59 = vadd.f32 %v15258_v18, %v860_v58  ;;  %v9925_v58 = vor.u32 %v13491_v56, %v9924_v55 }
 0x131   : > { %9823 = vmatmul.msk.bf16.gmra.mxu0 %vm777_vm0, %v13460_v57  ;;  %v925_v5 = vmax.f32 %v861_v59, 0.0  ;;  %v13487_v57 = vld [vmem:[#allocation10 + $0x84] sm:$0xf]  ;;  %1591 = vmatpush.bf16.msra.mxu2 %v9925_v58 }
 0x132   : > { %v9926_v59 = vld [vmem:[#allocation10 + $0xa0] sm:$0xf0] }
 0x133   : > { %v9929_v63 = vor.u32 %v13487_v57, %v9926_v59 }
 0x135   : > { %1680 = vmatpush.bf16.msra.mxu3 %v9929_v63 }
 0x136   : > { %v862_v60 = vpop.f32.mrf.mxu0 }
 0x137   : > { %v863_v61 = vadd.f32 %v15258_v18, %v862_v60  ;;  %v9932_v60 = vld [vmem:[#allocation10 + $0x88] sm:$0xf] }
 0x139   : > { %v926_v6 = vmax.f32 %v863_v61, 0.0  ;;  %v13492_v61 = vld [vmem:[#allocation10 + $0xa4] sm:$0xf0] }
 0x13a   : > { %v9933_v0 = vor.u32 %v13492_v61, %v9932_v60 }
 0x13b   : > { %v952_v9 = vpack.c.bf16 %v926_v6, %v925_v5  ;;  %v9893_v5 = vor.u32 %v13483_v3, %v9892_v2  ;;  %v9894_v6 = vld [vmem:[#allocation10 + $0x60] sm:$0xf0] }
 0x13c   : > { %1769 = vmatpush.bf16.msrb.mxu0 %v9933_v0 }
 0x13d   : > { %9847 = vmatmul.msk.bf16.gmra.mxu1 %vm777_vm0, %v952_v9  ;;  %v9897_v9 = vor.u32 %v13479_v4, %v9894_v6  ;;  %1592 = vmatpush.bf16.msra.mxu2 %v9893_v5 }
 0x13e   : > { %v865_v21 = vpop.f32.mrf.mxu0 }
 0x13f   : > { %v866_v38 = vadd.f32 %v15258_v18, %v865_v21  ;;  %1681 = vmatpush.bf16.msra.mxu3 %v9897_v9 }
 0x140   : > { %1770 = vmatpush.bf16.msrb.mxu0 %v9901_v10 }
 0x141   : > { %9824 = vmatmul.msk.bf16.gmra.mxu0 %vm777_vm0, %v13461_v17  ;;  %v927_v50 = vmax.f32 %v866_v38, 0.0  ;;  %v13476_v17 = vld [vmem:[#allocation10 + $0x24] sm:$0xf0]  ;;  %1593 = vmatpush.bf16.msra.mxu2 %v9861_v14 }
 0x142   : > { %v9869_v21 = vor.u32 %v13476_v17, %v9868_v16 }
 0x143   : > { %1682 = vmatpush.bf16.msra.mxu3 %v9865_v20 }
 0x144   : > { %1771 = vmatpush.bf16.msrb.mxu0 %v9869_v21 }
 0x146   : > { %v867_v41 = vpop.f32.mrf.mxu0 }
 0x147   : > { %v868_v42 = vadd.f32 %v15258_v18, %v867_v41 }
 0x149   : > { %v928_v51 = vmax.f32 %v868_v42, 0.0 }
 0x14b   : > { %v953_v54 = vpack.c.bf16 %v928_v51, %v927_v50 }
 0x14d   : > { %9848 = vmatmul.msk.bf16.gmra.mxu1 %vm777_vm0, %v953_v54 }
 0x14e   : > { %v870_v1 = vpop.f32.mrf.mxu0 }
 0x14f   : > { %v871_v19 = vadd.f32 %v15258_v18, %v870_v1 }
 0x151   : > { %9825 = vmatmul.msk.bf16.gmra.mxu0 %vm777_vm0, %v13462_v62  ;;  %v929_v24 = vmax.f32 %v871_v19, 0.0 }
 0x156   : > { %v872_v22 = vpop.f32.mrf.mxu0 }
 0x157   : > { %v873_v23 = vadd.f32 %v15258_v18, %v872_v22 }
 0x159   : > { %v930_v25 = vmax.f32 %v873_v23, 0.0 }
 0x15b   : > { %v954_v26 = vpack.c.bf16 %v930_v25, %v929_v24 }
 0x15d   : > { %9849 = vmatmul.msk.bf16.gmra.mxu1 %vm777_vm0, %v954_v26 }
 0x15e   : > { %v875_v27 = vpop.f32.mrf.mxu0 }
 0x15f   : > { %v876_v28 = vadd.f32 %v15258_v18, %v875_v27 }
 0x161   : > { %v931_v31 = vmax.f32 %v876_v28, 0.0 }
 0x166   : > { %v877_v29 = vpop.f32.mrf.mxu0 }
 0x167   : > { %v878_v30 = vadd.f32 %v15258_v18, %v877_v29  ;;  %v13528_v29 = vld [vmem:[#allocation10 + $0x1cc] sm:$0xf] }
 0x169   : > { %v932_v32 = vmax.f32 %v878_v30, 0.0  ;;  %v10094_v30 = vld [vmem:[#allocation10 + $0x1e8] sm:$0xf0] }
 0x16a   : > { %v1056_v33 = vpop.f32.mrf.mxu1 }
 0x16b   : > { %v955_v34 = vpack.c.bf16 %v932_v32, %v931_v31  ;;  %v1057_v37 = vadd.f32 %v15301_v35, %v1056_v33  ;;  %v10097_v31 = vor.u32 %v13528_v29, %v10094_v30  ;;  %v13520_v33 = vld [vmem:[#allocation10 + $0x18c] sm:$0xf] }
 0x16d   : > { %9850 = vmatmul.msk.bf16.gmra.mxu1 %vm777_vm0, %v955_v34  ;;  %v1136_v40 = vmax.f32 %v1057_v37, 0.0  ;;  %v10062_v34 = vld [vmem:[#allocation10 + $0x1a8] sm:$0xf0] }
 0x16e   : > { %v880_v36 = vpop.f32.mrf.mxu0  ;;  %1853 = vmatpush.bf16.msrb.mxu1 %v10097_v31  ;;  %v10065_v37 = vor.u32 %v13520_v33, %v10062_v34 }
 0x16f   : > { %v881_v41 = vadd.f32 %v15258_v18, %v880_v36 }
 0x171   : > { %v933_v46 = vmax.f32 %v881_v41, 0.0  ;;  %v10030_v41 = vld [vmem:[#allocation10 + $0x168] sm:$0xf0] }
 0x172   : > { %v1058_v38 = vpop.f32.mrf.mxu1  ;;  %1854 = vmatpush.bf16.msrb.mxu1 %v10065_v37 }
 0x173   : > { %v1059_v39 = vadd.f32 %v15301_v35, %v1058_v38 }
 0x175   : > { %v1137_v42 = vmax.f32 %v1059_v39, 0.0 }
 0x176   : > { %v882_v43 = vpop.f32.mrf.mxu0 }
 0x177   : > { %v15307_v44 = vpack.c.bf16 %v1137_v42, %v1136_v40  ;;  %v883_v45 = vadd.f32 %v15258_v18, %v882_v43  ;;  %v13512_v40 = vld [vmem:[#allocation10 + $0x14c] sm:$0xf] }
 0x179   : > { %v934_v47 = vmax.f32 %v883_v45, 0.0  ;;  %1594 = vmatmul.bf16.vlgmr.msra.gmra.mxu2 %v15307_v44  ;;  %1683 = vmatmul.bf16.vlgmr.msra.gmra.mxu3 %v15307_v44 }
 0x17a   : > { %1772 = vmatmul.bf16.vlgmr.msrb.gmra.mxu0 %v15307_v44  ;;  %v1061_v48 = vpop.f32.mrf.mxu1 }
 0x17b   : > { %v956_v49 = vpack.c.bf16 %v934_v47, %v933_v46  ;;  %v1062_v51 = vadd.f32 %v15301_v35, %v1061_v48  ;;  %v10033_v46 = vor.u32 %v13512_v40, %v10030_v41 }
 0x17d   : > { %9851 = vmatmul.msk.bf16.gmra.mxu1 %vm777_vm0, %v956_v49  ;;  %v1138_v54 = vmax.f32 %v1062_v51, 0.0  ;;  %v9998_v51 = vld [vmem:[#allocation10 + $0x128] sm:$0xf0] }
 0x17e   : > { %v885_v50 = vpop.f32.mrf.mxu0  ;;  %1855 = vmatpush.bf16.msrb.mxu1 %v10033_v46 }
 0x17f   : > { %v886_v55 = vadd.f32 %v15258_v18, %v885_v50  ;;  %v13504_v50 = vld [vmem:[#allocation10 + $0x10c] sm:$0xf] }
 0x181   : > { %v935_v60 = vmax.f32 %v886_v55, 0.0 }
 0x182   : > { %v1063_v52 = vpop.f32.mrf.mxu1 }
 0x183   : > { %v1064_v53 = vadd.f32 %v15301_v35, %v1063_v52 }
 0x185   : > { %v1139_v56 = vmax.f32 %v1064_v53, 0.0 }
 0x186   : > { %v887_v57 = vpop.f32.mrf.mxu0 }
 0x187   : > { %v15317_v58 = vpack.c.bf16 %v1139_v56, %v1138_v54  ;;  %v888_v59 = vadd.f32 %v15258_v18, %v887_v57  ;;  %v10001_v54 = vor.u32 %v13504_v50, %v9998_v51  ;;  %v13496_v57 = vld [vmem:[#allocation10 + $0xcc] sm:$0xf] }
 0x189   : > { %v936_v61 = vmax.f32 %v888_v59, 0.0  ;;  %1599 = vmatmul.bf16.gmra.mxu2 %v15317_v58  ;;  %1688 = vmatmul.bf16.gmra.mxu3 %v15317_v58  ;;  %v9966_v59 = vld [vmem:[#allocation10 + $0xe8] sm:$0xf0] }
 0x18a   : > { %1777 = vmatmul.bf16.gmra.mxu0 %v15317_v58  ;;  %v1066_v62 = vpop.f32.mrf.mxu1  ;;  %1856 = vmatpush.bf16.msrb.mxu1 %v10001_v54 }
 0x18b   : > { %v957_v63 = vpack.c.bf16 %v936_v61, %v935_v60  ;;  %v1067_v1 = vadd.f32 %v15301_v35, %v1066_v62  ;;  %v9969_v60 = vor.u32 %v13496_v57, %v9966_v59  ;;  %v13488_v62 = vld [vmem:[#allocation10 + $0x8c] sm:$0xf] }
 0x18d   : > { %9852 = vmatmul.msk.bf16.gmra.mxu1 %vm777_vm0, %v957_v63  ;;  %v1140_v4 = vmax.f32 %v1067_v1, 0.0  ;;  %v9934_v63 = vld [vmem:[#allocation10 + $0xa8] sm:$0xf0] }
 0x18e   : > { %v890_v0 = vpop.f32.mrf.mxu0  ;;  %1857 = vmatpush.bf16.msrb.mxu1 %v9969_v60  ;;  %v9937_v1 = vor.u32 %v13488_v62, %v9934_v63 }
 0x18f   : > { %v891_v5 = vadd.f32 %v15258_v18, %v890_v0 }
 0x191   : > { %v937_v10 = vmax.f32 %v891_v5, 0.0  ;;  %v9902_v5 = vld [vmem:[#allocation10 + $0x68] sm:$0xf0] }
 0x192   : > { %v1068_v2 = vpop.f32.mrf.mxu1  ;;  %1858 = vmatpush.bf16.msrb.mxu1 %v9937_v1 }
 0x193   : > { %v1069_v3 = vadd.f32 %v15301_v35, %v1068_v2 }
 0x195   : > { %v1141_v6 = vmax.f32 %v1069_v3, 0.0 }
 0x196   : > { %v892_v7 = vpop.f32.mrf.mxu0 }
 0x197   : > { %v15327_v8 = vpack.c.bf16 %v1141_v6, %v1140_v4  ;;  %v893_v9 = vadd.f32 %v15258_v18, %v892_v7  ;;  %v13480_v4 = vld [vmem:[#allocation10 + $0x4c] sm:$0xf] }
 0x199   : > { %v938_v11 = vmax.f32 %v893_v9, 0.0  ;;  %1604 = vmatmul.bf16.gmra.mxu2 %v15327_v8  ;;  %1693 = vmatmul.bf16.gmra.mxu3 %v15327_v8 }
 0x19a   : > { %1782 = vmatmul.bf16.gmra.mxu0 %v15327_v8  ;;  %v1071_v12 = vpop.f32.mrf.mxu1 }
 0x19b   : > { %v958_v13 = vpack.c.bf16 %v938_v11, %v937_v10  ;;  %v1072_v15 = vadd.f32 %v15301_v35, %v1071_v12  ;;  %v9905_v10 = vor.u32 %v13480_v4, %v9902_v5 }
 0x19d   : > { %9853 = vmatmul.msk.bf16.gmra.mxu1 %vm777_vm0, %v958_v13  ;;  %v1142_v19 = vmax.f32 %v1072_v15, 0.0  ;;  %v9870_v15 = vld [vmem:[#allocation10 + $0x28] sm:$0xf0] }
 0x19e   : > { %v895_v14 = vpop.f32.mrf.mxu0  ;;  %1859 = vmatpush.bf16.msrb.mxu1 %v9905_v10 }
 0x19f   : > { %v896_v20 = vadd.f32 %v15258_v18, %v895_v14  ;;  %v13472_v14 = vld [vmem:[#allocation10 + $0xc] sm:$0xf] }
 0x1a1   : > { %v939_v25 = vmax.f32 %v896_v20, 0.0 }
 0x1a2   : > { %v1073_v16 = vpop.f32.mrf.mxu1 }
 0x1a3   : > { %v1074_v17 = vadd.f32 %v15301_v35, %v1073_v16 }
 0x1a5   : > { %v1143_v21 = vmax.f32 %v1074_v17, 0.0 }
 0x1a6   : > { %v897_v22 = vpop.f32.mrf.mxu0 }
 0x1a7   : > { %v15337_v23 = vpack.c.bf16 %v1143_v21, %v1142_v19  ;;  %v898_v24 = vadd.f32 %v15258_v18, %v897_v22  ;;  %v9873_v19 = vor.u32 %v13472_v14, %v9870_v15 }
 0x1a9   : > { %v940_v26 = vmax.f32 %v898_v24, 0.0  ;;  %1609 = vmatmul.bf16.gmra.mxu2 %v15337_v23  ;;  %1698 = vmatmul.bf16.gmra.mxu3 %v15337_v23 }
 0x1aa   : > { %1787 = vmatmul.bf16.gmra.mxu0 %v15337_v23  ;;  %v1076_v27 = vpop.f32.mrf.mxu1  ;;  %1860 = vmatpush.bf16.msrb.mxu1 %v9873_v19 }
 0x1ab   : > { %v959_v28 = vpack.c.bf16 %v940_v26, %v939_v25  ;;  %v1077_v36 = vadd.f32 %v15301_v35, %v1076_v27 }
 0x1ad   : > { %9854 = vmatmul.msk.bf16.gmra.mxu1 %vm777_vm0, %v959_v28  ;;  %v1144_v42 = vmax.f32 %v1077_v36, 0.0 }
 0x1ae   : > { %v900_v32 = vpop.f32.mrf.mxu0 }
 0x1af   : > { %v901_v43 = vadd.f32 %v15258_v18, %v900_v32 }
 0x1b1   : > { %v941_v52 = vmax.f32 %v901_v43, 0.0 }
 0x1b2   : > { %v1078_v38 = vpop.f32.mrf.mxu1 }
 0x1b3   : > { %v1079_v39 = vadd.f32 %v15301_v35, %v1078_v38 }
 0x1b5   : > { %v1145_v45 = vmax.f32 %v1079_v39, 0.0 }
 0x1b6   : > { %v902_v47 = vpop.f32.mrf.mxu0 }
 0x1b7   : > { %v15347_v48 = vpack.c.bf16 %v1145_v45, %v1144_v42  ;;  %v903_v49 = vadd.f32 %v15258_v18, %v902_v47 }
 0x1b9   : > { %v942_v53 = vmax.f32 %v903_v49, 0.0  ;;  %1614 = vmatmul.bf16.gmra.mxu2 %v15347_v48  ;;  %1703 = vmatmul.bf16.gmra.mxu3 %v15347_v48 }
 0x1ba   : > { %1792 = vmatmul.bf16.gmra.mxu0 %v15347_v48  ;;  %v1081_v55 = vpop.f32.mrf.mxu1 }
 0x1bb   : > { %v960_v56 = vpack.c.bf16 %v942_v53, %v941_v52  ;;  %v1082_v0 = vadd.f32 %v15301_v35, %v1081_v55  ;;  %v15386_v52 = vld [vmem:[#allocation11] sm:$0xff] }
 0x1bc   : > { %v15391_v54 = vperm.slane %v15386_v52, 2  ;;  %v15397_v60 = vperm.slane %v15386_v52, 0 }
 0x1bd   : > { %9855 = vmatmul.msk.bf16.gmra.mxu1 %vm777_vm0, %v960_v56  ;;  %v1146_v6 = vmax.f32 %v1082_v0, 0.0 }
 0x1be   : > { %v905_v61 = vpop.f32.mrf.mxu0 }
 0x1bf   : > { %v906_v7 = vadd.f32 %v15258_v18, %v905_v61  ;;  %v15400_v61 = vperm.slane %v15386_v52, 1 }
 0x1c1   : > { %v943_v16 = vmax.f32 %v906_v7, 0.0 }
 0x1c2   : > { %v1083_v2 = vpop.f32.mrf.mxu1 }
 0x1c3   : > { %v1084_v3 = vadd.f32 %v15301_v35, %v1083_v2 }
 0x1c5   : > { %v1147_v9 = vmax.f32 %v1084_v3, 0.0 }
 0x1c6   : > { %v907_v11 = vpop.f32.mrf.mxu0 }
 0x1c7   : > { %v15357_v12 = vpack.c.bf16 %v1147_v9, %v1146_v6  ;;  %v908_v13 = vadd.f32 %v15258_v18, %v907_v11 }
 0x1c9   : > { %v944_v17 = vmax.f32 %v908_v13, 0.0  ;;  %1619 = vmatmul.bf16.gmra.mxu2 %v15357_v12  ;;  %1708 = vmatmul.bf16.gmra.mxu3 %v15357_v12 }
 0x1ca   : > { %1797 = vmatmul.bf16.gmra.mxu0 %v15357_v12  ;;  %v1086_v20 = vpop.f32.mrf.mxu1 }
 0x1cb   : > { %v961_v21 = vpack.c.bf16 %v944_v17, %v943_v16  ;;  %v1087_v24 = vadd.f32 %v15301_v35, %v1086_v20 }
 0x1cd   : > { %9856 = vmatmul.msk.bf16.gmra.mxu1 %vm777_vm0, %v961_v21  ;;  %v1148_v27 = vmax.f32 %v1087_v24, 0.0 }
 0x1ce   : > { %v910_v22 = vpop.f32.mrf.mxu0 }
 0x1cf   : > { %v911_v28 = vadd.f32 %v15258_v18, %v910_v22 }
 0x1d1   : > { %v945_v33 = vmax.f32 %v911_v28, 0.0 }
 0x1d2   : > { %v1088_v25 = vpop.f32.mrf.mxu1 }
 0x1d3   : > { %v1089_v26 = vadd.f32 %v15301_v35, %v1088_v25 }
 0x1d5   : > { %v1149_v29 = vmax.f32 %v1089_v26, 0.0 }
 0x1d6   : > { %v912_v30 = vpop.f32.mrf.mxu0 }
 0x1d7   : > { %v15367_v31 = vpack.c.bf16 %v1149_v29, %v1148_v27  ;;  %v913_v32 = vadd.f32 %v15258_v18, %v912_v30 }
 0x1d9   : > { %v946_v34 = vmax.f32 %v913_v32, 0.0  ;;  %1624 = vmatmul.bf16.gmra.mxu2 %v15367_v31  ;;  %1713 = vmatmul.bf16.gmra.mxu3 %v15367_v31 }
 0x1da   : > { %1802 = vmatmul.bf16.gmra.mxu0 %v15367_v31  ;;  %v1091_v36 = vpop.f32.mrf.mxu1 }
 0x1db   : > { %v962_v37 = vpack.c.bf16 %v946_v34, %v945_v33  ;;  %v1092_v38 = vadd.f32 %v15301_v35, %v1091_v36 }
 0x1dd   : > { %9857 = vmatmul.msk.bf16.gmra.mxu1 %vm777_vm0, %v962_v37  ;;  %v1150_v41 = vmax.f32 %v1092_v38, 0.0 }
 0x1e2   : > { %v1093_v39 = vpop.f32.mrf.mxu1 }
 0x1e3   : > { %v1094_v40 = vadd.f32 %v15301_v35, %v1093_v39 }
 0x1e5   : > { %v1151_v42 = vmax.f32 %v1094_v40, 0.0 }
 0x1e7   : > { %v15376_v18 = vpack.c.bf16 %v1151_v42, %v1150_v41 }
 0x1e9   : > { %1629 = vmatmul.bf16.gmra.mxu2 %v15376_v18  ;;  %1718 = vmatmul.bf16.gmra.mxu3 %v15376_v18 }
 0x1ea   : > { %1807 = vmatmul.bf16.gmra.mxu0 %v15376_v18  ;;  %v1096_v43 = vpop.f32.mrf.mxu1 }
 0x1eb   : > { %v1097_v45 = vadd.f32 %v15301_v35, %v1096_v43 }
 0x1ed   : > { %1861 = vmatmul.bf16.vlgmr.msrb.gmra.mxu1 %v15307_v44  ;;  %v1152_v49 = vmax.f32 %v1097_v45, 0.0 }
 0x1f2   : > { %v1098_v46 = vpop.f32.mrf.mxu1 }
 0x1f3   : > { %v1099_v47 = vadd.f32 %v15301_v35, %v1098_v46 }
 0x1f5   : > { %v1153_v50 = vmax.f32 %v1099_v47, 0.0 }
 0x1f7   : > { %v15384_v51 = vpack.c.bf16 %v1153_v50, %v1152_v49  ;;  %v1773_v53 = vpop.f32.mrf.mxu0 }
 0x1f8   : > { %v1774_v59 = vadd.f32 %v1773_v53, %v15391_v54 }
 0x1f9   : > { %1634 = vmatmul.bf16.gmra.mxu2 %v15384_v51  ;;  %1723 = vmatmul.bf16.gmra.mxu3 %v15384_v51 }
 0x1fa   : > { %1812 = vmatmul.bf16.gmra.mxu0 %v15384_v51  ;;  %v1101_v55 = vpop.f32.mrf.mxu1  ;;  %v2300_v1 = vmax.f32 %v1774_v59, 0.0 }
 0x1fb   : > { %v1102_v0 = vadd.f32 %v15301_v35, %v1101_v55 }
 0x1fc   : > { %v1595_v56 = vpop.f32.mrf.mxu2  ;;  %v1684_v57 = vpop.f32.mrf.mxu3 }
 0x1fd   : > { %1866 = vmatmul.bf16.gmra.mxu1 %v15317_v58  ;;  %v1596_v2 = vadd.f32 %v1595_v56, %v15397_v60  ;;  %v1685_v5 = vadd.f32 %v1684_v57, %v15400_v61  ;;  %v1154_v11 = vmax.f32 %v1102_v0, 0.0 }
 0x1ff   : > { %v1775_v62 = vpop.f32.mrf.mxu0  ;;  %v2298_v16 = vmax.f32 %v1596_v2, 0.0  ;;  %v2299_v17 = vmax.f32 %v1685_v5, 0.0 }
 0x200   : > { %v1776_v63 = vadd.f32 %v1775_v62, %v15391_v54 }
 0x202   : > { %v2308_v3 = vmax.f32 %v1776_v63, 0.0  ;;  %v1103_v4 = vpop.f32.mrf.mxu1 }
 0x203   : > { %v1104_v6 = vadd.f32 %v15301_v35, %v1103_v4 }
 0x204   : > { %v2596_v7 = vmax.f32 %v2300_v1, %v2308_v3  ;;  %v1597_v9 = vpop.f32.mrf.mxu2  ;;  %v1686_v10 = vpop.f32.mrf.mxu3 }
 0x205   : > { %v1155_v13 = vmax.f32 %v1104_v6, 0.0  ;;  %v1598_v14 = vadd.f32 %v1597_v9, %v15397_v60  ;;  %v1687_v15 = vadd.f32 %v1686_v10, %v15400_v61 }
 0x207   : > { %v15409_v19 = vpack.c.bf16 %v1155_v13, %v1154_v11  ;;  %v2306_v20 = vmax.f32 %v1598_v14, 0.0  ;;  %v2307_v21 = vmax.f32 %v1687_v15, 0.0  ;;  %v1778_v22 = vpop.f32.mrf.mxu0 }
 0x208   : > { %v1779_v24 = vadd.f32 %v1778_v22, %v15391_v54 }
 0x209   : > { %v2554_v25 = vmax.f32 %v2298_v16, %v2306_v20  ;;  %v2575_v26 = vmax.f32 %v2299_v17, %v2307_v21  ;;  %1639 = vmatmul.bf16.gmra.mxu2 %v15409_v19  ;;  %1728 = vmatmul.bf16.gmra.mxu3 %v15409_v19 }
 0x20a   : > { %v2316_v27 = vmax.f32 %v1779_v24, 0.0  ;;  %1817 = vmatmul.bf16.gmra.mxu0 %v15409_v19  ;;  %v1106_v28 = vpop.f32.mrf.mxu1 }
 0x20b   : > { %v1107_v40 = vadd.f32 %v15301_v35, %v1106_v28 }
 0x20c   : > { %v2597_v29 = vmax.f32 %v2596_v7, %v2316_v27  ;;  %v1600_v30 = vpop.f32.mrf.mxu2  ;;  %v1689_v32 = vpop.f32.mrf.mxu3 }
 0x20d   : > { %v1601_v33 = vadd.f32 %v1600_v30, %v15397_v60  ;;  %v1690_v34 = vadd.f32 %v1689_v32, %v15400_v61  ;;  %1871 = vmatmul.bf16.gmra.mxu1 %v15327_v8  ;;  %v1156_v53 = vmax.f32 %v1107_v40, 0.0 }
 0x20f   : > { %v2314_v36 = vmax.f32 %v1601_v33, 0.0  ;;  %v2315_v37 = vmax.f32 %v1690_v34, 0.0  ;;  %v1780_v38 = vpop.f32.mrf.mxu0 }
 0x210   : > { %v1781_v39 = vadd.f32 %v1780_v38, %v15391_v54 }
 0x211   : > { %v2555_v41 = vmax.f32 %v2554_v25, %v2314_v36  ;;  %v2576_v42 = vmax.f32 %v2575_v26, %v2315_v37 }
 0x212   : > { %v2324_v43 = vmax.f32 %v1781_v39, 0.0  ;;  %v1108_v45 = vpop.f32.mrf.mxu1 }
 0x213   : > { %v1109_v46 = vadd.f32 %v15301_v35, %v1108_v45 }
 0x214   : > { %v2598_v47 = vmax.f32 %v2597_v29, %v2324_v43  ;;  %v1602_v49 = vpop.f32.mrf.mxu2  ;;  %v1691_v50 = vpop.f32.mrf.mxu3 }
 0x215   : > { %v1157_v55 = vmax.f32 %v1109_v46, 0.0  ;;  %v1603_v56 = vadd.f32 %v1602_v49, %v15397_v60  ;;  %v1692_v57 = vadd.f32 %v1691_v50, %v15400_v61 }
 0x217   : > { %v15423_v59 = vpack.c.bf16 %v1157_v55, %v1156_v53  ;;  %v2322_v62 = vmax.f32 %v1603_v56, 0.0  ;;  %v2323_v63 = vmax.f32 %v1692_v57, 0.0  ;;  %v1783_v0 = vpop.f32.mrf.mxu0 }
 0x218   : > { %v1784_v1 = vadd.f32 %v1783_v0, %v15391_v54 }
 0x219   : > { %v2556_v2 = vmax.f32 %v2555_v41, %v2322_v62  ;;  %v2577_v3 = vmax.f32 %v2576_v42, %v2323_v63  ;;  %1644 = vmatmul.bf16.gmra.mxu2 %v15423_v59  ;;  %1733 = vmatmul.bf16.gmra.mxu3 %v15423_v59 }
 0x21a   : > { %v2332_v4 = vmax.f32 %v1784_v1, 0.0  ;;  %1822 = vmatmul.bf16.gmra.mxu0 %v15423_v59  ;;  %v1111_v5 = vpop.f32.mrf.mxu1 }
 0x21b   : > { %v1112_v17 = vadd.f32 %v15301_v35, %v1111_v5 }
 0x21c   : > { %v2599_v6 = vmax.f32 %v2598_v47, %v2332_v4  ;;  %v1605_v7 = vpop.f32.mrf.mxu2  ;;  %v1694_v9 = vpop.f32.mrf.mxu3 }
 0x21d   : > { %v1606_v10 = vadd.f32 %v1605_v7, %v15397_v60  ;;  %v1695_v11 = vadd.f32 %v1694_v9, %v15400_v61  ;;  %1876 = vmatmul.bf16.gmra.mxu1 %v15337_v23  ;;  %v1158_v29 = vmax.f32 %v1112_v17, 0.0 }
 0x21f   : > { %v2330_v13 = vmax.f32 %v1606_v10, 0.0  ;;  %v2331_v14 = vmax.f32 %v1695_v11, 0.0  ;;  %v1785_v15 = vpop.f32.mrf.mxu0 }
 0x220   : > { %v1786_v16 = vadd.f32 %v1785_v15, %v15391_v54 }
 0x221   : > { %v2557_v20 = vmax.f32 %v2556_v2, %v2330_v13  ;;  %v2578_v21 = vmax.f32 %v2577_v3, %v2331_v14 }
 0x222   : > { %v2340_v22 = vmax.f32 %v1786_v16, 0.0  ;;  %v1113_v24 = vpop.f32.mrf.mxu1 }
 0x223   : > { %v1114_v25 = vadd.f32 %v15301_v35, %v1113_v24 }
 0x224   : > { %v2600_v26 = vmax.f32 %v2599_v6, %v2340_v22  ;;  %v1607_v27 = vpop.f32.mrf.mxu2  ;;  %v1696_v28 = vpop.f32.mrf.mxu3  ;;  %v13529_v22 = vld [vmem:[#allocation10 + $0x1d4] sm:$0xf] }
 0x225   : > { %v1159_v30 = vmax.f32 %v1114_v25, 0.0  ;;  %v1608_v32 = vadd.f32 %v1607_v27, %v15397_v60  ;;  %v1697_v33 = vadd.f32 %v1696_v28, %v15400_v61  ;;  %v10102_v27 = vld [vmem:[#allocation10 + $0x1f0] sm:$0xf0]  ;;  %v10108_v28 = vld [vmem:[#allocation10 + $0x1d8] sm:$0xf] }
 0x227   : > { %v15437_v34 = vpack.c.bf16 %v1159_v30, %v1158_v29  ;;  %v2338_v36 = vmax.f32 %v1608_v32, 0.0  ;;  %v2339_v37 = vmax.f32 %v1697_v33, 0.0  ;;  %v1788_v38 = vpop.f32.mrf.mxu0  ;;  %v13534_v29 = vld [vmem:[#allocation10 + $0x1f4] sm:$0xf0]  ;;  %v10105_v33 = vor.u32 %v13529_v22, %v10102_v27  ;;  %v10004_v27 = vld [vmem:[#allocation10 + $0x110] sm:$0xf] }
 0x228   : > { %v1789_v39 = vadd.f32 %v1788_v38, %v15391_v54 }
 0x229   : > { %v2558_v40 = vmax.f32 %v2557_v20, %v2338_v36  ;;  %v2579_v41 = vmax.f32 %v2578_v21, %v2339_v37  ;;  %1649 = vmatmul.bf16.gmra.mxu2 %v15437_v34  ;;  %1738 = vmatmul.bf16.gmra.mxu3 %v15437_v34  ;;  %v10100_v20 = vld [vmem:[#allocation10 + $0x1d0] sm:$0xf]  ;;  %v10109_v36 = vor.u32 %v13534_v29, %v10108_v28 }
 0x22a   : > { %v2348_v42 = vmax.f32 %v1789_v39, 0.0  ;;  %1827 = vmatmul.bf16.gmra.mxu0 %v15437_v34  ;;  %v1116_v43 = vpop.f32.mrf.mxu1  ;;  %v13533_v21 = vld [vmem:[#allocation10 + $0x1ec] sm:$0xf0]  ;;  %2031 = vmatpush.bf16.msrb.mxu3 %v10105_v33  ;;  %v10006_v33 = vld [vmem:[#allocation10 + $0x130] sm:$0xf0] }
 0x22b   : > { %v1117_v62 = vadd.f32 %v15301_v35, %v1116_v43  ;;  %2120 = vmatpush.bf16.msra.mxu0 %v10109_v36  ;;  %v10012_v36 = vld [vmem:[#allocation10 + $0x118] sm:$0xf] }
 0x22c   : > { %v2601_v45 = vmax.f32 %v2600_v26, %v2348_v42  ;;  %v1610_v46 = vpop.f32.mrf.mxu2  ;;  %v1699_v47 = vpop.f32.mrf.mxu3  ;;  %v10101_v26 = vor.u32 %v13533_v21, %v10100_v20  ;;  %v13521_v42 = vld [vmem:[#allocation10 + $0x194] sm:$0xf] }
 0x22d   : > { %v1611_v49 = vadd.f32 %v1610_v46, %v15397_v60  ;;  %v1700_v50 = vadd.f32 %v1699_v47, %v15400_v61  ;;  %1881 = vmatmul.bf16.gmra.mxu1 %v15347_v48  ;;  %v1160_v7 = vmax.f32 %v1117_v62, 0.0  ;;  %v10070_v47 = vld [vmem:[#allocation10 + $0x1b0] sm:$0xf0] }
 0x22e   : > { %1942 = vmatpush.bf16.msrb.mxu2 %v10101_v26 }
 0x22f   : > { %v2346_v53 = vmax.f32 %v1611_v49, 0.0  ;;  %v2347_v55 = vmax.f32 %v1700_v50, 0.0  ;;  %v1790_v56 = vpop.f32.mrf.mxu0  ;;  %v10076_v49 = vld [vmem:[#allocation10 + $0x198] sm:$0xf]  ;;  %v10073_v50 = vor.u32 %v13521_v42, %v10070_v47  ;;  %v13501_v47 = vld [vmem:[#allocation10 + $0xec] sm:$0xf0] }
 0x230   : > { %v1791_v57 = vadd.f32 %v1790_v56, %v15391_v54 }
 0x231   : > { %v2559_v63 = vmax.f32 %v2558_v40, %v2346_v53  ;;  %v2580_v0 = vmax.f32 %v2579_v41, %v2347_v55  ;;  %v10068_v40 = vld [vmem:[#allocation10 + $0x190] sm:$0xf]  ;;  %v13526_v53 = vld [vmem:[#allocation10 + $0x1b4] sm:$0xf0]  ;;  %2032 = vmatpush.bf16.msrb.mxu3 %v10073_v50 }
 0x232   : > { %v2356_v1 = vmax.f32 %v1791_v57, 0.0  ;;  %v1118_v2 = vpop.f32.mrf.mxu1  ;;  %v13525_v41 = vld [vmem:[#allocation10 + $0x1ac] sm:$0xf0] }
 0x233   : > { %v1119_v3 = vadd.f32 %v15301_v35, %v1118_v2  ;;  %v10069_v46 = vor.u32 %v13525_v41, %v10068_v40  ;;  %v13517_v2 = vld [vmem:[#allocation10 + $0x16c] sm:$0xf0] }
 0x234   : > { %v2602_v4 = vmax.f32 %v2601_v45, %v2356_v1  ;;  %v1612_v5 = vpop.f32.mrf.mxu2  ;;  %v1701_v6 = vpop.f32.mrf.mxu3  ;;  %v10036_v1 = vld [vmem:[#allocation10 + $0x150] sm:$0xf] }
 0x235   : > { %v1161_v9 = vmax.f32 %v1119_v3, 0.0  ;;  %v1613_v10 = vadd.f32 %v1612_v5, %v15397_v60  ;;  %v1702_v11 = vadd.f32 %v1701_v6, %v15400_v61  ;;  %1943 = vmatpush.bf16.msrb.mxu2 %v10069_v46  ;;  %v13513_v3 = vld [vmem:[#allocation10 + $0x154] sm:$0xf]  ;;  %v10037_v6 = vor.u32 %v13517_v2, %v10036_v1  ;;  %v9972_v46 = vld [vmem:[#allocation10 + $0xd0] sm:$0xf] }
 0x237   : > { %v15451_v13 = vpack.c.bf16 %v1161_v9, %v1160_v7  ;;  %v2354_v14 = vmax.f32 %v1613_v10, 0.0  ;;  %v2355_v15 = vmax.f32 %v1702_v11, 0.0  ;;  %v1793_v16 = vpop.f32.mrf.mxu0  ;;  %v10038_v7 = vld [vmem:[#allocation10 + $0x170] sm:$0xf0]  ;;  %v10044_v9 = vld [vmem:[#allocation10 + $0x158] sm:$0xf] }
 0x238   : > { %v1794_v17 = vadd.f32 %v1793_v16, %v15391_v54  ;;  %v13518_v10 = vld [vmem:[#allocation10 + $0x174] sm:$0xf0] }
 0x239   : > { %v2560_v24 = vmax.f32 %v2559_v63, %v2354_v14  ;;  %v2581_v25 = vmax.f32 %v2580_v0, %v2355_v15  ;;  %1654 = vmatmul.bf16.gmra.mxu2 %v15451_v13  ;;  %1743 = vmatmul.bf16.gmra.mxu3 %v15451_v13  ;;  %v10077_v63 = vor.u32 %v13526_v53, %v10076_v49  ;;  %v13497_v49 = vld [vmem:[#allocation10 + $0xd4] sm:$0xf] }
 0x23a   : > { %v2364_v30 = vmax.f32 %v1794_v17, 0.0  ;;  %1832 = vmatmul.bf16.gmra.mxu0 %v15451_v13  ;;  %v1121_v32 = vpop.f32.mrf.mxu1  ;;  %v10041_v15 = vor.u32 %v13513_v3, %v10038_v7  ;;  %v10045_v16 = vor.u32 %v13518_v10, %v10044_v9  ;;  %1944 = vmatpush.bf16.msrb.mxu2 %v10037_v6  ;;  %v13493_v7 = vld [vmem:[#allocation10 + $0xac] sm:$0xf0]  ;;  %v13489_v9 = vld [vmem:[#allocation10 + $0x94] sm:$0xf] }
 0x23b   : > { %v1122_v55 = vadd.f32 %v15301_v35, %v1121_v32  ;;  %2121 = vmatpush.bf16.msra.mxu0 %v10077_v63 }
 0x23c   : > { %v2603_v37 = vmax.f32 %v2602_v4, %v2364_v30  ;;  %v1615_v38 = vpop.f32.mrf.mxu2  ;;  %v1704_v39 = vpop.f32.mrf.mxu3  ;;  %2033 = vmatpush.bf16.msrb.mxu3 %v10041_v15  ;;  %v9942_v15 = vld [vmem:[#allocation10 + $0xb0] sm:$0xf0] }
 0x23d   : > { %v1616_v43 = vadd.f32 %v1615_v38, %v15397_v60  ;;  %v1705_v45 = vadd.f32 %v1704_v39, %v15400_v61  ;;  %1886 = vmatmul.bf16.gmra.mxu1 %v15357_v12  ;;  %v1162_v17 = vmax.f32 %v1122_v55, 0.0  ;;  %v13510_v39 = vld [vmem:[#allocation10 + $0x134] sm:$0xf0]  ;;  %v9973_v55 = vor.u32 %v13501_v47, %v9972_v46 }
 0x23f   : > { %v2362_v56 = vmax.f32 %v1616_v43, 0.0  ;;  %v2363_v57 = vmax.f32 %v1705_v45, 0.0  ;;  %v1795_v62 = vpop.f32.mrf.mxu0  ;;  %2122 = vmatpush.bf16.msra.mxu0 %v10045_v16  ;;  %v10013_v43 = vor.u32 %v13510_v39, %v10012_v36  ;;  %v9948_v16 = vld [vmem:[#allocation10 + $0x98] sm:$0xf] }
 0x240   : > { %v1796_v0 = vadd.f32 %v1795_v62, %v15391_v54  ;;  %v13502_v62 = vld [vmem:[#allocation10 + $0xf4] sm:$0xf0] }
 0x241   : > { %v2561_v4 = vmax.f32 %v2560_v24, %v2362_v56  ;;  %v2582_v5 = vmax.f32 %v2581_v25, %v2363_v57  ;;  %v13509_v24 = vld [vmem:[#allocation10 + $0x12c] sm:$0xf0]  ;;  %v13505_v25 = vld [vmem:[#allocation10 + $0x114] sm:$0xf]  ;;  %v9980_v57 = vld [vmem:[#allocation10 + $0xd8] sm:$0xf] }
 0x242   : > { %v2372_v11 = vmax.f32 %v1796_v0, 0.0  ;;  %v1123_v14 = vpop.f32.mrf.mxu1  ;;  %v10005_v32 = vor.u32 %v13509_v24, %v10004_v27  ;;  %v10009_v38 = vor.u32 %v13505_v25, %v10006_v33  ;;  %v9974_v56 = vld [vmem:[#allocation10 + $0xf0] sm:$0xf0]  ;;  %v9981_v2 = vor.u32 %v13502_v62, %v9980_v57  ;;  %v9916_v39 = vld [vmem:[#allocation10 + $0x58] sm:$0xf] }
 0x243   : > { %v1124_v20 = vadd.f32 %v15301_v35, %v1123_v14  ;;  %v9977_v1 = vor.u32 %v13497_v49, %v9974_v56  ;;  %2123 = vmatpush.bf16.msra.mxu0 %v10013_v43  ;;  %v9876_v57 = vld [vmem:[#allocation10 + $0x10] sm:$0xf] }
 0x244   : > { %v2604_v21 = vmax.f32 %v2603_v37, %v2372_v11  ;;  %v1617_v22 = vpop.f32.mrf.mxu2  ;;  %v1706_v26 = vpop.f32.mrf.mxu3  ;;  %1945 = vmatpush.bf16.msrb.mxu2 %v10005_v32  ;;  %2034 = vmatpush.bf16.msrb.mxu3 %v10009_v38  ;;  %v9910_v38 = vld [vmem:[#allocation10 + $0x70] sm:$0xf0] }
 0x245   : > { %v1163_v28 = vmax.f32 %v1124_v20, 0.0  ;;  %v1618_v29 = vadd.f32 %v1617_v22, %v15397_v60  ;;  %v1707_v30 = vadd.f32 %v1706_v26, %v15400_v61  ;;  %v13494_v20 = vld [vmem:[#allocation10 + $0xb4] sm:$0xf0] }
 0x246   : > { %v9949_v24 = vor.u32 %v13494_v20, %v9948_v16 }
 0x247   : > { %v15465_v40 = vpack.c.bf16 %v1163_v28, %v1162_v17  ;;  %v2370_v37 = vmax.f32 %v1618_v29, 0.0  ;;  %v2371_v41 = vmax.f32 %v1707_v30, 0.0  ;;  %v1798_v42 = vpop.f32.mrf.mxu0  ;;  %v9945_v17 = vor.u32 %v13489_v9, %v9942_v15  ;;  %2124 = vmatpush.bf16.msra.mxu0 %v9981_v2  ;;  %v9908_v28 = vld [vmem:[#allocation10 + $0x50] sm:$0xf]  ;;  %v13481_v30 = vld [vmem:[#allocation10 + $0x54] sm:$0xf] }
 0x248   : > { %v1799_v45 = vadd.f32 %v1798_v42, %v15391_v54  ;;  %1946 = vmatpush.bf16.msrb.mxu2 %v9973_v55  ;;  %2035 = vmatpush.bf16.msrb.mxu3 %v9977_v1  ;;  %v13485_v29 = vld [vmem:[#allocation10 + $0x6c] sm:$0xf0]  ;;  %v9913_v43 = vor.u32 %v13481_v30, %v9910_v38  ;;  %v9878_v2 = vld [vmem:[#allocation10 + $0x30] sm:$0xf0] }
 0x249   : > { %v2562_v50 = vmax.f32 %v2561_v4, %v2370_v37  ;;  %v2583_v53 = vmax.f32 %v2582_v5, %v2371_v41  ;;  %1659 = vmatmul.bf16.gmra.mxu2 %v15465_v40  ;;  %1748 = vmatmul.bf16.gmra.mxu3 %v15465_v40  ;;  %v9940_v5 = vld [vmem:[#allocation10 + $0x90] sm:$0xf]  ;;  %v9909_v36 = vor.u32 %v13485_v29, %v9908_v28  ;;  %v13486_v37 = vld [vmem:[#allocation10 + $0x74] sm:$0xf0] }
 0x24a   : > { %v2380_v63 = vmax.f32 %v1799_v45, 0.0  ;;  %1837 = vmatmul.bf16.gmra.mxu0 %v15465_v40  ;;  %v1126_v0 = vpop.f32.mrf.mxu1  ;;  %v9941_v14 = vor.u32 %v13493_v7, %v9940_v5  ;;  %v9917_v47 = vor.u32 %v13486_v37, %v9916_v39  ;;  %v13478_v5 = vld [vmem:[#allocation10 + $0x34] sm:$0xf0] }
 0x24b   : > { %v1127_v22 = vadd.f32 %v15301_v35, %v1126_v0  ;;  %2125 = vmatpush.bf16.msra.mxu0 %v9949_v24 }
 0x24c   : > { %v2605_v3 = vmax.f32 %v2604_v21, %v2380_v63  ;;  %v1620_v6 = vpop.f32.mrf.mxu2  ;;  %v1709_v4 = vpop.f32.mrf.mxu3  ;;  %1947 = vmatpush.bf16.msrb.mxu2 %v9941_v14  ;;  %2036 = vmatpush.bf16.msrb.mxu3 %v9945_v17 }
 0x24d   : > { %v1621_v10 = vadd.f32 %v1620_v6, %v15397_v60  ;;  %v1710_v11 = vadd.f32 %v1709_v4, %v15400_v61  ;;  %1891 = vmatmul.bf16.gmra.mxu1 %v15367_v31  ;;  %v1164_v45 = vmax.f32 %v1127_v22, 0.0  ;;  %v9884_v6 = vld [vmem:[#allocation10 + $0x18] sm:$0xf] }
 0x24f   : > { %v2378_v21 = vmax.f32 %v1621_v10, 0.0  ;;  %v2379_v26 = vmax.f32 %v1710_v11, 0.0  ;;  %v1800_v27 = vpop.f32.mrf.mxu0  ;;  %2126 = vmatpush.bf16.msra.mxu0 %v9917_v47  ;;  %v9885_v11 = vor.u32 %v13478_v5, %v9884_v6 }
 0x250   : > { %v1801_v25 = vadd.f32 %v1800_v27, %v15391_v54  ;;  %1948 = vmatpush.bf16.msrb.mxu2 %v9909_v36  ;;  %2037 = vmatpush.bf16.msrb.mxu3 %v9913_v43 }
 0x251   : > { %v2563_v32 = vmax.f32 %v2562_v50, %v2378_v21  ;;  %v2584_v33 = vmax.f32 %v2583_v53, %v2379_v26  ;;  %v13477_v50 = vld [vmem:[#allocation10 + $0x2c] sm:$0xf0]  ;;  %v13473_v53 = vld [vmem:[#allocation10 + $0x14] sm:$0xf] }
 0x252   : > { %v2388_v41 = vmax.f32 %v1801_v25, 0.0  ;;  %v1128_v42 = vpop.f32.mrf.mxu1  ;;  %v9877_v1 = vor.u32 %v13477_v50, %v9876_v57  ;;  %v9881_v4 = vor.u32 %v13473_v53, %v9878_v2 }
 0x253   : > { %v1129_v46 = vadd.f32 %v15301_v35, %v1128_v42  ;;  %2127 = vmatpush.bf16.msra.mxu0 %v9885_v11 }
 0x254   : > { %v2606_v49 = vmax.f32 %v2605_v3, %v2388_v41  ;;  %v1622_v55 = vpop.f32.mrf.mxu2  ;;  %v1711_v56 = vpop.f32.mrf.mxu3  ;;  %1949 = vmatpush.bf16.msrb.mxu2 %v9877_v1  ;;  %2038 = vmatpush.bf16.msrb.mxu3 %v9881_v4  ;;  %v15500_v4 = vperm.slane %v15386_v52, 3 }
 0x255   : > { %v1165_v62 = vmax.f32 %v1129_v46, 0.0  ;;  %v1623_v63 = vadd.f32 %v1622_v55, %v15397_v60  ;;  %v1712_v0 = vadd.f32 %v1711_v56, %v15400_v61 }
 0x257   : > { %v15479_v7 = vpack.c.bf16 %v1165_v62, %v1164_v45  ;;  %v2386_v9 = vmax.f32 %v1623_v63, 0.0  ;;  %v2387_v3 = vmax.f32 %v1712_v0, 0.0  ;;  %v1803_v10 = vpop.f32.mrf.mxu0 }
 0x258   : > { %v1804_v14 = vadd.f32 %v1803_v10, %v15391_v54 }
 0x259   : > { %v2564_v15 = vmax.f32 %v2563_v32, %v2386_v9  ;;  %v2585_v16 = vmax.f32 %v2584_v33, %v2387_v3  ;;  %1664 = vmatmul.bf16.gmra.mxu2 %v15479_v7  ;;  %1753 = vmatmul.bf16.gmra.mxu3 %v15479_v7 }
 0x25a   : > { %v2396_v17 = vmax.f32 %v1804_v14, 0.0  ;;  %1842 = vmatmul.bf16.gmra.mxu0 %v15479_v7  ;;  %v1131_v20 = vpop.f32.mrf.mxu1 }
 0x25b   : > { %v1132_v32 = vadd.f32 %v15301_v35, %v1131_v20 }
 0x25c   : > { %v2607_v22 = vmax.f32 %v2606_v49, %v2396_v17  ;;  %v1625_v21 = vpop.f32.mrf.mxu2  ;;  %v1714_v26 = vpop.f32.mrf.mxu3 }
 0x25d   : > { %v1626_v27 = vadd.f32 %v1625_v21, %v15397_v60  ;;  %v1715_v24 = vadd.f32 %v1714_v26, %v15400_v61  ;;  %1896 = vmatmul.bf16.gmra.mxu1 %v15376_v18  ;;  %v1166_v45 = vmax.f32 %v1132_v32, 0.0 }
 0x25f   : > { %v2394_v25 = vmax.f32 %v1626_v27, 0.0  ;;  %v2395_v28 = vmax.f32 %v1715_v24, 0.0  ;;  %v1805_v29 = vpop.f32.mrf.mxu0 }
 0x260   : > { %v1806_v30 = vadd.f32 %v1805_v29, %v15391_v54 }
 0x261   : > { %v2565_v33 = vmax.f32 %v2564_v15, %v2394_v25  ;;  %v2586_v36 = vmax.f32 %v2585_v16, %v2395_v28 }
 0x262   : > { %v2404_v38 = vmax.f32 %v1806_v30, 0.0  ;;  %v1133_v39 = vpop.f32.mrf.mxu1 }
 0x263   : > { %v1134_v37 = vadd.f32 %v15301_v35, %v1133_v39 }
 0x264   : > { %v2608_v41 = vmax.f32 %v2607_v22, %v2404_v38  ;;  %v1627_v42 = vpop.f32.mrf.mxu2  ;;  %v1716_v43 = vpop.f32.mrf.mxu3 }
 0x265   : > { %v1167_v46 = vmax.f32 %v1134_v37, 0.0  ;;  %v1628_v47 = vadd.f32 %v1627_v42, %v15397_v60  ;;  %v1717_v49 = vadd.f32 %v1716_v43, %v15400_v61 }
 0x267   : > { %v15493_v55 = vpack.c.bf16 %v1167_v46, %v1166_v45  ;;  %v2402_v56 = vmax.f32 %v1628_v47, 0.0  ;;  %v2403_v57 = vmax.f32 %v1717_v49, 0.0  ;;  %v1808_v50 = vpop.f32.mrf.mxu0 }
 0x268   : > { %v1809_v53 = vadd.f32 %v1808_v50, %v15391_v54 }
 0x269   : > { %v2566_v62 = vmax.f32 %v2565_v33, %v2402_v56  ;;  %v2587_v63 = vmax.f32 %v2586_v36, %v2403_v57  ;;  %1669 = vmatmul.bf16.gmra.mxu2 %v15493_v55  ;;  %1758 = vmatmul.bf16.gmra.mxu3 %v15493_v55 }
 0x26a   : > { %v2412_v35 = vmax.f32 %v1809_v53, 0.0  ;;  %1847 = vmatmul.bf16.gmra.mxu0 %v15493_v55  ;;  %v1862_v0 = vpop.f32.mrf.mxu1 }
 0x26b   : > { %v1863_v15 = vadd.f32 %v1862_v0, %v15500_v4 }
 0x26c   : > { %v2609_v1 = vmax.f32 %v2608_v41, %v2412_v35  ;;  %v1630_v2 = vpop.f32.mrf.mxu2  ;;  %v1719_v6 = vpop.f32.mrf.mxu3 }
 0x26d   : > { %v1631_v5 = vadd.f32 %v1630_v2, %v15397_v60  ;;  %v1720_v9 = vadd.f32 %v1719_v6, %v15400_v61  ;;  %1901 = vmatmul.bf16.gmra.mxu1 %v15384_v51  ;;  %v2301_v24 = vmax.f32 %v1863_v15, 0.0 }
 0x26f   : > { %v2410_v3 = vmax.f32 %v1631_v5, 0.0  ;;  %v2411_v10 = vmax.f32 %v1720_v9, 0.0  ;;  %v1810_v11 = vpop.f32.mrf.mxu0 }
 0x270   : > { %v1811_v14 = vadd.f32 %v1810_v11, %v15391_v54 }
 0x271   : > { %v2567_v16 = vmax.f32 %v2566_v62, %v2410_v3  ;;  %v2588_v17 = vmax.f32 %v2587_v63, %v2411_v10 }
 0x272   : > { %v2420_v20 = vmax.f32 %v1811_v14, 0.0  ;;  %v1864_v22 = vpop.f32.mrf.mxu1 }
 0x273   : > { %v1865_v52 = vadd.f32 %v1864_v22, %v15500_v4 }
 0x274   : > { %v15508_v21 = vmax.f32 %v2609_v1, %v2420_v20  ;;  %v1632_v26 = vpop.f32.mrf.mxu2  ;;  %v1721_v27 = vpop.f32.mrf.mxu3 }
 0x275   : > { %v2309_v25 = vmax.f32 %v1865_v52, 0.0  ;;  %v1633_v28 = vadd.f32 %v1632_v26, %v15397_v60  ;;  %v1722_v29 = vadd.f32 %v1721_v27, %v15400_v61 }
 0x277   : > { %v2617_v30 = vmax.f32 %v2301_v24, %v2309_v25  ;;  %v2418_v32 = vmax.f32 %v1633_v28, 0.0  ;;  %v2419_v33 = vmax.f32 %v1722_v29, 0.0  ;;  %v1813_v36 = vpop.f32.mrf.mxu0 }
 0x278   : > { %v1814_v46 = vadd.f32 %v1813_v36, %v15391_v54 }
 0x279   : > { %v15512_v38 = vmax.f32 %v2567_v16, %v2418_v32  ;;  %v15514_v39 = vmax.f32 %v2588_v17, %v2419_v33  ;;  %1950 = vmatmul.bf16.vlgmr.msrb.gmra.mxu2 %v15307_v44  ;;  %2039 = vmatmul.bf16.vlgmr.msrb.gmra.mxu3 %v15307_v44 }
 0x27a   : > { %2128 = vmatmul.bf16.vlgmr.msra.gmra.mxu0 %v15307_v44  ;;  %v1867_v37 = vpop.f32.mrf.mxu1  ;;  %v2428_v57 = vmax.f32 %v1814_v46, 0.0 }
 0x27b   : > { %v1868_v41 = vadd.f32 %v1867_v37, %v15500_v4 }
 0x27c   : > { %v1635_v42 = vpop.f32.mrf.mxu2  ;;  %v1724_v43 = vpop.f32.mrf.mxu3 }
 0x27d   : > { %v2317_v45 = vmax.f32 %v1868_v41, 0.0  ;;  %1906 = vmatmul.bf16.gmra.mxu1 %v15409_v19  ;;  %v1636_v62 = vadd.f32 %v1635_v42, %v15397_v60  ;;  %v1725_v35 = vadd.f32 %v1724_v43, %v15400_v61 }
 0x27f   : > { %v2618_v47 = vmax.f32 %v2617_v30, %v2317_v45  ;;  %v1815_v49 = vpop.f32.mrf.mxu0  ;;  %v2426_v3 = vmax.f32 %v1636_v62, 0.0  ;;  %v2427_v15 = vmax.f32 %v1725_v35, 0.0 }
 0x280   : > { %v1816_v56 = vadd.f32 %v1815_v49, %v15391_v54 }
 0x282   : > { %v2436_v50 = vmax.f32 %v1816_v56, 0.0  ;;  %v1869_v53 = vpop.f32.mrf.mxu1 }
 0x283   : > { %v1870_v63 = vadd.f32 %v1869_v53, %v15500_v4 }
 0x284   : > { %v2764_v0 = vmax.f32 %v2428_v57, %v2436_v50  ;;  %v1637_v1 = vpop.f32.mrf.mxu2  ;;  %v1726_v2 = vpop.f32.mrf.mxu3 }
 0x285   : > { %v2325_v6 = vmax.f32 %v1870_v63, 0.0  ;;  %v1638_v5 = vadd.f32 %v1637_v1, %v15397_v60  ;;  %v1727_v9 = vadd.f32 %v1726_v2, %v15400_v61 }
 0x287   : > { %v2619_v10 = vmax.f32 %v2618_v47, %v2325_v6  ;;  %v2434_v11 = vmax.f32 %v1638_v5, 0.0  ;;  %v1818_v14 = vpop.f32.mrf.mxu0  ;;  %v2435_v16 = vmax.f32 %v1727_v9, 0.0 }
 0x288   : > { %v1819_v17 = vadd.f32 %v1818_v14, %v15391_v54 }
 0x289   : > { %v2722_v20 = vmax.f32 %v2426_v3, %v2434_v11  ;;  %1955 = vmatmul.bf16.gmra.mxu2 %v15317_v58  ;;  %2044 = vmatmul.bf16.gmra.mxu3 %v15317_v58  ;;  %v2743_v22 = vmax.f32 %v2427_v15, %v2435_v16 }
 0x28a   : > { %v2444_v52 = vmax.f32 %v1819_v17, 0.0  ;;  %2133 = vmatmul.bf16.gmra.mxu0 %v15317_v58  ;;  %v1872_v26 = vpop.f32.mrf.mxu1 }
 0x28b   : > { %v1873_v27 = vadd.f32 %v1872_v26, %v15500_v4 }
 0x28c   : > { %v2765_v24 = vmax.f32 %v2764_v0, %v2444_v52  ;;  %v1640_v25 = vpop.f32.mrf.mxu2  ;;  %v1729_v28 = vpop.f32.mrf.mxu3 }
 0x28d   : > { %v2333_v29 = vmax.f32 %v1873_v27, 0.0  ;;  %v1641_v30 = vadd.f32 %v1640_v25, %v15397_v60  ;;  %v1730_v32 = vadd.f32 %v1729_v28, %v15400_v61  ;;  %1911 = vmatmul.bf16.gmra.mxu1 %v15423_v59 }
 0x28f   : > { %v2620_v33 = vmax.f32 %v2619_v10, %v2333_v29  ;;  %v2442_v36 = vmax.f32 %v1641_v30, 0.0  ;;  %v2443_v37 = vmax.f32 %v1730_v32, 0.0  ;;  %v1820_v41 = vpop.f32.mrf.mxu0 }
 0x290   : > { %v1821_v42 = vadd.f32 %v1820_v41, %v15391_v54 }
 0x291   : > { %v2723_v43 = vmax.f32 %v2722_v20, %v2442_v36  ;;  %v2744_v45 = vmax.f32 %v2743_v22, %v2443_v37 }
 0x292   : > { %v2452_v46 = vmax.f32 %v1821_v42, 0.0  ;;  %v1874_v47 = vpop.f32.mrf.mxu1 }
 0x293   : > { %v1875_v49 = vadd.f32 %v1874_v47, %v15500_v4 }
 0x294   : > { %v2766_v56 = vmax.f32 %v2765_v24, %v2452_v46  ;;  %v1642_v57 = vpop.f32.mrf.mxu2  ;;  %v1731_v50 = vpop.f32.mrf.mxu3 }
 0x295   : > { %v2341_v53 = vmax.f32 %v1875_v49, 0.0  ;;  %v1643_v62 = vadd.f32 %v1642_v57, %v15397_v60  ;;  %v1732_v63 = vadd.f32 %v1731_v50, %v15400_v61 }
 0x297   : > { %v2621_v35 = vmax.f32 %v2620_v33, %v2341_v53  ;;  %v2450_v0 = vmax.f32 %v1643_v62, 0.0  ;;  %v2451_v1 = vmax.f32 %v1732_v63, 0.0  ;;  %v1823_v2 = vpop.f32.mrf.mxu0 }
 0x298   : > { %v1824_v6 = vadd.f32 %v1823_v2, %v15391_v54 }
 0x299   : > { %v2724_v5 = vmax.f32 %v2723_v43, %v2450_v0  ;;  %v2745_v9 = vmax.f32 %v2744_v45, %v2451_v1  ;;  %1960 = vmatmul.bf16.gmra.mxu2 %v15327_v8  ;;  %2049 = vmatmul.bf16.gmra.mxu3 %v15327_v8 }
 0x29a   : > { %v2460_v3 = vmax.f32 %v1824_v6, 0.0  ;;  %2138 = vmatmul.bf16.gmra.mxu0 %v15327_v8  ;;  %v1877_v10 = vpop.f32.mrf.mxu1  ;;  %v13530_v6 = vld [vmem:[#allocation10 + $0x1dc] sm:$0xf] }
 0x29b   : > { %v1878_v11 = vadd.f32 %v1877_v10, %v15500_v4 }
 0x29c   : > { %v2767_v14 = vmax.f32 %v2766_v56, %v2460_v3  ;;  %v1645_v15 = vpop.f32.mrf.mxu2  ;;  %v1734_v16 = vpop.f32.mrf.mxu3 }
 0x29d   : > { %v2349_v17 = vmax.f32 %v1878_v11, 0.0  ;;  %v1646_v20 = vadd.f32 %v1645_v15, %v15397_v60  ;;  %v1735_v22 = vadd.f32 %v1734_v16, %v15400_v61  ;;  %1916 = vmatmul.bf16.gmra.mxu1 %v15437_v34 }
 0x29f   : > { %v2622_v52 = vmax.f32 %v2621_v35, %v2349_v17  ;;  %v2458_v26 = vmax.f32 %v1646_v20, 0.0  ;;  %v2459_v27 = vmax.f32 %v1735_v22, 0.0  ;;  %v1825_v24 = vpop.f32.mrf.mxu0  ;;  %v13522_v22 = vld [vmem:[#allocation10 + $0x19c] sm:$0xf] }
 0x2a0   : > { %v1826_v25 = vadd.f32 %v1825_v24, %v15391_v54 }
 0x2a1   : > { %v2725_v28 = vmax.f32 %v2724_v5, %v2458_v26  ;;  %v2746_v29 = vmax.f32 %v2745_v9, %v2459_v27  ;;  %v10110_v5 = vld [vmem:[#allocation10 + $0x1f8] sm:$0xf0] }
 0x2a2   : > { %v2468_v30 = vmax.f32 %v1826_v25, 0.0  ;;  %v1879_v32 = vpop.f32.mrf.mxu1  ;;  %v10113_v11 = vor.u32 %v13530_v6, %v10110_v5 }
 0x2a3   : > { %v1880_v33 = vadd.f32 %v1879_v32, %v15500_v4 }
 0x2a4   : > { %v2768_v36 = vmax.f32 %v2767_v14, %v2468_v30  ;;  %v1647_v37 = vpop.f32.mrf.mxu2  ;;  %v1736_v41 = vpop.f32.mrf.mxu3  ;;  %2209 = vmatpush.bf16.msra.mxu1 %v10113_v11 }
 0x2a5   : > { %v2357_v42 = vmax.f32 %v1880_v33, 0.0  ;;  %v1648_v43 = vadd.f32 %v1647_v37, %v15397_v60  ;;  %v1737_v45 = vadd.f32 %v1736_v41, %v15400_v61  ;;  %v10046_v37 = vld [vmem:[#allocation10 + $0x178] sm:$0xf0] }
 0x2a7   : > { %v2623_v46 = vmax.f32 %v2622_v52, %v2357_v42  ;;  %v2466_v47 = vmax.f32 %v1648_v43, 0.0  ;;  %v2467_v49 = vmax.f32 %v1737_v45, 0.0  ;;  %v1828_v56 = vpop.f32.mrf.mxu0  ;;  %v10078_v52 = vld [vmem:[#allocation10 + $0x1b8] sm:$0xf0] }
 0x2a8   : > { %v1829_v57 = vadd.f32 %v1828_v56, %v15391_v54  ;;  %v10081_v24 = vor.u32 %v13522_v22, %v10078_v52 }
 0x2a9   : > { %v2726_v50 = vmax.f32 %v2725_v28, %v2466_v47  ;;  %v2747_v53 = vmax.f32 %v2746_v29, %v2467_v49  ;;  %1965 = vmatmul.bf16.gmra.mxu2 %v15337_v23  ;;  %2054 = vmatmul.bf16.gmra.mxu3 %v15337_v23 }
 0x2aa   : > { %v2476_v62 = vmax.f32 %v1829_v57, 0.0  ;;  %2143 = vmatmul.bf16.gmra.mxu0 %v15337_v23  ;;  %v1882_v63 = vpop.f32.mrf.mxu1  ;;  %2210 = vmatpush.bf16.msra.mxu1 %v10081_v24  ;;  %v9950_v24 = vld [vmem:[#allocation10 + $0xb8] sm:$0xf0] }
 0x2ab   : > { %v1883_v35 = vadd.f32 %v1882_v63, %v15500_v4 }
 0x2ac   : > { %v2769_v0 = vmax.f32 %v2768_v36, %v2476_v62  ;;  %v1650_v1 = vpop.f32.mrf.mxu2  ;;  %v1739_v2 = vpop.f32.mrf.mxu3  ;;  %v13514_v36 = vld [vmem:[#allocation10 + $0x15c] sm:$0xf] }
 0x2ad   : > { %v2365_v9 = vmax.f32 %v1883_v35, 0.0  ;;  %v1651_v3 = vadd.f32 %v1650_v1, %v15397_v60  ;;  %v1740_v10 = vadd.f32 %v1739_v2, %v15400_v61  ;;  %1921 = vmatmul.bf16.gmra.mxu1 %v15451_v13  ;;  %v10049_v45 = vor.u32 %v13514_v36, %v10046_v37 }
 0x2af   : > { %v2624_v14 = vmax.f32 %v2623_v46, %v2365_v9  ;;  %v2474_v15 = vmax.f32 %v1651_v3, 0.0  ;;  %v2475_v16 = vmax.f32 %v1740_v10, 0.0  ;;  %v1830_v17 = vpop.f32.mrf.mxu0  ;;  %2211 = vmatpush.bf16.msra.mxu1 %v10049_v45  ;;  %v13498_v3 = vld [vmem:[#allocation10 + $0xdc] sm:$0xf] }
 0x2b0   : > { %v1831_v20 = vadd.f32 %v1830_v17, %v15391_v54  ;;  %v9982_v10 = vld [vmem:[#allocation10 + $0xf8] sm:$0xf0] }
 0x2b1   : > { %v2727_v26 = vmax.f32 %v2726_v50, %v2474_v15  ;;  %v2748_v27 = vmax.f32 %v2747_v53, %v2475_v16  ;;  %v13506_v50 = vld [vmem:[#allocation10 + $0x11c] sm:$0xf]  ;;  %v9985_v16 = vor.u32 %v13498_v3, %v9982_v10 }
 0x2b2   : > { %v2484_v25 = vmax.f32 %v1831_v20, 0.0  ;;  %v1884_v28 = vpop.f32.mrf.mxu1  ;;  %v10014_v53 = vld [vmem:[#allocation10 + $0x138] sm:$0xf0] }
 0x2b3   : > { %v1885_v29 = vadd.f32 %v1884_v28, %v15500_v4  ;;  %v10017_v35 = vor.u32 %v13506_v50, %v10014_v53 }
 0x2b4   : > { %v2770_v30 = vmax.f32 %v2769_v0, %v2484_v25  ;;  %v1652_v32 = vpop.f32.mrf.mxu2  ;;  %v1741_v33 = vpop.f32.mrf.mxu3 }
 0x2b5   : > { %v2373_v41 = vmax.f32 %v1885_v29, 0.0  ;;  %v1653_v42 = vadd.f32 %v1652_v32, %v15397_v60  ;;  %v1742_v43 = vadd.f32 %v1741_v33, %v15400_v61  ;;  %2212 = vmatpush.bf16.msra.mxu1 %v10017_v35  ;;  %v9886_v35 = vld [vmem:[#allocation10 + $0x38] sm:$0xf0] }
 0x2b7   : > { %v2625_v46 = vmax.f32 %v2624_v14, %v2373_v41  ;;  %v2482_v47 = vmax.f32 %v1653_v42, 0.0  ;;  %v2483_v49 = vmax.f32 %v1742_v43, 0.0  ;;  %v1833_v56 = vpop.f32.mrf.mxu0  ;;  %v13482_v42 = vld [vmem:[#allocation10 + $0x5c] sm:$0xf] }
 0x2b8   : > { %v1834_v57 = vadd.f32 %v1833_v56, %v15391_v54  ;;  %v9918_v43 = vld [vmem:[#allocation10 + $0x78] sm:$0xf0] }
 0x2b9   : > { %v2728_v62 = vmax.f32 %v2727_v26, %v2482_v47  ;;  %v2749_v63 = vmax.f32 %v2748_v27, %v2483_v49  ;;  %1970 = vmatmul.bf16.gmra.mxu2 %v15347_v48  ;;  %2059 = vmatmul.bf16.gmra.mxu3 %v15347_v48  ;;  %v13490_v27 = vld [vmem:[#allocation10 + $0x9c] sm:$0xf]  ;;  %v9921_v49 = vor.u32 %v13482_v42, %v9918_v43 }
 0x2ba   : > { %v2492_v0 = vmax.f32 %v1834_v57, 0.0  ;;  %2148 = vmatmul.bf16.gmra.mxu0 %v15347_v48  ;;  %v1887_v1 = vpop.f32.mrf.mxu1  ;;  %2213 = vmatpush.bf16.msra.mxu1 %v9985_v16  ;;  %v9953_v29 = vor.u32 %v13490_v27, %v9950_v24 }
 0x2bb   : > { %v1888_v2 = vadd.f32 %v1887_v1, %v15500_v4 }
 0x2bc   : > { %v2771_v6 = vmax.f32 %v2770_v30, %v2492_v0  ;;  %v1655_v5 = vpop.f32.mrf.mxu2  ;;  %v1744_v9 = vpop.f32.mrf.mxu3 }
 0x2bd   : > { %v2381_v11 = vmax.f32 %v1888_v2, 0.0  ;;  %v1656_v14 = vadd.f32 %v1655_v5, %v15397_v60  ;;  %v1745_v15 = vadd.f32 %v1744_v9, %v15400_v61  ;;  %1926 = vmatmul.bf16.gmra.mxu1 %v15465_v40 }
 0x2be   : > { %2214 = vmatpush.bf16.msra.mxu1 %v9953_v29 }
 0x2bf   : > { %v2626_v17 = vmax.f32 %v2625_v46, %v2381_v11  ;;  %v2490_v20 = vmax.f32 %v1656_v14, 0.0  ;;  %v2491_v22 = vmax.f32 %v1745_v15, 0.0  ;;  %v1835_v52 = vpop.f32.mrf.mxu0 }
 0x2c0   : > { %v1836_v26 = vadd.f32 %v1835_v52, %v15391_v54 }
 0x2c1   : > { %v2729_v25 = vmax.f32 %v2728_v62, %v2490_v20  ;;  %v2750_v28 = vmax.f32 %v2749_v63, %v2491_v22  ;;  %v13474_v63 = vld [vmem:[#allocation10 + $0x1c] sm:$0xf] }
 0x2c2   : > { %v2500_v30 = vmax.f32 %v1836_v26, 0.0  ;;  %v1889_v32 = vpop.f32.mrf.mxu1  ;;  %2215 = vmatpush.bf16.msra.mxu1 %v9921_v49  ;;  %v9889_v2 = vor.u32 %v13474_v63, %v9886_v35 }
 0x2c3   : > { %v1890_v33 = vadd.f32 %v1889_v32, %v15500_v4 }
 0x2c4   : > { %v2772_v36 = vmax.f32 %v2771_v6, %v2500_v30  ;;  %v1657_v37 = vpop.f32.mrf.mxu2  ;;  %v1746_v41 = vpop.f32.mrf.mxu3 }
 0x2c5   : > { %v2389_v45 = vmax.f32 %v1890_v33, 0.0  ;;  %v1658_v46 = vadd.f32 %v1657_v37, %v15397_v60  ;;  %v1747_v47 = vadd.f32 %v1746_v41, %v15400_v61 }
 0x2c6   : > { %2216 = vmatpush.bf16.msra.mxu1 %v9889_v2 }
 0x2c7   : > { %v2627_v56 = vmax.f32 %v2626_v17, %v2389_v45  ;;  %v2498_v57 = vmax.f32 %v1658_v46, 0.0  ;;  %v2499_v50 = vmax.f32 %v1747_v47, 0.0  ;;  %v1838_v53 = vpop.f32.mrf.mxu0 }
 0x2c8   : > { %v1839_v62 = vadd.f32 %v1838_v53, %v15391_v54 }
 0x2c9   : > { %v2730_v0 = vmax.f32 %v2729_v25, %v2498_v57  ;;  %v2751_v1 = vmax.f32 %v2750_v28, %v2499_v50  ;;  %1975 = vmatmul.bf16.gmra.mxu2 %v15357_v12  ;;  %2064 = vmatmul.bf16.gmra.mxu3 %v15357_v12 }
 0x2ca   : > { %v2508_v6 = vmax.f32 %v1839_v62, 0.0  ;;  %2153 = vmatmul.bf16.gmra.mxu0 %v15357_v12  ;;  %v1892_v5 = vpop.f32.mrf.mxu1 }
 0x2cb   : > { %v1893_v9 = vadd.f32 %v1892_v5, %v15500_v4 }
 0x2cc   : > { %v2773_v3 = vmax.f32 %v2772_v36, %v2508_v6  ;;  %v1660_v10 = vpop.f32.mrf.mxu2  ;;  %v1749_v11 = vpop.f32.mrf.mxu3 }
 0x2cd   : > { %v2397_v14 = vmax.f32 %v1893_v9, 0.0  ;;  %v1661_v15 = vadd.f32 %v1660_v10, %v15397_v60  ;;  %v1750_v16 = vadd.f32 %v1749_v11, %v15400_v61  ;;  %1931 = vmatmul.bf16.gmra.mxu1 %v15479_v7 }
 0x2cf   : > { %v2628_v17 = vmax.f32 %v2627_v56, %v2397_v14  ;;  %v2506_v20 = vmax.f32 %v1661_v15, 0.0  ;;  %v2507_v22 = vmax.f32 %v1750_v16, 0.0  ;;  %v1840_v52 = vpop.f32.mrf.mxu0 }
 0x2d0   : > { %v1841_v26 = vadd.f32 %v1840_v52, %v15391_v54 }
 0x2d1   : > { %v2731_v27 = vmax.f32 %v2730_v0, %v2506_v20  ;;  %v2752_v24 = vmax.f32 %v2751_v1, %v2507_v22  ;;  %v2611_v20 = vrot.slane %v15508_v21, 4 }
 0x2d2   : > { %v2516_v25 = vmax.f32 %v1841_v26, 0.0  ;;  %v1894_v28 = vpop.f32.mrf.mxu1 }
 0x2d3   : > { %v1895_v29 = vadd.f32 %v1894_v28, %v15500_v4 }
 0x2d4   : > { %v2774_v30 = vmax.f32 %v2773_v3, %v2516_v25  ;;  %v1662_v32 = vpop.f32.mrf.mxu2  ;;  %v1751_v33 = vpop.f32.mrf.mxu3 }
 0x2d5   : > { %v2405_v36 = vmax.f32 %v1895_v29, 0.0  ;;  %v1663_v37 = vadd.f32 %v1662_v32, %v15397_v60  ;;  %v1752_v41 = vadd.f32 %v1751_v33, %v15400_v61  ;;  %v2612_v33 = vmax.f32 %v15508_v21, %v2611_v20 }
 0x2d7   : > { %v2629_v42 = vmax.f32 %v2628_v17, %v2405_v36  ;;  %v2514_v43 = vmax.f32 %v1663_v37, 0.0  ;;  %v2515_v45 = vmax.f32 %v1752_v41, 0.0  ;;  %v1843_v46 = vpop.f32.mrf.mxu0  ;;  %v2569_v36 = vrot.slane %v15512_v38, 4 }
 0x2d8   : > { %v1844_v47 = vadd.f32 %v1843_v46, %v15391_v54  ;;  %v2613_v46 = vrot.slane %v2612_v33, 2 }
 0x2d9   : > { %v2732_v49 = vmax.f32 %v2731_v27, %v2514_v43  ;;  %v2753_v56 = vmax.f32 %v2752_v24, %v2515_v45  ;;  %1980 = vmatmul.bf16.gmra.mxu2 %v15367_v31  ;;  %2069 = vmatmul.bf16.gmra.mxu3 %v15367_v31 }
 0x2da   : > { %v2524_v57 = vmax.f32 %v1844_v47, 0.0  ;;  %2158 = vmatmul.bf16.gmra.mxu0 %v15367_v31  ;;  %v1897_v50 = vpop.f32.mrf.mxu1  ;;  %v2570_v47 = vmax.f32 %v15512_v38, %v2569_v36 }
 0x2db   : > { %v1898_v53 = vadd.f32 %v1897_v50, %v15500_v4 }
 0x2dc   : > { %v2775_v62 = vmax.f32 %v2774_v30, %v2524_v57  ;;  %v1665_v63 = vpop.f32.mrf.mxu2  ;;  %v1754_v35 = vpop.f32.mrf.mxu3 }
 0x2dd   : > { %v2413_v0 = vmax.f32 %v1898_v53, 0.0  ;;  %v1666_v1 = vadd.f32 %v1665_v63, %v15397_v60  ;;  %v1755_v2 = vadd.f32 %v1754_v35, %v15400_v61  ;;  %1936 = vmatmul.bf16.gmra.mxu1 %v15493_v55 }
 0x2df   : > { %v2630_v6 = vmax.f32 %v2629_v42, %v2413_v0  ;;  %v2522_v5 = vmax.f32 %v1666_v1, 0.0  ;;  %v2523_v9 = vmax.f32 %v1755_v2, 0.0  ;;  %v1845_v3 = vpop.f32.mrf.mxu0  ;;  %v2614_v0 = vmax.f32 %v2612_v33, %v2613_v46 }
 0x2e0   : > { %v1846_v10 = vadd.f32 %v1845_v3, %v15391_v54  ;;  %v2571_v1 = vrot.slane %v2570_v47, 2 }
 0x2e1   : > { %v2733_v11 = vmax.f32 %v2732_v49, %v2522_v5  ;;  %v2754_v14 = vmax.f32 %v2753_v56, %v2523_v9  ;;  %v2590_v49 = vrot.slane %v15514_v39, 4 }
 0x2e2   : > { %v2532_v15 = vmax.f32 %v1846_v10, 0.0  ;;  %v1899_v16 = vpop.f32.mrf.mxu1 }
 0x2e3   : > { %v1900_v17 = vadd.f32 %v1899_v16, %v15500_v4  ;;  %v2591_v2 = vmax.f32 %v15514_v39, %v2590_v49 }
 0x2e4   : > { %v2776_v22 = vmax.f32 %v2775_v62, %v2532_v15  ;;  %v1667_v52 = vpop.f32.mrf.mxu2  ;;  %v1756_v26 = vpop.f32.mrf.mxu3  ;;  %v2572_v15 = vmax.f32 %v2570_v47, %v2571_v1 }
 0x2e5   : > { %v2421_v27 = vmax.f32 %v1900_v17, 0.0  ;;  %v1668_v24 = vadd.f32 %v1667_v52, %v15397_v60  ;;  %v1757_v25 = vadd.f32 %v1756_v26, %v15400_v61 }
 0x2e6   : > { %v2573_v36 = vrot.slane %v2572_v15, 1 }
 0x2e7   : > { %v15601_v28 = vmax.f32 %v2630_v6, %v2421_v27  ;;  %v2530_v29 = vmax.f32 %v1668_v24, 0.0  ;;  %v2531_v30 = vmax.f32 %v1757_v25, 0.0  ;;  %v1848_v32 = vpop.f32.mrf.mxu0 }
 0x2e8   : > { %v1849_v37 = vadd.f32 %v1848_v32, %v15391_v54 }
 0x2e9   : > { %v2734_v41 = vmax.f32 %v2733_v11, %v2530_v29  ;;  %v2755_v42 = vmax.f32 %v2754_v14, %v2531_v30  ;;  %1985 = vmatmul.bf16.gmra.mxu2 %v15376_v18  ;;  %2074 = vmatmul.bf16.gmra.mxu3 %v15376_v18  ;;  %v2615_v14 = vrot.slane %v2614_v0, 1 }
 0x2ea   : > { %v2540_v43 = vmax.f32 %v1849_v37, 0.0  ;;  %2163 = vmatmul.bf16.gmra.mxu0 %v15376_v18  ;;  %v1902_v45 = vpop.f32.mrf.mxu1 }
 0x2eb   : > { %v1903_v6 = vadd.f32 %v1902_v45, %v15500_v4  ;;  %v2616_v30 = vmax.f32 %v2614_v0, %v2615_v14 }
 0x2ec   : > { %v2777_v21 = vmax.f32 %v2776_v22, %v2540_v43  ;;  %v1670_v56 = vpop.f32.mrf.mxu2  ;;  %v1759_v57 = vpop.f32.mrf.mxu3  ;;  %v15622_v43 = vld [vmem:[#allocation11] sm:$0xff] }
 0x2ed   : > { %v1671_v50 = vadd.f32 %v1670_v56, %v15397_v60  ;;  %v1760_v53 = vadd.f32 %v1759_v57, %v15400_v61  ;;  %2217 = vmatmul.bf16.vlgmr.msra.gmra.mxu1 %v15307_v44  ;;  %v2592_v44 = vrot.slane %v2591_v2, 2  ;;  %v2429_v22 = vmax.f32 %v1903_v6, 0.0 }
 0x2ee   : > { %v2892_v49 = vpack.c.bf16 %v2616_v30, %v2616_v30 }
 0x2ef   : > { %v2538_v62 = vmax.f32 %v1671_v50, 0.0  ;;  %v2539_v63 = vmax.f32 %v1760_v53, 0.0  ;;  %v1850_v35 = vpop.f32.mrf.mxu0  ;;  %v2593_v32 = vmax.f32 %v2591_v2, %v2592_v44  ;;  %v2574_v53 = vmax.f32 %v2572_v15, %v2573_v36 }
 0x2f0   : > { %v1851_v38 = vadd.f32 %v1850_v35, %v15391_v54  ;;  %v15632_v2 = vperm.slane %v15622_v43, 4  ;;  %v3190_v15 = vunpack.c.l.b16 %v2892_v49 }
 0x2f1   : > { %v2735_v5 = vmax.f32 %v2734_v41, %v2538_v62  ;;  %v2756_v9 = vmax.f32 %v2755_v42, %v2539_v63  ;;  %v2890_v44 = vpack.c.bf16 %v2574_v53, %v2574_v53 }
 0x2f2   : > { %v2548_v3 = vmax.f32 %v1851_v38, 0.0  ;;  %v1904_v10 = vpop.f32.mrf.mxu1 }
 0x2f3   : > { %v1905_v11 = vadd.f32 %v1904_v10, %v15500_v4 }
 0x2f4   : > { %v2778_v16 = vmax.f32 %v2777_v21, %v2548_v3  ;;  %v1672_v17 = vpop.f32.mrf.mxu2  ;;  %v1761_v20 = vpop.f32.mrf.mxu3  ;;  %v2594_v21 = vrot.slane %v2593_v32, 1 }
 0x2f5   : > { %v2437_v52 = vmax.f32 %v1905_v11, 0.0  ;;  %v1673_v39 = vadd.f32 %v1672_v17, %v15397_v60  ;;  %v1762_v54 = vadd.f32 %v1761_v20, %v15400_v61  ;;  %v15625_v60 = vperm.slane %v15622_v43, 6 }
 0x2f6   : > { %v2779_v26 = vrot.slane %v2778_v16, 4  ;;  %v2595_v3 = vmax.f32 %v2593_v32, %v2594_v21  ;;  %v15635_v11 = vperm.slane %v15622_v43, 5 }
 0x2f7   : > { %v2785_v27 = vmax.f32 %v2429_v22, %v2437_v52  ;;  %v2546_v24 = vmax.f32 %v1673_v39, 0.0  ;;  %v2547_v25 = vmax.f32 %v1762_v54, 0.0  ;;  %v2129_v29 = vpop.f32.mrf.mxu0 }
 0x2f8   : > { %v2780_v33 = vmax.f32 %v2778_v16, %v2779_v26  ;;  %v2130_v1 = vadd.f32 %v2129_v29, %v15625_v60 }
 0x2f9   : > { %v2736_v37 = vmax.f32 %v2735_v5, %v2546_v24  ;;  %v2757_v41 = vmax.f32 %v2756_v9, %v2547_v25  ;;  %1990 = vmatmul.bf16.gmra.mxu2 %v15384_v51  ;;  %2079 = vmatmul.bf16.gmra.mxu3 %v15384_v51  ;;  %v2891_v24 = vpack.c.bf16 %v2595_v3, %v2595_v3 }
 0x2fa   : > { %v2781_v42 = vrot.slane %v2780_v33, 2  ;;  %2168 = vmatmul.bf16.gmra.mxu0 %v15384_v51  ;;  %v1907_v61 = vpop.f32.mrf.mxu1  ;;  %v2304_v20 = vmax.f32 %v2130_v1, 0.0 }
 0x2fb   : > { %v2737_v45 = vrot.slane %v2736_v37, 4  ;;  %v2758_v46 = vrot.slane %v2757_v41, 4  ;;  %v1908_v47 = vadd.f32 %v1907_v61, %v15500_v4 }
 0x2fc   : > { %v2782_v56 = vmax.f32 %v2780_v33, %v2781_v42  ;;  %v1951_v57 = vpop.f32.mrf.mxu2  ;;  %v2040_v50 = vpop.f32.mrf.mxu3 }
 0x2fd   : > { %v2738_v62 = vmax.f32 %v2736_v37, %v2737_v45  ;;  %v2759_v63 = vmax.f32 %v2757_v41, %v2758_v46  ;;  %v2445_v35 = vmax.f32 %v1908_v47, 0.0  ;;  %2222 = vmatmul.bf16.gmra.mxu1 %v15317_v58  ;;  %v1952_v22 = vadd.f32 %v1951_v57, %v15632_v2 }
 0x2fe   : > { %v2783_v0 = vrot.slane %v2782_v56, 1  ;;  %v2041_v29 = vadd.f32 %v2040_v50, %v15635_v11  ;;  %v3188_v50 = vunpack.c.l.b16 %v2890_v44 }
 0x2ff   : > { %v2739_v38 = vrot.slane %v2738_v62, 2  ;;  %v2760_v6 = vrot.slane %v2759_v63, 2  ;;  %v2786_v5 = vmax.f32 %v2785_v27, %v2445_v35  ;;  %v2131_v9 = vpop.f32.mrf.mxu0  ;;  %v2302_v61 = vmax.f32 %v1952_v22, 0.0 }
 0x300   : > { %v2784_v10 = vmax.f32 %v2782_v56, %v2783_v0  ;;  %v2132_v14 = vadd.f32 %v2131_v9, %v15625_v60  ;;  %v2303_v53 = vmax.f32 %v2041_v29, 0.0  ;;  %v3189_v35 = vunpack.c.l.b16 %v2891_v24 }
 0x301   : > { %v2740_v58 = vmax.f32 %v2738_v62, %v2739_v38  ;;  %v2761_v16 = vmax.f32 %v2759_v63, %v2760_v6 }
 0x302   : > { %v2900_v17 = vpack.c.bf16 %v2784_v10, %v2784_v10  ;;  %v2312_v52 = vmax.f32 %v2132_v14, 0.0  ;;  %v1909_v39 = vpop.f32.mrf.mxu1 }
 0x303   : > { %v2741_v54 = vrot.slane %v2740_v58, 1  ;;  %v2762_v26 = vrot.slane %v2761_v16, 1  ;;  %v1910_v27 = vadd.f32 %v1909_v39, %v15500_v4 }
 0x304   : > { %v3198_v25 = vunpack.c.l.b16 %v2900_v17  ;;  %v2680_v30 = vmax.f32 %v2304_v20, %v2312_v52  ;;  %v1953_v32 = vpop.f32.mrf.mxu2  ;;  %v2042_v33 = vpop.f32.mrf.mxu3 }
 0x305   : > { %v2742_v36 = vmax.f32 %v2740_v58, %v2741_v54  ;;  %v2763_v37 = vmax.f32 %v2761_v16, %v2762_v26  ;;  %v2453_v41 = vmax.f32 %v1910_v27, 0.0  ;;  %v1954_v42 = vadd.f32 %v1953_v32, %v15632_v2 }
 0x306   : > { %v2043_v45 = vadd.f32 %v2042_v33, %v15635_v11  ;;  %v15644_v46 = vsel %vm3204_vm1, %v3198_v25, %v3190_v15 }
 0x307   : > { %v2898_v47 = vpack.c.bf16 %v2742_v36, %v2742_v36  ;;  %v2899_v49 = vpack.c.bf16 %v2763_v37, %v2763_v37  ;;  %v2787_v21 = vmax.f32 %v2786_v5, %v2453_v41  ;;  %v2310_v56 = vmax.f32 %v1954_v42, 0.0  ;;  %v2134_v57 = vpop.f32.mrf.mxu0 }
 0x308   : > { %v2311_v62 = vmax.f32 %v2043_v45, 0.0  ;;  %v2135_v63 = vadd.f32 %v2134_v57, %v15625_v60 }
 0x309   : > { %v3196_v0 = vunpack.c.l.b16 %v2898_v47  ;;  %v3197_v1 = vunpack.c.l.b16 %v2899_v49  ;;  %v2638_v38 = vmax.f32 %v2302_v61, %v2310_v56  ;;  %1995 = vmatmul.bf16.gmra.mxu2 %v15409_v19  ;;  %2084 = vmatmul.bf16.gmra.mxu3 %v15409_v19 }
 0x30a   : > { %v2659_v6 = vmax.f32 %v2303_v53, %v2311_v62  ;;  %v2320_v9 = vmax.f32 %v2135_v63, 0.0  ;;  %2173 = vmatmul.bf16.gmra.mxu0 %v15409_v19  ;;  %v1912_v5 = vpop.f32.mrf.mxu1 }
 0x30b   : > { %v1913_v3 = vadd.f32 %v1912_v5, %v15500_v4  ;;  %v15652_v10 = vsel %vm3204_vm1, %v3196_v0, %v3188_v50  ;;  %v15655_v14 = vsel %vm3204_vm1, %v3197_v1, %v3189_v35 }
 0x30c   : > { %v2681_v15 = vmax.f32 %v2680_v30, %v2320_v9  ;;  %v1956_v44 = vpop.f32.mrf.mxu2  ;;  %v2045_v58 = vpop.f32.mrf.mxu3 }
 0x30d   : > { %v2461_v16 = vmax.f32 %v1913_v3, 0.0  ;;  %v1957_v17 = vadd.f32 %v1956_v44, %v15632_v2  ;;  %v2046_v20 = vadd.f32 %v2045_v58, %v15635_v11  ;;  %2227 = vmatmul.bf16.gmra.mxu1 %v15327_v8 }
 0x30f   : > { %v2788_v22 = vmax.f32 %v2787_v21, %v2461_v16  ;;  %v2318_v52 = vmax.f32 %v1957_v17, 0.0  ;;  %v2319_v39 = vmax.f32 %v2046_v20, 0.0  ;;  %v2136_v54 = vpop.f32.mrf.mxu0 }
 0x310   : > { %v2137_v26 = vadd.f32 %v2136_v54, %v15625_v60 }
 0x311   : > { %v2639_v27 = vmax.f32 %v2638_v38, %v2318_v52  ;;  %v2660_v24 = vmax.f32 %v2659_v6, %v2319_v39 }
 0x312   : > { %v2328_v25 = vmax.f32 %v2137_v26, 0.0  ;;  %v1914_v29 = vpop.f32.mrf.mxu1 }
 0x313   : > { %v1915_v30 = vadd.f32 %v1914_v29, %v15500_v4 }
 0x314   : > { %v2682_v32 = vmax.f32 %v2681_v15, %v2328_v25  ;;  %v1958_v33 = vpop.f32.mrf.mxu2  ;;  %v2047_v36 = vpop.f32.mrf.mxu3 }
 0x315   : > { %v2469_v37 = vmax.f32 %v1915_v30, 0.0  ;;  %v1959_v41 = vadd.f32 %v1958_v33, %v15632_v2  ;;  %v2048_v8 = vadd.f32 %v2047_v36, %v15635_v11  ;;  %v10228_v33 = vld [vmem:[#allocation13 + $0xe0] sm:$0xf]  ;;  %v13565_v36 = vld [vmem:[#allocation13 + $0xec] sm:$0xf0] }
 0x317   : > { %v2789_v42 = vmax.f32 %v2788_v22, %v2469_v37  ;;  %v2326_v61 = vmax.f32 %v1959_v41, 0.0  ;;  %v2327_v45 = vmax.f32 %v2048_v8, 0.0  ;;  %v2139_v47 = vpop.f32.mrf.mxu0  ;;  %v10356_v37 = vld [vmem:[#allocation13 + $0x1e0] sm:$0xf] }
 0x318   : > { %v2140_v49 = vadd.f32 %v2139_v47, %v15625_v60 }
 0x319   : > { %v2640_v21 = vmax.f32 %v2639_v27, %v2326_v61  ;;  %v2661_v56 = vmax.f32 %v2660_v24, %v2327_v45  ;;  %2000 = vmatmul.bf16.gmra.mxu2 %v15423_v59  ;;  %2089 = vmatmul.bf16.gmra.mxu3 %v15423_v59  ;;  %v10229_v61 = vor.u32 %v13565_v36, %v10228_v33  ;;  %v13597_v45 = vld [vmem:[#allocation13 + $0x1ec] sm:$0xf0] }
 0x31a   : > { %v2336_v57 = vmax.f32 %v2140_v49, 0.0  ;;  %2178 = vmatmul.bf16.gmra.mxu0 %v15423_v59  ;;  %v1917_v50 = vpop.f32.mrf.mxu1 }
 0x31b   : > { %v1918_v53 = vadd.f32 %v1917_v50, %v15500_v4  ;;  %4509 = vmatpush.bf16.msra.mxu2 %v10229_v61 }
 0x31c   : > { %v2683_v62 = vmax.f32 %v2682_v32, %v2336_v57  ;;  %v1961_v63 = vpop.f32.mrf.mxu2  ;;  %v2050_v35 = vpop.f32.mrf.mxu3 }
 0x31d   : > { %v2477_v0 = vmax.f32 %v1918_v53, 0.0  ;;  %v1962_v1 = vadd.f32 %v1961_v63, %v15632_v2  ;;  %v2051_v38 = vadd.f32 %v2050_v35, %v15635_v11  ;;  %2232 = vmatmul.bf16.gmra.mxu1 %v15337_v23  ;;  %v10212_v53 = vld [vmem:[#allocation13 + $0xc0] sm:$0xf] }
 0x31f   : > { %v15672_v6 = vmax.f32 %v2789_v42, %v2477_v0  ;;  %v2334_v9 = vmax.f32 %v1962_v1, 0.0  ;;  %v2335_v5 = vmax.f32 %v2051_v38, 0.0  ;;  %v2141_v3 = vpop.f32.mrf.mxu0  ;;  %v10340_v0 = vld [vmem:[#allocation13 + $0x1c0] sm:$0xf]  ;;  %v13593_v1 = vld [vmem:[#allocation13 + $0x1cc] sm:$0xf0] }
 0x320   : > { %v2142_v15 = vadd.f32 %v2141_v3, %v15625_v60 }
 0x321   : > { %v2641_v44 = vmax.f32 %v2640_v21, %v2334_v9  ;;  %v2662_v58 = vmax.f32 %v2661_v56, %v2335_v5  ;;  %v10357_v21 = vor.u32 %v13597_v45, %v10356_v37  ;;  %v10341_v5 = vor.u32 %v13593_v1, %v10340_v0  ;;  %v10308_v37 = vld [vmem:[#allocation13 + $0x180] sm:$0xf]  ;;  %v13581_v1 = vld [vmem:[#allocation13 + $0x16c] sm:$0xf0] }
 0x322   : > { %v2344_v16 = vmax.f32 %v2142_v15, 0.0  ;;  %v15675_v17 = vpop.f32.mrf.mxu1 }
 0x323   : > { %4522 = vmatpush.bf16.msra.mxu3 %v10357_v21 }
 0x324   : > { %v2684_v20 = vmax.f32 %v2683_v62, %v2344_v16  ;;  %v1963_v22 = vpop.f32.mrf.mxu2  ;;  %v2052_v52 = vpop.f32.mrf.mxu3  ;;  %v13561_v62 = vld [vmem:[#allocation13 + $0xcc] sm:$0xf0] }
 0x325   : > { %v1964_v39 = vadd.f32 %v1963_v22, %v15632_v2  ;;  %v2053_v54 = vadd.f32 %v2052_v52, %v15635_v11  ;;  %v10213_v35 = vor.u32 %v13561_v62, %v10212_v53  ;;  %v10292_v53 = vld [vmem:[#allocation13 + $0x160] sm:$0xf] }
 0x327   : > { %v2342_v23 = vmax.f32 %v1964_v39, 0.0  ;;  %v2343_v26 = vmax.f32 %v2053_v54, 0.0  ;;  %v2144_v27 = vpop.f32.mrf.mxu0  ;;  %4510 = vmatpush.bf16.msra.mxu2 %v10213_v35  ;;  %4523 = vmatpush.bf16.msra.mxu3 %v10341_v5  ;;  %v13589_v39 = vld [vmem:[#allocation13 + $0x1ac] sm:$0xf0] }
 0x328   : > { %v2145_v24 = vadd.f32 %v2144_v27, %v15625_v60 }
 0x329   : > { %v2642_v25 = vmax.f32 %v2641_v44, %v2342_v23  ;;  %v2663_v29 = vmax.f32 %v2662_v58, %v2343_v26  ;;  %2005 = vmatmul.bf16.gmra.mxu2 %v15437_v34  ;;  %2094 = vmatmul.bf16.gmra.mxu3 %v15437_v34  ;;  %v13557_v44 = vld [vmem:[#allocation13 + $0xac] sm:$0xf0]  ;;  %v10324_v58 = vld [vmem:[#allocation13 + $0x1a0] sm:$0xf] }
 0x32a   : > { %v2352_v30 = vmax.f32 %v2145_v24, 0.0  ;;  %2183 = vmatmul.bf16.gmra.mxu0 %v15437_v34  ;;  %v15683_v32 = vpop.f32.mrf.mxu1  ;;  %v10325_v26 = vor.u32 %v13589_v39, %v10324_v58 }
 0x32c   : > { %v2685_v41 = vmax.f32 %v2684_v20, %v2352_v30  ;;  %v1966_v8 = vpop.f32.mrf.mxu2  ;;  %v2055_v42 = vpop.f32.mrf.mxu3  ;;  %4524 = vmatpush.bf16.msra.mxu3 %v10325_v26  ;;  %v13553_v30 = vld [vmem:[#allocation13 + $0x8c] sm:$0xf0] }
 0x32d   : > { %v1967_v47 = vadd.f32 %v1966_v8, %v15632_v2  ;;  %v2056_v49 = vadd.f32 %v2055_v42, %v15635_v11  ;;  %2237 = vmatmul.bf16.gmra.mxu1 %v15347_v48  ;;  %v10196_v48 = vld [vmem:[#allocation13 + $0xa0] sm:$0xf]  ;;  %v10236_v8 = vld [vmem:[#allocation13 + $0xe8] sm:$0xf]  ;;  %v13577_v26 = vld [vmem:[#allocation13 + $0x14c] sm:$0xf0] }
 0x32e   : > { %v10197_v52 = vor.u32 %v13557_v44, %v10196_v48  ;;  %v10293_v48 = vor.u32 %v13581_v1, %v10292_v53 }
 0x32f   : > { %v2350_v56 = vmax.f32 %v1967_v47, 0.0  ;;  %v2351_v57 = vmax.f32 %v2056_v49, 0.0  ;;  %v2146_v50 = vpop.f32.mrf.mxu0  ;;  %v13566_v47 = vld [vmem:[#allocation13 + $0xf4] sm:$0xf0] }
 0x330   : > { %v2147_v63 = vadd.f32 %v2146_v50, %v15625_v60  ;;  %4511 = vmatpush.bf16.msra.mxu2 %v10197_v52  ;;  %v13549_v50 = vld [vmem:[#allocation13 + $0x6c] sm:$0xf0] }
 0x331   : > { %v2643_v38 = vmax.f32 %v2642_v25, %v2350_v56  ;;  %v2664_v9 = vmax.f32 %v2663_v29, %v2351_v57  ;;  %v10180_v29 = vld [vmem:[#allocation13 + $0x80] sm:$0xf]  ;;  %v10237_v56 = vor.u32 %v13566_v47, %v10236_v8  ;;  %v13545_v52 = vld [vmem:[#allocation13 + $0x4c] sm:$0xf0] }
 0x332   : > { %v2360_v3 = vmax.f32 %v2147_v63, 0.0  ;;  %v15689_v15 = vpop.f32.mrf.mxu1  ;;  %v10181_v36 = vor.u32 %v13553_v30, %v10180_v29  ;;  %v10164_v57 = vld [vmem:[#allocation13 + $0x60] sm:$0xf] }
 0x333   : > { %4717 = vmatpush.bf16.msrb.mxu0 %v10237_v56  ;;  %v10165_v0 = vor.u32 %v13549_v50, %v10164_v57  ;;  %v10260_v8 = vld [vmem:[#allocation13 + $0x120] sm:$0xf]  ;;  %v13573_v57 = vld [vmem:[#allocation13 + $0x12c] sm:$0xf0]  ;;  %v10188_v50 = vld [vmem:[#allocation13 + $0x88] sm:$0xf] }
 0x334   : > { %v2686_v16 = vmax.f32 %v2685_v41, %v2360_v3  ;;  %v1968_v20 = vpop.f32.mrf.mxu2  ;;  %v2057_v22 = vpop.f32.mrf.mxu3  ;;  %v13585_v41 = vld [vmem:[#allocation13 + $0x18c] sm:$0xf0]  ;;  %4512 = vmatpush.bf16.msra.mxu2 %v10181_v36 }
 0x335   : > { %v1969_v54 = vadd.f32 %v1968_v20, %v15632_v2  ;;  %v2058_v23 = vadd.f32 %v2057_v22, %v15635_v11  ;;  %v10309_v45 = vor.u32 %v13585_v41, %v10308_v37  ;;  %v10132_v37 = vld [vmem:[#allocation13 + $0x20] sm:$0xf]  ;;  %v13541_v41 = vld [vmem:[#allocation13 + $0x2c] sm:$0xf0] }
 0x336   : > { %v10133_v56 = vor.u32 %v13541_v41, %v10132_v37 }
 0x337   : > { %v2358_v27 = vmax.f32 %v1969_v54, 0.0  ;;  %v2359_v24 = vmax.f32 %v2058_v23, 0.0  ;;  %v2149_v25 = vpop.f32.mrf.mxu0  ;;  %4525 = vmatpush.bf16.msra.mxu3 %v10309_v45  ;;  %v10276_v23 = vld [vmem:[#allocation13 + $0x140] sm:$0xf] }
 0x338   : > { %v2150_v33 = vadd.f32 %v2149_v25, %v15625_v60  ;;  %4513 = vmatpush.bf16.msra.mxu2 %v10165_v0  ;;  %v10277_v29 = vor.u32 %v13577_v26, %v10276_v23  ;;  %v13661_v23 = vld [vmem:[#allocation13 + $0x3ec] sm:$0xf0] }
 0x339   : > { %v2644_v42 = vmax.f32 %v2643_v38, %v2358_v27  ;;  %v2665_v61 = vmax.f32 %v2664_v9, %v2359_v24  ;;  %2010 = vmatmul.bf16.gmra.mxu2 %v15451_v13  ;;  %2099 = vmatmul.bf16.gmra.mxu3 %v15451_v13  ;;  %v10220_v38 = vld [vmem:[#allocation13 + $0xc8] sm:$0xf]  ;;  %v13562_v9 = vld [vmem:[#allocation13 + $0xd4] sm:$0xf0] }
 0x33a   : > { %v2368_v49 = vmax.f32 %v2150_v33, 0.0  ;;  %2188 = vmatmul.bf16.gmra.mxu0 %v15451_v13  ;;  %v15697_v21 = vpop.f32.mrf.mxu1  ;;  %v10221_v44 = vor.u32 %v13562_v9, %v10220_v38  ;;  %v10204_v27 = vld [vmem:[#allocation13 + $0xa8] sm:$0xf]  ;;  %v10116_v9 = vld [vmem:[#allocation13] sm:$0xf] }
 0x33b   : > { %4526 = vmatpush.bf16.msra.mxu3 %v10293_v48 }
 0x33c   : > { %v2687_v62 = vmax.f32 %v2686_v16, %v2368_v49  ;;  %v1971_v63 = vpop.f32.mrf.mxu2  ;;  %v2060_v35 = vpop.f32.mrf.mxu3  ;;  %v10148_v16 = vld [vmem:[#allocation13 + $0x40] sm:$0xf]  ;;  %4718 = vmatpush.bf16.msrb.mxu0 %v10221_v44 }
 0x33d   : > { %v1972_v5 = vadd.f32 %v1971_v63, %v15632_v2  ;;  %v2061_v3 = vadd.f32 %v2060_v35, %v15635_v11  ;;  %2242 = vmatmul.bf16.gmra.mxu1 %v15357_v12  ;;  %v10149_v54 = vor.u32 %v13545_v52, %v10148_v16  ;;  %v13558_v12 = vld [vmem:[#allocation13 + $0xb4] sm:$0xf0]  ;;  %v10261_v63 = vor.u32 %v13573_v57, %v10260_v8  ;;  %v10244_v44 = vld [vmem:[#allocation13 + $0x100] sm:$0xf] }
 0x33e   : > { %v10205_v36 = vor.u32 %v13558_v12, %v10204_v27  ;;  %v13550_v12 = vld [vmem:[#allocation13 + $0x74] sm:$0xf0]  ;;  %v10468_v8 = vld [vmem:[#allocation13 + $0x2c0] sm:$0xf] }
 0x33f   : > { %v2366_v58 = vmax.f32 %v1972_v5, 0.0  ;;  %v2367_v20 = vmax.f32 %v2061_v3, 0.0  ;;  %v2151_v22 = vpop.f32.mrf.mxu0  ;;  %4514 = vmatpush.bf16.msra.mxu2 %v10149_v54  ;;  %4527 = vmatpush.bf16.msra.mxu3 %v10277_v29  ;;  %v15709_v5 = vadd.f32 %v15675_v17, %v15500_v4  ;;  %v10612_v54 = vld [vmem:[#allocation13 + $0x3e0] sm:$0xf]  ;;  %v1923_v17 = vadd.f32 %v15683_v32, %v15500_v4  ;;  %v13625_v32 = vld [vmem:[#allocation13 + $0x2cc] sm:$0xf0] }
 0x340   : > { %v2152_v39 = vadd.f32 %v2151_v22, %v15625_v60  ;;  %4719 = vmatpush.bf16.msrb.mxu0 %v10205_v36  ;;  %v10469_v57 = vor.u32 %v13625_v32, %v10468_v8  ;;  %v13649_v8 = vld [vmem:[#allocation13 + $0x38c] sm:$0xf0]  ;;  %v10124_v32 = vld [vmem:[#allocation13 + $0x8] sm:$0xf] }
 0x341   : > { %v2645_v24 = vmax.f32 %v2644_v42, %v2366_v58  ;;  %v2666_v25 = vmax.f32 %v2665_v61, %v2367_v20  ;;  %v13554_v42 = vld [vmem:[#allocation13 + $0x94] sm:$0xf0]  ;;  %v13569_v58 = vld [vmem:[#allocation13 + $0x10c] sm:$0xf0]  ;;  %v10484_v20 = vld [vmem:[#allocation13 + $0x2e0] sm:$0xf] }
 0x342   : > { %v2376_v30 = vmax.f32 %v2152_v39, 0.0  ;;  %v15703_v33 = vpop.f32.mrf.mxu1  ;;  %v10189_v35 = vor.u32 %v13554_v42, %v10188_v50  ;;  %v10245_v52 = vor.u32 %v13569_v58, %v10244_v44  ;;  %v13629_v39 = vld [vmem:[#allocation13 + $0x2ec] sm:$0xf0]  ;;  %v10156_v42 = vld [vmem:[#allocation13 + $0x48] sm:$0xf] }
 0x343   : > { %4515 = vmatpush.bf16.msra.mxu2 %v10133_v56  ;;  %4528 = vmatpush.bf16.msra.mxu3 %v10261_v63  ;;  %v10485_v29 = vor.u32 %v13629_v39, %v10484_v20  ;;  %v13657_v50 = vld [vmem:[#allocation13 + $0x3cc] sm:$0xf0]  ;;  %v13546_v63 = vld [vmem:[#allocation13 + $0x54] sm:$0xf0]  ;;  %v10140_v20 = vld [vmem:[#allocation13 + $0x28] sm:$0xf]  ;;  %v1928_v39 = vadd.f32 %v15697_v21, %v15500_v4 }
 0x344   : > { %v2688_v45 = vmax.f32 %v2687_v62, %v2376_v30  ;;  %v1973_v47 = vpop.f32.mrf.mxu2  ;;  %v2062_v49 = vpop.f32.mrf.mxu3  ;;  %v13537_v62 = vld [vmem:[#allocation13 + $0xc] sm:$0xf0]  ;;  %4720 = vmatpush.bf16.msrb.mxu0 %v10189_v35  ;;  %v1925_v35 = vadd.f32 %v15689_v15, %v15500_v4 }
 0x345   : > { %v1974_v61 = vadd.f32 %v1973_v47, %v15632_v2  ;;  %v2063_v53 = vadd.f32 %v2062_v49, %v15635_v11  ;;  %v10117_v48 = vor.u32 %v13537_v62, %v10116_v9  ;;  %v10596_v47 = vld [vmem:[#allocation13 + $0x3c0] sm:$0xf]  ;;  %v10157_v9 = vor.u32 %v13546_v63, %v10156_v42 }
 0x346   : > { %v10452_v62 = vld [vmem:[#allocation13 + $0x2a0] sm:$0xf] }
 0x347   : > { %v2374_v0 = vmax.f32 %v1974_v61, 0.0  ;;  %v2375_v1 = vmax.f32 %v2063_v53, 0.0  ;;  %v2154_v38 = vpop.f32.mrf.mxu0  ;;  %4516 = vmatpush.bf16.msra.mxu2 %v10117_v48  ;;  %4529 = vmatpush.bf16.msra.mxu3 %v10245_v52  ;;  %v2493_v61 = vmax.f32 %v1923_v17, 0.0  ;;  %v10597_v53 = vor.u32 %v13657_v50, %v10596_v47  ;;  %v13542_v52 = vld [vmem:[#allocation13 + $0x34] sm:$0xf0] }
 0x348   : > { %v2155_v3 = vadd.f32 %v2154_v38, %v15625_v60  ;;  %v10141_v17 = vor.u32 %v13542_v52, %v10140_v20  ;;  %v2509_v47 = vmax.f32 %v1928_v39, 0.0 }
 0x349   : > { %v2646_v22 = vmax.f32 %v2645_v24, %v2374_v0  ;;  %v2667_v16 = vmax.f32 %v2666_v25, %v2375_v1  ;;  %2015 = vmatmul.bf16.gmra.mxu2 %v15465_v40  ;;  %2104 = vmatmul.bf16.gmra.mxu3 %v15465_v40  ;;  %v10613_v24 = vor.u32 %v13661_v23, %v10612_v54  ;;  %v10172_v25 = vld [vmem:[#allocation13 + $0x68] sm:$0xf] }
 0x34a   : > { %v2384_v26 = vmax.f32 %v2155_v3, 0.0  ;;  %2193 = vmatmul.bf16.gmra.mxu0 %v15465_v40  ;;  %v15717_v27 = vpop.f32.mrf.mxu1  ;;  %v10173_v30 = vor.u32 %v13550_v12, %v10172_v25  ;;  %v10580_v3 = vld [vmem:[#allocation13 + $0x3a0] sm:$0xf] }
 0x34b   : > { %4535 = vmatpush.bf16.msrb.mxu2 %v10485_v29  ;;  %4548 = vmatpush.bf16.msrb.mxu3 %v10613_v24  ;;  %v2501_v29 = vmax.f32 %v1925_v35, 0.0  ;;  %v10564_v12 = vld [vmem:[#allocation13 + $0x380] sm:$0xf]  ;;  %v1933_v50 = vadd.f32 %v15717_v27, %v15500_v4 }
 0x34c   : > { %v15719_v36 = vmax.f32 %v2688_v45, %v2384_v26  ;;  %v1976_v37 = vpop.f32.mrf.mxu2  ;;  %v2065_v41 = vpop.f32.mrf.mxu3  ;;  %4721 = vmatpush.bf16.msrb.mxu0 %v10173_v30  ;;  %v2485_v45 = vmax.f32 %v15709_v5, 0.0  ;;  %v13653_v5 = vld [vmem:[#allocation13 + $0x3ac] sm:$0xf0] }
 0x34d   : > { %v1977_v49 = vadd.f32 %v1976_v37, %v15632_v2  ;;  %v2066_v56 = vadd.f32 %v2065_v41, %v15635_v11  ;;  %2247 = vmatmul.bf16.gmra.mxu1 %v15367_v31  ;;  %v13621_v31 = vld [vmem:[#allocation13 + $0x2ac] sm:$0xf0]  ;;  %v10581_v23 = vor.u32 %v13653_v5, %v10580_v3  ;;  %v2525_v39 = vmax.f32 %v1933_v50, 0.0 }
 0x34e   : > { %v10453_v58 = vor.u32 %v13621_v31, %v10452_v62  ;;  %v2791_v26 = vmax.f32 %v15672_v6, %v2485_v45  ;;  %v1930_v6 = vadd.f32 %v15703_v33, %v15500_v4  ;;  %v2632_v33 = vrot.slane %v15601_v28, 4  ;;  %v13645_v31 = vld [vmem:[#allocation13 + $0x36c] sm:$0xf0] }
 0x34f   : > { %v2382_v0 = vmax.f32 %v1977_v49, 0.0  ;;  %v2383_v1 = vmax.f32 %v2066_v56, 0.0  ;;  %v2156_v38 = vpop.f32.mrf.mxu0  ;;  %4536 = vmatpush.bf16.msrb.mxu2 %v10469_v57  ;;  %4549 = vmatpush.bf16.msrb.mxu3 %v10597_v53  ;;  %v10565_v56 = vor.u32 %v13649_v8, %v10564_v12  ;;  %v13538_v57 = vld [vmem:[#allocation13 + $0x14] sm:$0xf0] }
 0x350   : > { %4722 = vmatpush.bf16.msrb.mxu0 %v10157_v9  ;;  %v2157_v15 = vadd.f32 %v2156_v38, %v15625_v60  ;;  %v2792_v30 = vmax.f32 %v2791_v26, %v2493_v61  ;;  %v10125_v53 = vor.u32 %v13538_v57, %v10124_v32  ;;  %v10548_v38 = vld [vmem:[#allocation13 + $0x360] sm:$0xf]  ;;  %v2517_v3 = vmax.f32 %v1930_v6, 0.0 }
 0x351   : > { %v2647_v48 = vmax.f32 %v2646_v22, %v2382_v0  ;;  %v2668_v44 = vmax.f32 %v2667_v16, %v2383_v1  ;;  %v10436_v22 = vld [vmem:[#allocation13 + $0x280] sm:$0xf]  ;;  %v13617_v16 = vld [vmem:[#allocation13 + $0x28c] sm:$0xf0]  ;;  %v10549_v52 = vor.u32 %v13645_v31, %v10548_v38  ;;  %v2633_v12 = vmax.f32 %v15601_v28, %v2632_v33 }
 0x352   : > { %v1934_v54 = vpop.f32.mrf.mxu1  ;;  %v10437_v41 = vor.u32 %v13617_v16, %v10436_v22  ;;  %v2392_v49 = vmax.f32 %v2157_v15, 0.0  ;;  %v2793_v63 = vmax.f32 %v2792_v30, %v2501_v29  ;;  %v10420_v0 = vld [vmem:[#allocation13 + $0x260] sm:$0xf]  ;;  %v13613_v1 = vld [vmem:[#allocation13 + $0x26c] sm:$0xf0] }
 0x353   : > { %4537 = vmatpush.bf16.msrb.mxu2 %v10453_v58  ;;  %4550 = vmatpush.bf16.msrb.mxu3 %v10581_v23  ;;  %v10421_v27 = vor.u32 %v13613_v1, %v10420_v0  ;;  %v1935_v15 = vadd.f32 %v1934_v54, %v15500_v4  ;;  %v10404_v26 = vld [vmem:[#allocation13 + $0x240] sm:$0xf]  ;;  %v13609_v29 = vld [vmem:[#allocation13 + $0x24c] sm:$0xf0] }
 0x354   : > { %v1978_v24 = vpop.f32.mrf.mxu2  ;;  %v2067_v25 = vpop.f32.mrf.mxu3  ;;  %4723 = vmatpush.bf16.msrb.mxu0 %v10141_v17  ;;  %v2690_v58 = vmax.f32 %v15719_v36, %v2392_v49  ;;  %v10405_v54 = vor.u32 %v13609_v29, %v10404_v26  ;;  %v13641_v16 = vld [vmem:[#allocation13 + $0x34c] sm:$0xf0]  ;;  %v10388_v6 = vld [vmem:[#allocation13 + $0x220] sm:$0xf] }
 0x355   : > { %v1979_v37 = vadd.f32 %v1978_v24, %v15632_v2  ;;  %v2068_v21 = vadd.f32 %v2067_v25, %v15635_v11  ;;  %v10532_v24 = vld [vmem:[#allocation13 + $0x340] sm:$0xf]  ;;  %v13605_v49 = vld [vmem:[#allocation13 + $0x22c] sm:$0xf0] }
 0x356   : > { %v10372_v33 = vld [vmem:[#allocation13 + $0x200] sm:$0xf] }
 0x357   : > { %v2390_v42 = vmax.f32 %v1979_v37, 0.0  ;;  %v2391_v45 = vmax.f32 %v2068_v21, 0.0  ;;  %v2159_v61 = vpop.f32.mrf.mxu0  ;;  %4538 = vmatpush.bf16.msrb.mxu2 %v10437_v41  ;;  %4551 = vmatpush.bf16.msrb.mxu3 %v10565_v56  ;;  %v10533_v37 = vor.u32 %v13641_v16, %v10532_v24  ;;  %v2533_v21 = vmax.f32 %v1935_v15, 0.0  ;;  %v10516_v56 = vld [vmem:[#allocation13 + $0x320] sm:$0xf] }
 0x358   : > { %v2160_v35 = vadd.f32 %v2159_v61, %v15625_v60  ;;  %4724 = vmatpush.bf16.msrb.mxu0 %v10125_v53  ;;  %v2634_v61 = vrot.slane %v2633_v12, 2  ;;  %v10500_v31 = vld [vmem:[#allocation13 + $0x300] sm:$0xf] }
 0x359   : > { %v2648_v9 = vmax.f32 %v2647_v48, %v2390_v42  ;;  %v2669_v62 = vmax.f32 %v2668_v44, %v2391_v45  ;;  %2020 = vmatmul.bf16.gmra.mxu2 %v15479_v7  ;;  %2109 = vmatmul.bf16.gmra.mxu3 %v15479_v7  ;;  %v2794_v48 = vmax.f32 %v2793_v63, %v2509_v47  ;;  %v13637_v45 = vld [vmem:[#allocation13 + $0x32c] sm:$0xf0] }
 0x35a   : > { %v2400_v5 = vmax.f32 %v2160_v35, 0.0  ;;  %2198 = vmatmul.bf16.gmra.mxu0 %v15479_v7  ;;  %v1937_v20 = vpop.f32.mrf.mxu1  ;;  %v10517_v63 = vor.u32 %v13637_v45, %v10516_v56 }
 0x35b   : > { %4539 = vmatpush.bf16.msrb.mxu2 %v10421_v27  ;;  %4552 = vmatpush.bf16.msrb.mxu3 %v10549_v52  ;;  %v1938_v36 = vadd.f32 %v1937_v20, %v15500_v4  ;;  %v2795_v30 = vmax.f32 %v2794_v48, %v2517_v3  ;;  %v13601_v27 = vld [vmem:[#allocation13 + $0x20c] sm:$0xf0] }
 0x35c   : > { %v15744_v44 = vmax.f32 %v2690_v58, %v2400_v5  ;;  %v1981_v23 = vpop.f32.mrf.mxu2  ;;  %v2070_v17 = vpop.f32.mrf.mxu3  ;;  %v13633_v58 = vld [vmem:[#allocation13 + $0x30c] sm:$0xf0]  ;;  %v2635_v5 = vmax.f32 %v2633_v12, %v2634_v61 }
 0x35d   : > { %v1982_v25 = vadd.f32 %v1981_v23, %v15632_v2  ;;  %v2071_v22 = vadd.f32 %v2070_v17, %v15635_v11  ;;  %2252 = vmatmul.bf16.gmra.mxu1 %v15376_v18  ;;  %v2796_v47 = vmax.f32 %v2795_v30, %v2525_v39  ;;  %v2541_v57 = vmax.f32 %v1938_v36, 0.0 }
 0x35e   : > { %v10389_v18 = vor.u32 %v13605_v49, %v10388_v6  ;;  %v10501_v39 = vor.u32 %v13633_v58, %v10500_v31  ;;  %v2636_v26 = vrot.slane %v2635_v5, 1 }
 0x35f   : > { %v2398_v41 = vmax.f32 %v1982_v25, 0.0  ;;  %v2399_v8 = vmax.f32 %v2071_v22, 0.0  ;;  %v2161_v32 = vpop.f32.mrf.mxu0  ;;  %4540 = vmatpush.bf16.msrb.mxu2 %v10405_v54  ;;  %4553 = vmatpush.bf16.msrb.mxu3 %v10533_v37  ;;  %v2797_v35 = vmax.f32 %v2796_v47, %v2533_v21  ;;  %v15763_v21 = vperm.slane %v15622_v43, 7 }
 0x360   : > { %v2162_v28 = vadd.f32 %v2161_v32, %v15625_v60 }
 0x361   : > { %v2649_v50 = vmax.f32 %v2648_v9, %v2398_v41  ;;  %v2670_v42 = vmax.f32 %v2669_v62, %v2399_v8  ;;  %v2798_v3 = vmax.f32 %v2797_v35, %v2541_v57  ;;  %v10373_v62 = vor.u32 %v13601_v27, %v10372_v33 }
 0x362   : > { %v1939_v53 = vpop.f32.mrf.mxu1  ;;  %v2408_v20 = vmax.f32 %v2162_v28, 0.0 }
 0x363   : > { %v1940_v0 = vadd.f32 %v1939_v53, %v15500_v4  ;;  %4541 = vmatpush.bf16.msrb.mxu2 %v10389_v18  ;;  %4554 = vmatpush.bf16.msrb.mxu3 %v10517_v63 }
 0x364   : > { %v1983_v1 = vpop.f32.mrf.mxu2  ;;  %v2072_v38 = vpop.f32.mrf.mxu3  ;;  %v2692_v29 = vmax.f32 %v15744_v44, %v2408_v20  ;;  %v2637_v44 = vmax.f32 %v2635_v5, %v2636_v26 }
 0x365   : > { %v2549_v9 = vmax.f32 %v1940_v0, 0.0  ;;  %v1984_v52 = vadd.f32 %v1983_v1, %v15632_v2  ;;  %v2073_v48 = vadd.f32 %v2072_v38, %v15635_v11 }
 0x366   : > { %v2893_v28 = vpack.c.bf16 %v2637_v44, %v2637_v44 }
 0x367   : > { %v2799_v15 = vmax.f32 %v2798_v3, %v2549_v9  ;;  %v2164_v4 = vpop.f32.mrf.mxu0  ;;  %4542 = vmatpush.bf16.msrb.mxu2 %v10373_v62  ;;  %4555 = vmatpush.bf16.msrb.mxu3 %v10501_v39  ;;  %v2406_v24 = vmax.f32 %v1984_v52, 0.0  ;;  %v2407_v54 = vmax.f32 %v2073_v48, 0.0  ;;  %v15782_v3 = vpack.c.b16 %v15652_v10, %v15652_v10 }
 0x368   : > { %v2165_v23 = vadd.f32 %v2164_v4, %v15625_v60  ;;  %v3191_v38 = vunpack.c.l.b16 %v2893_v28  ;;  %v15786_v9 = vpack.c.b16 %v15655_v14, %v15655_v14 }
 0x369   : > { %v2800_v17 = vrot.slane %v2799_v15, 4  ;;  %2025 = vmatmul.bf16.gmra.mxu2 %v15493_v55  ;;  %2114 = vmatmul.bf16.gmra.mxu3 %v15493_v55  ;;  %v2650_v32 = vmax.f32 %v2649_v50, %v2406_v24  ;;  %v2671_v6 = vmax.f32 %v2670_v42, %v2407_v54 }
 0x36a   : > { %v2416_v36 = vmax.f32 %v2165_v23, 0.0  ;;  %2203 = vmatmul.bf16.gmra.mxu0 %v15493_v55  ;;  %v2218_v25 = vpop.f32.mrf.mxu1 }
 0x36b   : > { %v2801_v22 = vmax.f32 %v2799_v15, %v2800_v17  ;;  %v2219_v45 = vadd.f32 %v2218_v25, %v15763_v21 }
 0x36c   : > { %v15760_v16 = vmax.f32 %v2692_v29, %v2416_v36  ;;  %v1986_v12 = vpop.f32.mrf.mxu2  ;;  %v2075_v30 = vpop.f32.mrf.mxu3 }
 0x36d   : > { %v2802_v37 = vrot.slane %v2801_v22, 2  ;;  %v1987_v41 = vadd.f32 %v1986_v12, %v15632_v2  ;;  %v2076_v8 = vadd.f32 %v2075_v30, %v15635_v11  ;;  %2257 = vmatmul.bf16.gmra.mxu1 %v15384_v51  ;;  %v2305_v0 = vmax.f32 %v2219_v45, 0.0 }
 0x36f   : > { %v2803_v47 = vmax.f32 %v2801_v22, %v2802_v37  ;;  %v2414_v49 = vmax.f32 %v1987_v41, 0.0  ;;  %v2415_v56 = vmax.f32 %v2076_v8, 0.0  ;;  %v15768_v57 = vpop.f32.mrf.mxu0 }
 0x371   : > { %v2804_v18 = vrot.slane %v2803_v47, 1  ;;  %v15771_v61 = vmax.f32 %v2650_v32, %v2414_v49  ;;  %v15773_v43 = vmax.f32 %v2671_v6, %v2415_v56 }
 0x372   : > { %v2220_v53 = vpop.f32.mrf.mxu1 }
 0x373   : > { %v2805_v63 = vmax.f32 %v2803_v47, %v2804_v18  ;;  %v2221_v51 = vadd.f32 %v2220_v53, %v15763_v21 }
 0x374   : > { %v15776_v35 = vpop.f32.mrf.mxu2  ;;  %v15778_v50 = vpop.f32.mrf.mxu3 }
 0x375   : > { %v2901_v42 = vpack.c.bf16 %v2805_v63, %v2805_v63  ;;  %v2313_v1 = vmax.f32 %v2221_v51, 0.0 }
 0x377   : > { %v3199_v33 = vunpack.c.l.b16 %v2901_v42  ;;  %v2701_v27 = vmax.f32 %v2305_v0, %v2313_v1  ;;  %v2169_v31 = vpop.f32.mrf.mxu0 }
 0x378   : > { %v2170_v23 = vadd.f32 %v2169_v31, %v15625_v60 }
 0x379   : > { %4517 = vmatmul.bf16.vlgmr.msra.gmra.mxu2 %v15782_v3  ;;  %4530 = vmatmul.bf16.vlgmr.msra.gmra.mxu3 %v15786_v9  ;;  %v3208_v62 = vsel %vm3204_vm1, %v3199_v33, %v3191_v38 }
 0x37a   : > { %4725 = vmatmul.bf16.vlgmr.msrb.gmra.mxu0 %v15782_v3  ;;  %v2223_v58 = vpop.f32.mrf.mxu1  ;;  %v15803_v12 = vpack.c.b16 %v3208_v62, %v3208_v62  ;;  %v2432_v30 = vmax.f32 %v2170_v23, 0.0 }
 0x37b   : > { %v2224_v5 = vadd.f32 %v2223_v58, %v15763_v21 }
 0x37c   : > { %v1991_v20 = vpop.f32.mrf.mxu2  ;;  %v2080_v52 = vpop.f32.mrf.mxu3 }
 0x37d   : > { %v2321_v39 = vmax.f32 %v2224_v5, 0.0  ;;  %2262 = vmatmul.bf16.gmra.mxu1 %v15409_v19  ;;  %v15801_v19 = vpack.c.b16 %v15644_v46, %v15644_v46  ;;  %v1992_v37 = vadd.f32 %v1991_v20, %v15632_v2  ;;  %v2081_v8 = vadd.f32 %v2080_v52, %v15635_v11 }
 0x37f   : > { %v2702_v10 = vmax.f32 %v2701_v27, %v2321_v39  ;;  %v2171_v15 = vpop.f32.mrf.mxu0  ;;  %v2430_v56 = vmax.f32 %v1992_v37, 0.0  ;;  %v2431_v53 = vmax.f32 %v2081_v8, 0.0  ;;  %v13594_v8 = vld [vmem:[#allocation13 + $0x1d4] sm:$0xf0] }
 0x380   : > { %v2172_v14 = vadd.f32 %v2171_v15, %v15625_v60 }
 0x382   : > { %v2225_v48 = vpop.f32.mrf.mxu1  ;;  %v2440_v24 = vmax.f32 %v2172_v14, 0.0 }
 0x383   : > { %v2226_v4 = vadd.f32 %v2225_v48, %v15763_v21 }
 0x384   : > { %v1993_v17 = vpop.f32.mrf.mxu2  ;;  %v2082_v26 = vpop.f32.mrf.mxu3  ;;  %v2848_v44 = vmax.f32 %v2432_v30, %v2440_v24 }
 0x385   : > { %v2329_v29 = vmax.f32 %v2226_v4, 0.0  ;;  %v1994_v36 = vadd.f32 %v1993_v17, %v15632_v2  ;;  %v2083_v22 = vadd.f32 %v2082_v26, %v15635_v11  ;;  %v10364_v17 = vld [vmem:[#allocation13 + $0x1e8] sm:$0xf]  ;;  %v13598_v26 = vld [vmem:[#allocation13 + $0x1f4] sm:$0xf0] }
 0x386   : > { %v10365_v24 = vor.u32 %v13598_v26, %v10364_v17 }
 0x387   : > { %v2703_v25 = vmax.f32 %v2702_v10, %v2329_v29  ;;  %v2174_v54 = vpop.f32.mrf.mxu0  ;;  %v2438_v32 = vmax.f32 %v1994_v36, 0.0  ;;  %v2439_v49 = vmax.f32 %v2083_v22, 0.0 }
 0x388   : > { %v2175_v41 = vadd.f32 %v2174_v54, %v15625_v60  ;;  %4730 = vmatpush.bf16.msrb.mxu1 %v10365_v24 }
 0x389   : > { %4543 = vmatmul.bf16.vlgmr.msrb.gmra.mxu2 %v15801_v19  ;;  %4556 = vmatmul.bf16.vlgmr.msrb.gmra.mxu3 %v15803_v12  ;;  %v2806_v0 = vmax.f32 %v2430_v56, %v2438_v32  ;;  %v2827_v1 = vmax.f32 %v2431_v53, %v2439_v49 }
 0x38a   : > { %v2448_v47 = vmax.f32 %v2175_v41, 0.0  ;;  %v2228_v6 = vpop.f32.mrf.mxu1  ;;  %v10348_v41 = vld [vmem:[#allocation13 + $0x1c8] sm:$0xf] }
 0x38b   : > { %v2229_v46 = vadd.f32 %v2228_v6, %v15763_v21  ;;  %v10349_v6 = vor.u32 %v13594_v8, %v10348_v41 }
 0x38c   : > { %v2849_v18 = vmax.f32 %v2848_v44, %v2448_v47  ;;  %v1996_v45 = vpop.f32.mrf.mxu2  ;;  %v2085_v28 = vpop.f32.mrf.mxu3 }
 0x38d   : > { %v2337_v63 = vmax.f32 %v2229_v46, 0.0  ;;  %v1997_v51 = vadd.f32 %v1996_v45, %v15632_v2  ;;  %v2086_v42 = vadd.f32 %v2085_v28, %v15635_v11  ;;  %2267 = vmatmul.bf16.gmra.mxu1 %v15423_v59 }
 0x38e   : > { %4731 = vmatpush.bf16.msrb.mxu1 %v10349_v6 }
 0x38f   : > { %v2704_v38 = vmax.f32 %v2703_v25, %v2337_v63  ;;  %v2446_v33 = vmax.f32 %v1997_v51, 0.0  ;;  %v2447_v27 = vmax.f32 %v2086_v42, 0.0  ;;  %v2176_v31 = vpop.f32.mrf.mxu0  ;;  %v10332_v42 = vld [vmem:[#allocation13 + $0x1a8] sm:$0xf] }
 0x390   : > { %v2177_v5 = vadd.f32 %v2176_v31, %v15625_v60 }
 0x391   : > { %v2807_v62 = vmax.f32 %v2806_v0, %v2446_v33  ;;  %v2828_v58 = vmax.f32 %v2827_v1, %v2447_v27  ;;  %v13590_v0 = vld [vmem:[#allocation13 + $0x1b4] sm:$0xf0] }
 0x392   : > { %v2230_v20 = vpop.f32.mrf.mxu1  ;;  %v2456_v14 = vmax.f32 %v2177_v5, 0.0  ;;  %v10333_v1 = vor.u32 %v13590_v0, %v10332_v42  ;;  %v13586_v5 = vld [vmem:[#allocation13 + $0x194] sm:$0xf0] }
 0x393   : > { %v2231_v52 = vadd.f32 %v2230_v20, %v15763_v21  ;;  %v13694_v42 = vld [vmem:[#allocation13 + $0x4f4] sm:$0xf0] }
 0x394   : > { %v1998_v39 = vpop.f32.mrf.mxu2  ;;  %v2087_v10 = vpop.f32.mrf.mxu3  ;;  %v2850_v36 = vmax.f32 %v2849_v18, %v2456_v14  ;;  %4732 = vmatpush.bf16.msrb.mxu1 %v10333_v1 }
 0x395   : > { %v2345_v15 = vmax.f32 %v2231_v52, 0.0  ;;  %v1999_v48 = vadd.f32 %v1998_v39, %v15632_v2  ;;  %v2088_v4 = vadd.f32 %v2087_v10, %v15635_v11 }
 0x397   : > { %v2705_v59 = vmax.f32 %v2704_v38, %v2345_v15  ;;  %v2179_v23 = vpop.f32.mrf.mxu0  ;;  %v2454_v25 = vmax.f32 %v1999_v48, 0.0  ;;  %v2455_v30 = vmax.f32 %v2088_v4, 0.0  ;;  %v10300_v48 = vld [vmem:[#allocation13 + $0x168] sm:$0xf] }
 0x398   : > { %v2180_v29 = vadd.f32 %v2179_v23, %v15625_v60 }
 0x399   : > { %v2808_v18 = vmax.f32 %v2807_v62, %v2454_v25  ;;  %v2829_v45 = vmax.f32 %v2828_v58, %v2455_v30  ;;  %v10316_v62 = vld [vmem:[#allocation13 + $0x188] sm:$0xf]  ;;  %v13578_v25 = vld [vmem:[#allocation13 + $0x154] sm:$0xf0] }
 0x39a   : > { %v2464_v22 = vmax.f32 %v2180_v29, 0.0  ;;  %v2233_v54 = vpop.f32.mrf.mxu1  ;;  %v10317_v52 = vor.u32 %v13586_v5, %v10316_v62 }
 0x39b   : > { %v2234_v37 = vadd.f32 %v2233_v54, %v15763_v21 }
 0x39c   : > { %v2851_v44 = vmax.f32 %v2850_v36, %v2464_v22  ;;  %v2001_v32 = vpop.f32.mrf.mxu2  ;;  %v2090_v47 = vpop.f32.mrf.mxu3  ;;  %4733 = vmatpush.bf16.msrb.mxu1 %v10317_v52  ;;  %v10284_v36 = vld [vmem:[#allocation13 + $0x148] sm:$0xf] }
 0x39d   : > { %v2353_v49 = vmax.f32 %v2234_v37, 0.0  ;;  %v2002_v46 = vadd.f32 %v2001_v32, %v15632_v2  ;;  %v2091_v56 = vadd.f32 %v2090_v47, %v15635_v11  ;;  %2272 = vmatmul.bf16.gmra.mxu1 %v15437_v34  ;;  %v10285_v37 = vor.u32 %v13578_v25, %v10284_v36  ;;  %v10268_v32 = vld [vmem:[#allocation13 + $0x128] sm:$0xf]  ;;  %v13574_v47 = vld [vmem:[#allocation13 + $0x134] sm:$0xf0] }
 0x39e   : > { %v10269_v6 = vor.u32 %v13574_v47, %v10268_v32  ;;  %v13685_v36 = vld [vmem:[#allocation13 + $0x4ac] sm:$0xf0]  ;;  %v13686_v32 = vld [vmem:[#allocation13 + $0x4b4] sm:$0xf0]  ;;  %v10844_v47 = vld [vmem:[#allocation13 + $0x5a8] sm:$0xf] }
 0x39f   : > { %v2706_v28 = vmax.f32 %v2705_v59, %v2353_v49  ;;  %v2462_v53 = vmax.f32 %v2002_v46, 0.0  ;;  %v2463_v63 = vmax.f32 %v2091_v56, 0.0  ;;  %v2181_v51 = vpop.f32.mrf.mxu0  ;;  %v13582_v59 = vld [vmem:[#allocation13 + $0x174] sm:$0xf0]  ;;  %v10740_v56 = vld [vmem:[#allocation13 + $0x4e0] sm:$0xf] }
 0x3a0   : > { %v2182_v27 = vadd.f32 %v2181_v51, %v15625_v60  ;;  %v10301_v23 = vor.u32 %v13582_v59, %v10300_v48  ;;  %v10748_v51 = vld [vmem:[#allocation13 + $0x4e8] sm:$0xf]  ;;  %v13690_v48 = vld [vmem:[#allocation13 + $0x4d4] sm:$0xf0] }
 0x3a1   : > { %v15823_v38 = vmax.f32 %v2808_v18, %v2462_v53  ;;  %v15825_v33 = vmax.f32 %v2829_v45, %v2463_v63  ;;  %v13693_v18 = vld [vmem:[#allocation13 + $0x4ec] sm:$0xf0]  ;;  %v10252_v45 = vld [vmem:[#allocation13 + $0x108] sm:$0xf] }
 0x3a2   : > { %v2235_v31 = vpop.f32.mrf.mxu1  ;;  %v2472_v10 = vmax.f32 %v2182_v27, 0.0  ;;  %4734 = vmatpush.bf16.msrb.mxu1 %v10301_v23  ;;  %v10741_v63 = vor.u32 %v13693_v18, %v10740_v56  ;;  %v10876_v27 = vld [vmem:[#allocation13 + $0x5e8] sm:$0xf]  ;;  %v13722_v23 = vld [vmem:[#allocation13 + $0x5d4] sm:$0xf0] }
 0x3a3   : > { %v2236_v34 = vadd.f32 %v2235_v31, %v15763_v21  ;;  %v13726_v31 = vld [vmem:[#allocation13 + $0x5f4] sm:$0xf0]  ;;  %v10860_v59 = vld [vmem:[#allocation13 + $0x5c8] sm:$0xf] }
 0x3a4   : > { %v15829_v58 = vpop.f32.mrf.mxu2  ;;  %v15831_v20 = vpop.f32.mrf.mxu3  ;;  %v2852_v17 = vmax.f32 %v2851_v44, %v2472_v10  ;;  %4561 = vmatpush.bf16.msra.mxu2 %v10741_v63  ;;  %v10877_v62 = vor.u32 %v13726_v31, %v10876_v27  ;;  %v13689_v10 = vld [vmem:[#allocation13 + $0x4cc] sm:$0xf0]  ;;  %v10692_v63 = vld [vmem:[#allocation13 + $0x480] sm:$0xf]  ;;  %v13714_v31 = vld [vmem:[#allocation13 + $0x594] sm:$0xf0] }
 0x3a5   : > { %v2361_v39 = vmax.f32 %v2236_v34, 0.0  ;;  %v10749_v34 = vor.u32 %v13694_v42, %v10748_v51  ;;  %v10700_v42 = vld [vmem:[#allocation13 + $0x488] sm:$0xf] }
 0x3a6   : > { %4735 = vmatpush.bf16.msrb.mxu1 %v10285_v37 }
 0x3a7   : > { %v2707_v15 = vmax.f32 %v2706_v28, %v2361_v39  ;;  %v2184_v14 = vpop.f32.mrf.mxu0  ;;  %v10724_v39 = vld [vmem:[#allocation13 + $0x4c0] sm:$0xf]  ;;  %4769 = vmatpush.bf16.msra.mxu0 %v10749_v34 }
 0x3a8   : > { %v2185_v4 = vadd.f32 %v2184_v14, %v15625_v60  ;;  %v10732_v14 = vld [vmem:[#allocation13 + $0x4c8] sm:$0xf] }
 0x3aa   : > { %v2480_v26 = vmax.f32 %v2185_v4, 0.0  ;;  %v2238_v29 = vpop.f32.mrf.mxu1  ;;  %4736 = vmatpush.bf16.msrb.mxu1 %v10269_v6  ;;  %v10733_v4 = vor.u32 %v13690_v48, %v10732_v14  ;;  %v10684_v14 = vld [vmem:[#allocation13 + $0x468] sm:$0xf]  ;;  %v13678_v48 = vld [vmem:[#allocation13 + $0x474] sm:$0xf0] }
 0x3ab   : > { %v2239_v24 = vadd.f32 %v2238_v29, %v15763_v21 }
 0x3ac   : > { %v15835_v22 = vmax.f32 %v2852_v17, %v2480_v26  ;;  %v15837_v54 = vpop.f32.mrf.mxu2  ;;  %v15839_v30 = vpop.f32.mrf.mxu3  ;;  %v10861_v26 = vor.u32 %v13722_v23, %v10860_v59  ;;  %4770 = vmatpush.bf16.msra.mxu0 %v10733_v4  ;;  %v10812_v59 = vld [vmem:[#allocation13 + $0x568] sm:$0xf]  ;;  %v10685_v23 = vor.u32 %v13678_v48, %v10684_v14  ;;  %v13702_v48 = vld [vmem:[#allocation13 + $0x534] sm:$0xf0] }
 0x3ad   : > { %v2369_v41 = vmax.f32 %v2239_v24, 0.0  ;;  %2277 = vmatmul.bf16.gmra.mxu1 %v15451_v13  ;;  %v13570_v13 = vld [vmem:[#allocation13 + $0x114] sm:$0xf0]  ;;  %v10708_v24 = vld [vmem:[#allocation13 + $0x4a0] sm:$0xf] }
 0x3ae   : > { %v10253_v1 = vor.u32 %v13570_v13, %v10252_v45  ;;  %v13681_v13 = vld [vmem:[#allocation13 + $0x48c] sm:$0xf0] }
 0x3af   : > { %v2708_v8 = vmax.f32 %v2707_v15, %v2369_v41  ;;  %v15842_v44 = vpop.f32.mrf.mxu0  ;;  %v10725_v15 = vor.u32 %v13689_v10, %v10724_v39  ;;  %v10709_v41 = vor.u32 %v13685_v36, %v10708_v24  ;;  %v10693_v51 = vor.u32 %v13681_v13, %v10692_v63  ;;  %v13677_v39 = vld [vmem:[#allocation13 + $0x46c] sm:$0xf0]  ;;  %v10660_v36 = vld [vmem:[#allocation13 + $0x440] sm:$0xf] }
 0x3b0   : > { %4737 = vmatpush.bf16.msrb.mxu1 %v10253_v1  ;;  %v10828_v1 = vld [vmem:[#allocation13 + $0x588] sm:$0xf] }
 0x3b1   : > { %4562 = vmatpush.bf16.msra.mxu2 %v10725_v15 }
 0x3b2   : > { %v2240_v49 = vpop.f32.mrf.mxu1 }
 0x3b3   : > { %v2241_v46 = vadd.f32 %v2240_v49, %v15763_v21 }
 0x3b4   : > { %v15845_v28 = vpop.f32.mrf.mxu2  ;;  %v15847_v53 = vpop.f32.mrf.mxu3  ;;  %4782 = vmatpush.bf16.msra.mxu1 %v10877_v62  ;;  %v10676_v62 = vld [vmem:[#allocation13 + $0x460] sm:$0xf] }
 0x3b5   : > { %v2377_v0 = vmax.f32 %v2241_v46, 0.0  ;;  %v13718_v46 = vld [vmem:[#allocation13 + $0x5b4] sm:$0xf0]  ;;  %4563 = vmatpush.bf16.msra.mxu2 %v10709_v41  ;;  %v10677_v15 = vor.u32 %v13677_v39, %v10676_v62  ;;  %v13673_v41 = vld [vmem:[#allocation13 + $0x44c] sm:$0xf0] }
 0x3b6   : > { %v10845_v56 = vor.u32 %v13718_v46, %v10844_v47  ;;  %v13674_v47 = vld [vmem:[#allocation13 + $0x454] sm:$0xf0]  ;;  %v10780_v62 = vld [vmem:[#allocation13 + $0x528] sm:$0xf] }
 0x3b7   : > { %v2709_v5 = vmax.f32 %v2708_v8, %v2377_v0  ;;  %v15849_v52 = vpop.f32.mrf.mxu0  ;;  %v10716_v8 = vld [vmem:[#allocation13 + $0x4a8] sm:$0xf]  ;;  %v13682_v0 = vld [vmem:[#allocation13 + $0x494] sm:$0xf0] }
 0x3b8   : > { %4783 = vmatpush.bf16.msra.mxu1 %v10861_v26  ;;  %v10717_v49 = vor.u32 %v13686_v32, %v10716_v8  ;;  %v10701_v27 = vor.u32 %v13682_v0, %v10700_v42  ;;  %v2167_v26 = vadd.f32 %v15768_v57, %v15625_v60  ;;  %v10661_v8 = vor.u32 %v13673_v41, %v10660_v36  ;;  %v10668_v32 = vld [vmem:[#allocation13 + $0x448] sm:$0xf]  ;;  %v10644_v42 = vld [vmem:[#allocation13 + $0x420] sm:$0xf]  ;;  %v13669_v0 = vld [vmem:[#allocation13 + $0x42c] sm:$0xf0] }
 0x3b9   : > { %4564 = vmatpush.bf16.msra.mxu2 %v10693_v51  ;;  %v10669_v46 = vor.u32 %v13674_v47, %v10668_v32  ;;  %v10628_v41 = vld [vmem:[#allocation13 + $0x400] sm:$0xf]  ;;  %v10636_v47 = vld [vmem:[#allocation13 + $0x408] sm:$0xf] }
 0x3ba   : > { %v2243_v17 = vpop.f32.mrf.mxu1  ;;  %4771 = vmatpush.bf16.msra.mxu0 %v10717_v49  ;;  %v2424_v63 = vmax.f32 %v2167_v26, 0.0  ;;  %v10996_v32 = vld [vmem:[#allocation13 + $0x6e0] sm:$0xf] }
 0x3bb   : > { %v2244_v29 = vadd.f32 %v2243_v17, %v15763_v21  ;;  %v13710_v17 = vld [vmem:[#allocation13 + $0x574] sm:$0xf0] }
 0x3bc   : > { %v15852_v25 = vpop.f32.mrf.mxu2  ;;  %v15854_v37 = vpop.f32.mrf.mxu3  ;;  %4784 = vmatpush.bf16.msra.mxu1 %v10845_v56  ;;  %v13706_v56 = vld [vmem:[#allocation13 + $0x554] sm:$0xf0] }
 0x3bd   : > { %v2385_v6 = vmax.f32 %v2244_v29, 0.0  ;;  %2282 = vmatmul.bf16.gmra.mxu1 %v15465_v40  ;;  %v10829_v40 = vor.u32 %v13714_v31, %v10828_v1  ;;  %4565 = vmatpush.bf16.msra.mxu2 %v10677_v15  ;;  %v10813_v29 = vor.u32 %v13710_v17, %v10812_v59  ;;  %v10645_v31 = vor.u32 %v13669_v0, %v10644_v42  ;;  %v13725_v17 = vld [vmem:[#allocation13 + $0x5ec] sm:$0xf0]  ;;  %v13564_v0 = vld [vmem:[#allocation13 + $0xec] sm:$0xf] }
 0x3be   : > { %4772 = vmatpush.bf16.msra.mxu0 %v10701_v27  ;;  %v2694_v59 = vmax.f32 %v15760_v16, %v2424_v63  ;;  %v1989_v16 = vadd.f32 %v15776_v35, %v15632_v2  ;;  %v2093_v35 = vadd.f32 %v15831_v20, %v15635_v11 }
 0x3bf   : > { %v2710_v18 = vmax.f32 %v2709_v5, %v2385_v6  ;;  %v15857_v45 = vpop.f32.mrf.mxu0  ;;  %v10796_v6 = vld [vmem:[#allocation13 + $0x548] sm:$0xf] }
 0x3c0   : > { %4785 = vmatpush.bf16.msra.mxu1 %v10829_v40  ;;  %v10797_v51 = vor.u32 %v13706_v56, %v10796_v6  ;;  %v13670_v40 = vld [vmem:[#allocation13 + $0x434] sm:$0xf0]  ;;  %v2695_v63 = vrot.slane %v2694_v59, 4 }
 0x3c1   : > { %4566 = vmatpush.bf16.msra.mxu2 %v10661_v8  ;;  %v13665_v8 = vld [vmem:[#allocation13 + $0x40c] sm:$0xf0]  ;;  %v13698_v56 = vld [vmem:[#allocation13 + $0x514] sm:$0xf0] }
 0x3c2   : > { %v2245_v34 = vpop.f32.mrf.mxu1  ;;  %4773 = vmatpush.bf16.msra.mxu0 %v10685_v23  ;;  %v10868_v23 = vld [vmem:[#allocation13 + $0x5e0] sm:$0xf]  ;;  %v15894_v20 = vmax.f32 %v2694_v59, %v2695_v63  ;;  %v2187_v59 = vadd.f32 %v15842_v44, %v15625_v60 }
 0x3c3   : > { %v2246_v4 = vadd.f32 %v2245_v34, %v15763_v21  ;;  %v10652_v34 = vld [vmem:[#allocation13 + $0x428] sm:$0xf]  ;;  %v10869_v36 = vor.u32 %v13725_v17, %v10868_v23  ;;  %v13560_v17 = vld [vmem:[#allocation13 + $0xcc] sm:$0xf]  ;;  %v10964_v63 = vld [vmem:[#allocation13 + $0x6a0] sm:$0xf] }
 0x3c4   : > { %v15859_v10 = vpop.f32.mrf.mxu2  ;;  %v15861_v5 = vpop.f32.mrf.mxu3  ;;  %4786 = vmatpush.bf16.msra.mxu1 %v10813_v29  ;;  %v10653_v14 = vor.u32 %v13670_v40, %v10652_v34  ;;  %v15885_v34 = vadd.f32 %v15778_v50, %v15635_v11 }
 0x3c5   : > { %v2393_v49 = vmax.f32 %v2246_v4, 0.0  ;;  %4567 = vmatpush.bf16.msra.mxu2 %v10645_v31  ;;  %v10781_v4 = vor.u32 %v13702_v48, %v10780_v62  ;;  %4574 = vmatpush.bf16.msra.mxu3 %v10869_v36  ;;  %v10238_v31 = vld [vmem:[#allocation13 + $0xf8] sm:$0xf0]  ;;  %v10852_v62 = vld [vmem:[#allocation13 + $0x5c0] sm:$0xf] }
 0x3c6   : > { %4774 = vmatpush.bf16.msra.mxu0 %v10669_v46  ;;  %v10764_v46 = vld [vmem:[#allocation13 + $0x508] sm:$0xf]  ;;  %v10241_v40 = vor.u32 %v13564_v0, %v10238_v31  ;;  %v13753_v48 = vld [vmem:[#allocation13 + $0x6cc] sm:$0xf0]  ;;  %v10222_v36 = vld [vmem:[#allocation13 + $0xd8] sm:$0xf0] }
 0x3c7   : > { %v15866_v24 = vpop.f32.mrf.mxu0  ;;  %v2711_v39 = vmax.f32 %v2710_v18, %v2393_v49  ;;  %v10629_v18 = vor.u32 %v13665_v8, %v10628_v41  ;;  %v13666_v49 = vld [vmem:[#allocation13 + $0x414] sm:$0xf0]  ;;  %v10765_v42 = vor.u32 %v13698_v56, %v10764_v46  ;;  %v15907_v46 = vadd.f32 %v15845_v28, %v15632_v2  ;;  %v13717_v56 = vld [vmem:[#allocation13 + $0x5ac] sm:$0xf0]  ;;  %v10206_v0 = vld [vmem:[#allocation13 + $0xb8] sm:$0xf0] }
 0x3c8   : > { %4787 = vmatpush.bf16.msra.mxu1 %v10797_v51  ;;  %v2697_v31 = vrot.slane %v15894_v20, 2  ;;  %v2098_v28 = vadd.f32 %v15847_v53, %v15635_v11 }
 0x3c9   : > { %4568 = vmatpush.bf16.msra.mxu2 %v10629_v18  ;;  %v10225_v18 = vor.u32 %v13560_v17, %v10222_v36 }
 0x3ca   : > { %v2248_v13 = vpop.f32.mrf.mxu1  ;;  %4775 = vmatpush.bf16.msra.mxu0 %v10653_v14  ;;  %v10980_v14 = vld [vmem:[#allocation13 + $0x6c0] sm:$0xf] }
 0x3cb   : > { %v2249_v57 = vadd.f32 %v2248_v13, %v15763_v21  ;;  %v2004_v13 = vadd.f32 %v15829_v58, %v15632_v2  ;;  %v13721_v58 = vld [vmem:[#allocation13 + $0x5cc] sm:$0xf0]  ;;  %v10981_v8 = vor.u32 %v13753_v48, %v10980_v14 }
 0x3cc   : > { %v15869_v1 = vpop.f32.mrf.mxu2  ;;  %v15871_v27 = vpop.f32.mrf.mxu3  ;;  %4788 = vmatpush.bf16.msra.mxu1 %v10781_v4  ;;  %v2422_v4 = vmax.f32 %v1989_v16, 0.0  ;;  %v10853_v50 = vor.u32 %v13721_v58, %v10852_v62  ;;  %v2096_v16 = vadd.f32 %v15839_v30, %v15635_v11  ;;  %v10820_v62 = vld [vmem:[#allocation13 + $0x580] sm:$0xf] }
 0x3cd   : > { %v2401_v15 = vmax.f32 %v2249_v57, 0.0  ;;  %2287 = vmatmul.bf16.gmra.mxu1 %v15479_v7  ;;  %v13757_v7 = vld [vmem:[#allocation13 + $0x6ec] sm:$0xf0]  ;;  %v10637_v57 = vor.u32 %v13666_v49, %v10636_v47  ;;  %v2470_v41 = vmax.f32 %v2004_v13, 0.0  ;;  %v2007_v47 = vadd.f32 %v15837_v54, %v15632_v2  ;;  %v10836_v49 = vld [vmem:[#allocation13 + $0x5a0] sm:$0xf] }
 0x3ce   : > { %v10997_v6 = vor.u32 %v13757_v7, %v10996_v32  ;;  %v2423_v32 = vmax.f32 %v15885_v34, 0.0  ;;  %v2471_v7 = vmax.f32 %v2093_v35, 0.0  ;;  %4575 = vmatpush.bf16.msra.mxu3 %v10853_v50  ;;  %v13749_v13 = vld [vmem:[#allocation13 + $0x6ac] sm:$0xf0]  ;;  %v15910_v54 = vmax.f32 %v15771_v61, %v2422_v4 }
 0x3cf   : > { %v15875_v26 = vmax.f32 %v2711_v39, %v2401_v15  ;;  %v15877_v29 = vpop.f32.mrf.mxu0  ;;  %4776 = vmatpush.bf16.msra.mxu0 %v10637_v57  ;;  %v10837_v30 = vor.u32 %v13717_v56, %v10836_v49  ;;  %v10965_v57 = vor.u32 %v13749_v13, %v10964_v63  ;;  %v2810_v44 = vmax.f32 %v15823_v38, %v2470_v41  ;;  %v13713_v4 = vld [vmem:[#allocation13 + $0x58c] sm:$0xf0]  ;;  %v10948_v41 = vld [vmem:[#allocation13 + $0x680] sm:$0xf] }
 0x3d0   : > { %4587 = vmatpush.bf16.msrb.mxu2 %v10997_v6  ;;  %4789 = vmatpush.bf16.msra.mxu1 %v10765_v42  ;;  %v13556_v42 = vld [vmem:[#allocation13 + $0xac] sm:$0xf]  ;;  %v2831_v58 = vmax.f32 %v15825_v33, %v2471_v7  ;;  %v2478_v61 = vmax.f32 %v2007_v47, 0.0  ;;  %v2479_v14 = vmax.f32 %v2096_v16, 0.0  ;;  %v2486_v50 = vmax.f32 %v15907_v46, 0.0 }
 0x3d1   : > { %v2190_v38 = vadd.f32 %v15849_v52, %v15625_v60  ;;  %v10821_v36 = vor.u32 %v13713_v4, %v10820_v62  ;;  %v13745_v33 = vld [vmem:[#allocation13 + $0x68c] sm:$0xf0]  ;;  %v13552_v52 = vld [vmem:[#allocation13 + $0x8c] sm:$0xf]  ;;  %v10190_v16 = vld [vmem:[#allocation13 + $0x98] sm:$0xf0] }
 0x3d2   : > { %v2250_v51 = vpop.f32.mrf.mxu1  ;;  %4576 = vmatpush.bf16.msra.mxu3 %v10837_v30  ;;  %v2487_v49 = vmax.f32 %v2098_v28, 0.0  ;;  %v10949_v46 = vor.u32 %v13745_v33, %v10948_v41  ;;  %v10193_v56 = vor.u32 %v13552_v52, %v10190_v16  ;;  %v10804_v63 = vld [vmem:[#allocation13 + $0x560] sm:$0xf]  ;;  %v2811_v13 = vmax.f32 %v2810_v44, %v2478_v61  ;;  %v13741_v28 = vld [vmem:[#allocation13 + $0x66c] sm:$0xf0] }
 0x3d3   : > { %v2251_v23 = vadd.f32 %v2250_v51, %v15763_v21  ;;  %4821 = vmatpush.bf16.msrb.mxu0 %v10241_v40  ;;  %v10209_v40 = vor.u32 %v13556_v42, %v10206_v0  ;;  %v2832_v30 = vmax.f32 %v2831_v58, %v2479_v14  ;;  %v2496_v42 = vmax.f32 %v2190_v38, 0.0  ;;  %v10932_v0 = vld [vmem:[#allocation13 + $0x660] sm:$0xf]  ;;  %v10174_v62 = vld [vmem:[#allocation13 + $0x78] sm:$0xf0] }
 0x3d4   : > { %v15889_v39 = vpop.f32.mrf.mxu2  ;;  %v15891_v15 = vpop.f32.mrf.mxu3  ;;  %4588 = vmatpush.bf16.msrb.mxu2 %v10981_v8  ;;  %v2012_v8 = vadd.f32 %v15852_v25, %v15632_v2  ;;  %v2014_v25 = vadd.f32 %v15859_v10, %v15632_v2  ;;  %v2195_v10 = vadd.f32 %v15866_v24, %v15625_v60  ;;  %v2812_v61 = vmax.f32 %v2811_v13, %v2486_v50  ;;  %v10788_v14 = vld [vmem:[#allocation13 + $0x540] sm:$0xf]  ;;  %v13705_v24 = vld [vmem:[#allocation13 + $0x54c] sm:$0xf0] }
 0x3d5   : > { %v2409_v51 = vmax.f32 %v2251_v23, 0.0  ;;  %v2488_v23 = vmax.f32 %v2187_v59, 0.0  ;;  %v2192_v59 = vadd.f32 %v15857_v45, %v15625_v60  ;;  %v2106_v41 = vadd.f32 %v15871_v27, %v15635_v11  ;;  %v10916_v52 = vld [vmem:[#allocation13 + $0x640] sm:$0xf]  ;;  %v13737_v16 = vld [vmem:[#allocation13 + $0x64c] sm:$0xf0] }
 0x3d6   : > { %4577 = vmatpush.bf16.msra.mxu3 %v10821_v36  ;;  %v2494_v44 = vmax.f32 %v2012_v8, 0.0  ;;  %v2017_v36 = vadd.f32 %v15869_v1, %v15632_v2  ;;  %v2653_v33 = vrot.slane %v15910_v54, 4  ;;  %v2197_v50 = vadd.f32 %v15877_v29, %v15625_v60 }
 0x3d7   : > { %v15901_v6 = vpop.f32.mrf.mxu0  ;;  %4822 = vmatpush.bf16.msrb.mxu0 %v10225_v18  ;;  %v2101_v18 = vadd.f32 %v15854_v37, %v15635_v11  ;;  %v2713_v7 = vmax.f32 %v15875_v26, %v2409_v51  ;;  %v2103_v37 = vadd.f32 %v15861_v5, %v15635_v11  ;;  %v13709_v51 = vld [vmem:[#allocation13 + $0x56c] sm:$0xf0]  ;;  %v10933_v5 = vor.u32 %v13741_v28, %v10932_v0 }
 0x3d8   : > { %4589 = vmatpush.bf16.msrb.mxu2 %v10965_v57  ;;  %v2854_v57 = vmax.f32 %v15835_v22, %v2488_v23  ;;  %v10805_v45 = vor.u32 %v13709_v51, %v10804_v63  ;;  %v2504_v4 = vmax.f32 %v2192_v59, 0.0  ;;  %v2502_v23 = vmax.f32 %v2014_v25, 0.0  ;;  %v13596_v25 = vld [vmem:[#allocation13 + $0x1ec] sm:$0xf] }
 0x3d9   : > { %v2503_v38 = vmax.f32 %v2103_v37, 0.0  ;;  %v2813_v1 = vmax.f32 %v2812_v61, %v2494_v44  ;;  %v2512_v59 = vmax.f32 %v2195_v10, 0.0  ;;  %v10917_v27 = vor.u32 %v13737_v16, %v10916_v52  ;;  %v10366_v37 = vld [vmem:[#allocation13 + $0x1f8] sm:$0xf0]  ;;  %v13701_v44 = vld [vmem:[#allocation13 + $0x52c] sm:$0xf0] }
 0x3da   : > { %v2253_v35 = vpop.f32.mrf.mxu1  ;;  %4578 = vmatpush.bf16.msra.mxu3 %v10805_v45  ;;  %v2855_v8 = vmax.f32 %v2854_v57, %v2496_v42  ;;  %v15958_v63 = vmax.f32 %v15773_v43, %v2423_v32  ;;  %v2200_v13 = vadd.f32 %v15901_v6, %v15625_v60  ;;  %v2510_v45 = vmax.f32 %v2017_v36, 0.0  ;;  %v10900_v6 = vld [vmem:[#allocation13 + $0x620] sm:$0xf]  ;;  %v13733_v10 = vld [vmem:[#allocation13 + $0x62c] sm:$0xf0] }
 0x3db   : > { %v2254_v48 = vadd.f32 %v2253_v35, %v15763_v21  ;;  %4823 = vmatpush.bf16.msrb.mxu0 %v10209_v40  ;;  %v2495_v35 = vmax.f32 %v2101_v18, 0.0  ;;  %v13548_v40 = vld [vmem:[#allocation13 + $0x6c] sm:$0xf]  ;;  %v2814_v57 = vmax.f32 %v2813_v1, %v2502_v23  ;;  %v2511_v0 = vmax.f32 %v2106_v41, 0.0 }
 0x3dc   : > { %v15921_v17 = vpop.f32.mrf.mxu2  ;;  %v15923_v53 = vpop.f32.mrf.mxu3  ;;  %4590 = vmatpush.bf16.msrb.mxu2 %v10949_v46  ;;  %v10177_v22 = vor.u32 %v13548_v40, %v10174_v62  ;;  %v13544_v46 = vld [vmem:[#allocation13 + $0x4c] sm:$0xf]  ;;  %v2856_v29 = vmax.f32 %v2855_v8, %v2504_v4  ;;  %v15964_v43 = vadd.f32 %v15889_v39, %v15632_v2  ;;  %v2108_v40 = vadd.f32 %v15891_v15, %v15635_v11  ;;  %v10142_v4 = vld [vmem:[#allocation13 + $0x38] sm:$0xf0] }
 0x3dd   : > { %v2417_v47 = vmax.f32 %v2254_v48, 0.0  ;;  %2292 = vmatmul.bf16.gmra.mxu1 %v15493_v55  ;;  %v2833_v48 = vmax.f32 %v2832_v30, %v2487_v49  ;;  %v10772_v30 = vld [vmem:[#allocation13 + $0x520] sm:$0xf]  ;;  %v10369_v62 = vor.u32 %v13596_v25, %v10366_v37  ;;  %v10901_v61 = vor.u32 %v13733_v10, %v10900_v6  ;;  %v13592_v23 = vld [vmem:[#allocation13 + $0x1cc] sm:$0xf] }
 0x3de   : > { %v10773_v32 = vor.u32 %v13701_v44, %v10772_v30  ;;  %v2022_v39 = vadd.f32 %v15921_v17, %v15632_v2  ;;  %v2674_v41 = vrot.slane %v15958_v63, 4  ;;  %v2111_v8 = vadd.f32 %v15923_v53, %v15635_v11  ;;  %v13588_v44 = vld [vmem:[#allocation13 + $0x1ac] sm:$0xf] }
 0x3df   : > { %v15937_v26 = vmax.f32 %v2713_v7, %v2417_v47  ;;  %v2201_v55 = vpop.f32.mrf.mxu0  ;;  %4824 = vmatpush.bf16.msrb.mxu0 %v10193_v56  ;;  %v10789_v47 = vor.u32 %v13705_v24, %v10788_v14  ;;  %v2834_v49 = vmax.f32 %v2833_v48, %v2495_v35  ;;  %v10158_v56 = vld [vmem:[#allocation13 + $0x58] sm:$0xf0]  ;;  %v2520_v35 = vmax.f32 %v2197_v50, 0.0  ;;  %v13540_v48 = vld [vmem:[#allocation13 + $0x2c] sm:$0xf] }
 0x3e0   : > { %4591 = vmatpush.bf16.msrb.mxu2 %v10933_v5  ;;  %v10161_v51 = vor.u32 %v13544_v46, %v10158_v56  ;;  %v2202_v34 = vadd.f32 %v2201_v55, %v15625_v60  ;;  %v2857_v5 = vmax.f32 %v2856_v29, %v2512_v59  ;;  %v10145_v36 = vor.u32 %v13540_v48, %v10142_v4  ;;  %v10756_v50 = vld [vmem:[#allocation13 + $0x500] sm:$0xf]  ;;  %v13729_v46 = vld [vmem:[#allocation13 + $0x60c] sm:$0xf0] }
 0x3e1   : > { %v2835_v42 = vmax.f32 %v2834_v49, %v2503_v38  ;;  %4579 = vmatpush.bf16.msra.mxu3 %v10789_v47  ;;  %v10350_v38 = vld [vmem:[#allocation13 + $0x1d8] sm:$0xf0]  ;;  %v2815_v24 = vmax.f32 %v2814_v57, %v2510_v45  ;;  %v13697_v47 = vld [vmem:[#allocation13 + $0x50c] sm:$0xf0]  ;;  %v2518_v17 = vmax.f32 %v15964_v43, 0.0  ;;  %v2519_v56 = vmax.f32 %v2108_v40, 0.0 }
 0x3e2   : > { %v15942_v58 = vpop.f32.mrf.mxu1  ;;  %v2858_v52 = vmax.f32 %v2857_v5, %v2520_v35  ;;  %v2536_v16 = vmax.f32 %v2202_v34, 0.0  ;;  %v10757_v59 = vor.u32 %v13697_v47, %v10756_v50  ;;  %v2526_v37 = vmax.f32 %v2022_v39, 0.0  ;;  %v13536_v57 = vld [vmem:[#allocation13 + $0xc] sm:$0xf]  ;;  %v10334_v35 = vld [vmem:[#allocation13 + $0x1b8] sm:$0xf0] }
 0x3e3   : > { %4825 = vmatpush.bf16.msrb.mxu0 %v10177_v22  ;;  %v2528_v22 = vmax.f32 %v2200_v13, 0.0  ;;  %v2836_v15 = vmax.f32 %v2835_v42, %v2511_v0  ;;  %v10353_v13 = vor.u32 %v13592_v23, %v10350_v38  ;;  %v10126_v42 = vld [vmem:[#allocation13 + $0x18] sm:$0xf0]  ;;  %v2527_v45 = vmax.f32 %v2111_v8, 0.0 }
 0x3e4   : > { %v15951_v18 = vpop.f32.mrf.mxu2  ;;  %v15953_v7 = vpop.f32.mrf.mxu3  ;;  %4592 = vmatpush.bf16.msrb.mxu2 %v10917_v27  ;;  %v10884_v27 = vld [vmem:[#allocation13 + $0x600] sm:$0xf]  ;;  %v2654_v43 = vmax.f32 %v15910_v54, %v2653_v33  ;;  %v2675_v34 = vmax.f32 %v15958_v63, %v2674_v41  ;;  %v2816_v10 = vmax.f32 %v2815_v24, %v2518_v17  ;;  %v10337_v54 = vor.u32 %v13588_v44, %v10334_v35  ;;  %v10318_v23 = vld [vmem:[#allocation13 + $0x198] sm:$0xf0] }
 0x3e5   : > { %4580 = vmatpush.bf16.msra.mxu3 %v10773_v32  ;;  %v2024_v29 = vadd.f32 %v15951_v18, %v15632_v2  ;;  %v2113_v53 = vadd.f32 %v15953_v7, %v15635_v11  ;;  %v2859_v25 = vmax.f32 %v2858_v52, %v2528_v22  ;;  %v10885_v30 = vor.u32 %v13729_v46, %v10884_v27 }
 0x3e6   : > { %v10129_v7 = vor.u32 %v13536_v57, %v10126_v42  ;;  %v2837_v5 = vmax.f32 %v2836_v15, %v2519_v56  ;;  %v2817_v33 = vmax.f32 %v2816_v10, %v2526_v37  ;;  %v2655_v38 = vrot.slane %v2654_v43, 2 }
 0x3e7   : > { %v2204_v28 = vpop.f32.mrf.mxu0  ;;  %4826 = vmatpush.bf16.msrb.mxu0 %v10161_v51  ;;  %v2860_v32 = vmax.f32 %v2859_v25, %v2536_v16  ;;  %v2534_v40 = vmax.f32 %v2024_v29, 0.0  ;;  %v13580_v29 = vld [vmem:[#allocation13 + $0x16c] sm:$0xf] }
 0x3e8   : > { %v2205_v14 = vadd.f32 %v2204_v28, %v15625_v60  ;;  %4593 = vmatpush.bf16.msrb.mxu2 %v10901_v61  ;;  %v2698_v61 = vmax.f32 %v15894_v20, %v2697_v31  ;;  %v2838_v63 = vmax.f32 %v2837_v5, %v2527_v45 }
 0x3e9   : > { %4581 = vmatpush.bf16.msra.mxu3 %v10757_v59  ;;  %v2818_v50 = vmax.f32 %v2817_v33, %v2534_v40 }
 0x3ea   : > { %v15972_v55 = vpop.f32.mrf.mxu1  ;;  %v2544_v51 = vmax.f32 %v2205_v14, 0.0  ;;  %v2699_v52 = vrot.slane %v2698_v61, 1 }
 0x3eb   : > { %4827 = vmatpush.bf16.msrb.mxu0 %v10145_v36  ;;  %v2676_v36 = vrot.slane %v2675_v34, 2  ;;  %v2259_v17 = vadd.f32 %v15972_v55, %v15763_v21 }
 0x3ec   : > { %v2026_v1 = vpop.f32.mrf.mxu2  ;;  %v2115_v49 = vpop.f32.mrf.mxu3  ;;  %4594 = vmatpush.bf16.msrb.mxu2 %v10885_v30  ;;  %v2861_v48 = vmax.f32 %v2860_v32, %v2544_v51 }
 0x3ed   : > { %4738 = vmatmul.bf16.vlgmr.msrb.gmra.mxu1 %v15786_v9  ;;  %v2027_v0 = vadd.f32 %v2026_v1, %v15632_v2  ;;  %v2116_v28 = vadd.f32 %v2115_v49, %v15635_v11  ;;  %v2677_v25 = vmax.f32 %v2675_v34, %v2676_v36  ;;  %v2433_v57 = vmax.f32 %v2259_v17, 0.0 }
 0x3ee   : > { %4834 = vmatpush.bf16.msrb.mxu1 %v10369_v62  ;;  %v2535_v62 = vmax.f32 %v2113_v53, 0.0  ;;  %v10302_v53 = vld [vmem:[#allocation13 + $0x178] sm:$0xf0] }
 0x3ef   : > { %v2206_v18 = vpop.f32.mrf.mxu0  ;;  %4828 = vmatpush.bf16.msrb.mxu0 %v10129_v7  ;;  %v2542_v39 = vmax.f32 %v2027_v0, 0.0  ;;  %v2543_v14 = vmax.f32 %v2116_v28, 0.0  ;;  %v10305_v0 = vor.u32 %v13580_v29, %v10302_v53  ;;  %v2700_v28 = vmax.f32 %v2698_v61, %v2699_v52  ;;  %v13576_v7 = vld [vmem:[#allocation13 + $0x14c] sm:$0xf] }
 0x3f0   : > { %v2207_v6 = vadd.f32 %v2206_v18, %v15625_v60  ;;  %v13584_v60 = vld [vmem:[#allocation13 + $0x18c] sm:$0xf]  ;;  %v2839_v20 = vmax.f32 %v2838_v63, %v2535_v62  ;;  %v2678_v32 = vrot.slane %v2677_v25, 1 }
 0x3f1   : > { %v10321_v1 = vor.u32 %v13584_v60, %v10318_v23  ;;  %v2819_v49 = vmax.f32 %v2818_v50, %v2542_v39  ;;  %v13572_v23 = vld [vmem:[#allocation13 + $0x12c] sm:$0xf]  ;;  %v2896_v36 = vpack.c.bf16 %v2700_v28, %v2700_v28 }
 0x3f2   : > { %v2552_v4 = vmax.f32 %v2207_v6, 0.0  ;;  %v2260_v22 = vpop.f32.mrf.mxu1  ;;  %4835 = vmatpush.bf16.msrb.mxu1 %v10353_v13  ;;  %v2840_v59 = vmax.f32 %v2839_v20, %v2543_v14  ;;  %v2656_v13 = vmax.f32 %v2654_v43, %v2655_v38  ;;  %v10286_v43 = vld [vmem:[#allocation13 + $0x158] sm:$0xf0] }
 0x3f3   : > { %v2261_v24 = vadd.f32 %v2260_v22, %v15763_v21  ;;  %v10289_v33 = vor.u32 %v13576_v7, %v10286_v43  ;;  %v10270_v38 = vld [vmem:[#allocation13 + $0x138] sm:$0xf0] }
 0x3f4   : > { %v2862_v41 = vmax.f32 %v2861_v48, %v2552_v4  ;;  %v2028_v15 = vpop.f32.mrf.mxu2  ;;  %v2117_v8 = vpop.f32.mrf.mxu3  ;;  %v2657_v34 = vrot.slane %v2656_v13, 1  ;;  %v10750_v7 = vld [vmem:[#allocation13 + $0x4f8] sm:$0xf0] }
 0x3f5   : > { %v2029_v31 = vadd.f32 %v2028_v15, %v15632_v2  ;;  %v2118_v47 = vadd.f32 %v2117_v8, %v15635_v11  ;;  %v2441_v37 = vmax.f32 %v2261_v24, 0.0  ;;  %v16000_v11 = vld [vmem:[#allocation14] sm:$0xf]  ;;  %v2679_v15 = vmax.f32 %v2677_v25, %v2678_v32  ;;  %v10878_v32 = vld [vmem:[#allocation13 + $0x5f8] sm:$0xf0] }
 0x3f6   : > { %v2863_v16 = vrot.slane %v2862_v41, 4  ;;  %4836 = vmatpush.bf16.msrb.mxu1 %v10337_v54  ;;  %v3164_v55 = vperm.slane %v16000_v11, 0 }
 0x3f7   : > { %v2550_v27 = vmax.f32 %v2029_v31, 0.0  ;;  %v2551_v46 = vmax.f32 %v2118_v47, 0.0  ;;  %v15998_v56 = vpop.f32.mrf.mxu0  ;;  %v2869_v10 = vmax.f32 %v2433_v57, %v2441_v37  ;;  %v10273_v47 = vor.u32 %v13572_v23, %v10270_v38 }
 0x3f8   : > { %v2864_v2 = vmax.f32 %v2862_v41, %v2863_v16  ;;  %v2658_v41 = vmax.f32 %v2656_v13, %v2657_v34  ;;  %v13568_v16 = vld [vmem:[#allocation13 + $0x10c] sm:$0xf]  ;;  %v2895_v53 = vpack.c.bf16 %v2679_v15, %v2679_v15  ;;  %v10862_v15 = vld [vmem:[#allocation13 + $0x5d8] sm:$0xf0] }
 0x3f9   : > { %v2820_v51 = vmax.f32 %v2819_v49, %v2550_v27  ;;  %v2841_v30 = vmax.f32 %v2840_v59, %v2551_v46  ;;  %v3194_v49 = vunpack.c.l.b16 %v2896_v36  ;;  %v13724_v34 = vld [vmem:[#allocation13 + $0x5ec] sm:$0xf] }
 0x3fa   : > { %v2865_v42 = vrot.slane %v2864_v2, 2  ;;  %v2263_v45 = vpop.f32.mrf.mxu1  ;;  %4837 = vmatpush.bf16.msrb.mxu1 %v10321_v1  ;;  %v10254_v1 = vld [vmem:[#allocation13 + $0x118] sm:$0xf0]  ;;  %v2894_v59 = vpack.c.bf16 %v2658_v41, %v2658_v41  ;;  %v10881_v38 = vor.u32 %v13724_v34, %v10878_v32  ;;  %v13688_v36 = vld [vmem:[#allocation13 + $0x4cc] sm:$0xf] }
 0x3fb   : > { %v2821_v18 = vrot.slane %v2820_v51, 4  ;;  %v2842_v44 = vrot.slane %v2841_v30, 4  ;;  %v2264_v35 = vadd.f32 %v2263_v45, %v15763_v21  ;;  %v10257_v37 = vor.u32 %v13568_v16, %v10254_v1  ;;  %v10230_v45 = vld [vmem:[#allocation13 + $0xf0] sm:$0xf0]  ;;  %v10734_v41 = vld [vmem:[#allocation13 + $0x4d8] sm:$0xf0] }
 0x3fc   : > { %v2866_v6 = vmax.f32 %v2864_v2, %v2865_v42  ;;  %v4518_v5 = vpop.f32.mrf.mxu2  ;;  %v4531_v40 = vpop.f32.mrf.mxu3  ;;  %v3192_v57 = vunpack.c.l.b16 %v2894_v59  ;;  %v13563_v42 = vld [vmem:[#allocation13 + $0xe4] sm:$0xf]  ;;  %v13716_v1 = vld [vmem:[#allocation13 + $0x5ac] sm:$0xf] }
 0x3fd   : > { %v2822_v62 = vmax.f32 %v2820_v51, %v2821_v18  ;;  %v2843_v48 = vmax.f32 %v2841_v30, %v2842_v44  ;;  %v2449_v4 = vmax.f32 %v2264_v35, 0.0  ;;  %v4519_v22 = vadd.f32 %v4518_v5, %v3164_v55  ;;  %v13692_v35 = vld [vmem:[#allocation13 + $0x4ec] sm:$0xf] }
 0x3fe   : > { %v2867_v54 = vrot.slane %v2866_v6, 1  ;;  %4838 = vmatpush.bf16.msrb.mxu1 %v10305_v0  ;;  %v3193_v0 = vunpack.c.l.b16 %v2895_v53  ;;  %v13551_v53 = vld [vmem:[#allocation13 + $0x84] sm:$0xf] }
 0x3ff   : > { %v2823_v61 = vrot.slane %v2822_v62, 2  ;;  %v2844_v63 = vrot.slane %v2843_v48, 2  ;;  %v2870_v39 = vmax.f32 %v2869_v10, %v2449_v4  ;;  %v4532_v14 = vadd.f32 %v4531_v40, %v4519_v22  ;;  %v4728_v60 = vpop.f32.mrf.mxu0 }
 0x400   : > { %v2868_v24 = vmax.f32 %v2866_v6, %v2867_v54  ;;  %v10233_v40 = vor.u32 %v13563_v42, %v10230_v45  ;;  %v10753_v54 = vor.u32 %v13692_v35, %v10750_v7  ;;  %v13547_v45 = vld [vmem:[#allocation13 + $0x64] sm:$0xf]  ;;  %v13708_v7 = vld [vmem:[#allocation13 + $0x56c] sm:$0xf] }
 0x401   : > { %v2824_v8 = vmax.f32 %v2822_v62, %v2823_v61  ;;  %v2845_v50 = vmax.f32 %v2843_v48, %v2844_v63  ;;  %v10214_v61 = vld [vmem:[#allocation13 + $0xd0] sm:$0xf0] }
 0x402   : > { %v2904_v20 = vpack.c.bf16 %v2868_v24, %v2868_v24  ;;  %v2265_v31 = vpop.f32.mrf.mxu1  ;;  %4839 = vmatpush.bf16.msrb.mxu1 %v10289_v33  ;;  %v13559_v33 = vld [vmem:[#allocation13 + $0xc4] sm:$0xf]  ;;  %v13720_v24 = vld [vmem:[#allocation13 + $0x5cc] sm:$0xf] }
 0x403   : > { %v2825_v52 = vrot.slane %v2824_v8, 1  ;;  %v2846_v17 = vrot.slane %v2845_v50, 1  ;;  %v2266_v25 = vadd.f32 %v2265_v31, %v15763_v21  ;;  %v10198_v31 = vld [vmem:[#allocation13 + $0xb0] sm:$0xf0] }
 0x404   : > { %v3202_v27 = vunpack.c.l.b16 %v2904_v20  ;;  %v4520_v46 = vpop.f32.mrf.mxu2  ;;  %v4533_v29 = vpop.f32.mrf.mxu3  ;;  %v10217_v20 = vor.u32 %v13559_v33, %v10214_v61  ;;  %v10798_v33 = vld [vmem:[#allocation13 + $0x558] sm:$0xf0] }
 0x405   : > { %v2826_v2 = vmax.f32 %v2824_v8, %v2825_v52  ;;  %v2847_v13 = vmax.f32 %v2845_v50, %v2846_v17  ;;  %v2457_v44 = vmax.f32 %v2266_v25, 0.0  ;;  %v13684_v52 = vld [vmem:[#allocation13 + $0x4ac] sm:$0xf]  ;;  %v10718_v17 = vld [vmem:[#allocation13 + $0x4b8] sm:$0xf0] }
 0x406   : > { %4840 = vmatpush.bf16.msrb.mxu1 %v10273_v47  ;;  %v16006_v51 = vsel %vm3204_vm1, %v3202_v27, %v3194_v49  ;;  %v10865_v47 = vor.u32 %v13720_v24, %v10862_v15  ;;  %v10846_v49 = vld [vmem:[#allocation13 + $0x5b8] sm:$0xf0]  ;;  %v10721_v29 = vor.u32 %v13684_v52, %v10718_v17  ;;  %v13680_v25 = vld [vmem:[#allocation13 + $0x48c] sm:$0xf]  ;;  %v13789_v24 = vld [vmem:[#allocation13 + $0x7ec] sm:$0xf0] }
 0x407   : > { %v2902_v30 = vpack.c.bf16 %v2826_v2, %v2826_v2  ;;  %v2903_v55 = vpack.c.bf16 %v2847_v13, %v2847_v13  ;;  %v2871_v63 = vmax.f32 %v2870_v39, %v2457_v44  ;;  %v10737_v39 = vor.u32 %v13688_v36, %v10734_v41  ;;  %v10182_v2 = vld [vmem:[#allocation13 + $0x90] sm:$0xf0]  ;;  %v10686_v44 = vld [vmem:[#allocation13 + $0x478] sm:$0xf0]  ;;  %v11124_v41 = vld [vmem:[#allocation13 + $0x7e0] sm:$0xf] }
 0x408   : > { %v10849_v13 = vor.u32 %v13716_v1, %v10846_v49  ;;  %v16029_v32 = vpack.c.b16 %v16006_v51, %v16006_v51  ;;  %v10654_v36 = vld [vmem:[#allocation13 + $0x438] sm:$0xf0]  ;;  %v10118_v52 = vld [vmem:[#allocation13 + $0x10] sm:$0xf0]  ;;  %v13627_v1 = vld [vmem:[#allocation13 + $0x2e4] sm:$0xf] }
 0x409   : > { %v3200_v28 = vunpack.c.l.b16 %v2902_v30  ;;  %v3201_v18 = vunpack.c.l.b16 %v2903_v55  ;;  %v13712_v30 = vld [vmem:[#allocation13 + $0x58c] sm:$0xf]  ;;  %v10830_v55 = vld [vmem:[#allocation13 + $0x598] sm:$0xf0]  ;;  %v10486_v49 = vld [vmem:[#allocation13 + $0x2f0] sm:$0xf0] }
 0x40a   : > { %v2268_v43 = vpop.f32.mrf.mxu1  ;;  %4841 = vmatpush.bf16.msrb.mxu1 %v10257_v37  ;;  %v10702_v37 = vld [vmem:[#allocation13 + $0x498] sm:$0xf0] }
 0x40b   : > { %v2269_v6 = vadd.f32 %v2268_v43, %v15763_v21  ;;  %v3209_v10 = vsel %vm3204_vm1, %v3200_v28, %v3192_v57  ;;  %v3210_v5 = vsel %vm3204_vm1, %v3201_v18, %v3193_v0  ;;  %v10185_v57 = vor.u32 %v13551_v53, %v10182_v2  ;;  %v10166_v0 = vld [vmem:[#allocation13 + $0x70] sm:$0xf0]  ;;  %v13676_v18 = vld [vmem:[#allocation13 + $0x46c] sm:$0xf]  ;;  %v10814_v43 = vld [vmem:[#allocation13 + $0x578] sm:$0xf0] }
 0x40c   : > { %v4544_v62 = vpop.f32.mrf.mxu2  ;;  %v4557_v48 = vpop.f32.mrf.mxu3  ;;  %v16011_v4 = vpack.c.b16 %v3209_v10, %v3209_v10  ;;  %v16013_v22 = vpack.c.b16 %v3210_v5, %v3210_v5  ;;  %v10705_v42 = vor.u32 %v13680_v25, %v10702_v37  ;;  %v10833_v28 = vor.u32 %v13712_v30, %v10830_v55  ;;  %v13543_v10 = vld [vmem:[#allocation13 + $0x44] sm:$0xf]  ;;  %v10150_v5 = vld [vmem:[#allocation13 + $0x50] sm:$0xf0]  ;;  %v13785_v53 = vld [vmem:[#allocation13 + $0x7cc] sm:$0xf0] }
 0x40d   : > { %v2465_v60 = vmax.f32 %v2269_v6, 0.0  ;;  %v4545_v23 = vadd.f32 %v4544_v62, %v4532_v14  ;;  %v13555_v14 = vld [vmem:[#allocation13 + $0xa4] sm:$0xf]  ;;  %v10169_v34 = vor.u32 %v13547_v45, %v10166_v0  ;;  %v10689_v6 = vor.u32 %v13676_v18, %v10686_v44  ;;  %v13672_v62 = vld [vmem:[#allocation13 + $0x44c] sm:$0xf] }
 0x40e   : > { %4569 = vmatmul.bf16.vlgmr.msra.gmra.mxu2 %v16011_v4  ;;  %4582 = vmatmul.bf16.vlgmr.msra.gmra.mxu3 %v16013_v22  ;;  %v10201_v59 = vor.u32 %v13555_v14, %v10198_v31  ;;  %v10153_v61 = vor.u32 %v13543_v10, %v10150_v5  ;;  %v11125_v14 = vor.u32 %v13789_v24, %v11124_v41  ;;  %v13696_v2 = vld [vmem:[#allocation13 + $0x50c] sm:$0xf]  ;;  %v10470_v45 = vld [vmem:[#allocation13 + $0x2d0] sm:$0xf0]  ;;  %v11092_v0 = vld [vmem:[#allocation13 + $0x7a0] sm:$0xf] }
 0x40f   : > { %v16017_v8 = vmax.f32 %v2871_v63, %v2465_v60  ;;  %v16019_v50 = vadd.f32 %v4557_v48, %v4545_v23  ;;  %4613 = vmatpush.bf16.msra.mxu2 %v10233_v40  ;;  %4777 = vmatmul.bf16.vlgmr.msra.gmra.mxu0 %v16011_v4  ;;  %v10817_v40 = vor.u32 %v13708_v7, %v10814_v43  ;;  %v10670_v48 = vld [vmem:[#allocation13 + $0x458] sm:$0xf0]  ;;  %v13539_v63 = vld [vmem:[#allocation13 + $0x24] sm:$0xf]  ;;  %v10134_v60 = vld [vmem:[#allocation13 + $0x30] sm:$0xf0] }
 0x410   : > { %4790 = vmatmul.bf16.vlgmr.msra.gmra.mxu1 %v16013_v22  ;;  %4873 = vmatpush.bf16.msra.mxu0 %v10753_v54  ;;  %v13704_v54 = vld [vmem:[#allocation13 + $0x54c] sm:$0xf]  ;;  %v10673_v51 = vor.u32 %v13672_v62, %v10670_v48  ;;  %v10137_v31 = vor.u32 %v13539_v63, %v10134_v60  ;;  %v10489_v30 = vor.u32 %v13627_v1, %v10486_v49  ;;  %v13619_v43 = vld [vmem:[#allocation13 + $0x2a4] sm:$0xf]  ;;  %v13777_v10 = vld [vmem:[#allocation13 + $0x78c] sm:$0xf0] }
 0x411   : > { %4886 = vmatpush.bf16.msra.mxu1 %v10881_v38  ;;  %v13668_v23 = vld [vmem:[#allocation13 + $0x42c] sm:$0xf]  ;;  %v10801_v38 = vor.u32 %v13704_v54, %v10798_v33  ;;  %4600 = vmatpush.bf16.msrb.mxu3 %v11125_v14  ;;  %v13615_v62 = vld [vmem:[#allocation13 + $0x284] sm:$0xf]  ;;  %v10438_v48 = vld [vmem:[#allocation13 + $0x290] sm:$0xf0] }
 0x412   : > { %v16023_v16 = vpop.f32.mrf.mxu1  ;;  %v10657_v17 = vor.u32 %v13668_v23, %v10654_v36  ;;  %v11060_v54 = vld [vmem:[#allocation13 + $0x760] sm:$0xf]  ;;  %v13773_v33 = vld [vmem:[#allocation13 + $0x76c] sm:$0xf0]  ;;  %v10441_v63 = vor.u32 %v13615_v62, %v10438_v48  ;;  %v13611_v60 = vld [vmem:[#allocation13 + $0x264] sm:$0xf] }
 0x413   : > { %4614 = vmatpush.bf16.msra.mxu2 %v10217_v20  ;;  %v13700_v20 = vld [vmem:[#allocation13 + $0x52c] sm:$0xf]  ;;  %v10422_v23 = vld [vmem:[#allocation13 + $0x270] sm:$0xf0]  ;;  %v13607_v24 = vld [vmem:[#allocation13 + $0x244] sm:$0xf] }
 0x414   : > { %4874 = vmatpush.bf16.msra.mxu0 %v10737_v39  ;;  %v4546_v27 = vpop.f32.mrf.mxu2  ;;  %v4559_v46 = vpop.f32.mrf.mxu3  ;;  %v10782_v39 = vld [vmem:[#allocation13 + $0x538] sm:$0xf0]  ;;  %v10425_v41 = vor.u32 %v13611_v60, %v10422_v23  ;;  %v13765_v14 = vld [vmem:[#allocation13 + $0x72c] sm:$0xf0]  ;;  %v10390_v1 = vld [vmem:[#allocation13 + $0x230] sm:$0xf0] }
 0x415   : > { %4887 = vmatpush.bf16.msra.mxu1 %v10865_v47  ;;  %v13535_v47 = vld [vmem:[#allocation13 + $0x4] sm:$0xf]  ;;  %v10785_v27 = vor.u32 %v13700_v20, %v10782_v39  ;;  %v10638_v46 = vld [vmem:[#allocation13 + $0x418] sm:$0xf0]  ;;  %v10406_v20 = vld [vmem:[#allocation13 + $0x250] sm:$0xf0] }
 0x416   : > { %v10121_v37 = vor.u32 %v13535_v47, %v10118_v52  ;;  %v11028_v39 = vld [vmem:[#allocation13 + $0x720] sm:$0xf]  ;;  %v10409_v52 = vor.u32 %v13607_v24, %v10406_v20  ;;  %v10710_v62 = vld [vmem:[#allocation13 + $0x4b0] sm:$0xf0]  ;;  %v13583_v48 = vld [vmem:[#allocation13 + $0x184] sm:$0xf] }
 0x417   : > { %4615 = vmatpush.bf16.msra.mxu2 %v10201_v59  ;;  %v13664_v59 = vld [vmem:[#allocation13 + $0x40c] sm:$0xf]  ;;  %v11029_v47 = vor.u32 %v13765_v14, %v11028_v39  ;;  %v11012_v49 = vld [vmem:[#allocation13 + $0x700] sm:$0xf] }
 0x418   : > { %4875 = vmatpush.bf16.msra.mxu0 %v10721_v29  ;;  %v11108_v29 = vld [vmem:[#allocation13 + $0x7c0] sm:$0xf]  ;;  %v10641_v55 = vor.u32 %v13664_v59, %v10638_v46  ;;  %v13761_v59 = vld [vmem:[#allocation13 + $0x70c] sm:$0xf0]  ;;  %v13595_v46 = vld [vmem:[#allocation13 + $0x1e4] sm:$0xf] }
 0x419   : > { %4888 = vmatpush.bf16.msra.mxu1 %v10849_v13  ;;  %v10766_v13 = vld [vmem:[#allocation13 + $0x518] sm:$0xf0]  ;;  %v11109_v25 = vor.u32 %v13785_v53, %v11108_v29  ;;  %v10358_v29 = vld [vmem:[#allocation13 + $0x1f0] sm:$0xf0] }
 0x41a   : > { %v16025_v35 = vpop.f32.mrf.mxu1  ;;  %v10361_v53 = vor.u32 %v13595_v46, %v10358_v29 }
 0x41b   : > { %4616 = vmatpush.bf16.msra.mxu2 %v10185_v57  ;;  %v13623_v57 = vld [vmem:[#allocation13 + $0x2c4] sm:$0xf]  ;;  %4601 = vmatpush.bf16.msrb.mxu3 %v11109_v25  ;;  %v10374_v25 = vld [vmem:[#allocation13 + $0x210] sm:$0xf0]  ;;  %v2274_v60 = vadd.f32 %v16025_v35, %v15763_v21 }
 0x41c   : > { %4876 = vmatpush.bf16.msra.mxu0 %v10705_v42  ;;  %v10769_v42 = vor.u32 %v13696_v2, %v10766_v13  ;;  %v10473_v7 = vor.u32 %v13623_v57, %v10470_v45  ;;  %v13599_v13 = vld [vmem:[#allocation13 + $0x204] sm:$0xf] }
 0x41d   : > { %4889 = vmatpush.bf16.msra.mxu1 %v10833_v28  ;;  %v13781_v28 = vld [vmem:[#allocation13 + $0x7ac] sm:$0xf0]  ;;  %v13591_v57 = vld [vmem:[#allocation13 + $0x1c4] sm:$0xf]  ;;  %v2481_v14 = vmax.f32 %v2274_v60, 0.0 }
 0x41e   : > { %4595 = vmatmul.bf16.vlgmr.msrb.gmra.mxu2 %v16029_v32  ;;  %v11093_v44 = vor.u32 %v13781_v28, %v11092_v0  ;;  %v10377_v0 = vor.u32 %v13599_v13, %v10374_v25  ;;  %v13675_v35 = vld [vmem:[#allocation13 + $0x464] sm:$0xf]  ;;  %v10630_v60 = vld [vmem:[#allocation13 + $0x410] sm:$0xf0] }
 0x41f   : > { %4617 = vmatpush.bf16.msra.mxu2 %v10169_v34  ;;  %4829 = vmatmul.bf16.vlgmr.msrb.gmra.mxu0 %v15782_v3  ;;  %v10454_v34 = vld [vmem:[#allocation13 + $0x2b0] sm:$0xf0]  ;;  %v13671_v25 = vld [vmem:[#allocation13 + $0x444] sm:$0xf] }
 0x420   : > { %4842 = vmatmul.bf16.vlgmr.msrb.gmra.mxu1 %v15786_v9  ;;  %4877 = vmatpush.bf16.msra.mxu0 %v10689_v6  ;;  %v11076_v6 = vld [vmem:[#allocation13 + $0x780] sm:$0xf] }
 0x421   : > { %4890 = vmatpush.bf16.msra.mxu1 %v10817_v40  ;;  %4602 = vmatpush.bf16.msrb.mxu3 %v11093_v44  ;;  %v11077_v5 = vor.u32 %v13777_v10, %v11076_v6  ;;  %v10457_v40 = vor.u32 %v13619_v43, %v10454_v34  ;;  %v13687_v44 = vld [vmem:[#allocation13 + $0x4c4] sm:$0xf]  ;;  %v10326_v34 = vld [vmem:[#allocation13 + $0x1b0] sm:$0xf0] }
 0x422   : > { %v16034_v15 = vpop.f32.mrf.mxu1  ;;  %v13587_v43 = vld [vmem:[#allocation13 + $0x1a4] sm:$0xf] }
 0x423   : > { %4618 = vmatpush.bf16.msra.mxu2 %v10153_v61  ;;  %v10329_v6 = vor.u32 %v13587_v43, %v10326_v34  ;;  %v10646_v34 = vld [vmem:[#allocation13 + $0x430] sm:$0xf0] }
 0x424   : > { %4878 = vmatpush.bf16.msra.mxu0 %v10673_v51  ;;  %v11061_v51 = vor.u32 %v13773_v33, %v11060_v54  ;;  %v10310_v54 = vld [vmem:[#allocation13 + $0x190] sm:$0xf0]  ;;  %v2271_v33 = vadd.f32 %v16023_v16, %v15763_v21  ;;  %v2276_v16 = vadd.f32 %v16034_v15, %v15763_v21 }
 0x425   : > { %4891 = vmatpush.bf16.msra.mxu1 %v10801_v38  ;;  %4603 = vmatpush.bf16.msrb.mxu3 %v11077_v5  ;;  %v13769_v38 = vld [vmem:[#allocation13 + $0x74c] sm:$0xf0]  ;;  %v13683_v5 = vld [vmem:[#allocation13 + $0x4a4] sm:$0xf] }
 0x426   : > { %v10713_v23 = vor.u32 %v13683_v5, %v10710_v62  ;;  %v2473_v24 = vmax.f32 %v2271_v33, 0.0 }
 0x427   : > { %4619 = vmatpush.bf16.msra.mxu2 %v10137_v31 }
 0x428   : > { %4879 = vmatpush.bf16.msra.mxu0 %v10657_v17  ;;  %v13603_v17 = vld [vmem:[#allocation13 + $0x224] sm:$0xf] }
 0x429   : > { %4892 = vmatpush.bf16.msra.mxu1 %v10785_v27  ;;  %4604 = vmatpush.bf16.msrb.mxu3 %v11061_v51  ;;  %v11013_v27 = vor.u32 %v13761_v59, %v11012_v49  ;;  %v10393_v2 = vor.u32 %v13603_v17, %v10390_v1  ;;  %v10313_v51 = vor.u32 %v13583_v48, %v10310_v54  ;;  %v10678_v17 = vld [vmem:[#allocation13 + $0x470] sm:$0xf0]  ;;  %v13575_v1 = vld [vmem:[#allocation13 + $0x144] sm:$0xf] }
 0x42a   : > { %v16036_v18 = vpop.f32.mrf.mxu1  ;;  %v10278_v49 = vld [vmem:[#allocation13 + $0x150] sm:$0xf0]  ;;  %v2873_v59 = vmax.f32 %v16017_v8, %v2473_v24  ;;  %v10681_v13 = vor.u32 %v13675_v35, %v10678_v17 }
 0x42b   : > { %4620 = vmatpush.bf16.msra.mxu2 %v10121_v37  ;;  %v13691_v37 = vld [vmem:[#allocation13 + $0x4e4] sm:$0xf]  ;;  %v10281_v46 = vor.u32 %v13575_v1, %v10278_v49  ;;  %v10982_v17 = vld [vmem:[#allocation13 + $0x6d0] sm:$0xf0]  ;;  %v3166_v1 = vperm.slane %v16000_v11, 2 }
 0x42c   : > { %4880 = vmatpush.bf16.msra.mxu0 %v10641_v55  ;;  %v10742_v55 = vld [vmem:[#allocation13 + $0x4f0] sm:$0xf0] }
 0x42d   : > { %4893 = vmatpush.bf16.msra.mxu1 %v10769_v42  ;;  %v10342_v42 = vld [vmem:[#allocation13 + $0x1d0] sm:$0xf0]  ;;  %v10745_v28 = vor.u32 %v13691_v37, %v10742_v55  ;;  %v13571_v55 = vld [vmem:[#allocation13 + $0x124] sm:$0xf] }
 0x42e   : > { %4621 = vmatmul.bf16.vlgmr.msra.gmra.mxu2 %v15782_v3  ;;  %v11044_v3 = vld [vmem:[#allocation13 + $0x740] sm:$0xf]  ;;  %v10345_v45 = vor.u32 %v13591_v57, %v10342_v42  ;;  %v10662_v37 = vld [vmem:[#allocation13 + $0x450] sm:$0xf0] }
 0x42f   : > { %4639 = vmatpush.bf16.msrb.mxu2 %v10489_v30  ;;  %4881 = vmatmul.bf16.vlgmr.msra.gmra.mxu0 %v16011_v4  ;;  %v11045_v36 = vor.u32 %v13769_v38, %v11044_v3  ;;  %v13679_v3 = vld [vmem:[#allocation13 + $0x484] sm:$0xf]  ;;  %v10694_v38 = vld [vmem:[#allocation13 + $0x490] sm:$0xf0] }
 0x430   : > { %4894 = vmatmul.bf16.vlgmr.msra.gmra.mxu1 %v16013_v22  ;;  %v10262_v57 = vld [vmem:[#allocation13 + $0x130] sm:$0xf0] }
 0x431   : > { %4605 = vmatpush.bf16.msrb.mxu3 %v11045_v36  ;;  %v13579_v36 = vld [vmem:[#allocation13 + $0x164] sm:$0xf] }
 0x432   : > { %v16041_v61 = vpop.f32.mrf.mxu1 }
 0x433   : > { %4640 = vmatpush.bf16.msrb.mxu2 %v10473_v7  ;;  %v10726_v7 = vld [vmem:[#allocation13 + $0x4d0] sm:$0xf0]  ;;  %v2281_v15 = vadd.f32 %v16041_v61, %v15763_v21 }
 0x434   : > { %v10729_v10 = vor.u32 %v13687_v44, %v10726_v7  ;;  %v13667_v7 = vld [vmem:[#allocation13 + $0x424] sm:$0xf] }
 0x435   : > { %4606 = vmatpush.bf16.msrb.mxu3 %v11029_v47  ;;  %v10697_v47 = vor.u32 %v13679_v3, %v10694_v38  ;;  %v2505_v42 = vmax.f32 %v2281_v15, 0.0 }
 0x437   : > { %4641 = vmatpush.bf16.msrb.mxu2 %v10457_v40 }
 0x439   : > { %4607 = vmatpush.bf16.msrb.mxu3 %v11013_v27  ;;  %v2489_v27 = vmax.f32 %v2276_v16, 0.0 }
 0x43a   : > { %v16043_v31 = vpop.f32.mrf.mxu1 }
 0x43b   : > { %4642 = vmatpush.bf16.msrb.mxu2 %v10441_v63  ;;  %v2256_v63 = vadd.f32 %v15942_v58, %v15763_v21  ;;  %v2279_v58 = vadd.f32 %v16036_v18, %v15763_v21  ;;  %v2284_v18 = vadd.f32 %v16043_v31, %v15763_v21  ;;  %v10665_v31 = vor.u32 %v13671_v25, %v10662_v37 }
 0x43d   : > { %4626 = vmatpush.bf16.msra.mxu3 %v10361_v53  ;;  %v2425_v39 = vmax.f32 %v2256_v63, 0.0  ;;  %v2874_v53 = vmax.f32 %v2873_v59, %v2481_v14  ;;  %v10649_v63 = vor.u32 %v13667_v7, %v10646_v34  ;;  %v10918_v34 = vld [vmem:[#allocation13 + $0x650] sm:$0xf0] }
 0x43f   : > { %4643 = vmatpush.bf16.msrb.mxu2 %v10425_v41  ;;  %v10294_v41 = vld [vmem:[#allocation13 + $0x170] sm:$0xf0]  ;;  %v2715_v29 = vmax.f32 %v15937_v26, %v2425_v39  ;;  %v2875_v8 = vmax.f32 %v2874_v53, %v2489_v27 }
 0x440   : > { %v10297_v20 = vor.u32 %v13579_v36, %v10294_v41  ;;  %v13755_v36 = vld [vmem:[#allocation13 + $0x6e4] sm:$0xf]  ;;  %v10998_v41 = vld [vmem:[#allocation13 + $0x6f0] sm:$0xf0] }
 0x441   : > { %4627 = vmatpush.bf16.msra.mxu3 %v10345_v45  ;;  %v10265_v45 = vor.u32 %v13571_v55, %v10262_v57  ;;  %v11001_v14 = vor.u32 %v13755_v36, %v10998_v41  ;;  %v10966_v53 = vld [vmem:[#allocation13 + $0x6b0] sm:$0xf0]  ;;  %v13743_v57 = vld [vmem:[#allocation13 + $0x684] sm:$0xf]  ;;  %v10492_v41 = vld [vmem:[#allocation13 + $0x2e8] sm:$0xf] }
 0x442   : > { %v16045_v30 = vpop.f32.mrf.mxu1  ;;  %v10886_v36 = vld [vmem:[#allocation13 + $0x610] sm:$0xf0] }
 0x443   : > { %4644 = vmatpush.bf16.msrb.mxu2 %v10409_v52  ;;  %v2286_v61 = vadd.f32 %v16045_v30, %v15763_v21 }
 0x445   : > { %4628 = vmatpush.bf16.msra.mxu3 %v10329_v6  ;;  %v13567_v6 = vld [vmem:[#allocation13 + $0x104] sm:$0xf]  ;;  %v2521_v62 = vmax.f32 %v2286_v61, 0.0 }
 0x447   : > { %4645 = vmatpush.bf16.msrb.mxu2 %v10393_v2  ;;  %v2497_v2 = vmax.f32 %v2279_v58, 0.0 }
 0x449   : > { %4629 = vmatpush.bf16.msra.mxu3 %v10313_v51  ;;  %v2876_v26 = vmax.f32 %v2875_v8, %v2497_v2  ;;  %v4727_v2 = vadd.f32 %v15998_v56, %v3166_v1  ;;  %v10950_v8 = vld [vmem:[#allocation13 + $0x690] sm:$0xf0] }
 0x44a   : > { %v2288_v40 = vpop.f32.mrf.mxu1  ;;  %v10953_v61 = vor.u32 %v13743_v57, %v10950_v8  ;;  %v10566_v1 = vld [vmem:[#allocation13 + $0x390] sm:$0xf0]  ;;  %v10428_v8 = vld [vmem:[#allocation13 + $0x268] sm:$0xf] }
 0x44b   : > { %4646 = vmatpush.bf16.msrb.mxu2 %v10377_v0  ;;  %v2716_v0 = vrot.slane %v2715_v29, 4  ;;  %v2289_v44 = vadd.f32 %v2288_v40, %v15763_v21  ;;  %v2877_v5 = vmax.f32 %v2876_v26, %v2505_v42  ;;  %v13663_v40 = vld [vmem:[#allocation13 + $0x404] sm:$0xf] }
 0x44c   : > { %v13739_v26 = vld [vmem:[#allocation13 + $0x664] sm:$0xf] }
 0x44d   : > { %4630 = vmatpush.bf16.msra.mxu3 %v10297_v20  ;;  %v2529_v33 = vmax.f32 %v2289_v44, 0.0  ;;  %v10633_v20 = vor.u32 %v13663_v40, %v10630_v60 }
 0x44e   : > { %4647 = vmatmul.bf16.vlgmr.msrb.gmra.mxu2 %v15801_v19 }
 0x44f   : > { %4665 = vmatpush.bf16.msra.mxu2 %v10745_v28  ;;  %v2513_v28 = vmax.f32 %v2284_v18, 0.0 }
 0x451   : > { %4631 = vmatpush.bf16.msra.mxu3 %v10281_v46  ;;  %v2878_v30 = vmax.f32 %v2877_v5, %v2513_v28  ;;  %v10934_v28 = vld [vmem:[#allocation13 + $0x670] sm:$0xf0]  ;;  %v13659_v5 = vld [vmem:[#allocation13 + $0x3e4] sm:$0xf] }
 0x452   : > { %v2290_v52 = vpop.f32.mrf.mxu1  ;;  %v10937_v44 = vor.u32 %v13739_v26, %v10934_v28  ;;  %v10518_v26 = vld [vmem:[#allocation13 + $0x330] sm:$0xf0] }
 0x453   : > { %4666 = vmatpush.bf16.msra.mxu2 %v10729_v10  ;;  %v10246_v10 = vld [vmem:[#allocation13 + $0x110] sm:$0xf0]  ;;  %v2291_v48 = vadd.f32 %v2290_v52, %v15763_v21  ;;  %v2879_v3 = vmax.f32 %v2878_v30, %v2521_v62  ;;  %v13751_v52 = vld [vmem:[#allocation13 + $0x6c4] sm:$0xf] }
 0x454   : > { %v10249_v54 = vor.u32 %v13567_v6, %v10246_v10  ;;  %v10985_v27 = vor.u32 %v13751_v52, %v10982_v17  ;;  %v10614_v62 = vld [vmem:[#allocation13 + $0x3f0] sm:$0xf0]  ;;  %v13731_v30 = vld [vmem:[#allocation13 + $0x624] sm:$0xf] }
 0x455   : > { %4632 = vmatpush.bf16.msra.mxu3 %v10265_v45  ;;  %v2537_v38 = vmax.f32 %v2291_v48, 0.0  ;;  %v2880_v24 = vmax.f32 %v2879_v3, %v2529_v33  ;;  %v10902_v33 = vld [vmem:[#allocation13 + $0x630] sm:$0xf0]  ;;  %v13647_v17 = vld [vmem:[#allocation13 + $0x384] sm:$0xf] }
 0x456   : > { %v10905_v60 = vor.u32 %v13731_v30, %v10902_v33  ;;  %v10598_v3 = vld [vmem:[#allocation13 + $0x3d0] sm:$0xf0]  ;;  %v13606_v30 = vld [vmem:[#allocation13 + $0x234] sm:$0xf0] }
 0x457   : > { %4667 = vmatpush.bf16.msra.mxu2 %v10713_v23  ;;  %v2717_v23 = vmax.f32 %v2715_v29, %v2716_v0  ;;  %v13747_v29 = vld [vmem:[#allocation13 + $0x6a4] sm:$0xf] }
 0x459   : > { %4633 = vmatpush.bf16.msra.mxu3 %v10249_v54  ;;  %v2718_v58 = vrot.slane %v2717_v23, 2 }
 0x45a   : > { %v2293_v43 = vpop.f32.mrf.mxu1 }
 0x45b   : > { %4668 = vmatpush.bf16.msra.mxu2 %v10697_v47  ;;  %v2294_v51 = vadd.f32 %v2293_v43, %v15763_v21  ;;  %v2881_v47 = vmax.f32 %v2880_v24, %v2537_v38  ;;  %v2719_v15 = vmax.f32 %v2717_v23, %v2718_v58  ;;  %v13735_v43 = vld [vmem:[#allocation13 + $0x644] sm:$0xf]  ;;  %v13630_v24 = vld [vmem:[#allocation13 + $0x2f4] sm:$0xf0] }
 0x45c   : > { %v10921_v10 = vor.u32 %v13735_v43, %v10918_v34  ;;  %v13655_v23 = vld [vmem:[#allocation13 + $0x3c4] sm:$0xf]  ;;  %v10493_v58 = vor.u32 %v13630_v24, %v10492_v41  ;;  %v3167_v24 = vperm.slane %v16000_v11, 3 }
 0x45d   : > { %v2545_v16 = vmax.f32 %v2294_v51, 0.0  ;;  %v2720_v25 = vrot.slane %v2719_v15, 1  ;;  %v13727_v38 = vld [vmem:[#allocation13 + $0x604] sm:$0xf] }
 0x45e   : > { %v13631_v34 = vld [vmem:[#allocation13 + $0x304] sm:$0xf] }
 0x45f   : > { %4669 = vmatpush.bf16.msra.mxu2 %v10681_v13  ;;  %v2882_v49 = vmax.f32 %v2881_v47, %v2545_v16  ;;  %v10969_v13 = vor.u32 %v13747_v29, %v10966_v53  ;;  %v2721_v45 = vmax.f32 %v2719_v15, %v2720_v25  ;;  %v10601_v16 = vor.u32 %v13655_v23, %v10598_v3  ;;  %v10476_v47 = vld [vmem:[#allocation13 + $0x2c8] sm:$0xf]  ;;  %v10550_v29 = vld [vmem:[#allocation13 + $0x370] sm:$0xf0]  ;;  %v13719_v23 = vld [vmem:[#allocation13 + $0x5c4] sm:$0xf] }
 0x460   : > { %v10569_v15 = vor.u32 %v13647_v17, %v10566_v1  ;;  %v10534_v25 = vld [vmem:[#allocation13 + $0x350] sm:$0xf0]  ;;  %v13711_v11 = vld [vmem:[#allocation13 + $0x584] sm:$0xf] }
 0x461   : > { %v10854_v3 = vld [vmem:[#allocation13 + $0x5d0] sm:$0xf0] }
 0x462   : > { %v2295_v39 = vpop.f32.mrf.mxu1 }
 0x463   : > { %4670 = vmatpush.bf16.msra.mxu2 %v10665_v31  ;;  %v2296_v35 = vadd.f32 %v2295_v39, %v15763_v21  ;;  %v2897_v31 = vpack.c.bf16 %v2721_v45, %v2721_v45  ;;  %v13651_v39 = vld [vmem:[#allocation13 + $0x3a4] sm:$0xf] }
 0x465   : > { %v2553_v59 = vmax.f32 %v2296_v35, 0.0  ;;  %v3195_v48 = vunpack.c.l.b16 %v2897_v31  ;;  %v13626_v35 = vld [vmem:[#allocation13 + $0x2d4] sm:$0xf0] }
 0x467   : > { %4671 = vmatpush.bf16.msra.mxu2 %v10649_v63  ;;  %v2883_v46 = vmax.f32 %v2882_v49, %v2553_v59  ;;  %v10617_v63 = vor.u32 %v13659_v5, %v10614_v62  ;;  %v10477_v49 = vor.u32 %v13626_v35, %v10476_v47  ;;  %v10460_v59 = vld [vmem:[#allocation13 + $0x2a8] sm:$0xf]  ;;  %v10870_v5 = vld [vmem:[#allocation13 + $0x5f0] sm:$0xf0] }
 0x468   : > { %v10838_v47 = vld [vmem:[#allocation13 + $0x5b0] sm:$0xf0] }
 0x469   : > { %v2884_v18 = vrot.slane %v2883_v46, 4 }
 0x46a   : > { %v4739_v21 = vpop.f32.mrf.mxu1 }
 0x46b   : > { %4672 = vmatpush.bf16.msra.mxu2 %v10633_v20  ;;  %v2885_v37 = vmax.f32 %v2883_v46, %v2884_v18  ;;  %v16073_v55 = vadd.f32 %v4739_v21, %v4727_v2  ;;  %v10889_v20 = vor.u32 %v13727_v38, %v10886_v36  ;;  %v13643_v46 = vld [vmem:[#allocation13 + $0x364] sm:$0xf]  ;;  %v10444_v2 = vld [vmem:[#allocation13 + $0x288] sm:$0xf]  ;;  %v13618_v18 = vld [vmem:[#allocation13 + $0x294] sm:$0xf0] }
 0x46c   : > { %v10553_v21 = vor.u32 %v13643_v46, %v10550_v29  ;;  %v10380_v38 = vld [vmem:[#allocation13 + $0x208] sm:$0xf]  ;;  %v10822_v46 = vld [vmem:[#allocation13 + $0x590] sm:$0xf0] }
 0x46d   : > { %v2886_v42 = vrot.slane %v2885_v37, 2 }
 0x46e   : > { %4673 = vmatmul.bf16.vlgmr.msra.gmra.mxu2 %v16011_v4 }
 0x46f   : > { %4691 = vmatpush.bf16.msrb.mxu2 %v11001_v14  ;;  %v2887_v0 = vmax.f32 %v2885_v37, %v2886_v42  ;;  %v10582_v14 = vld [vmem:[#allocation13 + $0x3b0] sm:$0xf0]  ;;  %v10445_v37 = vor.u32 %v13618_v18, %v10444_v2  ;;  %v13614_v42 = vld [vmem:[#allocation13 + $0x274] sm:$0xf0]  ;;  %v10972_v2 = vld [vmem:[#allocation13 + $0x6a8] sm:$0xf] }
 0x470   : > { %v10585_v52 = vor.u32 %v13651_v39, %v10582_v14  ;;  %v10429_v28 = vor.u32 %v13614_v42, %v10428_v8  ;;  %v10857_v39 = vor.u32 %v13719_v23, %v10854_v3  ;;  %v13750_v18 = vld [vmem:[#allocation13 + $0x6b4] sm:$0xf0]  ;;  %v11126_v23 = vld [vmem:[#allocation13 + $0x7f0] sm:$0xf0] }
 0x471   : > { %v2888_v4 = vrot.slane %v2887_v0, 1  ;;  %v10973_v42 = vor.u32 %v13750_v18, %v10972_v2  ;;  %v10478_v2 = vld [vmem:[#allocation13 + $0x2d8] sm:$0xf0] }
 0x472   : > { %v4741_v56 = vpop.f32.mrf.mxu1 }
 0x473   : > { %4692 = vmatpush.bf16.msrb.mxu2 %v10985_v27  ;;  %v2889_v7 = vmax.f32 %v2887_v0, %v2888_v4  ;;  %v13622_v27 = vld [vmem:[#allocation13 + $0x2b4] sm:$0xf0]  ;;  %v13635_v0 = vld [vmem:[#allocation13 + $0x324] sm:$0xf]  ;;  %v10412_v4 = vld [vmem:[#allocation13 + $0x248] sm:$0xf] }
 0x474   : > { %v10461_v53 = vor.u32 %v13622_v27, %v10460_v59  ;;  %v13610_v56 = vld [vmem:[#allocation13 + $0x254] sm:$0xf0] }
 0x475   : > { %v2905_v6 = vpack.c.bf16 %v2889_v7, %v2889_v7  ;;  %v10521_v7 = vor.u32 %v13635_v0, %v10518_v26  ;;  %v13754_v59 = vld [vmem:[#allocation13 + $0x6d4] sm:$0xf0]  ;;  %v10956_v0 = vld [vmem:[#allocation13 + $0x688] sm:$0xf] }
 0x476   : > { %v13746_v26 = vld [vmem:[#allocation13 + $0x694] sm:$0xf0] }
 0x477   : > { %4693 = vmatpush.bf16.msrb.mxu2 %v10969_v13  ;;  %v3203_v54 = vunpack.c.l.b16 %v2905_v6  ;;  %v13639_v13 = vld [vmem:[#allocation13 + $0x344] sm:$0xf]  ;;  %v10413_v6 = vor.u32 %v13610_v56, %v10412_v4  ;;  %v10790_v56 = vld [vmem:[#allocation13 + $0x550] sm:$0xf0] }
 0x478   : > { %v10537_v45 = vor.u32 %v13639_v13, %v10534_v25  ;;  %v10825_v13 = vor.u32 %v13711_v11, %v10822_v46  ;;  %v13707_v25 = vld [vmem:[#allocation13 + $0x564] sm:$0xf]  ;;  %v11196_v46 = vld [vmem:[#allocation16 + $0x70] sm:$0xf] }
 0x479   : > { %v3212_v51 = vsel %vm3204_vm1, %v3203_v54, %v3195_v48  ;;  %v10396_v54 = vld [vmem:[#allocation13 + $0x228] sm:$0xf]  ;;  %v13703_v4 = vld [vmem:[#allocation13 + $0x544] sm:$0xf] }
 0x47a   : > { %v16076_v40 = vpack.c.b16 %v3212_v51, %v3212_v51 }
 0x47b   : > { %4694 = vmatpush.bf16.msrb.mxu2 %v10953_v61 }
 0x47c   : > { %4608 = vmatmul.bf16.vlgmr.msrb.gmra.mxu3 %v16076_v40 }
 0x47d   : > { %4652 = vmatpush.bf16.msrb.mxu3 %v10617_v63 }
 0x47f   : > { %4695 = vmatpush.bf16.msrb.mxu2 %v10937_v44 }
 0x481   : > { %4653 = vmatpush.bf16.msrb.mxu3 %v10601_v16  ;;  %v11004_v16 = vld [vmem:[#allocation13 + $0x6e8] sm:$0xf] }
 0x483   : > { %4696 = vmatpush.bf16.msrb.mxu2 %v10921_v10  ;;  %v13723_v10 = vld [vmem:[#allocation13 + $0x5e4] sm:$0xf] }
 0x484   : > { %v10873_v63 = vor.u32 %v13723_v10, %v10870_v5 }
 0x485   : > { %4654 = vmatpush.bf16.msrb.mxu3 %v10585_v52 }
 0x487   : > { %4697 = vmatpush.bf16.msrb.mxu2 %v10905_v60  ;;  %v10397_v60 = vor.u32 %v13606_v30, %v10396_v54  ;;  %v13738_v54 = vld [vmem:[#allocation13 + $0x654] sm:$0xf0] }
 0x489   : > { %4655 = vmatpush.bf16.msrb.mxu3 %v10569_v15 }
 0x48b   : > { %4698 = vmatpush.bf16.msrb.mxu2 %v10889_v20  ;;  %v13758_v20 = vld [vmem:[#allocation13 + $0x6f4] sm:$0xf0] }
 0x48c   : > { %v16080_v57 = vpop.f32.mrf.mxu0  ;;  %4634 = vmatmul.bf16.vlgmr.msra.gmra.mxu3 %v15786_v9  ;;  %v10502_v9 = vld [vmem:[#allocation13 + $0x310] sm:$0xf0]  ;;  %v11005_v52 = vor.u32 %v13758_v20, %v11004_v16  ;;  %v13783_v20 = vld [vmem:[#allocation13 + $0x7c4] sm:$0xf] }
 0x48d   : > { %v16083_v61 = vpop.f32.mrf.mxu1  ;;  %4656 = vmatpush.bf16.msrb.mxu3 %v10553_v21  ;;  %v10505_v51 = vor.u32 %v13631_v34, %v10502_v9  ;;  %v10793_v34 = vor.u32 %v13703_v4, %v10790_v56  ;;  %v13699_v9 = vld [vmem:[#allocation13 + $0x524] sm:$0xf]  ;;  %v11062_v56 = vld [vmem:[#allocation13 + $0x770] sm:$0xf0] }
 0x48e   : > { %4699 = vmatmul.bf16.vlgmr.msrb.gmra.mxu2 %v16029_v32  ;;  %v13771_v4 = vld [vmem:[#allocation13 + $0x764] sm:$0xf] }
 0x48f   : > { %4743 = vmatpush.bf16.msra.mxu2 %v10493_v58  ;;  %v13715_v58 = vld [vmem:[#allocation13 + $0x5a4] sm:$0xf] }
 0x490   : > { %v10841_v27 = vor.u32 %v13715_v58, %v10838_v47  ;;  %v10892_v58 = vld [vmem:[#allocation13 + $0x608] sm:$0xf]  ;;  %v13730_v47 = vld [vmem:[#allocation13 + $0x614] sm:$0xf0] }
 0x491   : > { %4657 = vmatpush.bf16.msrb.mxu3 %v10537_v45  ;;  %v4570_v44 = vpop.f32.mrf.mxu2  ;;  %v4583_v31 = vpop.f32.mrf.mxu3 }
 0x492   : > { %v4571_v43 = vadd.f32 %v4570_v44, %v16019_v50  ;;  %v13602_v50 = vld [vmem:[#allocation13 + $0x214] sm:$0xf0]  ;;  %v10957_v44 = vor.u32 %v13746_v26, %v10956_v0  ;;  %v13620_v0 = vld [vmem:[#allocation13 + $0x2ac] sm:$0xf]  ;;  %v10462_v26 = vld [vmem:[#allocation13 + $0x2b8] sm:$0xf0] }
 0x493   : > { %4744 = vmatpush.bf16.msra.mxu2 %v10477_v49  ;;  %v10381_v14 = vor.u32 %v13602_v50, %v10380_v38  ;;  %v10988_v49 = vld [vmem:[#allocation13 + $0x6c8] sm:$0xf]  ;;  %v13734_v50 = vld [vmem:[#allocation13 + $0x634] sm:$0xf0] }
 0x494   : > { %v4584_v62 = vadd.f32 %v4583_v31, %v4571_v43  ;;  %v4780_v48 = vpop.f32.mrf.mxu0  ;;  %v10989_v29 = vor.u32 %v13754_v59, %v10988_v49  ;;  %v13742_v43 = vld [vmem:[#allocation13 + $0x674] sm:$0xf0]  ;;  %v10908_v38 = vld [vmem:[#allocation13 + $0x628] sm:$0xf]  ;;  %v13779_v49 = vld [vmem:[#allocation13 + $0x7a4] sm:$0xf] }
 0x495   : > { %v4793_v33 = vpop.f32.mrf.mxu1  ;;  %4658 = vmatpush.bf16.msrb.mxu3 %v10521_v7  ;;  %v10940_v7 = vld [vmem:[#allocation13 + $0x668] sm:$0xf]  ;;  %v10909_v16 = vor.u32 %v13734_v50, %v10908_v38  ;;  %v11094_v59 = vld [vmem:[#allocation13 + $0x7b0] sm:$0xf0]  ;;  %v13763_v38 = vld [vmem:[#allocation13 + $0x724] sm:$0xf] }
 0x496   : > { %v10941_v5 = vor.u32 %v13742_v43, %v10940_v7  ;;  %v10924_v48 = vld [vmem:[#allocation13 + $0x648] sm:$0xf]  ;;  %v13695_v33 = vld [vmem:[#allocation13 + $0x504] sm:$0xf]  ;;  %v13802_v7 = vld [vmem:[#allocation16 + $0x54] sm:$0xf0] }
 0x497   : > { %4745 = vmatpush.bf16.msra.mxu2 %v10461_v53  ;;  %v13616_v43 = vld [vmem:[#allocation13 + $0x28c] sm:$0xf]  ;;  %v11030_v50 = vld [vmem:[#allocation13 + $0x730] sm:$0xf0] }
 0x499   : > { %4659 = vmatpush.bf16.msrb.mxu3 %v10505_v51  ;;  %v4572_v36 = vpop.f32.mrf.mxu2  ;;  %v4585_v41 = vpop.f32.mrf.mxu3  ;;  %v10758_v51 = vld [vmem:[#allocation13 + $0x510] sm:$0xf0] }
 0x49a   : > { %v10761_v36 = vor.u32 %v13695_v33, %v10758_v51  ;;  %v13800_v33 = vld [vmem:[#allocation16 + $0x44] sm:$0xf0] }
 0x49b   : > { %4746 = vmatpush.bf16.msra.mxu2 %v10445_v37  ;;  %v10806_v37 = vld [vmem:[#allocation13 + $0x570] sm:$0xf0]  ;;  %v13612_v51 = vld [vmem:[#allocation13 + $0x26c] sm:$0xf] }
 0x49c   : > { %v4830_v35 = vpop.f32.mrf.mxu0  ;;  %4660 = vmatmul.bf16.vlgmr.msrb.gmra.mxu3 %v15803_v12 }
 0x49d   : > { %4678 = vmatpush.bf16.msra.mxu3 %v10873_v63  ;;  %v4831_v17 = vadd.f32 %v4830_v35, %v3167_v24  ;;  %v4843_v1 = vpop.f32.mrf.mxu1  ;;  %v10925_v63 = vor.u32 %v13738_v54, %v10924_v48  ;;  %v13628_v35 = vld [vmem:[#allocation13 + $0x2ec] sm:$0xf]  ;;  %v11046_v48 = vld [vmem:[#allocation13 + $0x750] sm:$0xf0] }
 0x49f   : > { %4747 = vmatpush.bf16.msra.mxu2 %v10429_v28  ;;  %v16088_v15 = vadd.f32 %v4843_v1, %v4831_v17  ;;  %v10809_v28 = vor.u32 %v13707_v25, %v10806_v37  ;;  %v10893_v1 = vor.u32 %v13730_v47, %v10892_v58  ;;  %v13775_v25 = vld [vmem:[#allocation13 + $0x784] sm:$0xf]  ;;  %v11078_v37 = vld [vmem:[#allocation13 + $0x790] sm:$0xf0] }
 0x4a0   : > { %v13759_v58 = vld [vmem:[#allocation13 + $0x704] sm:$0xf]  ;;  %v11014_v47 = vld [vmem:[#allocation13 + $0x710] sm:$0xf0] }
 0x4a1   : > { %4679 = vmatpush.bf16.msra.mxu3 %v10857_v39  ;;  %v4596_v53 = vpop.f32.mrf.mxu2  ;;  %v11110_v39 = vld [vmem:[#allocation13 + $0x7d0] sm:$0xf0] }
 0x4a2   : > { %v16090_v21 = vadd.f32 %v4596_v53, %v4584_v62  ;;  %v11113_v17 = vor.u32 %v13783_v20, %v11110_v39  ;;  %v13624_v53 = vld [vmem:[#allocation13 + $0x2cc] sm:$0xf]  ;;  %v10414_v20 = vld [vmem:[#allocation13 + $0x258] sm:$0xf0] }
 0x4a3   : > { %4748 = vmatpush.bf16.msra.mxu2 %v10413_v6  ;;  %v10774_v6 = vld [vmem:[#allocation13 + $0x530] sm:$0xf0] }
 0x4a4   : > { %v4832_v8 = vpop.f32.mrf.mxu0  ;;  %v10777_v30 = vor.u32 %v13699_v9, %v10774_v6  ;;  %v11065_v6 = vor.u32 %v13771_v4, %v11062_v56  ;;  %v13654_v56 = vld [vmem:[#allocation13 + $0x3b4] sm:$0xf0] }
 0x4a5   : > { %4680 = vmatpush.bf16.msra.mxu3 %v10841_v27  ;;  %v4845_v45 = vpop.f32.mrf.mxu1  ;;  %v10481_v8 = vor.u32 %v13624_v53, %v10478_v2  ;;  %v10604_v2 = vld [vmem:[#allocation13 + $0x3c8] sm:$0xf] }
 0x4a6   : > { %v13804_v45 = vld [vmem:[#allocation16 + $0x64] sm:$0xf0] }
 0x4a7   : > { %4749 = vmatpush.bf16.msra.mxu2 %v10397_v60  ;;  %v13787_v60 = vld [vmem:[#allocation13 + $0x7e4] sm:$0xf] }
 0x4a8   : > { %v11129_v41 = vor.u32 %v13787_v60, %v11126_v23 }
 0x4a9   : > { %4681 = vmatpush.bf16.msra.mxu3 %v10825_v13  ;;  %v4598_v31 = vpop.f32.mrf.mxu2  ;;  %v11097_v13 = vor.u32 %v13779_v49, %v11094_v59  ;;  %v13796_v49 = vld [vmem:[#allocation16 + $0x24] sm:$0xf0] }
 0x4aa   : > { %v11180_v31 = vld [vmem:[#allocation16 + $0x50] sm:$0xf] }
 0x4ab   : > { %4750 = vmatpush.bf16.msra.mxu2 %v10381_v14  ;;  %v11181_v9 = vor.u32 %v13802_v7, %v11180_v31  ;;  %v13792_v31 = vld [vmem:[#allocation16 + $0x4] sm:$0xf0] }
 0x4ac   : > { %v16093_v10 = vpop.f32.mrf.mxu0 }
 0x4ad   : > { %4682 = vmatpush.bf16.msra.mxu3 %v10809_v28  ;;  %v16095_v62 = vpop.f32.mrf.mxu1  ;;  %v11081_v28 = vor.u32 %v13775_v25, %v11078_v37  ;;  %v11148_v25 = vld [vmem:[#allocation16 + $0x10] sm:$0xf]  ;;  %v13794_v37 = vld [vmem:[#allocation16 + $0x14] sm:$0xf0] }
 0x4ae   : > { %4751 = vmatmul.bf16.vlgmr.msra.gmra.mxu2 %v15801_v19 }
 0x4af   : > { %4795 = vmatpush.bf16.msrb.mxu2 %v11005_v52  ;;  %v10494_v52 = vld [vmem:[#allocation13 + $0x2f8] sm:$0xf0] }
 0x4b0   : > { %v10497_v11 = vor.u32 %v13628_v35, %v10494_v52  ;;  %v10620_v35 = vld [vmem:[#allocation13 + $0x3e8] sm:$0xf] }
 0x4b1   : > { %4683 = vmatpush.bf16.msra.mxu3 %v10793_v34  ;;  %v16097_v3 = vpop.f32.mrf.mxu2  ;;  %v10446_v34 = vld [vmem:[#allocation13 + $0x298] sm:$0xf0] }
 0x4b2   : > { %v10449_v54 = vor.u32 %v13616_v43, %v10446_v34 }
 0x4b3   : > { %4796 = vmatpush.bf16.msrb.mxu2 %v10989_v29  ;;  %v13806_v29 = vld [vmem:[#allocation16 + $0x74] sm:$0xf0] }
 0x4b4   : > { %v4884_v24 = vpop.f32.mrf.mxu0  ;;  %v11197_v18 = vor.u32 %v13806_v29, %v11196_v46  ;;  %v11017_v29 = vor.u32 %v13759_v58, %v11014_v47  ;;  %v13744_v58 = vld [vmem:[#allocation13 + $0x68c] sm:$0xf]  ;;  %v10958_v47 = vld [vmem:[#allocation13 + $0x698] sm:$0xf0] }
 0x4b5   : > { %4684 = vmatpush.bf16.msra.mxu3 %v10777_v30  ;;  %v4897_v14 = vpop.f32.mrf.mxu1  ;;  %v11172_v30 = vld [vmem:[#allocation16 + $0x40] sm:$0xf]  ;;  %v13798_v24 = vld [vmem:[#allocation16 + $0x34] sm:$0xf0] }
 0x4b6   : > { %5323 = vmatpush.bf16.msrb.mxu0 %v11197_v18  ;;  %v11173_v60 = vor.u32 %v13800_v33, %v11172_v30  ;;  %v11033_v14 = vor.u32 %v13763_v38, %v11030_v50  ;;  %v10572_v33 = vld [vmem:[#allocation13 + $0x388] sm:$0xf]  ;;  %v13748_v50 = vld [vmem:[#allocation13 + $0x6ac] sm:$0xf] }
 0x4b7   : > { %4797 = vmatpush.bf16.msrb.mxu2 %v10973_v42  ;;  %v11188_v42 = vld [vmem:[#allocation16 + $0x60] sm:$0xf] }
 0x4b9   : > { %4685 = vmatpush.bf16.msra.mxu3 %v10761_v36  ;;  %v4624_v27 = vpop.f32.mrf.mxu2 }
 0x4ba   : > { %v13604_v27 = vld [vmem:[#allocation13 + $0x22c] sm:$0xf] }
 0x4bb   : > { %4798 = vmatpush.bf16.msrb.mxu2 %v10957_v44  ;;  %v10465_v44 = vor.u32 %v13620_v0, %v10462_v26  ;;  %v13756_v0 = vld [vmem:[#allocation13 + $0x6ec] sm:$0xf]  ;;  %v11006_v26 = vld [vmem:[#allocation13 + $0x6f8] sm:$0xf0] }
 0x4bc   : > { %4686 = vmatmul.bf16.vlgmr.msra.gmra.mxu3 %v16013_v22  ;;  %v11189_v22 = vor.u32 %v13804_v45, %v11188_v42  ;;  %v10382_v42 = vld [vmem:[#allocation13 + $0x218] sm:$0xf0]  ;;  %v11149_v45 = vor.u32 %v13794_v37, %v11148_v25  ;;  %v11009_v43 = vor.u32 %v13756_v0, %v11006_v26  ;;  %v13797_v25 = vld [vmem:[#allocation16 + $0x34] sm:$0xf]  ;;  %v11166_v37 = vld [vmem:[#allocation16 + $0x38] sm:$0xf0] }
 0x4bd   : > { %4704 = vmatpush.bf16.msrb.mxu3 %v11129_v41  ;;  %v11164_v41 = vld [vmem:[#allocation16 + $0x30] sm:$0xf]  ;;  %v10508_v26 = vld [vmem:[#allocation13 + $0x308] sm:$0xf] }
 0x4be   : > { %5324 = vmatpush.bf16.msrb.mxu0 %v11189_v22  ;;  %v11165_v39 = vor.u32 %v13798_v24, %v11164_v41  ;;  %v10556_v24 = vld [vmem:[#allocation13 + $0x368] sm:$0xf] }
 0x4bf   : > { %4799 = vmatpush.bf16.msrb.mxu2 %v10941_v5  ;;  %v13767_v5 = vld [vmem:[#allocation13 + $0x744] sm:$0xf] }
 0x4c0   : > { %v11049_v23 = vor.u32 %v13767_v5, %v11046_v48  ;;  %v13752_v5 = vld [vmem:[#allocation13 + $0x6cc] sm:$0xf]  ;;  %v10990_v48 = vld [vmem:[#allocation13 + $0x6d8] sm:$0xf0] }
 0x4c1   : > { %4705 = vmatpush.bf16.msrb.mxu3 %v11113_v17  ;;  %v13662_v17 = vld [vmem:[#allocation13 + $0x3f4] sm:$0xf0] }
 0x4c2   : > { %5325 = vmatpush.bf16.msrb.mxu0 %v11181_v9  ;;  %v10621_v53 = vor.u32 %v13662_v17, %v10620_v35  ;;  %v13805_v9 = vld [vmem:[#allocation16 + $0x74] sm:$0xf]  ;;  %v10540_v17 = vld [vmem:[#allocation13 + $0x348] sm:$0xf] }
 0x4c3   : > { %4800 = vmatpush.bf16.msrb.mxu2 %v10925_v63  ;;  %v10430_v63 = vld [vmem:[#allocation13 + $0x278] sm:$0xf0] }
 0x4c4   : > { %v10433_v36 = vor.u32 %v13612_v51, %v10430_v63  ;;  %v13650_v51 = vld [vmem:[#allocation13 + $0x394] sm:$0xf0]  ;;  %v13803_v63 = vld [vmem:[#allocation16 + $0x64] sm:$0xf] }
 0x4c5   : > { %4706 = vmatpush.bf16.msrb.mxu3 %v11097_v13  ;;  %v13658_v13 = vld [vmem:[#allocation13 + $0x3d4] sm:$0xf0]  ;;  %v10573_v41 = vor.u32 %v13650_v51, %v10572_v33  ;;  %v11150_v51 = vld [vmem:[#allocation16 + $0x18] sm:$0xf0] }
 0x4c6   : > { %5326 = vmatpush.bf16.msrb.mxu0 %v11173_v60  ;;  %v10605_v22 = vor.u32 %v13658_v13, %v10604_v2  ;;  %v11190_v60 = vld [vmem:[#allocation16 + $0x68] sm:$0xf0]  ;;  %v10524_v2 = vld [vmem:[#allocation13 + $0x328] sm:$0xf]  ;;  %v13793_v33 = vld [vmem:[#allocation16 + $0x14] sm:$0xf] }
 0x4c7   : > { %4801 = vmatpush.bf16.msrb.mxu2 %v10909_v16  ;;  %v13608_v16 = vld [vmem:[#allocation13 + $0x24c] sm:$0xf]  ;;  %v11193_v38 = vor.u32 %v13803_v63, %v11190_v60  ;;  %v10894_v60 = vld [vmem:[#allocation13 + $0x618] sm:$0xf0] }
 0x4c8   : > { %v10417_v52 = vor.u32 %v13608_v16, %v10414_v20  ;;  %v13646_v16 = vld [vmem:[#allocation13 + $0x374] sm:$0xf0]  ;;  %v13728_v63 = vld [vmem:[#allocation13 + $0x60c] sm:$0xf] }
 0x4c9   : > { %4707 = vmatpush.bf16.msrb.mxu3 %v11081_v28  ;;  %v10588_v28 = vld [vmem:[#allocation13 + $0x3a8] sm:$0xf] }
 0x4ca   : > { %5327 = vmatpush.bf16.msrb.mxu0 %v11165_v39  ;;  %v10589_v30 = vor.u32 %v13654_v56, %v10588_v28  ;;  %v13801_v39 = vld [vmem:[#allocation16 + $0x54] sm:$0xf]  ;;  %v13795_v28 = vld [vmem:[#allocation16 + $0x24] sm:$0xf] }
 0x4cb   : > { %4802 = vmatpush.bf16.msrb.mxu2 %v10893_v1  ;;  %v11156_v1 = vld [vmem:[#allocation16 + $0x20] sm:$0xf] }
 0x4cc   : > { %v11157_v46 = vor.u32 %v13796_v49, %v11156_v1  ;;  %v13642_v1 = vld [vmem:[#allocation13 + $0x354] sm:$0xf0]  ;;  %v10961_v49 = vor.u32 %v13744_v58, %v10958_v47  ;;  %v11084_v58 = vld [vmem:[#allocation13 + $0x788] sm:$0xf] }
 0x4cd   : > { %4708 = vmatpush.bf16.msrb.mxu3 %v11065_v6  ;;  %v11198_v6 = vld [vmem:[#allocation16 + $0x78] sm:$0xf0]  ;;  %v13778_v47 = vld [vmem:[#allocation13 + $0x794] sm:$0xf0] }
 0x4ce   : > { %4803 = vmatmul.bf16.vlgmr.msrb.gmra.mxu2 %v16029_v32  ;;  %5328 = vmatpush.bf16.msrb.mxu0 %v11157_v46  ;;  %v10942_v46 = vld [vmem:[#allocation13 + $0x678] sm:$0xf0] }
 0x4cf   : > { %4847 = vmatpush.bf16.msra.mxu2 %v10497_v11  ;;  %v10398_v11 = vld [vmem:[#allocation13 + $0x238] sm:$0xf0] }
 0x4d0   : > { %v10401_v18 = vor.u32 %v13604_v27, %v10398_v11  ;;  %v13799_v27 = vld [vmem:[#allocation16 + $0x44] sm:$0xf]  ;;  %v13740_v11 = vld [vmem:[#allocation13 + $0x66c] sm:$0xf] }
 0x4d1   : > { %4709 = vmatpush.bf16.msrb.mxu3 %v11049_v23  ;;  %v16101_v59 = vpop.f32.mrf.mxu2  ;;  %v10993_v23 = vor.u32 %v13752_v5, %v10990_v48  ;;  %v10945_v13 = vor.u32 %v13740_v11, %v10942_v46  ;;  %v11116_v48 = vld [vmem:[#allocation13 + $0x7c8] sm:$0xf] }
 0x4d2   : > { %5329 = vmatpush.bf16.msrb.mxu0 %v11149_v45  ;;  %v11169_v45 = vor.u32 %v13797_v25, %v11166_v37  ;;  %v13762_v25 = vld [vmem:[#allocation13 + $0x714] sm:$0xf0] }
 0x4d3   : > { %4848 = vmatpush.bf16.msra.mxu2 %v10481_v8  ;;  %v13600_v8 = vld [vmem:[#allocation13 + $0x20c] sm:$0xf] }
 0x4d4   : > { %v10385_v4 = vor.u32 %v13600_v8, %v10382_v42  ;;  %v13736_v8 = vld [vmem:[#allocation13 + $0x64c] sm:$0xf]  ;;  %v10926_v42 = vld [vmem:[#allocation13 + $0x658] sm:$0xf0] }
 0x4d5   : > { %4710 = vmatpush.bf16.msrb.mxu3 %v11033_v14  ;;  %v11182_v14 = vld [vmem:[#allocation16 + $0x58] sm:$0xf0]  ;;  %v10929_v56 = vor.u32 %v13736_v8, %v10926_v42  ;;  %v13660_v8 = vld [vmem:[#allocation13 + $0x3ec] sm:$0xf]  ;;  %v10622_v42 = vld [vmem:[#allocation13 + $0x3f8] sm:$0xf0] }
 0x4d6   : > { %v11185_v35 = vor.u32 %v13801_v39, %v11182_v14 }
 0x4d7   : > { %4849 = vmatpush.bf16.msra.mxu2 %v10465_v44  ;;  %v11140_v44 = vld [vmem:[#allocation16] sm:$0xf] }
 0x4d8   : > { %v11141_v34 = vor.u32 %v13792_v31, %v11140_v44  ;;  %v11132_v44 = vld [vmem:[#allocation13 + $0x7e8] sm:$0xf]  ;;  %v13790_v31 = vld [vmem:[#allocation13 + $0x7f4] sm:$0xf0] }
 0x4d9   : > { %4711 = vmatpush.bf16.msrb.mxu3 %v11017_v29  ;;  %v4650_v7 = vpop.f32.mrf.mxu2  ;;  %v11133_v5 = vor.u32 %v13790_v31, %v11132_v44 }
 0x4da   : > { %5330 = vmatpush.bf16.msrb.mxu0 %v11141_v34  ;;  %v13732_v34 = vld [vmem:[#allocation13 + $0x62c] sm:$0xf] }
 0x4db   : > { %4850 = vmatpush.bf16.msra.mxu2 %v10449_v54  ;;  %v11201_v54 = vor.u32 %v13805_v9, %v11198_v6  ;;  %v10910_v9 = vld [vmem:[#allocation13 + $0x638] sm:$0xf0] }
 0x4dc   : > { %4712 = vmatmul.bf16.vlgmr.msrb.gmra.mxu3 %v16076_v40 }
 0x4dd   : > { %4756 = vmatpush.bf16.msra.mxu3 %v10621_v53  ;;  %v10541_v53 = vor.u32 %v13642_v1, %v10540_v17  ;;  %v13774_v17 = vld [vmem:[#allocation13 + $0x774] sm:$0xf0] }
 0x4de   : > { %5375 = vmatpush.bf16.msra.mxu0 %v11201_v54  ;;  %v10913_v54 = vor.u32 %v13732_v34, %v10910_v9  ;;  %v10590_v34 = vld [vmem:[#allocation13 + $0x3b8] sm:$0xf0] }
 0x4df   : > { %4851 = vmatpush.bf16.msra.mxu2 %v10433_v36  ;;  %v10974_v36 = vld [vmem:[#allocation13 + $0x6b8] sm:$0xf0] }
 0x4e0   : > { %v10977_v20 = vor.u32 %v13748_v50, %v10974_v36  ;;  %v11100_v50 = vld [vmem:[#allocation13 + $0x7a8] sm:$0xf]  ;;  %v10897_v36 = vor.u32 %v13728_v63, %v10894_v60  ;;  %v11252_v60 = vld [vmem:[#allocation16 + $0xe0] sm:$0xf] }
 0x4e1   : > { %4757 = vmatpush.bf16.msra.mxu3 %v10605_v22  ;;  %v13634_v22 = vld [vmem:[#allocation13 + $0x314] sm:$0xf0] }
 0x4e2   : > { %5376 = vmatpush.bf16.msra.mxu0 %v11193_v38  ;;  %v10509_v6 = vor.u32 %v13634_v22, %v10508_v26  ;;  %v14540_v26 = vld [vmem:[#allocation14] sm:$0xf]  ;;  %v10625_v22 = vor.u32 %v13660_v8, %v10622_v42  ;;  %v11220_v42 = vld [vmem:[#allocation16 + $0xa0] sm:$0xf] }
 0x4e3   : > { %4852 = vmatpush.bf16.msra.mxu2 %v10417_v52  ;;  %v10557_v52 = vor.u32 %v13646_v16, %v10556_v24  ;;  %v13791_v24 = vld [vmem:[#allocation16 + $0x4] sm:$0xf]  ;;  %v11142_v16 = vld [vmem:[#allocation16 + $0x8] sm:$0xf0] }
 0x4e4   : > { %v11145_v39 = vor.u32 %v13791_v24, %v11142_v16  ;;  %v11244_v16 = vld [vmem:[#allocation16 + $0xd0] sm:$0xf] }
 0x4e5   : > { %4758 = vmatpush.bf16.msra.mxu3 %v10589_v30  ;;  %v13786_v30 = vld [vmem:[#allocation13 + $0x7d4] sm:$0xf0] }
 0x4e6   : > { %5377 = vmatpush.bf16.msra.mxu0 %v11185_v35  ;;  %v11117_v38 = vor.u32 %v13786_v30, %v11116_v48  ;;  %v11085_v35 = vor.u32 %v13778_v47, %v11084_v58  ;;  %v13822_v30 = vld [vmem:[#allocation16 + $0xf4] sm:$0xf0]  ;;  %v11236_v47 = vld [vmem:[#allocation16 + $0xc0] sm:$0xf] }
 0x4e7   : > { %4853 = vmatpush.bf16.msra.mxu2 %v10401_v18  ;;  %v13638_v18 = vld [vmem:[#allocation13 + $0x334] sm:$0xf0] }
 0x4e8   : > { %v10525_v0 = vor.u32 %v13638_v18, %v10524_v2  ;;  %v13766_v2 = vld [vmem:[#allocation13 + $0x734] sm:$0xf0] }
 0x4e9   : > { %4759 = vmatpush.bf16.msra.mxu3 %v10573_v41  ;;  %v13782_v41 = vld [vmem:[#allocation13 + $0x7b4] sm:$0xf0] }
 0x4ea   : > { %v11101_v14 = vor.u32 %v13782_v41, %v11100_v50  ;;  %v13644_v50 = vld [vmem:[#allocation13 + $0x36c] sm:$0xf] }
 0x4eb   : > { %4854 = vmatpush.bf16.msra.mxu2 %v10385_v4  ;;  %v11158_v4 = vld [vmem:[#allocation16 + $0x28] sm:$0xf0] }
 0x4ec   : > { %v11161_v7 = vor.u32 %v13795_v28, %v11158_v4  ;;  %v13656_v28 = vld [vmem:[#allocation13 + $0x3cc] sm:$0xf]  ;;  %v10606_v4 = vld [vmem:[#allocation13 + $0x3d8] sm:$0xf0] }
 0x4ed   : > { %4760 = vmatpush.bf16.msra.mxu3 %v10557_v52  ;;  %v11068_v52 = vld [vmem:[#allocation13 + $0x768] sm:$0xf]  ;;  %v10609_v44 = vor.u32 %v13656_v28, %v10606_v4  ;;  %v11118_v28 = vld [vmem:[#allocation13 + $0x7d8] sm:$0xf0]  ;;  %v11212_v4 = vld [vmem:[#allocation16 + $0x90] sm:$0xf] }
 0x4ee   : > { %4855 = vmatmul.bf16.vlgmr.msra.gmra.mxu2 %v15801_v19  ;;  %v11174_v19 = vld [vmem:[#allocation16 + $0x48] sm:$0xf0]  ;;  %v11069_v1 = vor.u32 %v13774_v17, %v11068_v52  ;;  %v13636_v17 = vld [vmem:[#allocation13 + $0x32c] sm:$0xf] }
 0x4ef   : > { %4899 = vmatpush.bf16.msrb.mxu2 %v11009_v43  ;;  %v11177_v29 = vor.u32 %v13799_v27, %v11174_v19  ;;  %v13770_v27 = vld [vmem:[#allocation13 + $0x754] sm:$0xf0] }
 0x4f1   : > { %5378 = vmatpush.bf16.msra.mxu0 %v11177_v29  ;;  %4761 = vmatpush.bf16.msra.mxu3 %v10541_v53  ;;  %v16105_v43 = vpop.f32.mrf.mxu2  ;;  %v11036_v53 = vld [vmem:[#allocation13 + $0x728] sm:$0xf] }
 0x4f3   : > { %4900 = vmatpush.bf16.msrb.mxu2 %v10993_v23  ;;  %v11153_v23 = vor.u32 %v13793_v33, %v11150_v51  ;;  %v13648_v33 = vld [vmem:[#allocation13 + $0x38c] sm:$0xf]  ;;  %v10574_v51 = vld [vmem:[#allocation13 + $0x398] sm:$0xf0] }
 0x4f5   : > { %5379 = vmatpush.bf16.msra.mxu0 %v11169_v45  ;;  %4762 = vmatpush.bf16.msra.mxu3 %v10525_v0 }
 0x4f7   : > { %4901 = vmatpush.bf16.msrb.mxu2 %v10977_v20 }
 0x4f9   : > { %5380 = vmatpush.bf16.msra.mxu0 %v11161_v7  ;;  %4763 = vmatpush.bf16.msra.mxu3 %v10509_v6  ;;  %v4676_v20 = vpop.f32.mrf.mxu2  ;;  %v13652_v7 = vld [vmem:[#allocation13 + $0x3ac] sm:$0xf] }
 0x4fa   : > { %v13640_v20 = vld [vmem:[#allocation13 + $0x34c] sm:$0xf] }
 0x4fb   : > { %4902 = vmatpush.bf16.msrb.mxu2 %v10961_v49  ;;  %v11052_v49 = vld [vmem:[#allocation13 + $0x748] sm:$0xf] }
 0x4fc   : > { %4764 = vmatmul.bf16.vlgmr.msra.gmra.mxu3 %v15803_v12  ;;  %v11053_v46 = vor.u32 %v13770_v27, %v11052_v49 }
 0x4fd   : > { %4808 = vmatpush.bf16.msrb.mxu3 %v11133_v5  ;;  %5381 = vmatpush.bf16.msra.mxu0 %v11153_v23  ;;  %v10593_v5 = vor.u32 %v13652_v7, %v10590_v34  ;;  %v13820_v23 = vld [vmem:[#allocation16 + $0xe4] sm:$0xf0] }
 0x4fe   : > { %v11253_v41 = vor.u32 %v13820_v23, %v11252_v60  ;;  %v13808_v34 = vld [vmem:[#allocation16 + $0x84] sm:$0xf0]  ;;  %v11086_v60 = vld [vmem:[#allocation13 + $0x798] sm:$0xf0] }
 0x4ff   : > { %4903 = vmatpush.bf16.msrb.mxu2 %v10945_v13  ;;  %v4609_v19 = vpop.f32.mrf.mxu3  ;;  %v11037_v13 = vor.u32 %v13766_v2, %v11036_v53  ;;  %v13632_v53 = vld [vmem:[#allocation13 + $0x30c] sm:$0xf]  ;;  %v10510_v2 = vld [vmem:[#allocation13 + $0x318] sm:$0xf0] }
 0x500   : > { %v4610_v11 = vadd.f32 %v4609_v19, %v16090_v21  ;;  %v3165_v21 = vperm.slane %v14540_v26, 1  ;;  %v10513_v8 = vor.u32 %v13632_v53, %v10510_v2  ;;  %v11022_v53 = vld [vmem:[#allocation13 + $0x718] sm:$0xf0] }
 0x501   : > { %4809 = vmatpush.bf16.msrb.mxu3 %v11117_v38  ;;  %5382 = vmatpush.bf16.msra.mxu0 %v11145_v39  ;;  %v10542_v39 = vld [vmem:[#allocation13 + $0x358] sm:$0xf0] }
 0x502   : > { %v4925_v29 = vmax.f32 %v4610_v11, 0.0  ;;  %v10545_v58 = vor.u32 %v13640_v20, %v10542_v39 }
 0x503   : > { %4904 = vmatpush.bf16.msrb.mxu2 %v10929_v56  ;;  %v4623_v56 = vadd.f32 %v16097_v3, %v3165_v21  ;;  %v10577_v3 = vor.u32 %v13648_v33, %v10574_v51  ;;  %v13819_v51 = vld [vmem:[#allocation16 + $0xe4] sm:$0xf] }
 0x504   : > { %v4929_v18 = vpack.c.bf16 %v4925_v29, %v4925_v29  ;;  %v13814_v29 = vld [vmem:[#allocation16 + $0xb4] sm:$0xf0] }
 0x505   : > { %4810 = vmatpush.bf16.msrb.mxu3 %v11101_v14 }
 0x506   : > { %5331 = vmatmul.bf16.vlgmr.msrb.gmra.mxu0 %v4929_v18 }
 0x507   : > { %4905 = vmatpush.bf16.msrb.mxu2 %v10913_v54  ;;  %v4611_v37 = vpop.f32.mrf.mxu3  ;;  %v11260_v54 = vld [vmem:[#allocation16 + $0xf0] sm:$0xf] }
 0x508   : > { %v11261_v63 = vor.u32 %v13822_v30, %v11260_v54 }
 0x509   : > { %4811 = vmatpush.bf16.msrb.mxu3 %v11085_v35  ;;  %v13816_v35 = vld [vmem:[#allocation16 + $0xc4] sm:$0xf0] }
 0x50a   : > { %5336 = vmatpush.bf16.msrb.mxu1 %v11261_v63  ;;  %v11237_v49 = vor.u32 %v13816_v35, %v11236_v47  ;;  %v11254_v63 = vld [vmem:[#allocation16 + $0xe8] sm:$0xf0]  ;;  %v13764_v35 = vld [vmem:[#allocation13 + $0x72c] sm:$0xf] }
 0x50b   : > { %4906 = vmatpush.bf16.msrb.mxu2 %v10897_v36  ;;  %v10558_v36 = vld [vmem:[#allocation13 + $0x378] sm:$0xf0]  ;;  %v11257_v23 = vor.u32 %v13819_v51, %v11254_v63 }
 0x50c   : > { %v10561_v24 = vor.u32 %v13644_v50, %v10558_v36  ;;  %v13772_v50 = vld [vmem:[#allocation13 + $0x76c] sm:$0xf]  ;;  %v11070_v36 = vld [vmem:[#allocation13 + $0x778] sm:$0xf0] }
 0x50d   : > { %4812 = vmatpush.bf16.msrb.mxu3 %v11069_v1  ;;  %v10526_v1 = vld [vmem:[#allocation13 + $0x338] sm:$0xf0] }
 0x50e   : > { %4907 = vmatmul.bf16.vlgmr.msrb.gmra.mxu2 %v16029_v32  ;;  %v11020_v32 = vld [vmem:[#allocation13 + $0x708] sm:$0xf]  ;;  %5337 = vmatpush.bf16.msrb.mxu1 %v11253_v41  ;;  %v10529_v19 = vor.u32 %v13636_v17, %v10526_v1  ;;  %v11073_v41 = vor.u32 %v13772_v50, %v11070_v36  ;;  %v13830_v51 = vld [vmem:[#allocation16 + $0x134] sm:$0xf0] }
 0x50f   : > { %v11021_v0 = vor.u32 %v13762_v25, %v11020_v32  ;;  %v4635_v31 = vpop.f32.mrf.mxu3  ;;  %v11134_v32 = vld [vmem:[#allocation13 + $0x7f8] sm:$0xf0] }
 0x510   : > { %v4636_v9 = vadd.f32 %v4635_v31, %v4623_v56  ;;  %v13810_v56 = vld [vmem:[#allocation16 + $0x94] sm:$0xf0] }
 0x511   : > { %4813 = vmatpush.bf16.msrb.mxu3 %v11053_v46  ;;  %v16110_v45 = vpop.f32.mrf.mxu2  ;;  %v11228_v46 = vld [vmem:[#allocation16 + $0xb0] sm:$0xf]  ;;  %v11213_v7 = vor.u32 %v13810_v56, %v11212_v4 }
 0x512   : > { %v4649_v48 = vadd.f32 %v16101_v59, %v4636_v9  ;;  %v13818_v59 = vld [vmem:[#allocation16 + $0xd4] sm:$0xf0]  ;;  %v11262_v9 = vld [vmem:[#allocation16 + $0xf8] sm:$0xf0] }
 0x513   : > { %v11245_v14 = vor.u32 %v13818_v59, %v11244_v16  ;;  %v13768_v16 = vld [vmem:[#allocation13 + $0x74c] sm:$0xf]  ;;  %v11054_v59 = vld [vmem:[#allocation13 + $0x758] sm:$0xf0] }
 0x514   : > { %v11057_v39 = vor.u32 %v13768_v16, %v11054_v59  ;;  %v11268_v59 = vld [vmem:[#allocation16 + $0x100] sm:$0xf] }
 0x515   : > { %4814 = vmatpush.bf16.msrb.mxu3 %v11037_v13  ;;  %5338 = vmatpush.bf16.msrb.mxu1 %v11245_v14  ;;  %v13788_v13 = vld [vmem:[#allocation13 + $0x7ec] sm:$0xf]  ;;  %v13815_v14 = vld [vmem:[#allocation16 + $0xc4] sm:$0xf] }
 0x516   : > { %5383 = vmatmul.bf16.vlgmr.msra.gmra.mxu0 %v4929_v18  ;;  %v11229_v18 = vor.u32 %v13814_v29, %v11228_v46  ;;  %v11137_v21 = vor.u32 %v13788_v13, %v11134_v32  ;;  %v11230_v46 = vld [vmem:[#allocation16 + $0xb8] sm:$0xf0]  ;;  %v13760_v29 = vld [vmem:[#allocation13 + $0x70c] sm:$0xf]  ;;  %v11222_v13 = vld [vmem:[#allocation16 + $0xa8] sm:$0xf0] }
 0x517   : > { %v4637_v38 = vpop.f32.mrf.mxu3 }
 0x519   : > { %4815 = vmatpush.bf16.msrb.mxu3 %v11021_v0  ;;  %v4702_v6 = vpop.f32.mrf.mxu2  ;;  %5339 = vmatpush.bf16.msrb.mxu1 %v11237_v49  ;;  %v13812_v0 = vld [vmem:[#allocation16 + $0xa4] sm:$0xf0] }
 0x51a   : > { %v13780_v6 = vld [vmem:[#allocation13 + $0x7ac] sm:$0xf] }
 0x51c   : > { %4816 = vmatmul.bf16.vlgmr.msrb.gmra.mxu3 %v16076_v40 }
 0x51d   : > { %4860 = vmatpush.bf16.msra.mxu3 %v10625_v22  ;;  %5340 = vmatpush.bf16.msrb.mxu1 %v11229_v18  ;;  %v13784_v22 = vld [vmem:[#allocation13 + $0x7cc] sm:$0xf]  ;;  %v13811_v18 = vld [vmem:[#allocation16 + $0xa4] sm:$0xf] }
 0x51e   : > { %v11121_v31 = vor.u32 %v13784_v22, %v11118_v28  ;;  %v13838_v22 = vld [vmem:[#allocation16 + $0x174] sm:$0xf0] }
 0x51f   : > { %v4661_v52 = vpop.f32.mrf.mxu3 }
 0x520   : > { %v4662_v27 = vadd.f32 %v4661_v52, %v4649_v48  ;;  %v11038_v52 = vld [vmem:[#allocation13 + $0x738] sm:$0xf0] }
 0x521   : > { %4861 = vmatpush.bf16.msra.mxu3 %v10609_v44  ;;  %v11204_v44 = vld [vmem:[#allocation16 + $0x80] sm:$0xf]  ;;  %v11041_v49 = vor.u32 %v13764_v35, %v11038_v52  ;;  %v13835_v52 = vld [vmem:[#allocation16 + $0x164] sm:$0xf] }
 0x522   : > { %v16116_v11 = vadd.f32 %v16105_v43, %v4662_v27  ;;  %v11221_v43 = vor.u32 %v13812_v0, %v11220_v42  ;;  %v11205_v54 = vor.u32 %v13808_v34, %v11204_v44  ;;  %v11214_v0 = vld [vmem:[#allocation16 + $0x98] sm:$0xf0]  ;;  %v11316_v44 = vld [vmem:[#allocation16 + $0x160] sm:$0xf]  ;;  %v11308_v34 = vld [vmem:[#allocation16 + $0x150] sm:$0xf] }
 0x524   : > { %5341 = vmatpush.bf16.msrb.mxu1 %v11221_v43  ;;  %v11324_v43 = vld [vmem:[#allocation16 + $0x170] sm:$0xf] }
 0x525   : > { %4862 = vmatpush.bf16.msra.mxu3 %v10593_v5  ;;  %v11102_v5 = vld [vmem:[#allocation13 + $0x7b8] sm:$0xf0]  ;;  %v11325_v28 = vor.u32 %v13838_v22, %v11324_v43  ;;  %v11278_v22 = vld [vmem:[#allocation16 + $0x118] sm:$0xf0] }
 0x526   : > { %v11105_v33 = vor.u32 %v13780_v6, %v11102_v5  ;;  %v11300_v6 = vld [vmem:[#allocation16 + $0x140] sm:$0xf]  ;;  %v13832_v5 = vld [vmem:[#allocation16 + $0x144] sm:$0xf0] }
 0x527   : > { %v4663_v26 = vpop.f32.mrf.mxu3  ;;  %5349 = vmatpush.bf16.msra.mxu2 %v11325_v28  ;;  %v11388_v28 = vld [vmem:[#allocation16 + $0x1f0] sm:$0xf] }
 0x528   : > { %5342 = vmatpush.bf16.msrb.mxu1 %v11213_v7  ;;  %v13807_v26 = vld [vmem:[#allocation16 + $0x84] sm:$0xf] }
 0x529   : > { %4863 = vmatpush.bf16.msra.mxu3 %v10577_v3  ;;  %v13776_v3 = vld [vmem:[#allocation13 + $0x78c] sm:$0xf] }
 0x52a   : > { %v11089_v38 = vor.u32 %v13776_v3, %v11086_v60  ;;  %v11284_v60 = vld [vmem:[#allocation16 + $0x120] sm:$0xf] }
 0x52c   : > { %5343 = vmatpush.bf16.msrb.mxu1 %v11205_v54  ;;  %v11301_v54 = vor.u32 %v13832_v5, %v11300_v6  ;;  %v11372_v5 = vld [vmem:[#allocation16 + $0x1d0] sm:$0xf] }
 0x52d   : > { %4864 = vmatpush.bf16.msra.mxu3 %v10561_v24  ;;  %v11246_v24 = vld [vmem:[#allocation16 + $0xd8] sm:$0xf0] }
 0x531   : > { %4865 = vmatpush.bf16.msra.mxu3 %v10545_v58  ;;  %v4752_v25 = vpop.f32.mrf.mxu2  ;;  %v11238_v58 = vld [vmem:[#allocation16 + $0xc8] sm:$0xf0] }
 0x532   : > { %v16119_v37 = vadd.f32 %v4752_v25, %v16073_v55  ;;  %v13821_v55 = vld [vmem:[#allocation16 + $0xf4] sm:$0xf]  ;;  %v11241_v17 = vor.u32 %v13815_v14, %v11238_v58  ;;  %v11225_v25 = vor.u32 %v13811_v18, %v11222_v13  ;;  %v11326_v14 = vld [vmem:[#allocation16 + $0x178] sm:$0xf0] }
 0x533   : > { %v11265_v30 = vor.u32 %v13821_v55, %v11262_v9  ;;  %v13834_v55 = vld [vmem:[#allocation16 + $0x154] sm:$0xf0]  ;;  %v13829_v13 = vld [vmem:[#allocation16 + $0x134] sm:$0xf] }
 0x534   : > { %v11309_v9 = vor.u32 %v13834_v55, %v11308_v34  ;;  %v11380_v55 = vld [vmem:[#allocation16 + $0x1e0] sm:$0xf] }
 0x535   : > { %4866 = vmatpush.bf16.msra.mxu3 %v10529_v19  ;;  %5388 = vmatpush.bf16.msra.mxu1 %v11265_v30  ;;  %v13813_v19 = vld [vmem:[#allocation16 + $0xb4] sm:$0xf] }
 0x536   : > { %v11233_v2 = vor.u32 %v13813_v19, %v11230_v46  ;;  %v13831_v19 = vld [vmem:[#allocation16 + $0x144] sm:$0xf]  ;;  %v11302_v46 = vld [vmem:[#allocation16 + $0x148] sm:$0xf0] }
 0x539   : > { %4867 = vmatpush.bf16.msra.mxu3 %v10513_v8  ;;  %v4754_v48 = vpop.f32.mrf.mxu2  ;;  %5389 = vmatpush.bf16.msra.mxu1 %v11257_v23  ;;  %v11025_v8 = vor.u32 %v13760_v29, %v11022_v53  ;;  %v13828_v23 = vld [vmem:[#allocation16 + $0x124] sm:$0xf0]  ;;  %v11305_v53 = vor.u32 %v13831_v19, %v11302_v46  ;;  %v13849_v46 = vld [vmem:[#allocation16 + $0x1d4] sm:$0xf] }
 0x53a   : > { %v11285_v50 = vor.u32 %v13828_v23, %v11284_v60  ;;  %v11356_v23 = vld [vmem:[#allocation16 + $0x1b0] sm:$0xf] }
 0x53c   : > { %4868 = vmatmul.bf16.vlgmr.msra.gmra.mxu3 %v15803_v12  ;;  %v13817_v12 = vld [vmem:[#allocation16 + $0xd4] sm:$0xf] }
 0x53d   : > { %4912 = vmatpush.bf16.msrb.mxu3 %v11137_v21  ;;  %v11249_v20 = vor.u32 %v13817_v12, %v11246_v24  ;;  %v11206_v21 = vld [vmem:[#allocation16 + $0x88] sm:$0xf0]  ;;  %v11276_v12 = vld [vmem:[#allocation16 + $0x110] sm:$0xf]  ;;  %v13826_v24 = vld [vmem:[#allocation16 + $0x114] sm:$0xf0] }
 0x53e   : > { %v11209_v56 = vor.u32 %v13807_v26, %v11206_v21  ;;  %v11277_v16 = vor.u32 %v13826_v24, %v11276_v12  ;;  %v13825_v21 = vld [vmem:[#allocation16 + $0x114] sm:$0xf]  ;;  %v11348_v12 = vld [vmem:[#allocation16 + $0x1a0] sm:$0xf]  ;;  %v13844_v24 = vld [vmem:[#allocation16 + $0x1a4] sm:$0xf0] }
 0x53f   : > { %5390 = vmatpush.bf16.msra.mxu1 %v11249_v20  ;;  %v4687_v47 = vpop.f32.mrf.mxu3  ;;  %v13824_v20 = vld [vmem:[#allocation16 + $0x104] sm:$0xf0] }
 0x540   : > { %v4688_v1 = vadd.f32 %v4687_v47, %v16116_v11  ;;  %v13809_v11 = vld [vmem:[#allocation16 + $0x94] sm:$0xf]  ;;  %v11269_v47 = vor.u32 %v13824_v20, %v11268_v59  ;;  %v11340_v59 = vld [vmem:[#allocation16 + $0x190] sm:$0xf]  ;;  %v13842_v20 = vld [vmem:[#allocation16 + $0x194] sm:$0xf0] }
 0x541   : > { %4913 = vmatpush.bf16.msrb.mxu3 %v11121_v31  ;;  %v13836_v31 = vld [vmem:[#allocation16 + $0x164] sm:$0xf0] }
 0x542   : > { %v4701_v27 = vadd.f32 %v16110_v45, %v4688_v1  ;;  %v11217_v45 = vor.u32 %v13809_v11, %v11214_v0  ;;  %v11317_v7 = vor.u32 %v13836_v31, %v11316_v44  ;;  %v13833_v1 = vld [vmem:[#allocation16 + $0x154] sm:$0xf]  ;;  %v13827_v11 = vld [vmem:[#allocation16 + $0x124] sm:$0xf]  ;;  %v11286_v0 = vld [vmem:[#allocation16 + $0x128] sm:$0xf0] }
 0x543   : > { %5391 = vmatpush.bf16.msra.mxu1 %v11241_v17  ;;  %v11318_v17 = vld [vmem:[#allocation16 + $0x168] sm:$0xf0]  ;;  %v13823_v44 = vld [vmem:[#allocation16 + $0x104] sm:$0xf] }
 0x544   : > { %5350 = vmatpush.bf16.msra.mxu2 %v11317_v7  ;;  %v11270_v31 = vld [vmem:[#allocation16 + $0x108] sm:$0xf0] }
 0x545   : > { %4914 = vmatpush.bf16.msrb.mxu3 %v11105_v33  ;;  %v11273_v34 = vor.u32 %v13823_v44, %v11270_v31  ;;  %v11334_v31 = vld [vmem:[#allocation16 + $0x188] sm:$0xf0] }
 0x547   : > { %5392 = vmatpush.bf16.msra.mxu1 %v11233_v2  ;;  %v4689_v42 = vpop.f32.mrf.mxu3 }
 0x548   : > { %5351 = vmatpush.bf16.msra.mxu2 %v11309_v9  ;;  %v13852_v9 = vld [vmem:[#allocation16 + $0x1e4] sm:$0xf0] }
 0x549   : > { %4915 = vmatpush.bf16.msrb.mxu3 %v11089_v38 }
 0x54b   : > { %5393 = vmatpush.bf16.msra.mxu1 %v11225_v25  ;;  %v11294_v25 = vld [vmem:[#allocation16 + $0x138] sm:$0xf0] }
 0x54c   : > { %5352 = vmatpush.bf16.msra.mxu2 %v11301_v54 }
 0x54d   : > { %4916 = vmatpush.bf16.msrb.mxu3 %v11073_v41 }
 0x54f   : > { %5394 = vmatpush.bf16.msra.mxu1 %v11217_v45  ;;  %v11289_v45 = vor.u32 %v13827_v11, %v11286_v0  ;;  %v13845_v11 = vld [vmem:[#allocation16 + $0x1b4] sm:$0xf]  ;;  %v11358_v0 = vld [vmem:[#allocation16 + $0x1b8] sm:$0xf0] }
 0x551   : > { %4917 = vmatpush.bf16.msrb.mxu3 %v11057_v39  ;;  %v16124_v32 = vpop.f32.mrf.mxu2  ;;  %v13837_v39 = vld [vmem:[#allocation16 + $0x174] sm:$0xf] }
 0x552   : > { %v11329_v35 = vor.u32 %v13837_v39, %v11326_v14 }
 0x553   : > { %5395 = vmatpush.bf16.msra.mxu1 %v11209_v56 }
 0x555   : > { %4918 = vmatpush.bf16.msrb.mxu3 %v11041_v49  ;;  %v11310_v49 = vld [vmem:[#allocation16 + $0x158] sm:$0xf0] }
 0x559   : > { %4919 = vmatpush.bf16.msrb.mxu3 %v11025_v8  ;;  %v4806_v4 = vpop.f32.mrf.mxu2  ;;  %v11297_v8 = vor.u32 %v13829_v13, %v11294_v25 }
 0x55c   : > { %4920 = vmatmul.bf16.vlgmr.msrb.gmra.mxu3 %v16076_v40  ;;  %v11292_v40 = vld [vmem:[#allocation16 + $0x130] sm:$0xf] }
 0x55d   : > { %v11293_v63 = vor.u32 %v13830_v51, %v11292_v40 }
 0x55f   : > { %v4713_v48 = vpop.f32.mrf.mxu3  ;;  %5353 = vmatpush.bf16.msra.mxu2 %v11293_v63 }
 0x560   : > { %v4714_v30 = vadd.f32 %v4713_v48, %v4701_v27  ;;  %v11313_v27 = vor.u32 %v13833_v1, %v11310_v49  ;;  %v13850_v48 = vld [vmem:[#allocation16 + $0x1d4] sm:$0xf0]  ;;  %v13851_v49 = vld [vmem:[#allocation16 + $0x1e4] sm:$0xf] }
 0x561   : > { %v11373_v54 = vor.u32 %v13850_v48, %v11372_v5 }
 0x562   : > { %v4926_v33 = vmax.f32 %v4714_v30, 0.0  ;;  %v11364_v30 = vld [vmem:[#allocation16 + $0x1c0] sm:$0xf] }
 0x563   : > { %5354 = vmatpush.bf16.msra.mxu2 %v11285_v50 }
 0x564   : > { %v4930_v3 = vpack.c.bf16 %v4926_v33, %v4926_v33  ;;  %v13848_v33 = vld [vmem:[#allocation16 + $0x1c4] sm:$0xf0] }
 0x565   : > { %v11365_v63 = vor.u32 %v13848_v33, %v11364_v30 }
 0x566   : > { %5344 = vmatmul.bf16.vlgmr.msrb.gmra.mxu1 %v4930_v3 }
 0x567   : > { %v4715_v41 = vpop.f32.mrf.mxu3  ;;  %5355 = vmatpush.bf16.msra.mxu2 %v11277_v16  ;;  %v11349_v16 = vor.u32 %v13844_v24, %v11348_v12  ;;  %v14063_v24 = vld [vmem:[#allocation19 + $0x67c] sm:$0xf0] }
 0x56b   : > { %5356 = vmatpush.bf16.msra.mxu2 %v11269_v47  ;;  %v11332_v47 = vld [vmem:[#allocation16 + $0x180] sm:$0xf] }
 0x56f   : > { %5401 = vmatpush.bf16.msrb.mxu2 %v11329_v35  ;;  %v13840_v35 = vld [vmem:[#allocation16 + $0x184] sm:$0xf0] }
 0x571   : > { %v4856_v38 = vpop.f32.mrf.mxu2 }
 0x572   : > { %v16128_v36 = vadd.f32 %v4856_v38, %v16088_v15  ;;  %v11321_v15 = vor.u32 %v13835_v52, %v11318_v17  ;;  %v13846_v38 = vld [vmem:[#allocation16 + $0x1b4] sm:$0xf0]  ;;  %v13853_v52 = vld [vmem:[#allocation16 + $0x1f4] sm:$0xf]  ;;  %v11390_v17 = vld [vmem:[#allocation16 + $0x1f8] sm:$0xf0] }
 0x573   : > { %v11357_v50 = vor.u32 %v13846_v38, %v11356_v23  ;;  %v11393_v1 = vor.u32 %v13853_v52, %v11390_v17  ;;  %v14095_v23 = vld [vmem:[#allocation19 + $0x77c] sm:$0xf0]  ;;  %v14079_v38 = vld [vmem:[#allocation19 + $0x704] sm:$0xf] }
 0x574   : > { %5402 = vmatpush.bf16.msrb.mxu2 %v11321_v15  ;;  %v11333_v15 = vor.u32 %v13840_v35, %v11332_v47  ;;  %v12038_v47 = vld [vmem:[#allocation19 + $0x580] sm:$0xf0]  ;;  %v11908_v17 = vld [vmem:[#allocation19 + $0x400] sm:$0xf] }
 0x576   : > { %5396 = vmatmul.bf16.vlgmr.msra.gmra.mxu1 %v4930_v3 }
 0x578   : > { %5403 = vmatpush.bf16.msrb.mxu2 %v11313_v27  ;;  %v11382_v27 = vld [vmem:[#allocation16 + $0x1e8] sm:$0xf0] }
 0x579   : > { %v4858_v58 = vpop.f32.mrf.mxu2  ;;  %v11385_v19 = vor.u32 %v13851_v49, %v11382_v27  ;;  %v11910_v27 = vld [vmem:[#allocation19 + $0x480] sm:$0xf0] }
 0x57a   : > { %v11341_v58 = vor.u32 %v13842_v20, %v11340_v59  ;;  %v12166_v20 = vld [vmem:[#allocation19 + $0x680] sm:$0xf0] }
 0x57c   : > { %5404 = vmatpush.bf16.msrb.mxu2 %v11305_v53 }
 0x57f   : > { %v4765_v29 = vpop.f32.mrf.mxu3 }
 0x580   : > { %v4766_v2 = vadd.f32 %v4765_v29, %v16119_v37  ;;  %5405 = vmatpush.bf16.msrb.mxu2 %v11297_v8  ;;  %v13854_v37 = vld [vmem:[#allocation16 + $0x1f4] sm:$0xf0]  ;;  %v11374_v29 = vld [vmem:[#allocation16 + $0x1d8] sm:$0xf0] }
 0x581   : > { %v11389_v56 = vor.u32 %v13854_v37, %v11388_v28  ;;  %v11377_v53 = vor.u32 %v13849_v46, %v11374_v29  ;;  %v13967_v46 = vld [vmem:[#allocation19 + $0x37c] sm:$0xf0] }
 0x582   : > { %v4779_v18 = vadd.f32 %v16080_v57, %v4766_v2  ;;  %v11281_v57 = vor.u32 %v13825_v21, %v11278_v22  ;;  %v13847_v2 = vld [vmem:[#allocation16 + $0x1c4] sm:$0xf]  ;;  %v11350_v22 = vld [vmem:[#allocation16 + $0x1a8] sm:$0xf0] }
 0x583   : > { %5362 = vmatpush.bf16.msra.mxu3 %v11389_v56  ;;  %v13841_v56 = vld [vmem:[#allocation16 + $0x194] sm:$0xf] }
 0x584   : > { %v4792_v42 = vadd.f32 %v16083_v61, %v4779_v18  ;;  %5406 = vmatpush.bf16.msrb.mxu2 %v11289_v45  ;;  %v16136_v61 = vpop.f32.mrf.mxu0  ;;  %v11366_v18 = vld [vmem:[#allocation16 + $0x1c8] sm:$0xf0]  ;;  %v11361_v45 = vor.u32 %v13845_v11, %v11358_v0  ;;  %v13318_v11 = vld [vmem:[#allocation19 + $0xf80] sm:$0xf0] }
 0x585   : > { %v11369_v25 = vor.u32 %v13847_v2, %v11366_v18  ;;  %v14351_v2 = vld [vmem:[#allocation19 + $0xf7c] sm:$0xf0]  ;;  %v13951_v18 = vld [vmem:[#allocation19 + $0x304] sm:$0xf] }
 0x586   : > { %v4805_v43 = vadd.f32 %v16124_v32, %v4792_v42  ;;  %v11381_v32 = vor.u32 %v13852_v9, %v11380_v55  ;;  %v4997_v9 = vld [vmem:[#allocation17] sm:$0x3] }
 0x587   : > { %v4767_v4 = vpop.f32.mrf.mxu3  ;;  %v5000_v30 = vperm.slane %v4997_v9, 1 }
 0x588   : > { %5407 = vmatpush.bf16.msrb.mxu2 %v11281_v57  ;;  %5363 = vmatpush.bf16.msra.mxu3 %v11381_v32  ;;  %v11342_v57 = vld [vmem:[#allocation16 + $0x198] sm:$0xf0]  ;;  %v4999_v32 = vperm.slane %v4997_v9, 0 }
 0x589   : > { %v11345_v44 = vor.u32 %v13841_v56, %v11342_v57  ;;  %v11654_v56 = vld [vmem:[#allocation19 + $0x280] sm:$0xf0] }
 0x58c   : > { %5408 = vmatpush.bf16.msrb.mxu2 %v11273_v34  ;;  %v5334_v6 = vpop.f32.mrf.mxu0  ;;  %5364 = vmatpush.bf16.msra.mxu3 %v11373_v54 }
 0x590   : > { %5365 = vmatpush.bf16.msra.mxu3 %v11365_v63 }
 0x591   : > { %v16133_v26 = vpop.f32.mrf.mxu2 }
 0x594   : > { %v16138_v51 = vpop.f32.mrf.mxu0  ;;  %5366 = vmatpush.bf16.msra.mxu3 %v11357_v50 }
 0x595   : > { %v5385_v33 = vadd.f32 %v16138_v51, %v5000_v30  ;;  %v13062_v30 = vld [vmem:[#allocation19 + $0xd80] sm:$0xf0] }
 0x598   : > { %5367 = vmatpush.bf16.msra.mxu3 %v11349_v16  ;;  %v14047_v16 = vld [vmem:[#allocation19 + $0x604] sm:$0xf] }
 0x599   : > { %v4910_v7 = vpop.f32.mrf.mxu2  ;;  %v12169_v51 = vor.u32 %v14047_v16, %v12166_v20  ;;  %v14096_v20 = vld [vmem:[#allocation19 + $0x784] sm:$0xf0] }
 0x59c   : > { %v5386_v14 = vpop.f32.mrf.mxu0  ;;  %5368 = vmatpush.bf16.msra.mxu3 %v11341_v58  ;;  %v14015_v58 = vld [vmem:[#allocation19 + $0x504] sm:$0xf] }
 0x59d   : > { %v14031_v14 = vld [vmem:[#allocation19 + $0x57c] sm:$0xf0]  ;;  %v12041_v52 = vor.u32 %v14015_v58, %v12038_v47  ;;  %v12302_v58 = vld [vmem:[#allocation19 + $0x788] sm:$0xf0] }
 0x59e   : > { %v12804_v47 = vld [vmem:[#allocation19 + $0xb00] sm:$0xf] }
 0x59f   : > { %v4817_v40 = vpop.f32.mrf.mxu3 }
 0x5a0   : > { %v4818_v3 = vadd.f32 %v4817_v40, %v4805_v43  ;;  %5369 = vmatpush.bf16.msra.mxu3 %v11333_v15  ;;  %v13843_v43 = vld [vmem:[#allocation16 + $0x1a4] sm:$0xf] }
 0x5a1   : > { %v11353_v28 = vor.u32 %v13843_v43, %v11350_v22  ;;  %v13999_v15 = vld [vmem:[#allocation19 + $0x47c] sm:$0xf0] }
 0x5a2   : > { %v4927_v60 = vmax.f32 %v4818_v3, 0.0  ;;  %v11909_v49 = vor.u32 %v13999_v15, %v11908_v17  ;;  %v13935_v43 = vld [vmem:[#allocation19 + $0x27c] sm:$0xf0]  ;;  %v14207_v15 = vld [vmem:[#allocation19 + $0xb04] sm:$0xf] }
 0x5a3   : > { %v13188_v22 = vld [vmem:[#allocation19 + $0xe00] sm:$0xf] }
 0x5a4   : > { %v4931_v41 = vpack.c.bf16 %v4927_v60, %v4927_v60  ;;  %5414 = vmatpush.bf16.msrb.mxu3 %v11393_v1  ;;  %v12292_v60 = vld [vmem:[#allocation19 + $0x700] sm:$0xf]  ;;  %v13983_v1 = vld [vmem:[#allocation19 + $0x404] sm:$0xf] }
 0x5a5   : > { %v12293_v50 = vor.u32 %v14095_v23, %v12292_v60  ;;  %v11913_v29 = vor.u32 %v13983_v1, %v11910_v27  ;;  %v12932_v60 = vld [vmem:[#allocation19 + $0xc00] sm:$0xf]  ;;  %v12806_v1 = vld [vmem:[#allocation19 + $0xb80] sm:$0xf0]  ;;  %v14064_v27 = vld [vmem:[#allocation19 + $0x684] sm:$0xf0] }
 0x5a6   : > { %5357 = vmatmul.bf16.vlgmr.msra.gmra.mxu2 %v4931_v41  ;;  %v14255_v23 = vld [vmem:[#allocation19 + $0xc7c] sm:$0xf0] }
 0x5a7   : > { %v4819_v39 = vpop.f32.mrf.mxu3  ;;  %8575 = vmatpush.bf16.msrb.mxu0 %v12293_v50  ;;  %v11398_v50 = vld [vmem:[#allocation19 + $0x80] sm:$0xf0]  ;;  %v12933_v16 = vor.u32 %v14255_v23, %v12932_v60  ;;  %v13952_v60 = vld [vmem:[#allocation19 + $0x30c] sm:$0xf] }
 0x5a8   : > { %5415 = vmatpush.bf16.msrb.mxu3 %v11385_v19  ;;  %v12036_v39 = vld [vmem:[#allocation19 + $0x500] sm:$0xf]  ;;  %v11790_v23 = vld [vmem:[#allocation19 + $0x388] sm:$0xf0] }
 0x5a9   : > { %v12037_v35 = vor.u32 %v14031_v14, %v12036_v39  ;;  %v11780_v19 = vld [vmem:[#allocation19 + $0x300] sm:$0xf]  ;;  %v14080_v39 = vld [vmem:[#allocation19 + $0x70c] sm:$0xf] }
 0x5aa   : > { %v12305_v17 = vor.u32 %v14080_v39, %v12302_v58  ;;  %v11660_v39 = vld [vmem:[#allocation19 + $0x208] sm:$0xf] }
 0x5ac   : > { %5416 = vmatpush.bf16.msrb.mxu3 %v11377_v53  ;;  %v13316_v53 = vld [vmem:[#allocation19 + $0xf00] sm:$0xf] }
 0x5b0   : > { %5417 = vmatpush.bf16.msrb.mxu3 %v11369_v25  ;;  %v13317_v25 = vor.u32 %v14351_v2, %v13316_v53  ;;  %v12809_v53 = vor.u32 %v14207_v15, %v12806_v1  ;;  %v12676_v2 = vld [vmem:[#allocation19 + $0xa00] sm:$0xf]  ;;  %v13198_v15 = vld [vmem:[#allocation19 + $0xe88] sm:$0xf0] }
 0x5b2   : > { %8588 = vmatpush.bf16.msrb.mxu1 %v13317_v25 }
 0x5b4   : > { %5418 = vmatpush.bf16.msrb.mxu3 %v11361_v45 }
 0x5b6   : > { %5409 = vmatmul.bf16.vlgmr.msrb.gmra.mxu2 %v4931_v41  ;;  %v12294_v41 = vld [vmem:[#allocation19 + $0x780] sm:$0xf0] }
 0x5b7   : > { %v12297_v12 = vor.u32 %v14079_v38, %v12294_v41  ;;  %v13855_v38 = vld [vmem:[#allocation19 + $0x4] sm:$0xf] }
 0x5b8   : > { %5419 = vmatpush.bf16.msrb.mxu3 %v11353_v28  ;;  %v14239_v41 = vld [vmem:[#allocation19 + $0xc04] sm:$0xf]  ;;  %v11401_v14 = vor.u32 %v13855_v38, %v11398_v50 }
 0x5b9   : > { %8601 = vmatpush.bf16.msra.mxu2 %v12297_v12  ;;  %v12934_v12 = vld [vmem:[#allocation19 + $0xc80] sm:$0xf0] }
 0x5bc   : > { %5420 = vmatpush.bf16.msrb.mxu3 %v11345_v44 }
 0x5bd   : > { %8602 = vmatpush.bf16.msra.mxu2 %v12169_v51  ;;  %v12937_v51 = vor.u32 %v14239_v41, %v12934_v12  ;;  %v14336_v41 = vld [vmem:[#allocation19 + $0xf0c] sm:$0xf] }
 0x5be   : > { %v13326_v12 = vld [vmem:[#allocation19 + $0xf88] sm:$0xf0] }
 0x5bf   : > { %v4869_v13 = vpop.f32.mrf.mxu3  ;;  %v13329_v58 = vor.u32 %v14336_v41, %v13326_v12  ;;  %v12558_v41 = vld [vmem:[#allocation19 + $0x988] sm:$0xf0] }
 0x5c0   : > { %v4870_v8 = vadd.f32 %v4869_v13, %v16128_v36  ;;  %v13839_v36 = vld [vmem:[#allocation16 + $0x184] sm:$0xf]  ;;  %v11781_v13 = vor.u32 %v13967_v46, %v11780_v19  ;;  %v14048_v19 = vld [vmem:[#allocation19 + $0x60c] sm:$0xf] }
 0x5c1   : > { %8603 = vmatpush.bf16.msra.mxu2 %v12041_v52  ;;  %v12174_v46 = vld [vmem:[#allocation19 + $0x688] sm:$0xf0] }
 0x5c2   : > { %v4883_v42 = vadd.f32 %v16093_v10, %v4870_v8  ;;  %v11337_v10 = vor.u32 %v13839_v36, %v11334_v31  ;;  %v11782_v8 = vld [vmem:[#allocation19 + $0x380] sm:$0xf0]  ;;  %v12177_v25 = vor.u32 %v14048_v19, %v12174_v46 }
 0x5c3   : > { %v11785_v0 = vor.u32 %v13951_v18, %v11782_v8  ;;  %v14303_v36 = vld [vmem:[#allocation19 + $0xe04] sm:$0xf]  ;;  %v14191_v18 = vld [vmem:[#allocation19 + $0xa7c] sm:$0xf0] }
 0x5c4   : > { %v4896_v21 = vadd.f32 %v16095_v62, %v4883_v42  ;;  %5421 = vmatpush.bf16.msrb.mxu3 %v11337_v10  ;;  %v14335_v42 = vld [vmem:[#allocation19 + $0xf04] sm:$0xf]  ;;  %v11524_v10 = vld [vmem:[#allocation19 + $0x100] sm:$0xf] }
 0x5c5   : > { %8604 = vmatpush.bf16.msra.mxu2 %v11913_v29  ;;  %v13321_v45 = vor.u32 %v14335_v42, %v13318_v11  ;;  %v13190_v31 = vld [vmem:[#allocation19 + $0xe80] sm:$0xf0]  ;;  %v12044_v11 = vld [vmem:[#allocation19 + $0x508] sm:$0xf] }
 0x5c6   : > { %v4909_v37 = vadd.f32 %v16133_v26, %v4896_v21  ;;  %v5333_v26 = vadd.f32 %v16136_v61, %v4999_v32  ;;  %v12164_v61 = vld [vmem:[#allocation19 + $0x600] sm:$0xf]  ;;  %v13887_v32 = vld [vmem:[#allocation19 + $0x104] sm:$0xf] }
 0x5c7   : > { %v4871_v4 = vpop.f32.mrf.mxu3  ;;  %v12165_v59 = vor.u32 %v14063_v24, %v12164_v61  ;;  %v11652_v21 = vld [vmem:[#allocation19 + $0x200] sm:$0xf]  ;;  %v14175_v8 = vld [vmem:[#allocation19 + $0xa04] sm:$0xf] }
 0x5c8   : > { %v11653_v28 = vor.u32 %v13935_v43, %v11652_v21  ;;  %v13919_v4 = vld [vmem:[#allocation19 + $0x204] sm:$0xf]  ;;  %v12046_v21 = vld [vmem:[#allocation19 + $0x588] sm:$0xf0] }
 0x5c9   : > { %8576 = vmatpush.bf16.msrb.mxu0 %v12165_v59  ;;  %8605 = vmatpush.bf16.msra.mxu2 %v11785_v0  ;;  %v11657_v44 = vor.u32 %v13919_v4, %v11654_v56  ;;  %v12300_v59 = vld [vmem:[#allocation19 + $0x708] sm:$0xf]  ;;  %v12678_v42 = vld [vmem:[#allocation19 + $0xa80] sm:$0xf0]  ;;  %v14159_v4 = vld [vmem:[#allocation19 + $0x97c] sm:$0xf0] }
 0x5ca   : > { %v12301_v52 = vor.u32 %v14096_v20, %v12300_v59  ;;  %v14032_v0 = vld [vmem:[#allocation19 + $0x584] sm:$0xf0]  ;;  %v11793_v20 = vor.u32 %v13952_v60, %v11790_v23  ;;  %v14144_v23 = vld [vmem:[#allocation19 + $0x90c] sm:$0xf] }
 0x5cb   : > { %v12045_v56 = vor.u32 %v14032_v0, %v12044_v11  ;;  %v14272_v0 = vld [vmem:[#allocation19 + $0xd0c] sm:$0xf]  ;;  %v14160_v60 = vld [vmem:[#allocation19 + $0x984] sm:$0xf0]  ;;  %v12561_v12 = vor.u32 %v14144_v23, %v12558_v41  ;;  %v13206_v23 = vld [vmem:[#allocation19 + $0xe90] sm:$0xf0] }
 0x5cd   : > { %8577 = vmatpush.bf16.msrb.mxu0 %v12037_v35  ;;  %8606 = vmatpush.bf16.msra.mxu2 %v11657_v44  ;;  %v14223_v35 = vld [vmem:[#allocation19 + $0xb7c] sm:$0xf0]  ;;  %v14143_v44 = vld [vmem:[#allocation19 + $0x904] sm:$0xf] }
 0x5ce   : > { %v12805_v29 = vor.u32 %v14223_v35, %v12804_v47  ;;  %v13936_v47 = vld [vmem:[#allocation19 + $0x284] sm:$0xf0]  ;;  %v13920_v35 = vld [vmem:[#allocation19 + $0x20c] sm:$0xf] }
 0x5d1   : > { %8578 = vmatpush.bf16.msrb.mxu0 %v11909_v49  ;;  %v12172_v49 = vld [vmem:[#allocation19 + $0x608] sm:$0xf] }
 0x5d5   : > { %8579 = vmatpush.bf16.msrb.mxu0 %v11781_v13  ;;  %v12173_v13 = vor.u32 %v14064_v27, %v12172_v49  ;;  %v11661_v49 = vor.u32 %v13936_v47, %v11660_v39  ;;  %v12430_v39 = vld [vmem:[#allocation19 + $0x888] sm:$0xf0]  ;;  %v12308_v47 = vld [vmem:[#allocation19 + $0x710] sm:$0xf] }
 0x5d9   : > { %8580 = vmatpush.bf16.msrb.mxu0 %v11653_v28  ;;  %v12681_v28 = vor.u32 %v14175_v8, %v12678_v42  ;;  %v11534_v8 = vld [vmem:[#allocation19 + $0x188] sm:$0xf0] }
 0x5df   : > { %v4921_v7 = vpop.f32.mrf.mxu3 }
 0x5e0   : > { %v4922_v34 = vadd.f32 %v4921_v7, %v4909_v37  ;;  %v14319_v37 = vld [vmem:[#allocation19 + $0xe7c] sm:$0xf0]  ;;  %v13193_v7 = vor.u32 %v14303_v36, %v13190_v31  ;;  %v12550_v36 = vld [vmem:[#allocation19 + $0x980] sm:$0xf0]  ;;  %v11916_v31 = vld [vmem:[#allocation19 + $0x408] sm:$0xf] }
 0x5e1   : > { %v13189_v57 = vor.u32 %v14319_v37, %v13188_v22  ;;  %v12677_v22 = vor.u32 %v14191_v18, %v12676_v2  ;;  %v12548_v37 = vld [vmem:[#allocation19 + $0x900] sm:$0xf]  ;;  %v13068_v2 = vld [vmem:[#allocation19 + $0xd08] sm:$0xf] }
 0x5e2   : > { %v4928_v55 = vmax.f32 %v4922_v34, 0.0  ;;  %v13903_v34 = vld [vmem:[#allocation19 + $0x17c] sm:$0xf0] }
 0x5e3   : > { %v5345_v5 = vpop.f32.mrf.mxu1  ;;  %8589 = vmatpush.bf16.msrb.mxu1 %v13189_v57  ;;  %v11525_v9 = vor.u32 %v13903_v34, %v11524_v10  ;;  %v14000_v10 = vld [vmem:[#allocation19 + $0x484] sm:$0xf0]  ;;  %v11918_v34 = vld [vmem:[#allocation19 + $0x488] sm:$0xf0] }
 0x5e4   : > { %v4932_v62 = vpack.c.bf16 %v4928_v55, %v4928_v55  ;;  %v16145_v48 = vadd.f32 %v5345_v5, %v5333_v26  ;;  %v13060_v55 = vld [vmem:[#allocation19 + $0xd00] sm:$0xf]  ;;  %v11526_v26 = vld [vmem:[#allocation19 + $0x180] sm:$0xf0] }
 0x5e5   : > { %v14271_v5 = vld [vmem:[#allocation19 + $0xd04] sm:$0xf]  ;;  %8581 = vmatpush.bf16.msrb.mxu0 %v11525_v9  ;;  %v12553_v9 = vor.u32 %v14143_v44, %v12550_v36 }
 0x5e6   : > { %5370 = vmatmul.bf16.vlgmr.msra.gmra.mxu3 %v4932_v62 }
 0x5e7   : > { %v4923_v6 = vpop.f32.mrf.mxu3  ;;  %8614 = vmatpush.bf16.msra.mxu3 %v13321_v45  ;;  %v14016_v45 = vld [vmem:[#allocation19 + $0x50c] sm:$0xf] }
 0x5e8   : > { %v12049_v57 = vor.u32 %v14016_v45, %v12046_v21  ;;  %v13070_v45 = vld [vmem:[#allocation19 + $0xd88] sm:$0xf0] }
 0x5e9   : > { %v13073_v21 = vor.u32 %v14272_v0, %v13070_v45  ;;  %v11924_v45 = vld [vmem:[#allocation19 + $0x410] sm:$0xf] }
 0x5eb   : > { %v5347_v54 = vpop.f32.mrf.mxu1  ;;  %8615 = vmatpush.bf16.msra.mxu3 %v13193_v7  ;;  %v13984_v7 = vld [vmem:[#allocation19 + $0x40c] sm:$0xf] }
 0x5ec   : > { %v11529_v54 = vor.u32 %v13887_v32, %v11526_v26  ;;  %v14111_v32 = vld [vmem:[#allocation19 + $0x804] sm:$0xf] }
 0x5ed   : > { %v12422_v26 = vld [vmem:[#allocation19 + $0x880] sm:$0xf0] }
 0x5ee   : > { %8607 = vmatpush.bf16.msra.mxu2 %v11529_v54  ;;  %v11921_v54 = vor.u32 %v13984_v7, %v11918_v34  ;;  %v12812_v34 = vld [vmem:[#allocation19 + $0xb08] sm:$0xf] }
 0x5f2   : > { %8608 = vmatpush.bf16.msra.mxu2 %v11401_v14  ;;  %v13196_v14 = vld [vmem:[#allocation19 + $0xe08] sm:$0xf] }
 0x5f3   : > { %v5397_v40 = vpop.f32.mrf.mxu1 }
 0x5f4   : > { %v16148_v63 = vadd.f32 %v5397_v40, %v5385_v33  ;;  %v11396_v33 = vld [vmem:[#allocation19] sm:$0xf] }
 0x5f5   : > { %v13871_v40 = vld [vmem:[#allocation19 + $0x7c] sm:$0xf0] }
 0x5f6   : > { %5422 = vmatmul.bf16.vlgmr.msrb.gmra.mxu3 %v4932_v62  ;;  %v14287_v62 = vld [vmem:[#allocation19 + $0xd7c] sm:$0xf0]  ;;  %v11397_v24 = vor.u32 %v13871_v40, %v11396_v33  ;;  %8653 = vmatpush.bf16.msrb.mxu2 %v12305_v17  ;;  %v13324_v33 = vld [vmem:[#allocation19 + $0xf08] sm:$0xf]  ;;  %v14304_v17 = vld [vmem:[#allocation19 + $0xe0c] sm:$0xf] }
 0x5f7   : > { %v13061_v6 = vor.u32 %v14287_v62, %v13060_v55  ;;  %v12549_v55 = vor.u32 %v14159_v4, %v12548_v37  ;;  %v12420_v62 = vld [vmem:[#allocation19 + $0x800] sm:$0xf]  ;;  %v14352_v40 = vld [vmem:[#allocation19 + $0xf84] sm:$0xf0]  ;;  %v13201_v19 = vor.u32 %v14304_v17, %v13198_v15  ;;  %v14081_v17 = vld [vmem:[#allocation19 + $0x714] sm:$0xf] }
 0x5f8   : > { %8582 = vmatpush.bf16.msrb.mxu0 %v11397_v24  ;;  %v12425_v24 = vor.u32 %v14111_v32, %v12422_v26  ;;  %v14256_v4 = vld [vmem:[#allocation19 + $0xc84] sm:$0xf0]  ;;  %v12310_v15 = vld [vmem:[#allocation19 + $0x790] sm:$0xf0] }
 0x5f9   : > { %8590 = vmatpush.bf16.msrb.mxu1 %v13061_v6  ;;  %v14127_v6 = vld [vmem:[#allocation19 + $0x87c] sm:$0xf0]  ;;  %v12684_v26 = vld [vmem:[#allocation19 + $0xa08] sm:$0xf] }
 0x5fa   : > { %8654 = vmatpush.bf16.msrb.mxu2 %v12177_v25  ;;  %v12421_v50 = vor.u32 %v14127_v6, %v12420_v62  ;;  %v13888_v25 = vld [vmem:[#allocation19 + $0x10c] sm:$0xf] }
 0x5fb   : > { %v5399_v3 = vpop.f32.mrf.mxu1  ;;  %v11537_v11 = vor.u32 %v13888_v25, %v11534_v8  ;;  %v14208_v62 = vld [vmem:[#allocation19 + $0xb0c] sm:$0xf]  ;;  %v14033_v25 = vld [vmem:[#allocation19 + $0x58c] sm:$0xf0]  ;;  %v14017_v8 = vld [vmem:[#allocation19 + $0x514] sm:$0xf] }
 0x5fc   : > { %v13065_v3 = vor.u32 %v14271_v5, %v13062_v30  ;;  %8627 = vmatpush.bf16.msra.mxu0 %v12301_v52  ;;  %v11917_v5 = vor.u32 %v14000_v10, %v11916_v31  ;;  %v11788_v30 = vld [vmem:[#allocation19 + $0x308] sm:$0xf]  ;;  %v11662_v52 = vld [vmem:[#allocation19 + $0x288] sm:$0xf0] }
 0x5fd   : > { %8591 = vmatpush.bf16.msrb.mxu1 %v12933_v16  ;;  %v13325_v16 = vor.u32 %v14352_v40, %v13324_v33  ;;  %v11665_v27 = vor.u32 %v13920_v35, %v11662_v52  ;;  %v14240_v31 = vld [vmem:[#allocation19 + $0xc0c] sm:$0xf]  ;;  %v14097_v52 = vld [vmem:[#allocation19 + $0x78c] sm:$0xf0] }
 0x5fe   : > { %8616 = vmatpush.bf16.msra.mxu3 %v13065_v3  ;;  %8655 = vmatpush.bf16.msrb.mxu2 %v12049_v57  ;;  %v13968_v3 = vld [vmem:[#allocation19 + $0x384] sm:$0xf0]  ;;  %v11406_v57 = vld [vmem:[#allocation19 + $0x88] sm:$0xf0] }
 0x5ff   : > { %v11789_v59 = vor.u32 %v13968_v3, %v11788_v30  ;;  %v12942_v10 = vld [vmem:[#allocation19 + $0xc88] sm:$0xf0]  ;;  %v12556_v3 = vld [vmem:[#allocation19 + $0x908] sm:$0xf] }
 0x600   : > { %8628 = vmatpush.bf16.msra.mxu0 %v12173_v13  ;;  %v14288_v13 = vld [vmem:[#allocation19 + $0xd84] sm:$0xf0]  ;;  %v12945_v7 = vor.u32 %v14240_v31, %v12942_v10  ;;  %v12814_v6 = vld [vmem:[#allocation19 + $0xb88] sm:$0xf0]  ;;  %v13332_v31 = vld [vmem:[#allocation19 + $0xf10] sm:$0xf] }
 0x601   : > { %8592 = vmatpush.bf16.msrb.mxu1 %v12805_v29  ;;  %v11532_v29 = vld [vmem:[#allocation19 + $0x108] sm:$0xf]  ;;  %v13069_v42 = vor.u32 %v14288_v13, %v13068_v2  ;;  %v12817_v32 = vor.u32 %v14208_v62, %v12814_v6  ;;  %v12686_v33 = vld [vmem:[#allocation19 + $0xa88] sm:$0xf0]  ;;  %v12182_v2 = vld [vmem:[#allocation19 + $0x690] sm:$0xf0] }
 0x602   : > { %8617 = vmatpush.bf16.msra.mxu3 %v12937_v51  ;;  %8656 = vmatpush.bf16.msrb.mxu2 %v11921_v54  ;;  %v14320_v51 = vld [vmem:[#allocation19 + $0xe84] sm:$0xf0]  ;;  %v14176_v54 = vld [vmem:[#allocation19 + $0xa0c] sm:$0xf]  ;;  %v12052_v13 = vld [vmem:[#allocation19 + $0x510] sm:$0xf] }
 0x603   : > { %v13197_v1 = vor.u32 %v14320_v51, %v13196_v14  ;;  %v12689_v40 = vor.u32 %v14176_v54, %v12686_v33  ;;  %v14353_v10 = vld [vmem:[#allocation19 + $0xf8c] sm:$0xf0]  ;;  %v14337_v62 = vld [vmem:[#allocation19 + $0xf14] sm:$0xf] }
 0x604   : > { %8629 = vmatpush.bf16.msra.mxu0 %v12045_v56  ;;  %v13856_v56 = vld [vmem:[#allocation19 + $0xc] sm:$0xf]  ;;  %v14321_v33 = vld [vmem:[#allocation19 + $0xe8c] sm:$0xf0] }
 0x605   : > { %8593 = vmatpush.bf16.msrb.mxu1 %v12677_v22  ;;  %v13872_v22 = vld [vmem:[#allocation19 + $0x84] sm:$0xf0]  ;;  %v11409_v36 = vor.u32 %v13856_v56, %v11406_v57 }
 0x606   : > { %8618 = vmatpush.bf16.msra.mxu3 %v12809_v53  ;;  %8657 = vmatpush.bf16.msrb.mxu2 %v11793_v20  ;;  %v13904_v53 = vld [vmem:[#allocation19 + $0x184] sm:$0xf0] }
 0x607   : > { %v11533_v18 = vor.u32 %v13904_v53, %v11532_v29  ;;  %v14065_v29 = vld [vmem:[#allocation19 + $0x68c] sm:$0xf0]  ;;  %v14049_v53 = vld [vmem:[#allocation19 + $0x614] sm:$0xf] }
 0x608   : > { %8630 = vmatpush.bf16.msra.mxu0 %v11917_v5  ;;  %v14192_v5 = vld [vmem:[#allocation19 + $0xa84] sm:$0xf0] }
 0x609   : > { %8594 = vmatpush.bf16.msrb.mxu1 %v12549_v55  ;;  %v14224_v55 = vld [vmem:[#allocation19 + $0xb84] sm:$0xf0]  ;;  %v12685_v30 = vor.u32 %v14192_v5, %v12684_v26  ;;  %v13937_v26 = vld [vmem:[#allocation19 + $0x28c] sm:$0xf0] }
 0x60a   : > { %8619 = vmatpush.bf16.msra.mxu3 %v12681_v28  ;;  %8658 = vmatpush.bf16.msrb.mxu2 %v11665_v27  ;;  %v12940_v28 = vld [vmem:[#allocation19 + $0xc08] sm:$0xf]  ;;  %v12313_v27 = vor.u32 %v14081_v17, %v12310_v15  ;;  %v11412_v15 = vld [vmem:[#allocation19 + $0x10] sm:$0xf] }
 0x60b   : > { %v12941_v44 = vor.u32 %v14256_v4, %v12940_v28 }
 0x60c   : > { %8631 = vmatpush.bf16.msra.mxu0 %v11789_v59  ;;  %v14112_v59 = vld [vmem:[#allocation19 + $0x80c] sm:$0xf] }
 0x60d   : > { %8595 = vmatpush.bf16.msrb.mxu1 %v12421_v50  ;;  %v12557_v50 = vor.u32 %v14160_v60, %v12556_v3  ;;  %v12433_v14 = vor.u32 %v14112_v59, %v12430_v39  ;;  %v11670_v3 = vld [vmem:[#allocation19 + $0x290] sm:$0xf0]  ;;  %v13076_v39 = vld [vmem:[#allocation19 + $0xd10] sm:$0xf] }
 0x60e   : > { %8620 = vmatpush.bf16.msra.mxu3 %v12553_v9  ;;  %8659 = vmatpush.bf16.msrb.mxu2 %v11537_v11  ;;  %v12813_v9 = vor.u32 %v14224_v55, %v12812_v34  ;;  %v12053_v11 = vor.u32 %v14033_v25, %v12052_v13  ;;  %v11798_v34 = vld [vmem:[#allocation19 + $0x390] sm:$0xf0]  ;;  %v14098_v13 = vld [vmem:[#allocation19 + $0x794] sm:$0xf0]  ;;  %v14082_v25 = vld [vmem:[#allocation19 + $0x71c] sm:$0xf] }
 0x60f   : > { %v14305_v60 = vld [vmem:[#allocation19 + $0xe14] sm:$0xf] }
 0x610   : > { %8632 = vmatpush.bf16.msra.mxu0 %v11661_v49  ;;  %v12309_v49 = vor.u32 %v14097_v52, %v12308_v47  ;;  %v14273_v47 = vld [vmem:[#allocation19 + $0xd14] sm:$0xf] }
 0x611   : > { %8640 = vmatpush.bf16.msra.mxu1 %v13325_v16  ;;  %v14128_v16 = vld [vmem:[#allocation19 + $0x884] sm:$0xf0] }
 0x612   : > { %8621 = vmatpush.bf16.msra.mxu3 %v12425_v24  ;;  %8660 = vmatpush.bf16.msrb.mxu2 %v11409_v36  ;;  %v12428_v24 = vld [vmem:[#allocation19 + $0x808] sm:$0xf]  ;;  %v13969_v36 = vld [vmem:[#allocation19 + $0x38c] sm:$0xf0] }
 0x613   : > { %v12429_v20 = vor.u32 %v14128_v16, %v12428_v24  ;;  %v11540_v24 = vld [vmem:[#allocation19 + $0x110] sm:$0xf] }
 0x614   : > { %8633 = vmatpush.bf16.msra.mxu0 %v11533_v18  ;;  %v12185_v18 = vor.u32 %v14049_v53, %v12182_v2  ;;  %v13905_v16 = vld [vmem:[#allocation19 + $0x18c] sm:$0xf0]  ;;  %v13857_v53 = vld [vmem:[#allocation19 + $0x14] sm:$0xf] }
 0x615   : > { %8641 = vmatpush.bf16.msra.mxu1 %v13197_v1  ;;  %v11541_v52 = vor.u32 %v13905_v16, %v11540_v24  ;;  %v11414_v2 = vld [vmem:[#allocation19 + $0x90] sm:$0xf0]  ;;  %v13986_v24 = vld [vmem:[#allocation19 + $0x41c] sm:$0xf] }
 0x616   : > { %8666 = vmatpush.bf16.msrb.mxu3 %v13329_v58  ;;  %v11934_v16 = vld [vmem:[#allocation19 + $0x498] sm:$0xf0] }
 0x619   : > { %8642 = vmatpush.bf16.msra.mxu1 %v13069_v42  ;;  %v12054_v42 = vld [vmem:[#allocation19 + $0x590] sm:$0xf0] }
 0x61a   : > { %8667 = vmatpush.bf16.msrb.mxu3 %v13201_v19  ;;  %v12180_v19 = vld [vmem:[#allocation19 + $0x610] sm:$0xf]  ;;  %v12057_v0 = vor.u32 %v14017_v8, %v12054_v42  ;;  %v12318_v8 = vld [vmem:[#allocation19 + $0x798] sm:$0xf0] }
 0x61d   : > { %8643 = vmatpush.bf16.msra.mxu1 %v12941_v44  ;;  %v11796_v44 = vld [vmem:[#allocation19 + $0x310] sm:$0xf] }
 0x61e   : > { %8668 = vmatpush.bf16.msrb.mxu3 %v13073_v21  ;;  %v14001_v21 = vld [vmem:[#allocation19 + $0x48c] sm:$0xf0] }
 0x61f   : > { %v11925_v4 = vor.u32 %v14001_v21, %v11924_v45  ;;  %v12820_v21 = vld [vmem:[#allocation19 + $0xb10] sm:$0xf] }
 0x621   : > { %8644 = vmatpush.bf16.msra.mxu1 %v12813_v9  ;;  %v13334_v9 = vld [vmem:[#allocation19 + $0xf90] sm:$0xf0] }
 0x622   : > { %8669 = vmatpush.bf16.msrb.mxu3 %v12945_v7  ;;  %v13953_v7 = vld [vmem:[#allocation19 + $0x314] sm:$0xf]  ;;  %v13337_v54 = vor.u32 %v14337_v62, %v13334_v9 }
 0x623   : > { %v11801_v5 = vor.u32 %v13953_v7, %v11798_v34  ;;  %v12692_v7 = vld [vmem:[#allocation19 + $0xa10] sm:$0xf]  ;;  %v14177_v9 = vld [vmem:[#allocation19 + $0xa14] sm:$0xf] }
 0x624   : > { %v14193_v34 = vld [vmem:[#allocation19 + $0xa8c] sm:$0xf0] }
 0x625   : > { %8645 = vmatpush.bf16.msra.mxu1 %v12685_v30  ;;  %v13204_v30 = vld [vmem:[#allocation19 + $0xe10] sm:$0xf] }
 0x626   : > { %8670 = vmatpush.bf16.msrb.mxu3 %v12817_v32  ;;  %v11668_v32 = vld [vmem:[#allocation19 + $0x210] sm:$0xf] }
 0x627   : > { %v11669_v41 = vor.u32 %v13937_v26, %v11668_v32  ;;  %v14034_v32 = vld [vmem:[#allocation19 + $0x594] sm:$0xf0]  ;;  %v14018_v26 = vld [vmem:[#allocation19 + $0x51c] sm:$0xf] }
 0x629   : > { %v16150_v61 = vpop.f32.mrf.mxu2  ;;  %8646 = vmatpush.bf16.msra.mxu1 %v12557_v50 }
 0x62a   : > { %8671 = vmatpush.bf16.msrb.mxu3 %v12689_v40  ;;  %v5359_v51 = vadd.f32 %v16150_v61, %v16145_v48  ;;  %v12181_v61 = vor.u32 %v14065_v29, %v12180_v19  ;;  %v13921_v40 = vld [vmem:[#allocation19 + $0x214] sm:$0xf]  ;;  %v14257_v29 = vld [vmem:[#allocation19 + $0xc8c] sm:$0xf0] }
 0x62b   : > { %v11673_v59 = vor.u32 %v13921_v40, %v11670_v3  ;;  %v14161_v40 = vld [vmem:[#allocation19 + $0x98c] sm:$0xf0] }
 0x62d   : > { %8647 = vmatpush.bf16.msra.mxu1 %v12429_v20  ;;  %v13209_v20 = vor.u32 %v14305_v60, %v13206_v23  ;;  %v14145_v23 = vld [vmem:[#allocation19 + $0x914] sm:$0xf] }
 0x62e   : > { %8672 = vmatpush.bf16.msrb.mxu3 %v12561_v12  ;;  %v13205_v12 = vor.u32 %v14321_v33, %v13204_v30  ;;  %v12564_v33 = vld [vmem:[#allocation19 + $0x910] sm:$0xf] }
 0x631   : > { %v5360_v43 = vpop.f32.mrf.mxu2 }
 0x632   : > { %v11404_v43 = vld [vmem:[#allocation19 + $0x8] sm:$0xf]  ;;  %8673 = vmatpush.bf16.msrb.mxu3 %v12433_v14  ;;  %v14289_v14 = vld [vmem:[#allocation19 + $0xd8c] sm:$0xf0] }
 0x633   : > { %v11405_v37 = vor.u32 %v13872_v22, %v11404_v43  ;;  %v13985_v43 = vld [vmem:[#allocation19 + $0x414] sm:$0xf]  ;;  %v13077_v17 = vor.u32 %v14289_v14, %v13076_v39  ;;  %v14129_v14 = vld [vmem:[#allocation19 + $0x88c] sm:$0xf0] }
 0x634   : > { %v11926_v22 = vld [vmem:[#allocation19 + $0x490] sm:$0xf0] }
 0x635   : > { %8634 = vmatpush.bf16.msra.mxu0 %v11405_v37  ;;  %v11929_v56 = vor.u32 %v13985_v43, %v11926_v22  ;;  %v14225_v43 = vld [vmem:[#allocation19 + $0xb8c] sm:$0xf0] }
 0x639   : > { %v16152_v38 = vpop.f32.mrf.mxu2 }
 0x63a   : > { %v5411_v28 = vadd.f32 %v16152_v38, %v16148_v63  ;;  %v11797_v63 = vor.u32 %v13969_v36, %v11796_v44  ;;  %v13333_v38 = vor.u32 %v14353_v10, %v13332_v31  ;;  %v14050_v44 = vld [vmem:[#allocation19 + $0x61c] sm:$0xf]  ;;  %v12821_v31 = vor.u32 %v14225_v43, %v12820_v21 }
 0x63b   : > { %v12190_v36 = vld [vmem:[#allocation19 + $0x698] sm:$0xf0] }
 0x63c   : > { %v12193_v62 = vor.u32 %v14050_v44, %v12190_v36  ;;  %v14306_v21 = vld [vmem:[#allocation19 + $0xe1c] sm:$0xf]  ;;  %v13906_v36 = vld [vmem:[#allocation19 + $0x194] sm:$0xf0] }
 0x63d   : > { %v13214_v43 = vld [vmem:[#allocation19 + $0xe98] sm:$0xf0] }
 0x63e   : > { %v13217_v44 = vor.u32 %v14306_v21, %v13214_v43  ;;  %v12574_v43 = vld [vmem:[#allocation19 + $0x998] sm:$0xf0] }
 0x641   : > { %v5412_v46 = vpop.f32.mrf.mxu2 }
 0x669   : > { %v5371_v58 = vpop.f32.mrf.mxu3 }
 0x66a   : > { %v5372_v35 = vadd.f32 %v5371_v58, %v5359_v51  ;;  %v13889_v51 = vld [vmem:[#allocation19 + $0x114] sm:$0xf] }
 0x66b   : > { %v11542_v58 = vld [vmem:[#allocation19 + $0x190] sm:$0xf0] }
 0x66c   : > { %v5427_v1 = vmax.f32 %v5372_v35, 0.0  ;;  %v13078_v35 = vld [vmem:[#allocation19 + $0xd90] sm:$0xf0] }
 0x66d   : > { %v13081_v19 = vor.u32 %v14273_v47, %v13078_v35  ;;  %v11937_v35 = vor.u32 %v13986_v24, %v11934_v16 }
 0x66e   : > { %v16156_v46 = vpack.c.bf16 %v5427_v1, %v5427_v1  ;;  %v13873_v1 = vld [vmem:[#allocation19 + $0x8c] sm:$0xf0] }
 0x66f   : > { %v11413_v42 = vor.u32 %v13873_v1, %v11412_v15  ;;  %v14354_v15 = vld [vmem:[#allocation19 + $0xf94] sm:$0xf0] }
 0x670   : > { %8583 = vmatmul.bf16.vlgmr.msrb.gmra.mxu0 %v16156_v46  ;;  %8609 = vmatmul.bf16.vlgmr.msra.gmra.mxu2 %v16156_v46  ;;  %v13970_v1 = vld [vmem:[#allocation19 + $0x394] sm:$0xf0] }
 0x671   : > { %8679 = vmatpush.bf16.msrb.mxu0 %v12309_v49  ;;  %8705 = vmatpush.bf16.msra.mxu2 %v12313_v27  ;;  %v5373_v48 = vpop.f32.mrf.mxu3  ;;  %v12948_v49 = vld [vmem:[#allocation19 + $0xc10] sm:$0xf]  ;;  %v11545_v27 = vor.u32 %v13889_v51, %v11542_v58  ;;  %v14113_v51 = vld [vmem:[#allocation19 + $0x814] sm:$0xf] }
 0x672   : > { %v14241_v48 = vld [vmem:[#allocation19 + $0xc14] sm:$0xf] }
 0x673   : > { %v12438_v58 = vld [vmem:[#allocation19 + $0x890] sm:$0xf0] }
 0x675   : > { %8680 = vmatpush.bf16.msrb.mxu0 %v12181_v61  ;;  %8706 = vmatpush.bf16.msra.mxu2 %v12185_v18  ;;  %v12950_v61 = vld [vmem:[#allocation19 + $0xc90] sm:$0xf0]  ;;  %v12316_v18 = vld [vmem:[#allocation19 + $0x718] sm:$0xf] }
 0x676   : > { %v12953_v45 = vor.u32 %v14241_v48, %v12950_v61  ;;  %v12317_v22 = vor.u32 %v14098_v13, %v12316_v18  ;;  %v11676_v13 = vld [vmem:[#allocation19 + $0x218] sm:$0xf] }
 0x679   : > { %8681 = vmatpush.bf16.msrb.mxu0 %v12053_v11  ;;  %8707 = vmatpush.bf16.msra.mxu2 %v12057_v0  ;;  %v5423_v37 = vpop.f32.mrf.mxu3  ;;  %v12949_v11 = vor.u32 %v14257_v29, %v12948_v49  ;;  %v11417_v0 = vor.u32 %v13857_v53, %v11414_v2  ;;  %v13954_v49 = vld [vmem:[#allocation19 + $0x31c] sm:$0xf]  ;;  %v12441_v2 = vor.u32 %v14113_v51, %v12438_v58 }
 0x67a   : > { %v5424_v57 = vadd.f32 %v5423_v37, %v5411_v28  ;;  %v12321_v28 = vor.u32 %v14082_v25, %v12318_v8  ;;  %v14209_v37 = vld [vmem:[#allocation19 + $0xb14] sm:$0xf]  ;;  %v14338_v29 = vld [vmem:[#allocation19 + $0xf1c] sm:$0xf]  ;;  %v13212_v25 = vld [vmem:[#allocation19 + $0xe18] sm:$0xf] }
 0x67b   : > { %v13342_v53 = vld [vmem:[#allocation19 + $0xf98] sm:$0xf0]  ;;  %v14322_v8 = vld [vmem:[#allocation19 + $0xe94] sm:$0xf0] }
 0x67c   : > { %v5428_v55 = vmax.f32 %v5424_v57, 0.0  ;;  %v14066_v57 = vld [vmem:[#allocation19 + $0x694] sm:$0xf0]  ;;  %v12830_v58 = vld [vmem:[#allocation19 + $0xb98] sm:$0xf0] }
 0x67d   : > { %8682 = vmatpush.bf16.msrb.mxu0 %v11925_v4  ;;  %8708 = vmatpush.bf16.msra.mxu2 %v11929_v56  ;;  %v12822_v4 = vld [vmem:[#allocation19 + $0xb90] sm:$0xf0]  ;;  %v12188_v56 = vld [vmem:[#allocation19 + $0x618] sm:$0xf] }
 0x67e   : > { %v16162_v6 = vpack.c.bf16 %v5428_v55, %v5428_v55  ;;  %v12825_v10 = vor.u32 %v14209_v37, %v12822_v4  ;;  %v12189_v55 = vor.u32 %v14066_v57, %v12188_v56  ;;  %v11548_v4 = vld [vmem:[#allocation19 + $0x118] sm:$0xf] }
 0x67f   : > { %v13084_v56 = vld [vmem:[#allocation19 + $0xd18] sm:$0xf] }
 0x680   : > { %8596 = vmatmul.bf16.vlgmr.msrb.gmra.mxu1 %v16162_v6  ;;  %8622 = vmatmul.bf16.vlgmr.msra.gmra.mxu3 %v16162_v6  ;;  %v14290_v57 = vld [vmem:[#allocation19 + $0xd94] sm:$0xf0] }
 0x681   : > { %8635 = vmatmul.bf16.vlgmr.msra.gmra.mxu0 %v16156_v46  ;;  %8661 = vmatmul.bf16.vlgmr.msrb.gmra.mxu2 %v16156_v46  ;;  %v5425_v50 = vpop.f32.mrf.mxu3 }
 0x682   : > { %8683 = vmatpush.bf16.msrb.mxu0 %v11797_v63  ;;  %8692 = vmatpush.bf16.msrb.mxu1 %v13333_v38  ;;  %v12694_v63 = vld [vmem:[#allocation19 + $0xa90] sm:$0xf0]  ;;  %v12060_v38 = vld [vmem:[#allocation19 + $0x518] sm:$0xf] }
 0x683   : > { %8709 = vmatpush.bf16.msra.mxu2 %v11801_v5  ;;  %8718 = vmatpush.bf16.msra.mxu3 %v13337_v54  ;;  %v12062_v5 = vld [vmem:[#allocation19 + $0x598] sm:$0xf0]  ;;  %v12693_v54 = vor.u32 %v14193_v34, %v12692_v7  ;;  %v12697_v30 = vor.u32 %v14177_v9, %v12694_v63  ;;  %v12061_v3 = vor.u32 %v14034_v32, %v12060_v38  ;;  %v12566_v50 = vld [vmem:[#allocation19 + $0x990] sm:$0xf0]  ;;  %v13874_v38 = vld [vmem:[#allocation19 + $0x94] sm:$0xf0] }
 0x684   : > { %v12065_v60 = vor.u32 %v14018_v26, %v12062_v5  ;;  %v12569_v39 = vor.u32 %v14145_v23, %v12566_v50  ;;  %v14274_v7 = vld [vmem:[#allocation19 + $0xd1c] sm:$0xf]  ;;  %v11549_v9 = vor.u32 %v13906_v36, %v11548_v4  ;;  %v12956_v32 = vld [vmem:[#allocation19 + $0xc18] sm:$0xf]  ;;  %v14083_v50 = vld [vmem:[#allocation19 + $0x724] sm:$0xf] }
 0x685   : > { %v13086_v34 = vld [vmem:[#allocation19 + $0xd98] sm:$0xf0]  ;;  %v14258_v26 = vld [vmem:[#allocation19 + $0xc94] sm:$0xf0]  ;;  %v11942_v4 = vld [vmem:[#allocation19 + $0x4a0] sm:$0xf0] }
 0x686   : > { %8684 = vmatpush.bf16.msrb.mxu0 %v11669_v41  ;;  %8693 = vmatpush.bf16.msrb.mxu1 %v13205_v12  ;;  %v11932_v41 = vld [vmem:[#allocation19 + $0x418] sm:$0xf]  ;;  %v13089_v5 = vor.u32 %v14274_v7, %v13086_v34  ;;  %v12957_v23 = vor.u32 %v14258_v26, %v12956_v32  ;;  %v12446_v7 = vld [vmem:[#allocation19 + $0x898] sm:$0xf0]  ;;  %v11814_v32 = vld [vmem:[#allocation19 + $0x3a0] sm:$0xf0] }
 0x687   : > { %8710 = vmatpush.bf16.msra.mxu2 %v11673_v59  ;;  %8719 = vmatpush.bf16.msra.mxu3 %v13209_v20  ;;  %v14002_v12 = vld [vmem:[#allocation19 + $0x494] sm:$0xf0]  ;;  %v12565_v59 = vor.u32 %v14161_v40, %v12564_v33  ;;  %v12436_v20 = vld [vmem:[#allocation19 + $0x810] sm:$0xf]  ;;  %v14242_v33 = vld [vmem:[#allocation19 + $0xc1c] sm:$0xf] }
 0x688   : > { %v11933_v47 = vor.u32 %v14002_v12, %v11932_v41  ;;  %v12958_v40 = vld [vmem:[#allocation19 + $0xc98] sm:$0xf0]  ;;  %v12326_v41 = vld [vmem:[#allocation19 + $0x7a0] sm:$0xf0] }
 0x689   : > { %v12961_v16 = vor.u32 %v14242_v33, %v12958_v40  ;;  %v12329_v51 = vor.u32 %v14083_v50, %v12326_v41  ;;  %v13220_v50 = vld [vmem:[#allocation19 + $0xe20] sm:$0xf] }
 0x68a   : > { %8685 = vmatpush.bf16.msrb.mxu0 %v11541_v52  ;;  %8694 = vmatpush.bf16.msrb.mxu1 %v13077_v17  ;;  %v11804_v52 = vld [vmem:[#allocation19 + $0x318] sm:$0xf] }
 0x68b   : > { %8711 = vmatpush.bf16.msra.mxu2 %v11545_v27  ;;  %8720 = vmatpush.bf16.msra.mxu3 %v13081_v19  ;;  %v13340_v17 = vld [vmem:[#allocation19 + $0xf18] sm:$0xf]  ;;  %v11806_v27 = vld [vmem:[#allocation19 + $0x398] sm:$0xf0]  ;;  %v12437_v19 = vor.u32 %v14129_v14, %v12436_v20  ;;  %v11805_v61 = vor.u32 %v13970_v1, %v11804_v52  ;;  %v14051_v52 = vld [vmem:[#allocation19 + $0x624] sm:$0xf] }
 0x68c   : > { %v13341_v48 = vor.u32 %v14354_v15, %v13340_v17  ;;  %v11809_v18 = vor.u32 %v13954_v49, %v11806_v27  ;;  %v12828_v20 = vld [vmem:[#allocation19 + $0xb18] sm:$0xf]  ;;  %v14210_v14 = vld [vmem:[#allocation19 + $0xb1c] sm:$0xf]  ;;  %v12198_v17 = vld [vmem:[#allocation19 + $0x6a0] sm:$0xf0] }
 0x68d   : > { %v12833_v1 = vor.u32 %v14210_v14, %v12830_v58  ;;  %v12700_v27 = vld [vmem:[#allocation19 + $0xa18] sm:$0xf]  ;;  %v11556_v58 = vld [vmem:[#allocation19 + $0x120] sm:$0xf] }
 0x68e   : > { %8686 = vmatpush.bf16.msrb.mxu0 %v11413_v42  ;;  %8695 = vmatpush.bf16.msrb.mxu1 %v12949_v11  ;;  %v13345_v42 = vor.u32 %v14338_v29, %v13342_v53  ;;  %v13938_v11 = vld [vmem:[#allocation19 + $0x294] sm:$0xf0]  ;;  %v14178_v29 = vld [vmem:[#allocation19 + $0xa1c] sm:$0xf]  ;;  %v12201_v53 = vor.u32 %v14051_v52, %v12198_v17  ;;  %v14291_v17 = vld [vmem:[#allocation19 + $0xd9c] sm:$0xf0] }
 0x68f   : > { %8712 = vmatpush.bf16.msra.mxu2 %v11417_v0  ;;  %8721 = vmatpush.bf16.msra.mxu3 %v12953_v45  ;;  %v13922_v0 = vld [vmem:[#allocation19 + $0x21c] sm:$0xf] }
 0x690   : > { %8648 = vmatmul.bf16.vlgmr.msra.gmra.mxu1 %v16162_v6  ;;  %8674 = vmatmul.bf16.vlgmr.msrb.gmra.mxu3 %v16162_v6  ;;  %v11678_v45 = vld [vmem:[#allocation19 + $0x298] sm:$0xf0] }
 0x691   : > { %8687 = vmatmul.bf16.vlgmr.msrb.gmra.mxu0 %v16156_v46  ;;  %v11681_v37 = vor.u32 %v13922_v0, %v11678_v45  ;;  %v14162_v0 = vld [vmem:[#allocation19 + $0x994] sm:$0xf0]  ;;  %v14146_v45 = vld [vmem:[#allocation19 + $0x91c] sm:$0xf] }
 0x692   : > { %8731 = vmatpush.bf16.msra.mxu0 %v12317_v22  ;;  %8696 = vmatpush.bf16.msrb.mxu1 %v12821_v31  ;;  %v13213_v22 = vor.u32 %v14322_v8, %v13212_v25  ;;  %v13890_v31 = vld [vmem:[#allocation19 + $0x11c] sm:$0xf] }
 0x693   : > { %8757 = vmatpush.bf16.msrb.mxu2 %v12321_v28  ;;  %8722 = vmatpush.bf16.msra.mxu3 %v12825_v10  ;;  %v11677_v28 = vor.u32 %v13938_v11, %v11676_v13  ;;  %v11550_v10 = vld [vmem:[#allocation19 + $0x198] sm:$0xf0]  ;;  %v12070_v13 = vld [vmem:[#allocation19 + $0x5a0] sm:$0xf0]  ;;  %v12572_v11 = vld [vmem:[#allocation19 + $0x918] sm:$0xf] }
 0x694   : > { %8713 = vmatmul.bf16.vlgmr.msra.gmra.mxu2 %v16156_v46  ;;  %v11553_v63 = vor.u32 %v13890_v31, %v11550_v10  ;;  %v14130_v31 = vld [vmem:[#allocation19 + $0x894] sm:$0xf0]  ;;  %v14114_v10 = vld [vmem:[#allocation19 + $0x81c] sm:$0xf] }
 0x696   : > { %8732 = vmatpush.bf16.msra.mxu0 %v12189_v55  ;;  %8697 = vmatpush.bf16.msrb.mxu1 %v12693_v54  ;;  %v13085_v55 = vor.u32 %v14290_v57, %v13084_v56  ;;  %v13858_v54 = vld [vmem:[#allocation19 + $0x1c] sm:$0xf]  ;;  %v12573_v56 = vor.u32 %v14162_v0, %v12572_v11  ;;  %v12444_v57 = vld [vmem:[#allocation19 + $0x818] sm:$0xf]  ;;  %v12966_v11 = vld [vmem:[#allocation19 + $0xca0] sm:$0xf0] }
 0x697   : > { %8758 = vmatpush.bf16.msrb.mxu2 %v12193_v62  ;;  %8723 = vmatpush.bf16.msra.mxu3 %v12697_v30  ;;  %v11420_v62 = vld [vmem:[#allocation19 + $0x18] sm:$0xf]  ;;  %v11422_v30 = vld [vmem:[#allocation19 + $0x98] sm:$0xf0]  ;;  %v12445_v26 = vor.u32 %v14130_v31, %v12444_v57  ;;  %v12332_v0 = vld [vmem:[#allocation19 + $0x728] sm:$0xf] }
 0x698   : > { %v11421_v12 = vor.u32 %v13874_v38, %v11420_v62  ;;  %v11425_v24 = vor.u32 %v13858_v54, %v11422_v30  ;;  %v13971_v62 = vld [vmem:[#allocation19 + $0x39c] sm:$0xf0]  ;;  %v13955_v38 = vld [vmem:[#allocation19 + $0x324] sm:$0xf]  ;;  %v12449_v30 = vor.u32 %v14114_v10, %v12446_v7  ;;  %v12204_v7 = vld [vmem:[#allocation19 + $0x628] sm:$0xf] }
 0x699   : > { %v13350_v54 = vld [vmem:[#allocation19 + $0xfa0] sm:$0xf0]  ;;  %v12836_v57 = vld [vmem:[#allocation19 + $0xb20] sm:$0xf] }
 0x69a   : > { %8733 = vmatpush.bf16.msra.mxu0 %v12061_v3  ;;  %8698 = vmatpush.bf16.msrb.mxu1 %v12565_v59  ;;  %v12324_v3 = vld [vmem:[#allocation19 + $0x720] sm:$0xf]  ;;  %v12838_v10 = vld [vmem:[#allocation19 + $0xba0] sm:$0xf0] }
 0x69b   : > { %8759 = vmatpush.bf16.msrb.mxu2 %v12065_v60  ;;  %8724 = vmatpush.bf16.msra.mxu3 %v12569_v39  ;;  %v14099_v60 = vld [vmem:[#allocation19 + $0x79c] sm:$0xf0]  ;;  %v14226_v39 = vld [vmem:[#allocation19 + $0xb94] sm:$0xf0] }
 0x69c   : > { %v12325_v59 = vor.u32 %v14099_v60, %v12324_v3  ;;  %v12829_v15 = vor.u32 %v14226_v39, %v12828_v20  ;;  %v11817_v3 = vor.u32 %v13955_v38, %v11814_v32  ;;  %v11684_v60 = vld [vmem:[#allocation19 + $0x220] sm:$0xf]  ;;  %v13222_v20 = vld [vmem:[#allocation19 + $0xea0] sm:$0xf0] }
 0x69d   : > { %v12708_v32 = vld [vmem:[#allocation19 + $0xa20] sm:$0xf] }
 0x69e   : > { %8734 = vmatpush.bf16.msra.mxu0 %v11933_v47  ;;  %8699 = vmatpush.bf16.msrb.mxu1 %v12437_v19  ;;  %v12196_v47 = vld [vmem:[#allocation19 + $0x620] sm:$0xf]  ;;  %v14194_v19 = vld [vmem:[#allocation19 + $0xa94] sm:$0xf0] }
 0x69f   : > { %8760 = vmatpush.bf16.msrb.mxu2 %v11937_v35  ;;  %8725 = vmatpush.bf16.msra.mxu3 %v12441_v2  ;;  %v14067_v35 = vld [vmem:[#allocation19 + $0x69c] sm:$0xf0]  ;;  %v12702_v2 = vld [vmem:[#allocation19 + $0xa98] sm:$0xf0]  ;;  %v12701_v25 = vor.u32 %v14194_v19, %v12700_v27  ;;  %v13094_v27 = vld [vmem:[#allocation19 + $0xda0] sm:$0xf0] }
 0x6a0   : > { %v12197_v49 = vor.u32 %v14067_v35, %v12196_v47  ;;  %v12705_v8 = vor.u32 %v14178_v29, %v12702_v2  ;;  %v13907_v47 = vld [vmem:[#allocation19 + $0x19c] sm:$0xf0] }
 0x6a1   : > { %8700 = vmatmul.bf16.vlgmr.msrb.gmra.mxu1 %v16162_v6  ;;  %v13092_v35 = vld [vmem:[#allocation19 + $0xd20] sm:$0xf]  ;;  %v11557_v19 = vor.u32 %v13907_v47, %v11556_v58  ;;  %v11950_v58 = vld [vmem:[#allocation19 + $0x4a8] sm:$0xf0] }
 0x6a2   : > { %8744 = vmatpush.bf16.msra.mxu1 %v13341_v48  ;;  %8735 = vmatpush.bf16.msra.mxu0 %v11805_v61  ;;  %v12068_v48 = vld [vmem:[#allocation19 + $0x520] sm:$0xf] }
 0x6a3   : > { %8761 = vmatpush.bf16.msrb.mxu2 %v11809_v18  ;;  %8770 = vmatpush.bf16.msrb.mxu3 %v13345_v42  ;;  %v14035_v61 = vld [vmem:[#allocation19 + $0x59c] sm:$0xf0]  ;;  %v14019_v18 = vld [vmem:[#allocation19 + $0x524] sm:$0xf] }
 0x6a4   : > { %8726 = vmatmul.bf16.vlgmr.msra.gmra.mxu3 %v16162_v6  ;;  %v12069_v42 = vor.u32 %v14035_v61, %v12068_v48  ;;  %v12073_v21 = vor.u32 %v14019_v18, %v12070_v13  ;;  %v11428_v29 = vld [vmem:[#allocation19 + $0x20] sm:$0xf] }
 0x6a5   : > { %v13875_v48 = vld [vmem:[#allocation19 + $0x9c] sm:$0xf0] }
 0x6a6   : > { %8745 = vmatpush.bf16.msra.mxu1 %v13213_v22  ;;  %8736 = vmatpush.bf16.msra.mxu0 %v11677_v28  ;;  %v11940_v22 = vld [vmem:[#allocation19 + $0x420] sm:$0xf] }
 0x6a7   : > { %8762 = vmatpush.bf16.msrb.mxu2 %v11681_v37  ;;  %8771 = vmatpush.bf16.msrb.mxu3 %v13217_v44  ;;  %v14003_v28 = vld [vmem:[#allocation19 + $0x49c] sm:$0xf0]  ;;  %v13987_v37 = vld [vmem:[#allocation19 + $0x424] sm:$0xf]  ;;  %v12577_v44 = vor.u32 %v14146_v45, %v12574_v43  ;;  %v14100_v45 = vld [vmem:[#allocation19 + $0x7a4] sm:$0xf0] }
 0x6a8   : > { %v11941_v36 = vor.u32 %v14003_v28, %v11940_v22  ;;  %v11945_v34 = vor.u32 %v13987_v37, %v11942_v4  ;;  %v12964_v61 = vld [vmem:[#allocation19 + $0xc20] sm:$0xf]  ;;  %v14084_v43 = vld [vmem:[#allocation19 + $0x72c] sm:$0xf] }
 0x6a9   : > { %v14259_v18 = vld [vmem:[#allocation19 + $0xc9c] sm:$0xf0]  ;;  %v12334_v22 = vld [vmem:[#allocation19 + $0x7a8] sm:$0xf0] }
 0x6aa   : > { %8746 = vmatpush.bf16.msra.mxu1 %v13085_v55  ;;  %8737 = vmatpush.bf16.msra.mxu0 %v11549_v9  ;;  %v11812_v55 = vld [vmem:[#allocation19 + $0x320] sm:$0xf]  ;;  %v12965_v28 = vor.u32 %v14259_v18, %v12964_v61  ;;  %v12337_v31 = vor.u32 %v14084_v43, %v12334_v22  ;;  %v11822_v61 = vld [vmem:[#allocation19 + $0x3a8] sm:$0xf0]  ;;  %v13228_v43 = vld [vmem:[#allocation19 + $0xe28] sm:$0xf] }
 0x6ab   : > { %8763 = vmatpush.bf16.msrb.mxu2 %v11553_v63  ;;  %8772 = vmatpush.bf16.msrb.mxu3 %v13089_v5  ;;  %v13348_v9 = vld [vmem:[#allocation19 + $0xf20] sm:$0xf]  ;;  %v14339_v5 = vld [vmem:[#allocation19 + $0xf24] sm:$0xf]  ;;  %v11813_v33 = vor.u32 %v13971_v62, %v11812_v55  ;;  %v14052_v55 = vld [vmem:[#allocation19 + $0x62c] sm:$0xf] }
 0x6ac   : > { %v14355_v63 = vld [vmem:[#allocation19 + $0xf9c] sm:$0xf0]  ;;  %v13353_v41 = vor.u32 %v14339_v5, %v13350_v54  ;;  %v12206_v62 = vld [vmem:[#allocation19 + $0x6a8] sm:$0xf0]  ;;  %v14179_v5 = vld [vmem:[#allocation19 + $0xa24] sm:$0xf] }
 0x6ad   : > { %v13349_v40 = vor.u32 %v14355_v63, %v13348_v9  ;;  %v12209_v54 = vor.u32 %v14052_v55, %v12206_v62  ;;  %v14292_v62 = vld [vmem:[#allocation19 + $0xda4] sm:$0xf0] }
 0x6ae   : > { %8747 = vmatpush.bf16.msra.mxu1 %v12957_v23  ;;  %8738 = vmatpush.bf16.msra.mxu0 %v11421_v12  ;;  %v13939_v23 = vld [vmem:[#allocation19 + $0x29c] sm:$0xf0] }
 0x6af   : > { %8764 = vmatpush.bf16.msrb.mxu2 %v11425_v24  ;;  %8773 = vmatpush.bf16.msrb.mxu3 %v12961_v16  ;;  %v14323_v12 = vld [vmem:[#allocation19 + $0xe9c] sm:$0xf0]  ;;  %v13923_v24 = vld [vmem:[#allocation19 + $0x224] sm:$0xf]  ;;  %v11685_v39 = vor.u32 %v13939_v23, %v11684_v60  ;;  %v12078_v60 = vld [vmem:[#allocation19 + $0x5a8] sm:$0xf0] }
 0x6b0   : > { %v11686_v16 = vld [vmem:[#allocation19 + $0x2a0] sm:$0xf0]  ;;  %v13221_v14 = vor.u32 %v14323_v12, %v13220_v50  ;;  %v12580_v12 = vld [vmem:[#allocation19 + $0x920] sm:$0xf] }
 0x6b1   : > { %8739 = vmatmul.bf16.vlgmr.msra.gmra.mxu0 %v16156_v46 }
 0x6b2   : > { %8783 = vmatpush.bf16.msrb.mxu0 %v12325_v59  ;;  %8765 = vmatmul.bf16.vlgmr.msrb.gmra.mxu2 %v16156_v46  ;;  %v14307_v59 = vld [vmem:[#allocation19 + $0xe24] sm:$0xf] }
 0x6b3   : > { %8809 = vmatpush.bf16.msra.mxu2 %v12329_v51  ;;  %8748 = vmatpush.bf16.msra.mxu1 %v12829_v15  ;;  %v11689_v51 = vor.u32 %v13923_v24, %v11686_v16  ;;  %v13225_v52 = vor.u32 %v14307_v59, %v13222_v20  ;;  %v13891_v15 = vld [vmem:[#allocation19 + $0x124] sm:$0xf]  ;;  %v14163_v24 = vld [vmem:[#allocation19 + $0x99c] sm:$0xf0] }
 0x6b4   : > { %8774 = vmatpush.bf16.msrb.mxu3 %v12833_v1  ;;  %v11558_v1 = vld [vmem:[#allocation19 + $0x1a0] sm:$0xf0]  ;;  %v12581_v47 = vor.u32 %v14163_v24, %v12580_v12  ;;  %v12974_v12 = vld [vmem:[#allocation19 + $0xca8] sm:$0xf0]  ;;  %v12340_v24 = vld [vmem:[#allocation19 + $0x730] sm:$0xf] }
 0x6b5   : > { %v11561_v2 = vor.u32 %v13891_v15, %v11558_v1  ;;  %v14147_v16 = vld [vmem:[#allocation19 + $0x924] sm:$0xf]  ;;  %v14131_v15 = vld [vmem:[#allocation19 + $0x89c] sm:$0xf0] }
 0x6b6   : > { %8784 = vmatpush.bf16.msrb.mxu0 %v12197_v49  ;;  %v14275_v49 = vld [vmem:[#allocation19 + $0xd24] sm:$0xf] }
 0x6b7   : > { %8810 = vmatpush.bf16.msra.mxu2 %v12201_v53  ;;  %8749 = vmatpush.bf16.msra.mxu1 %v12701_v25  ;;  %v13093_v53 = vor.u32 %v14291_v17, %v13092_v35  ;;  %v13097_v13 = vor.u32 %v14275_v49, %v13094_v27  ;;  %v13859_v25 = vld [vmem:[#allocation19 + $0x24] sm:$0xf]  ;;  %v12452_v35 = vld [vmem:[#allocation19 + $0x820] sm:$0xf] }
 0x6b8   : > { %8775 = vmatpush.bf16.msrb.mxu3 %v12705_v8  ;;  %v11430_v8 = vld [vmem:[#allocation19 + $0xa0] sm:$0xf0]  ;;  %v12453_v18 = vor.u32 %v14131_v15, %v12452_v35  ;;  %v12844_v35 = vld [vmem:[#allocation19 + $0xb28] sm:$0xf] }
 0x6b9   : > { %v11433_v37 = vor.u32 %v13859_v25, %v11430_v8  ;;  %v12582_v20 = vld [vmem:[#allocation19 + $0x9a0] sm:$0xf0]  ;;  %v13358_v25 = vld [vmem:[#allocation19 + $0xfa8] sm:$0xf0] }
 0x6ba   : > { %8785 = vmatpush.bf16.msrb.mxu0 %v12069_v42  ;;  %v14243_v42 = vld [vmem:[#allocation19 + $0xc24] sm:$0xf] }
 0x6bb   : > { %8811 = vmatpush.bf16.msra.mxu2 %v12073_v21  ;;  %8750 = vmatpush.bf16.msra.mxu1 %v12573_v56  ;;  %v11429_v21 = vor.u32 %v13875_v48, %v11428_v29  ;;  %v12969_v4 = vor.u32 %v14243_v42, %v12966_v11  ;;  %v12333_v56 = vor.u32 %v14100_v45, %v12332_v0  ;;  %v14115_v1 = vld [vmem:[#allocation19 + $0x824] sm:$0xf]  ;;  %v13972_v29 = vld [vmem:[#allocation19 + $0x3a4] sm:$0xf0]  ;;  %v13956_v48 = vld [vmem:[#allocation19 + $0x32c] sm:$0xf] }
 0x6bc   : > { %8776 = vmatpush.bf16.msrb.mxu3 %v12577_v44  ;;  %v14227_v44 = vld [vmem:[#allocation19 + $0xb9c] sm:$0xf0]  ;;  %v12454_v49 = vld [vmem:[#allocation19 + $0x8a0] sm:$0xf0]  ;;  %v11825_v0 = vor.u32 %v13956_v48, %v11822_v61  ;;  %v11692_v45 = vld [vmem:[#allocation19 + $0x228] sm:$0xf] }
 0x6bd   : > { %v12837_v9 = vor.u32 %v14227_v44, %v12836_v57  ;;  %v12457_v8 = vor.u32 %v14115_v1, %v12454_v49  ;;  %v13230_v57 = vld [vmem:[#allocation19 + $0xea8] sm:$0xf0]  ;;  %v12212_v49 = vld [vmem:[#allocation19 + $0x630] sm:$0xf]  ;;  %v12716_v61 = vld [vmem:[#allocation19 + $0xa28] sm:$0xf] }
 0x6be   : > { %8786 = vmatpush.bf16.msrb.mxu0 %v11941_v36  ;;  %v14211_v36 = vld [vmem:[#allocation19 + $0xb24] sm:$0xf]  ;;  %v12846_v1 = vld [vmem:[#allocation19 + $0xba8] sm:$0xf0] }
 0x6bf   : > { %8812 = vmatpush.bf16.msra.mxu2 %v11945_v34  ;;  %8751 = vmatpush.bf16.msra.mxu1 %v12445_v26  ;;  %v14068_v34 = vld [vmem:[#allocation19 + $0x6a4] sm:$0xf0]  ;;  %v12841_v63 = vor.u32 %v14211_v36, %v12838_v10  ;;  %v14195_v26 = vld [vmem:[#allocation19 + $0xa9c] sm:$0xf0] }
 0x6c0   : > { %8777 = vmatpush.bf16.msrb.mxu3 %v12449_v30  ;;  %v12205_v38 = vor.u32 %v14068_v34, %v12204_v7  ;;  %v12710_v30 = vld [vmem:[#allocation19 + $0xaa0] sm:$0xf0]  ;;  %v12709_v23 = vor.u32 %v14195_v26, %v12708_v32  ;;  %v11564_v10 = vld [vmem:[#allocation19 + $0x128] sm:$0xf]  ;;  %v13102_v32 = vld [vmem:[#allocation19 + $0xda8] sm:$0xf0] }
 0x6c1   : > { %v12713_v50 = vor.u32 %v14179_v5, %v12710_v30  ;;  %v13908_v7 = vld [vmem:[#allocation19 + $0x1a4] sm:$0xf0] }
 0x6c2   : > { %8787 = vmatpush.bf16.msrb.mxu0 %v11813_v33  ;;  %8752 = vmatmul.bf16.vlgmr.msra.gmra.mxu1 %v16162_v6  ;;  %v12076_v33 = vld [vmem:[#allocation19 + $0x528] sm:$0xf]  ;;  %v11565_v26 = vor.u32 %v13908_v7, %v11564_v10  ;;  %v13989_v10 = vld [vmem:[#allocation19 + $0x434] sm:$0xf] }
 0x6c3   : > { %8796 = vmatpush.bf16.msrb.mxu1 %v13349_v40  ;;  %8813 = vmatpush.bf16.msra.mxu2 %v11817_v3  ;;  %v14036_v40 = vld [vmem:[#allocation19 + $0x5a4] sm:$0xf0]  ;;  %v14020_v3 = vld [vmem:[#allocation19 + $0x52c] sm:$0xf]  ;;  %v11958_v7 = vld [vmem:[#allocation19 + $0x4b0] sm:$0xf0] }
 0x6c4   : > { %8822 = vmatpush.bf16.msra.mxu3 %v13353_v41  ;;  %v12077_v41 = vor.u32 %v14036_v40, %v12076_v33  ;;  %v12081_v59 = vor.u32 %v14020_v3, %v12078_v60  ;;  %v13100_v34 = vld [vmem:[#allocation19 + $0xd28] sm:$0xf] }
 0x6c5   : > { %8778 = vmatmul.bf16.vlgmr.msrb.gmra.mxu3 %v16162_v6  ;;  %v11436_v5 = vld [vmem:[#allocation19 + $0x28] sm:$0xf] }
 0x6c6   : > { %8788 = vmatpush.bf16.msrb.mxu0 %v11685_v39  ;;  %v11948_v39 = vld [vmem:[#allocation19 + $0x428] sm:$0xf] }
 0x6c7   : > { %8797 = vmatpush.bf16.msrb.mxu1 %v13221_v14  ;;  %8814 = vmatpush.bf16.msra.mxu2 %v11689_v51  ;;  %v14004_v14 = vld [vmem:[#allocation19 + $0x4a4] sm:$0xf0]  ;;  %v13988_v51 = vld [vmem:[#allocation19 + $0x42c] sm:$0xf] }
 0x6c8   : > { %8823 = vmatpush.bf16.msra.mxu3 %v13225_v52  ;;  %v12585_v52 = vor.u32 %v14147_v16, %v12582_v20  ;;  %v11949_v17 = vor.u32 %v14004_v14, %v11948_v39  ;;  %v11953_v27 = vor.u32 %v13988_v51, %v11950_v58  ;;  %v13876_v33 = vld [vmem:[#allocation19 + $0xa4] sm:$0xf0]  ;;  %v14101_v16 = vld [vmem:[#allocation19 + $0x7ac] sm:$0xf0]  ;;  %v14085_v20 = vld [vmem:[#allocation19 + $0x734] sm:$0xf] }
 0x6c9   : > { %v12972_v40 = vld [vmem:[#allocation19 + $0xc28] sm:$0xf]  ;;  %v12342_v39 = vld [vmem:[#allocation19 + $0x7b0] sm:$0xf0] }
 0x6ca   : > { %8789 = vmatpush.bf16.msrb.mxu0 %v11557_v19  ;;  %v11820_v19 = vld [vmem:[#allocation19 + $0x328] sm:$0xf]  ;;  %v12345_v15 = vor.u32 %v14085_v20, %v12342_v39  ;;  %v11700_v39 = vld [vmem:[#allocation19 + $0x230] sm:$0xf] }
 0x6cb   : > { %8798 = vmatpush.bf16.msrb.mxu1 %v13093_v53  ;;  %8815 = vmatpush.bf16.msra.mxu2 %v11561_v2  ;;  %v13356_v53 = vld [vmem:[#allocation19 + $0xf28] sm:$0xf]  ;;  %v11821_v42 = vor.u32 %v13972_v29, %v11820_v19  ;;  %v14053_v19 = vld [vmem:[#allocation19 + $0x634] sm:$0xf] }
 0x6cc   : > { %8824 = vmatpush.bf16.msra.mxu3 %v13097_v13  ;;  %v14356_v2 = vld [vmem:[#allocation19 + $0xfa4] sm:$0xf0]  ;;  %v14340_v13 = vld [vmem:[#allocation19 + $0xf2c] sm:$0xf]  ;;  %v12214_v29 = vld [vmem:[#allocation19 + $0x6b0] sm:$0xf0] }
 0x6cd   : > { %v13357_v11 = vor.u32 %v14356_v2, %v13356_v53  ;;  %v13361_v22 = vor.u32 %v14340_v13, %v13358_v25  ;;  %v14260_v3 = vld [vmem:[#allocation19 + $0xca4] sm:$0xf0]  ;;  %v14180_v13 = vld [vmem:[#allocation19 + $0xa2c] sm:$0xf]  ;;  %v12217_v25 = vor.u32 %v14053_v19, %v12214_v29  ;;  %v11572_v19 = vld [vmem:[#allocation19 + $0x130] sm:$0xf] }
 0x6ce   : > { %8790 = vmatpush.bf16.msrb.mxu0 %v11429_v21  ;;  %v13940_v21 = vld [vmem:[#allocation19 + $0x2a4] sm:$0xf0]  ;;  %v12973_v14 = vor.u32 %v14260_v3, %v12972_v40  ;;  %v14357_v40 = vld [vmem:[#allocation19 + $0xfac] sm:$0xf0]  ;;  %v13957_v3 = vld [vmem:[#allocation19 + $0x334] sm:$0xf] }
 0x6cf   : > { %8799 = vmatpush.bf16.msrb.mxu1 %v12965_v28  ;;  %8816 = vmatpush.bf16.msra.mxu2 %v11433_v37  ;;  %v14324_v28 = vld [vmem:[#allocation19 + $0xea4] sm:$0xf0]  ;;  %v13924_v37 = vld [vmem:[#allocation19 + $0x22c] sm:$0xf]  ;;  %v11693_v44 = vor.u32 %v13940_v21, %v11692_v45  ;;  %v12086_v45 = vld [vmem:[#allocation19 + $0x5b0] sm:$0xf0] }
 0x6d0   : > { %8825 = vmatpush.bf16.msra.mxu3 %v12969_v4  ;;  %v11694_v4 = vld [vmem:[#allocation19 + $0x2a8] sm:$0xf0]  ;;  %v13229_v36 = vor.u32 %v14324_v28, %v13228_v43  ;;  %v13909_v29 = vld [vmem:[#allocation19 + $0x1ac] sm:$0xf0] }
 0x6d1   : > { %8791 = vmatmul.bf16.vlgmr.msrb.gmra.mxu0 %v16156_v46 }
 0x6d2   : > { %8835 = vmatpush.bf16.msra.mxu0 %v12333_v56  ;;  %8817 = vmatmul.bf16.vlgmr.msra.gmra.mxu2 %v16156_v46  ;;  %v14308_v56 = vld [vmem:[#allocation19 + $0xe2c] sm:$0xf] }
 0x6d3   : > { %8861 = vmatpush.bf16.msrb.mxu2 %v12337_v31  ;;  %8800 = vmatpush.bf16.msrb.mxu1 %v12837_v9  ;;  %v11697_v31 = vor.u32 %v13924_v37, %v11694_v4  ;;  %v13233_v55 = vor.u32 %v14308_v56, %v13230_v57  ;;  %v13892_v9 = vld [vmem:[#allocation19 + $0x12c] sm:$0xf]  ;;  %v12588_v37 = vld [vmem:[#allocation19 + $0x928] sm:$0xf] }
 0x6d4   : > { %8826 = vmatpush.bf16.msra.mxu3 %v12841_v63  ;;  %v11566_v63 = vld [vmem:[#allocation19 + $0x1a8] sm:$0xf0]  ;;  %v14164_v4 = vld [vmem:[#allocation19 + $0x9a4] sm:$0xf0] }
 0x6d5   : > { %v11569_v30 = vor.u32 %v13892_v9, %v11566_v63  ;;  %v14148_v56 = vld [vmem:[#allocation19 + $0x92c] sm:$0xf]  ;;  %v14132_v63 = vld [vmem:[#allocation19 + $0x8a4] sm:$0xf0] }
 0x6d6   : > { %8836 = vmatpush.bf16.msra.mxu0 %v12205_v38  ;;  %v14276_v38 = vld [vmem:[#allocation19 + $0xd2c] sm:$0xf] }
 0x6d7   : > { %8862 = vmatpush.bf16.msrb.mxu2 %v12209_v54  ;;  %8801 = vmatpush.bf16.msrb.mxu1 %v12709_v23  ;;  %v13101_v54 = vor.u32 %v14292_v62, %v13100_v34  ;;  %v13105_v60 = vor.u32 %v14276_v38, %v13102_v32  ;;  %v13860_v23 = vld [vmem:[#allocation19 + $0x2c] sm:$0xf]  ;;  %v12589_v34 = vor.u32 %v14164_v4, %v12588_v37  ;;  %v12980_v37 = vld [vmem:[#allocation19 + $0xc30] sm:$0xf] }
 0x6d8   : > { %8827 = vmatpush.bf16.msra.mxu3 %v12713_v50  ;;  %v11438_v50 = vld [vmem:[#allocation19 + $0xa8] sm:$0xf0]  ;;  %v14261_v4 = vld [vmem:[#allocation19 + $0xcac] sm:$0xf0] }
 0x6d9   : > { %v11441_v51 = vor.u32 %v13860_v23, %v11438_v50  ;;  %v14116_v38 = vld [vmem:[#allocation19 + $0x82c] sm:$0xf]  ;;  %v14341_v50 = vld [vmem:[#allocation19 + $0xf34] sm:$0xf] }
 0x6da   : > { %8837 = vmatpush.bf16.msra.mxu0 %v12077_v41  ;;  %v14244_v41 = vld [vmem:[#allocation19 + $0xc2c] sm:$0xf] }
 0x6db   : > { %8863 = vmatpush.bf16.msrb.mxu2 %v12081_v59  ;;  %8802 = vmatpush.bf16.msrb.mxu1 %v12581_v47  ;;  %v11437_v59 = vor.u32 %v13876_v33, %v11436_v5  ;;  %v12977_v58 = vor.u32 %v14244_v41, %v12974_v12  ;;  %v12341_v47 = vor.u32 %v14101_v16, %v12340_v24  ;;  %v12462_v32 = vld [vmem:[#allocation19 + $0x8a8] sm:$0xf0]  ;;  %v11828_v5 = vld [vmem:[#allocation19 + $0x330] sm:$0xf]  ;;  %v13366_v41 = vld [vmem:[#allocation19 + $0xfb0] sm:$0xf0] }
 0x6dc   : > { %8828 = vmatpush.bf16.msra.mxu3 %v12585_v52  ;;  %v14228_v52 = vld [vmem:[#allocation19 + $0xba4] sm:$0xf0]  ;;  %v12465_v12 = vor.u32 %v14116_v38, %v12462_v32 }
 0x6dd   : > { %v12845_v53 = vor.u32 %v14228_v52, %v12844_v35  ;;  %v13925_v35 = vld [vmem:[#allocation19 + $0x234] sm:$0xf] }
 0x6de   : > { %8838 = vmatpush.bf16.msra.mxu0 %v11949_v17  ;;  %v14212_v17 = vld [vmem:[#allocation19 + $0xb2c] sm:$0xf]  ;;  %v11702_v52 = vld [vmem:[#allocation19 + $0x2b0] sm:$0xf0] }
 0x6df   : > { %8864 = vmatpush.bf16.msrb.mxu2 %v11953_v27  ;;  %8803 = vmatpush.bf16.msrb.mxu1 %v12453_v18  ;;  %v14069_v27 = vld [vmem:[#allocation19 + $0x6ac] sm:$0xf0]  ;;  %v12849_v2 = vor.u32 %v14212_v17, %v12846_v1  ;;  %v14196_v18 = vld [vmem:[#allocation19 + $0xaa4] sm:$0xf0]  ;;  %v14309_v17 = vld [vmem:[#allocation19 + $0xe34] sm:$0xf] }
 0x6e0   : > { %8829 = vmatpush.bf16.msra.mxu3 %v12457_v8  ;;  %v12213_v48 = vor.u32 %v14069_v27, %v12212_v49  ;;  %v12718_v8 = vld [vmem:[#allocation19 + $0xaa8] sm:$0xf0]  ;;  %v12717_v21 = vor.u32 %v14196_v18, %v12716_v61  ;;  %v11705_v27 = vor.u32 %v13925_v35, %v11702_v52  ;;  %v14293_v61 = vld [vmem:[#allocation19 + $0xdac] sm:$0xf0]  ;;  %v13893_v18 = vld [vmem:[#allocation19 + $0x134] sm:$0xf] }
 0x6e1   : > { %v12721_v43 = vor.u32 %v14180_v13, %v12718_v8  ;;  %v11574_v13 = vld [vmem:[#allocation19 + $0x1b0] sm:$0xf0]  ;;  %v12092_v52 = vld [vmem:[#allocation19 + $0x538] sm:$0xf] }
 0x6e2   : > { %8839 = vmatpush.bf16.msra.mxu0 %v11821_v42  ;;  %8804 = vmatmul.bf16.vlgmr.msrb.gmra.mxu1 %v16162_v6  ;;  %v12084_v42 = vld [vmem:[#allocation19 + $0x530] sm:$0xf]  ;;  %v13110_v8 = vld [vmem:[#allocation19 + $0xdb0] sm:$0xf0] }
 0x6e3   : > { %8848 = vmatpush.bf16.msra.mxu1 %v13357_v11  ;;  %8865 = vmatpush.bf16.msrb.mxu2 %v11825_v0  ;;  %v14037_v11 = vld [vmem:[#allocation19 + $0x5ac] sm:$0xf0]  ;;  %v14021_v0 = vld [vmem:[#allocation19 + $0x534] sm:$0xf] }
 0x6e4   : > { %8874 = vmatpush.bf16.msrb.mxu3 %v13361_v22  ;;  %v12085_v22 = vor.u32 %v14037_v11, %v12084_v42  ;;  %v12089_v57 = vor.u32 %v14021_v0, %v12086_v45  ;;  %v11573_v42 = vor.u32 %v13909_v29, %v11572_v19  ;;  %v11444_v0 = vld [vmem:[#allocation19 + $0x30] sm:$0xf]  ;;  %v12726_v35 = vld [vmem:[#allocation19 + $0xab0] sm:$0xf0] }
 0x6e5   : > { %8830 = vmatmul.bf16.vlgmr.msra.gmra.mxu3 %v16162_v6 }
 0x6e6   : > { %8840 = vmatpush.bf16.msra.mxu0 %v11693_v44  ;;  %v12590_v44 = vld [vmem:[#allocation19 + $0x9a8] sm:$0xf0] }
 0x6e7   : > { %8849 = vmatpush.bf16.msra.mxu1 %v13229_v36  ;;  %8866 = vmatpush.bf16.msrb.mxu2 %v11697_v31  ;;  %v11956_v36 = vld [vmem:[#allocation19 + $0x430] sm:$0xf]  ;;  %v12593_v62 = vor.u32 %v14148_v56, %v12590_v44  ;;  %v11446_v44 = vld [vmem:[#allocation19 + $0xb0] sm:$0xf0] }
 0x6e8   : > { %8875 = vmatpush.bf16.msrb.mxu3 %v13233_v55  ;;  %v14005_v31 = vld [vmem:[#allocation19 + $0x4ac] sm:$0xf0]  ;;  %v12460_v55 = vld [vmem:[#allocation19 + $0x828] sm:$0xf] }
 0x6e9   : > { %v11957_v9 = vor.u32 %v14005_v31, %v11956_v36  ;;  %v12461_v23 = vor.u32 %v14132_v63, %v12460_v55  ;;  %v14245_v36 = vld [vmem:[#allocation19 + $0xc34] sm:$0xf]  ;;  %v14086_v55 = vld [vmem:[#allocation19 + $0x73c] sm:$0xf] }
 0x6ea   : > { %8841 = vmatpush.bf16.msra.mxu0 %v11565_v26  ;;  %v11961_v26 = vor.u32 %v13989_v10, %v11958_v7  ;;  %v12982_v31 = vld [vmem:[#allocation19 + $0xcb0] sm:$0xf0]  ;;  %v12348_v10 = vld [vmem:[#allocation19 + $0x738] sm:$0xf] }
 0x6eb   : > { %8850 = vmatpush.bf16.msra.mxu1 %v13101_v54  ;;  %8867 = vmatpush.bf16.msrb.mxu2 %v11569_v30  ;;  %v13973_v54 = vld [vmem:[#allocation19 + $0x3ac] sm:$0xf0]  ;;  %v14102_v7 = vld [vmem:[#allocation19 + $0x7b4] sm:$0xf0]  ;;  %v12985_v38 = vor.u32 %v14245_v36, %v12982_v31 }
 0x6ec   : > { %8876 = vmatpush.bf16.msrb.mxu3 %v13105_v60  ;;  %v13364_v30 = vld [vmem:[#allocation19 + $0xf30] sm:$0xf]  ;;  %v11830_v60 = vld [vmem:[#allocation19 + $0x3b0] sm:$0xf0]  ;;  %v11829_v24 = vor.u32 %v13973_v54, %v11828_v5  ;;  %v12349_v32 = vor.u32 %v14102_v7, %v12348_v10 }
 0x6ed   : > { %v16184_v28 = vpop.f32.mrf.mxu0  ;;  %v11833_v20 = vor.u32 %v13957_v3, %v11830_v60  ;;  %v12852_v5 = vld [vmem:[#allocation19 + $0xb30] sm:$0xf]  ;;  %v12854_v60 = vld [vmem:[#allocation19 + $0xbb0] sm:$0xf0] }
 0x6ee   : > { %8842 = vmatpush.bf16.msra.mxu0 %v11437_v59  ;;  %v13365_v59 = vor.u32 %v14357_v40, %v13364_v30  ;;  %v14229_v54 = vld [vmem:[#allocation19 + $0xbac] sm:$0xf0]  ;;  %v14213_v30 = vld [vmem:[#allocation19 + $0xb34] sm:$0xf] }
 0x6ef   : > { %8851 = vmatpush.bf16.msra.mxu1 %v12973_v14  ;;  %8868 = vmatpush.bf16.msrb.mxu2 %v11441_v51  ;;  %v13941_v14 = vld [vmem:[#allocation19 + $0x2ac] sm:$0xf0] }
 0x6f0   : > { %8877 = vmatpush.bf16.msrb.mxu3 %v12977_v58  ;;  %v13236_v51 = vld [vmem:[#allocation19 + $0xe30] sm:$0xf]  ;;  %v13369_v58 = vor.u32 %v14341_v50, %v13366_v41  ;;  %v11701_v1 = vor.u32 %v13941_v14, %v11700_v39  ;;  %v14070_v50 = vld [vmem:[#allocation19 + $0x6b4] sm:$0xf0] }
 0x6f1   : > { %8843 = vmatmul.bf16.vlgmr.msra.gmra.mxu0 %v16156_v46  ;;  %v12724_v14 = vld [vmem:[#allocation19 + $0xa30] sm:$0xf] }
 0x6f2   : > { %8887 = vmatpush.bf16.msrb.mxu0 %v12341_v47  ;;  %8869 = vmatmul.bf16.vlgmr.msrb.gmra.mxu2 %v16156_v46  ;;  %v14325_v47 = vld [vmem:[#allocation19 + $0xeac] sm:$0xf0] }
 0x6f3   : > { %8913 = vmatpush.bf16.msra.mxu2 %v12345_v15  ;;  %8852 = vmatpush.bf16.msra.mxu1 %v12845_v53  ;;  %v16186_v33 = vpop.f32.mrf.mxu2  ;;  %v13238_v15 = vld [vmem:[#allocation19 + $0xeb0] sm:$0xf0]  ;;  %v13237_v49 = vor.u32 %v14325_v47, %v13236_v51  ;;  %v13108_v53 = vld [vmem:[#allocation19 + $0xd30] sm:$0xf] }
 0x6f4   : > { %8878 = vmatpush.bf16.msrb.mxu3 %v12849_v2  ;;  %v13241_v2 = vor.u32 %v14309_v17, %v13238_v15  ;;  %v13109_v45 = vor.u32 %v14293_v61, %v13108_v53  ;;  %v14197_v51 = vld [vmem:[#allocation19 + $0xaac] sm:$0xf0]  ;;  %v14038_v17 = vld [vmem:[#allocation19 + $0x5b4] sm:$0xf0]  ;;  %v16199_v15 = vld [vmem:[#allocation20] sm:$0xff] }
 0x6f5   : > { %v8586_v16 = vpop.f32.mrf.mxu0  ;;  %v12725_v19 = vor.u32 %v14197_v51, %v12724_v14  ;;  %v12093_v53 = vor.u32 %v14038_v17, %v12092_v52  ;;  %v14165_v61 = vld [vmem:[#allocation19 + $0x9ac] sm:$0xf0]  ;;  %v13244_v14 = vld [vmem:[#allocation19 + $0xe38] sm:$0xf]  ;;  %v13926_v52 = vld [vmem:[#allocation19 + $0x23c] sm:$0xf] }
 0x6f6   : > { %8888 = vmatpush.bf16.msrb.mxu0 %v12213_v48  ;;  %v12853_v16 = vor.u32 %v14229_v54, %v12852_v5  ;;  %v14326_v51 = vld [vmem:[#allocation19 + $0xeb4] sm:$0xf0]  ;;  %v11710_v17 = vld [vmem:[#allocation19 + $0x2b8] sm:$0xf0] }
 0x6f7   : > { %8914 = vmatpush.bf16.msra.mxu2 %v12217_v25  ;;  %8853 = vmatpush.bf16.msra.mxu1 %v12717_v21  ;;  %v14277_v25 = vld [vmem:[#allocation19 + $0xd34] sm:$0xf]  ;;  %v11577_v21 = vor.u32 %v13893_v18, %v11574_v13 }
 0x6f8   : > { %8879 = vmatpush.bf16.msrb.mxu3 %v12721_v43  ;;  %v13113_v56 = vor.u32 %v14277_v25, %v13110_v8  ;;  %v14149_v18 = vld [vmem:[#allocation19 + $0x934] sm:$0xf] }
 0x6f9   : > { %v12598_v8 = vld [vmem:[#allocation19 + $0x9b0] sm:$0xf0] }
 0x6fa   : > { %8889 = vmatpush.bf16.msrb.mxu0 %v12085_v22  ;;  %v13877_v22 = vld [vmem:[#allocation19 + $0xac] sm:$0xf0]  ;;  %v12601_v31 = vor.u32 %v14149_v18, %v12598_v8  ;;  %v11713_v18 = vor.u32 %v13926_v52, %v11710_v17  ;;  %v13116_v8 = vld [vmem:[#allocation19 + $0xd38] sm:$0xf] }
 0x6fb   : > { %8915 = vmatpush.bf16.msra.mxu2 %v12089_v57  ;;  %8854 = vmatpush.bf16.msra.mxu1 %v12589_v34  ;;  %v8612_v48 = vpop.f32.mrf.mxu2  ;;  %v13861_v57 = vld [vmem:[#allocation19 + $0x34] sm:$0xf]  ;;  %v11445_v34 = vor.u32 %v13877_v22, %v11444_v0  ;;  %v14006_v0 = vld [vmem:[#allocation19 + $0x4b4] sm:$0xf0]  ;;  %v11966_v22 = vld [vmem:[#allocation19 + $0x4b8] sm:$0xf0] }
 0x6fc   : > { %8880 = vmatpush.bf16.msrb.mxu3 %v12593_v62  ;;  %v12350_v62 = vld [vmem:[#allocation19 + $0x7b8] sm:$0xf0]  ;;  %v11449_v63 = vor.u32 %v13861_v57, %v11446_v44  ;;  %v12596_v48 = vld [vmem:[#allocation19 + $0x930] sm:$0xf] }
 0x6fd   : > { %v16190_v11 = vpop.f32.mrf.mxu1  ;;  %v12353_v40 = vor.u32 %v14086_v55, %v12350_v62  ;;  %v12468_v44 = vld [vmem:[#allocation19 + $0x830] sm:$0xf]  ;;  %v14117_v55 = vld [vmem:[#allocation19 + $0x834] sm:$0xf] }
 0x6fe   : > { %8890 = vmatpush.bf16.msrb.mxu0 %v11957_v9  ;;  %v16192_v43 = vpop.f32.mrf.mxu0  ;;  %v12981_v9 = vor.u32 %v14261_v4, %v12980_v37  ;;  %v5951_v37 = vperm.slane %v16199_v15, 0  ;;  %v5954_v4 = vperm.slane %v16199_v15, 3  ;;  %v12470_v62 = vld [vmem:[#allocation19 + $0x8b0] sm:$0xf0] }
 0x6ff   : > { %8916 = vmatpush.bf16.msra.mxu2 %v11961_v26  ;;  %8855 = vmatpush.bf16.msra.mxu1 %v12461_v23  ;;  %v12220_v23 = vld [vmem:[#allocation19 + $0x638] sm:$0xf] }
 0x700   : > { %8881 = vmatpush.bf16.msrb.mxu3 %v12465_v12  ;;  %v14054_v12 = vld [vmem:[#allocation19 + $0x63c] sm:$0xf]  ;;  %v12221_v39 = vor.u32 %v14070_v50, %v12220_v23  ;;  %v12473_v23 = vor.u32 %v14117_v55, %v12470_v62  ;;  %v12988_v55 = vld [vmem:[#allocation19 + $0xc38] sm:$0xf] }
 0x701   : > { %v14342_v50 = vld [vmem:[#allocation19 + $0xf3c] sm:$0xf]  ;;  %v14262_v62 = vld [vmem:[#allocation19 + $0xcb4] sm:$0xf0] }
 0x702   : > { %8891 = vmatpush.bf16.msrb.mxu0 %v11829_v24  ;;  %8856 = vmatmul.bf16.vlgmr.msra.gmra.mxu1 %v16162_v6  ;;  %v12222_v24 = vld [vmem:[#allocation19 + $0x6b8] sm:$0xf0] }
 0x703   : > { %8900 = vmatpush.bf16.msrb.mxu1 %v13365_v59  ;;  %8917 = vmatpush.bf16.msra.mxu2 %v11833_v20  ;;  %v16194_v26 = vpop.f32.mrf.mxu3  ;;  %v12857_v20 = vor.u32 %v14213_v30, %v12854_v60  ;;  %v12225_v47 = vor.u32 %v14054_v12, %v12222_v24  ;;  %v13958_v30 = vld [vmem:[#allocation19 + $0x33c] sm:$0xf] }
 0x704   : > { %8926 = vmatpush.bf16.msra.mxu3 %v13369_v58  ;;  %v16196_v3 = vpop.f32.mrf.mxu2  ;;  %v14181_v58 = vld [vmem:[#allocation19 + $0xa34] sm:$0xf] }
 0x705   : > { %8882 = vmatmul.bf16.vlgmr.msrb.gmra.mxu3 %v16162_v6  ;;  %v8599_v41 = vpop.f32.mrf.mxu1  ;;  %v12729_v29 = vor.u32 %v14181_v58, %v12726_v35  ;;  %v8663_v12 = vadd.f32 %v16196_v3, %v5954_v4  ;;  %v8585_v58 = vadd.f32 %v16184_v28, %v5951_v37  ;;  %v14278_v4 = vld [vmem:[#allocation19 + $0xd3c] sm:$0xf] }
 0x706   : > { %8892 = vmatpush.bf16.msrb.mxu0 %v11701_v1  ;;  %v8638_v59 = vpop.f32.mrf.mxu0  ;;  %v14022_v1 = vld [vmem:[#allocation19 + $0x53c] sm:$0xf] }
 0x707   : > { %8901 = vmatpush.bf16.msrb.mxu1 %v13237_v49  ;;  %8918 = vmatpush.bf16.msra.mxu2 %v11705_v27  ;;  %v12094_v49 = vld [vmem:[#allocation19 + $0x5b8] sm:$0xf0]  ;;  %v5952_v27 = vperm.slane %v16199_v15, 1 }
 0x708   : > { %8927 = vmatpush.bf16.msra.mxu3 %v13241_v2  ;;  %v12097_v13 = vor.u32 %v14022_v1, %v12094_v49  ;;  %v13374_v41 = vld [vmem:[#allocation19 + $0xfb8] sm:$0xf0] }
 0x709   : > { %v8611_v36 = vadd.f32 %v16186_v33, %v5952_v27  ;;  %v14358_v33 = vld [vmem:[#allocation19 + $0xfb4] sm:$0xf0]  ;;  %v13377_v35 = vor.u32 %v14342_v50, %v13374_v41  ;;  %v14310_v27 = vld [vmem:[#allocation19 + $0xe3c] sm:$0xf]  ;;  %v12358_v50 = vld [vmem:[#allocation19 + $0x7c0] sm:$0xf0]  ;;  %v12989_v41 = vor.u32 %v14262_v62, %v12988_v55 }
 0x70a   : > { %8893 = vmatpush.bf16.msrb.mxu0 %v11573_v42  ;;  %v11964_v42 = vld [vmem:[#allocation19 + $0x438] sm:$0xf]  ;;  %v14118_v62 = vld [vmem:[#allocation19 + $0x83c] sm:$0xf] }
 0x70b   : > { %8902 = vmatpush.bf16.msrb.mxu1 %v13109_v45  ;;  %8919 = vmatpush.bf16.msra.mxu2 %v11577_v21  ;;  %v8625_v2 = vpop.f32.mrf.mxu3  ;;  %v5953_v45 = vperm.slane %v16199_v15, 2  ;;  %v13990_v21 = vld [vmem:[#allocation19 + $0x43c] sm:$0xf]  ;;  %v11965_v7 = vor.u32 %v14006_v0, %v11964_v42  ;;  %v8624_v54 = vadd.f32 %v16194_v26, %v8611_v36  ;;  %v14134_v55 = vld [vmem:[#allocation19 + $0x8b4] sm:$0xf0] }
 0x70c   : > { %8928 = vmatpush.bf16.msra.mxu3 %v13113_v56  ;;  %v8664_v25 = vpop.f32.mrf.mxu2  ;;  %v12597_v56 = vor.u32 %v14165_v61, %v12596_v48  ;;  %v13245_v61 = vor.u32 %v14326_v51, %v13244_v14  ;;  %v12228_v14 = vld [vmem:[#allocation19 + $0x640] sm:$0xf] }
 0x70d   : > { %v8649_v57 = vpop.f32.mrf.mxu1  ;;  %v8637_v5 = vadd.f32 %v16192_v43, %v5953_v45  ;;  %v11708_v43 = vld [vmem:[#allocation19 + $0x238] sm:$0xf]  ;;  %v14071_v51 = vld [vmem:[#allocation19 + $0x6bc] sm:$0xf0] }
 0x70e   : > { %8894 = vmatpush.bf16.msrb.mxu0 %v11445_v34  ;;  %v16208_v10 = vpop.f32.mrf.mxu0  ;;  %v14133_v34 = vld [vmem:[#allocation19 + $0x8ac] sm:$0xf0]  ;;  %v13910_v25 = vld [vmem:[#allocation19 + $0x1b4] sm:$0xf0]  ;;  %v12229_v52 = vor.u32 %v14071_v51, %v12228_v14  ;;  %v14327_v14 = vld [vmem:[#allocation19 + $0xebc] sm:$0xf0] }
 0x70f   : > { %8903 = vmatpush.bf16.msrb.mxu1 %v12981_v9  ;;  %8920 = vmatpush.bf16.msra.mxu2 %v11449_v63  ;;  %v11969_v9 = vor.u32 %v13990_v21, %v11966_v22  ;;  %v11836_v63 = vld [vmem:[#allocation19 + $0x338] sm:$0xf]  ;;  %v12469_v60 = vor.u32 %v14133_v34, %v12468_v44  ;;  %v8650_v24 = vadd.f32 %v8649_v57, %v8637_v5  ;;  %v13894_v21 = vld [vmem:[#allocation19 + $0x13c] sm:$0xf]  ;;  %v13927_v51 = vld [vmem:[#allocation19 + $0x244] sm:$0xf] }
 0x710   : > { %8929 = vmatpush.bf16.msra.mxu3 %v12985_v38  ;;  %v13974_v38 = vld [vmem:[#allocation19 + $0x3b4] sm:$0xf0]  ;;  %v11582_v22 = vld [vmem:[#allocation19 + $0x1b8] sm:$0xf0] }
 0x711   : > { %8895 = vmatmul.bf16.vlgmr.msrb.gmra.mxu0 %v16156_v46  ;;  %v14294_v45 = vld [vmem:[#allocation19 + $0xdb4] sm:$0xf0] }
 0x712   : > { %8939 = vmatpush.bf16.msra.mxu0 %v12349_v32  ;;  %8921 = vmatmul.bf16.vlgmr.msra.gmra.mxu2 %v16156_v46  ;;  %v13372_v32 = vld [vmem:[#allocation19 + $0xf38] sm:$0xf]  ;;  %v13117_v36 = vor.u32 %v14294_v45, %v13116_v8 }
 0x713   : > { %8965 = vmatpush.bf16.msrb.mxu2 %v12353_v40  ;;  %8904 = vmatpush.bf16.msrb.mxu1 %v12853_v16  ;;  %v11838_v40 = vld [vmem:[#allocation19 + $0x3b8] sm:$0xf0]  ;;  %v11837_v16 = vor.u32 %v13974_v38, %v11836_v63  ;;  %v13373_v26 = vor.u32 %v14358_v33, %v13372_v32  ;;  %v11452_v44 = vld [vmem:[#allocation19 + $0x38] sm:$0xf] }
 0x714   : > { %8930 = vmatpush.bf16.msra.mxu3 %v12857_v20  ;;  %v11841_v59 = vor.u32 %v13958_v30, %v11838_v40  ;;  %v8675_v20 = vpop.f32.mrf.mxu3  ;;  %v13878_v34 = vld [vmem:[#allocation19 + $0xb4] sm:$0xf0]  ;;  %v13862_v63 = vld [vmem:[#allocation19 + $0x3c] sm:$0xf]  ;;  %v12356_v30 = vld [vmem:[#allocation19 + $0x740] sm:$0xf] }
 0x715   : > { %v8676_v3 = vadd.f32 %v8675_v20, %v8663_v12  ;;  %v8651_v49 = vpop.f32.mrf.mxu1  ;;  %v11454_v38 = vld [vmem:[#allocation19 + $0xb8] sm:$0xf0]  ;;  %v14103_v40 = vld [vmem:[#allocation19 + $0x7bc] sm:$0xf0] }
 0x716   : > { %8940 = vmatpush.bf16.msra.mxu0 %v12221_v39  ;;  %v13942_v39 = vld [vmem:[#allocation19 + $0x2b4] sm:$0xf0]  ;;  %v8690_v28 = vpop.f32.mrf.mxu0  ;;  %v14246_v32 = vld [vmem:[#allocation19 + $0xc3c] sm:$0xf]  ;;  %v11457_v12 = vor.u32 %v13862_v63, %v11454_v38  ;;  %v11844_v38 = vld [vmem:[#allocation19 + $0x340] sm:$0xf] }
 0x717   : > { %8966 = vmatpush.bf16.msrb.mxu2 %v12225_v47  ;;  %8905 = vmatpush.bf16.msrb.mxu1 %v12725_v19  ;;  %v9439_v47 = vrot.slane %v8624_v54, 6  ;;  %v16218_v1 = vpop.f32.mrf.mxu2  ;;  %v13246_v19 = vld [vmem:[#allocation19 + $0xeb8] sm:$0xf0]  ;;  %v9441_v2 = vrot.slane %v8676_v3, 2  ;;  %v11709_v48 = vor.u32 %v13942_v39, %v11708_v43  ;;  %v12860_v43 = vld [vmem:[#allocation19 + $0xb38] sm:$0xf] }
 0x718   : > { %8931 = vmatpush.bf16.msra.mxu3 %v12729_v29  ;;  %v8598_v29 = vadd.f32 %v16190_v11, %v8585_v58  ;;  %v13249_v11 = vor.u32 %v14310_v27, %v13246_v19  ;;  %v12990_v33 = vld [vmem:[#allocation19 + $0xcb8] sm:$0xf0]  ;;  %v14055_v58 = vld [vmem:[#allocation19 + $0x644] sm:$0xf]  ;;  %v12732_v49 = vld [vmem:[#allocation19 + $0xa38] sm:$0xf] }
 0x719   : > { %v12862_v39 = vld [vmem:[#allocation19 + $0xbb8] sm:$0xf0]  ;;  %v14198_v27 = vld [vmem:[#allocation19 + $0xab4] sm:$0xf0]  ;;  %v12100_v28 = vld [vmem:[#allocation19 + $0x540] sm:$0xf] }
 0x71a   : > { %8941 = vmatpush.bf16.msra.mxu0 %v12093_v53  ;;  %v9440_v53 = vrot.slane %v8650_v24, 4  ;;  %v9464_v42 = vsel %vm9463_vm2, %v8598_v29, %v9439_v47  ;;  %v12993_v24 = vor.u32 %v14246_v32, %v12990_v33  ;;  %v12230_v47 = vld [vmem:[#allocation19 + $0x6c0] sm:$0xf0]  ;;  %v14182_v19 = vld [vmem:[#allocation19 + $0xa3c] sm:$0xf] }
 0x71b   : > { %8967 = vmatpush.bf16.msrb.mxu2 %v12097_v13  ;;  %8906 = vmatpush.bf16.msrb.mxu1 %v12597_v56  ;;  %v11580_v13 = vld [vmem:[#allocation19 + $0x138] sm:$0xf]  ;;  %v13118_v56 = vld [vmem:[#allocation19 + $0xdb8] sm:$0xf0]  ;;  %v12233_v29 = vor.u32 %v14055_v58, %v12230_v47  ;;  %v13975_v32 = vld [vmem:[#allocation19 + $0x3bc] sm:$0xf0] }
 0x71c   : > { %8932 = vmatpush.bf16.msra.mxu3 %v12601_v31  ;;  %v9466_v0 = vsel %vm9465_vm3, %v9440_v53, %v9441_v2  ;;  %v11581_v57 = vor.u32 %v13910_v25, %v11580_v13  ;;  %v11585_v31 = vor.u32 %v13894_v21, %v11582_v22  ;;  %v12734_v2 = vld [vmem:[#allocation19 + $0xab8] sm:$0xf0]  ;;  %v12733_v13 = vor.u32 %v14198_v27, %v12732_v49  ;;  %v11972_v22 = vld [vmem:[#allocation19 + $0x440] sm:$0xf]  ;;  %v11718_v58 = vld [vmem:[#allocation19 + $0x2c0] sm:$0xf0] }
 0x71d   : > { %v9468_v37 = vsel %vm9467_vm4, %v9464_v42, %v9466_v0  ;;  %v12737_v25 = vor.u32 %v14182_v19, %v12734_v2  ;;  %v12604_v42 = vld [vmem:[#allocation19 + $0x938] sm:$0xf]  ;;  %v12606_v21 = vld [vmem:[#allocation19 + $0x9b8] sm:$0xf0]  ;;  %v14359_v33 = vld [vmem:[#allocation19 + $0xfbc] sm:$0xf0]  ;;  %v11721_v27 = vor.u32 %v13927_v51, %v11718_v58 }
 0x71e   : > { %8942 = vmatpush.bf16.msra.mxu0 %v11965_v7  ;;  %9498 = vst [vmem:[%s16227_s25] sm:$0xff] %v9468_v37  ;;  %v8677_v7 = vpop.f32.mrf.mxu3  ;;  %v16230_v54 = vpop.f32.mrf.mxu1  ;;  %v14166_v0 = vld [vmem:[#allocation19 + $0x9b4] sm:$0xf0]  ;;  %v14007_v37 = vld [vmem:[#allocation19 + $0x4bc] sm:$0xf0] }
 0x71f   : > { %8968 = vmatpush.bf16.msrb.mxu2 %v11969_v9  ;;  %8907 = vmatpush.bf16.msrb.mxu1 %v12469_v60  ;;  %v13121_v9 = vor.u32 %v14278_v4, %v13118_v56  ;;  %v8716_v5 = vpop.f32.mrf.mxu2  ;;  %v11453_v60 = vor.u32 %v13878_v34, %v11452_v44  ;;  %v13991_v4 = vld [vmem:[#allocation19 + $0x444] sm:$0xf]  ;;  %v12605_v44 = vor.u32 %v14166_v0, %v12604_v42  ;;  %v11588_v19 = vld [vmem:[#allocation19 + $0x140] sm:$0xf] }
 0x720   : > { %8933 = vmatpush.bf16.msra.mxu3 %v12473_v23  ;;  %v14087_v23 = vld [vmem:[#allocation19 + $0x744] sm:$0xf]  ;;  %v11973_v7 = vor.u32 %v14007_v37, %v11972_v22  ;;  %v13380_v5 = vld [vmem:[#allocation19 + $0xf40] sm:$0xf] }
 0x721   : > { %v12361_v20 = vor.u32 %v14087_v23, %v12358_v50  ;;  %v11974_v56 = vld [vmem:[#allocation19 + $0x4c0] sm:$0xf0]  ;;  %v11460_v0 = vld [vmem:[#allocation19 + $0x40] sm:$0xf] }
 0x722   : > { %8943 = vmatpush.bf16.msra.mxu0 %v11837_v16  ;;  %8908 = vmatmul.bf16.vlgmr.msrb.gmra.mxu1 %v16162_v6  ;;  %v12357_v16 = vor.u32 %v14103_v40, %v12356_v30  ;;  %v11977_v63 = vor.u32 %v13991_v4, %v11974_v56  ;;  %v13959_v30 = vld [vmem:[#allocation19 + $0x344] sm:$0xf]  ;;  %v13879_v22 = vld [vmem:[#allocation19 + $0xbc] sm:$0xf0] }
 0x723   : > { %8952 = vmatpush.bf16.msra.mxu1 %v13373_v26  ;;  %8969 = vmatpush.bf16.msrb.mxu2 %v11841_v59  ;;  %v14230_v26 = vld [vmem:[#allocation19 + $0xbb4] sm:$0xf0]  ;;  %v14214_v59 = vld [vmem:[#allocation19 + $0xb3c] sm:$0xf]  ;;  %v11846_v40 = vld [vmem:[#allocation19 + $0x3c0] sm:$0xf0] }
 0x724   : > { %8978 = vmatpush.bf16.msrb.mxu3 %v13377_v35  ;;  %v12861_v35 = vor.u32 %v14230_v26, %v12860_v43  ;;  %v12865_v3 = vor.u32 %v14214_v59, %v12862_v39  ;;  %v14343_v23 = vld [vmem:[#allocation19 + $0xf44] sm:$0xf]  ;;  %v11716_v26 = vld [vmem:[#allocation19 + $0x240] sm:$0xf] }
 0x725   : > { %8934 = vmatmul.bf16.vlgmr.msra.gmra.mxu3 %v16162_v6  ;;  %v13382_v50 = vld [vmem:[#allocation19 + $0xfc0] sm:$0xf0]  ;;  %v13943_v59 = vld [vmem:[#allocation19 + $0x2bc] sm:$0xf0] }
 0x726   : > { %8944 = vmatpush.bf16.msra.mxu0 %v11709_v48  ;;  %v8703_v53 = vpop.f32.mrf.mxu1  ;;  %v14039_v48 = vld [vmem:[#allocation19 + $0x5bc] sm:$0xf0]  ;;  %v13385_v39 = vor.u32 %v14343_v23, %v13382_v50 }
 0x727   : > { %8953 = vmatpush.bf16.msra.mxu1 %v13245_v61  ;;  %8970 = vmatpush.bf16.msrb.mxu2 %v11713_v18  ;;  %v16232_v17 = vpop.f32.mrf.mxu3  ;;  %v14023_v61 = vld [vmem:[#allocation19 + $0x544] sm:$0xf]  ;;  %v12101_v8 = vor.u32 %v14039_v48, %v12100_v28  ;;  %v13124_v53 = vld [vmem:[#allocation19 + $0xd40] sm:$0xf] }
 0x728   : > { %8979 = vmatpush.bf16.msrb.mxu3 %v13249_v11  ;;  %v12102_v18 = vld [vmem:[#allocation19 + $0x5c0] sm:$0xf0]  ;;  %v14150_v11 = vld [vmem:[#allocation19 + $0x93c] sm:$0xf]  ;;  %v14295_v28 = vld [vmem:[#allocation19 + $0xdbc] sm:$0xf0] }
 0x729   : > { %v12105_v45 = vor.u32 %v14023_v61, %v12102_v18  ;;  %v13895_v48 = vld [vmem:[#allocation19 + $0x144] sm:$0xf]  ;;  %v5956_v18 = vperm.slane %v16199_v15, 5  ;;  %v12996_v37 = vld [vmem:[#allocation19 + $0xc40] sm:$0xf] }
 0x72a   : > { %8945 = vmatpush.bf16.msra.mxu0 %v11581_v57  ;;  %v11590_v61 = vld [vmem:[#allocation19 + $0x1c0] sm:$0xf0]  ;;  %v14263_v4 = vld [vmem:[#allocation19 + $0xcbc] sm:$0xf0] }
 0x72b   : > { %8954 = vmatpush.bf16.msra.mxu1 %v13117_v36  ;;  %8971 = vmatpush.bf16.msrb.mxu2 %v11585_v31  ;;  %v12476_v36 = vld [vmem:[#allocation19 + $0x838] sm:$0xf]  ;;  %v12609_v31 = vor.u32 %v14150_v11, %v12606_v21  ;;  %v13125_v11 = vor.u32 %v14295_v28, %v13124_v53  ;;  %v12868_v50 = vld [vmem:[#allocation19 + $0xb40] sm:$0xf]  ;;  %v12742_v53 = vld [vmem:[#allocation19 + $0xac0] sm:$0xf0] }
 0x72c   : > { %8980 = vmatpush.bf16.msrb.mxu3 %v13121_v9  ;;  %v12478_v9 = vld [vmem:[#allocation19 + $0x8b8] sm:$0xf0]  ;;  %v14040_v28 = vld [vmem:[#allocation19 + $0x5c4] sm:$0xf0] }
 0x72e   : > { %8946 = vmatpush.bf16.msra.mxu0 %v11453_v60  ;;  %v16236_v57 = vpop.f32.mrf.mxu0  ;;  %v12477_v60 = vor.u32 %v14134_v55, %v12476_v36  ;;  %v11462_v36 = vld [vmem:[#allocation19 + $0xc0] sm:$0xf0] }
 0x72f   : > { %8955 = vmatpush.bf16.msra.mxu1 %v12989_v41  ;;  %8972 = vmatpush.bf16.msrb.mxu2 %v11457_v12  ;;  %v8729_v34 = vpop.f32.mrf.mxu3  ;;  %v12481_v41 = vor.u32 %v14118_v62, %v12478_v9  ;;  %v11845_v12 = vor.u32 %v13975_v32, %v11844_v38  ;;  %v12998_v55 = vld [vmem:[#allocation19 + $0xcc0] sm:$0xf0]  ;;  %v12364_v62 = vld [vmem:[#allocation19 + $0x748] sm:$0xf]  ;;  %v11461_v38 = vor.u32 %v13879_v22, %v11460_v0  ;;  %v14088_v32 = vld [vmem:[#allocation19 + $0x74c] sm:$0xf] }
 0x730   : > { %8981 = vmatpush.bf16.msrb.mxu3 %v12993_v24  ;;  %v13381_v24 = vor.u32 %v14359_v33, %v13380_v5  ;;  %v14104_v9 = vld [vmem:[#allocation19 + $0x7c4] sm:$0xf0]  ;;  %v12366_v5 = vld [vmem:[#allocation19 + $0x7c8] sm:$0xf0]  ;;  %v12612_v0 = vld [vmem:[#allocation19 + $0x940] sm:$0xf] }
 0x731   : > { %8947 = vmatmul.bf16.vlgmr.msra.gmra.mxu0 %v16156_v46  ;;  %v12365_v23 = vor.u32 %v14104_v9, %v12364_v62 }
 0x732   : > { %8991 = vmatpush.bf16.msrb.mxu0 %v12357_v16  ;;  %8973 = vmatmul.bf16.vlgmr.msrb.gmra.mxu2 %v16156_v46  ;;  %v11849_v16 = vor.u32 %v13959_v30, %v11846_v40  ;;  %v5958_v30 = vperm.slane %v16199_v15, 7  ;;  %v12997_v40 = vor.u32 %v14263_v4, %v12996_v37  ;;  %v12614_v4 = vld [vmem:[#allocation19 + $0x9c0] sm:$0xf0] }
 0x733   : > { %9017 = vmatpush.bf16.msra.mxu2 %v12361_v20  ;;  %8956 = vmatpush.bf16.msra.mxu1 %v12861_v35  ;;  %v13252_v20 = vld [vmem:[#allocation19 + $0xe40] sm:$0xf]  ;;  %v14311_v35 = vld [vmem:[#allocation19 + $0xe44] sm:$0xf] }
 0x734   : > { %8982 = vmatpush.bf16.msrb.mxu3 %v12865_v3  ;;  %v13254_v3 = vld [vmem:[#allocation19 + $0xec0] sm:$0xf0]  ;;  %v13253_v49 = vor.u32 %v14327_v14, %v13252_v20  ;;  %v14072_v20 = vld [vmem:[#allocation19 + $0x6c4] sm:$0xf0] }
 0x735   : > { %v16238_v43 = vpop.f32.mrf.mxu2  ;;  %v13257_v2 = vor.u32 %v14311_v35, %v13254_v3 }
 0x736   : > { %8992 = vmatpush.bf16.msrb.mxu0 %v12229_v52  ;;  %v8742_v47 = vpop.f32.mrf.mxu0  ;;  %v11717_v52 = vor.u32 %v13943_v59, %v11716_v26  ;;  %v12870_v26 = vld [vmem:[#allocation19 + $0xbc0] sm:$0xf0]  ;;  %v12236_v59 = vld [vmem:[#allocation19 + $0x648] sm:$0xf]  ;;  %v8767_v14 = vadd.f32 %v16238_v43, %v5958_v30 }
 0x737   : > { %9018 = vmatpush.bf16.msra.mxu2 %v12233_v29  ;;  %8957 = vmatpush.bf16.msra.mxu1 %v12733_v13  ;;  %v13911_v29 = vld [vmem:[#allocation19 + $0x1bc] sm:$0xf0]  ;;  %v14279_v13 = vld [vmem:[#allocation19 + $0xd44] sm:$0xf]  ;;  %v12237_v3 = vor.u32 %v14072_v20, %v12236_v59  ;;  %v11852_v30 = vld [vmem:[#allocation19 + $0x348] sm:$0xf] }
 0x738   : > { %8983 = vmatpush.bf16.msrb.mxu3 %v12737_v25  ;;  %v13126_v25 = vld [vmem:[#allocation19 + $0xdc0] sm:$0xf0]  ;;  %v11589_v42 = vor.u32 %v13911_v29, %v11588_v19 }
 0x739   : > { %v13129_v56 = vor.u32 %v14279_v13, %v13126_v25 }
 0x73a   : > { %8993 = vmatpush.bf16.msrb.mxu0 %v12101_v8  ;;  %v5957_v8 = vperm.slane %v16199_v15, 6 }
 0x73b   : > { %9019 = vmatpush.bf16.msra.mxu2 %v12105_v45  ;;  %8958 = vmatpush.bf16.msra.mxu1 %v12605_v44  ;;  %v11593_v45 = vor.u32 %v13895_v48, %v11590_v61  ;;  %v13863_v44 = vld [vmem:[#allocation19 + $0x44] sm:$0xf]  ;;  %v14024_v48 = vld [vmem:[#allocation19 + $0x54c] sm:$0xf] }
 0x73c   : > { %8984 = vmatpush.bf16.msrb.mxu3 %v12609_v31  ;;  %v14247_v31 = vld [vmem:[#allocation19 + $0xc44] sm:$0xf]  ;;  %v12110_v61 = vld [vmem:[#allocation19 + $0x5c8] sm:$0xf0] }
 0x73d   : > { %v8768_v21 = vpop.f32.mrf.mxu2  ;;  %v12113_v37 = vor.u32 %v14024_v48, %v12110_v61  ;;  %v13896_v48 = vld [vmem:[#allocation19 + $0x14c] sm:$0xf] }
 0x73e   : > { %8994 = vmatpush.bf16.msrb.mxu0 %v11973_v7  ;;  %v8715_v7 = vadd.f32 %v16218_v1, %v5956_v18  ;;  %v13001_v1 = vor.u32 %v14247_v31, %v12998_v55  ;;  %v13992_v31 = vld [vmem:[#allocation19 + $0x44c] sm:$0xf]  ;;  %v12484_v55 = vld [vmem:[#allocation19 + $0x840] sm:$0xf] }
 0x73f   : > { %9020 = vmatpush.bf16.msra.mxu2 %v11977_v63  ;;  %8959 = vmatpush.bf16.msra.mxu1 %v12477_v60  ;;  %v8753_v34 = vpop.f32.mrf.mxu1  ;;  %v5955_v63 = vperm.slane %v16199_v15, 4  ;;  %v11465_v60 = vor.u32 %v13863_v44, %v11462_v36  ;;  %v11598_v61 = vld [vmem:[#allocation19 + $0x1c8] sm:$0xf0] }
 0x740   : > { %8985 = vmatpush.bf16.msrb.mxu3 %v12481_v41  ;;  %v8728_v33 = vadd.f32 %v16232_v17, %v8715_v7  ;;  %v14231_v41 = vld [vmem:[#allocation19 + $0xbbc] sm:$0xf0]  ;;  %v14056_v17 = vld [vmem:[#allocation19 + $0x64c] sm:$0xf] }
 0x741   : > { %v12869_v58 = vor.u32 %v14231_v41, %v12868_v50  ;;  %v11982_v7 = vld [vmem:[#allocation19 + $0x4c8] sm:$0xf0] }
 0x742   : > { %8995 = vmatpush.bf16.msrb.mxu0 %v11845_v12  ;;  %8960 = vmatmul.bf16.vlgmr.msra.gmra.mxu1 %v16162_v6  ;;  %v14215_v12 = vld [vmem:[#allocation19 + $0xb44] sm:$0xf]  ;;  %v9442_v15 = vrot.slane %v8728_v33, 6  ;;  %v11985_v33 = vor.u32 %v13992_v31, %v11982_v7  ;;  %v11854_v50 = vld [vmem:[#allocation19 + $0x3c8] sm:$0xf0] }
 0x743   : > { %9004 = vmatpush.bf16.msrb.mxu1 %v13381_v24  ;;  %9021 = vmatpush.bf16.msra.mxu2 %v11849_v16  ;;  %v8741_v24 = vadd.f32 %v16236_v57, %v5957_v8  ;;  %v12369_v16 = vor.u32 %v14088_v32, %v12366_v5  ;;  %v12873_v47 = vor.u32 %v14215_v12, %v12870_v26  ;;  %v12740_v57 = vld [vmem:[#allocation19 + $0xa40] sm:$0xf]  ;;  %v14119_v32 = vld [vmem:[#allocation19 + $0x844] sm:$0xf]  ;;  %v14344_v12 = vld [vmem:[#allocation19 + $0xf4c] sm:$0xf] }
 0x744   : > { %9030 = vmatpush.bf16.msra.mxu3 %v13385_v39  ;;  %v12238_v39 = vld [vmem:[#allocation19 + $0x6c8] sm:$0xf0]  ;;  %v12486_v5 = vld [vmem:[#allocation19 + $0x8c0] sm:$0xf0]  ;;  %v12372_v31 = vld [vmem:[#allocation19 + $0x750] sm:$0xf] }
 0x745   : > { %8986 = vmatmul.bf16.vlgmr.msrb.gmra.mxu3 %v16162_v6  ;;  %v8754_v51 = vadd.f32 %v8753_v34, %v8741_v24  ;;  %v12241_v29 = vor.u32 %v14056_v17, %v12238_v39  ;;  %v13390_v24 = vld [vmem:[#allocation19 + $0xfc8] sm:$0xf0]  ;;  %v11724_v39 = vld [vmem:[#allocation19 + $0x248] sm:$0xf]  ;;  %v14105_v7 = vld [vmem:[#allocation19 + $0x7cc] sm:$0xf0] }
 0x746   : > { %8996 = vmatpush.bf16.msrb.mxu0 %v11717_v52  ;;  %v14199_v52 = vld [vmem:[#allocation19 + $0xabc] sm:$0xf0] }
 0x747   : > { %9005 = vmatpush.bf16.msrb.mxu1 %v13253_v49  ;;  %9022 = vmatpush.bf16.msra.mxu2 %v11721_v27  ;;  %v14183_v49 = vld [vmem:[#allocation19 + $0xa44] sm:$0xf]  ;;  %v8689_v27 = vadd.f32 %v16208_v10, %v5955_v63  ;;  %v8755_v43 = vpop.f32.mrf.mxu1  ;;  %v9443_v13 = vrot.slane %v8754_v51, 4  ;;  %v12741_v8 = vor.u32 %v14199_v52, %v12740_v57  ;;  %v13393_v51 = vor.u32 %v14344_v12, %v13390_v24  ;;  %v14312_v57 = vld [vmem:[#allocation19 + $0xe4c] sm:$0xf] }
 0x748   : > { %9031 = vmatpush.bf16.msra.mxu3 %v13257_v2  ;;  %v8779_v35 = vpop.f32.mrf.mxu3  ;;  %v12108_v2 = vld [vmem:[#allocation19 + $0x548] sm:$0xf]  ;;  %v12745_v10 = vor.u32 %v14183_v49, %v12742_v53  ;;  %v13262_v52 = vld [vmem:[#allocation19 + $0xec8] sm:$0xf0] }
 0x749   : > { %v8780_v19 = vadd.f32 %v8779_v35, %v8767_v14  ;;  %v8702_v18 = vadd.f32 %v16230_v54, %v8689_v27  ;;  %v11980_v54 = vld [vmem:[#allocation19 + $0x448] sm:$0xf]  ;;  %v13928_v35 = vld [vmem:[#allocation19 + $0x24c] sm:$0xf] }
 0x74a   : > { %8997 = vmatpush.bf16.msrb.mxu0 %v11589_v42  ;;  %v12109_v42 = vor.u32 %v14040_v28, %v12108_v2  ;;  %v13260_v14 = vld [vmem:[#allocation19 + $0xe48] sm:$0xf]  ;;  %v13265_v2 = vor.u32 %v14312_v57, %v13262_v52 }
 0x74b   : > { %9006 = vmatpush.bf16.msrb.mxu1 %v13125_v11  ;;  %9023 = vmatpush.bf16.msra.mxu2 %v11593_v45  ;;  %v9444_v25 = vrot.slane %v8780_v19, 2  ;;  %v14167_v11 = vld [vmem:[#allocation19 + $0x9bc] sm:$0xf0]  ;;  %v14151_v45 = vld [vmem:[#allocation19 + $0x944] sm:$0xf]  ;;  %v9469_v21 = vsel %vm9463_vm2, %v8702_v18, %v9442_v15 }
 0x74c   : > { %9032 = vmatpush.bf16.msra.mxu3 %v13129_v56  ;;  %v14008_v56 = vld [vmem:[#allocation19 + $0x4c4] sm:$0xf0]  ;;  %v12613_v34 = vor.u32 %v14167_v11, %v12612_v0  ;;  %v12617_v62 = vor.u32 %v14151_v45, %v12614_v4  ;;  %v14280_v18 = vld [vmem:[#allocation19 + $0xd4c] sm:$0xf] }
 0x74d   : > { %v9470_v22 = vsel %vm9465_vm3, %v9443_v13, %v9444_v25  ;;  %v11981_v63 = vor.u32 %v14008_v56, %v11980_v54  ;;  %v13944_v15 = vld [vmem:[#allocation19 + $0x2c4] sm:$0xf0]  ;;  %v13134_v13 = vld [vmem:[#allocation19 + $0xdc8] sm:$0xf0] }
 0x74e   : > { %8998 = vmatpush.bf16.msrb.mxu0 %v11461_v38  ;;  %v9471_v44 = vsel %vm9467_vm4, %v9469_v21, %v9470_v22  ;;  %v16257_v36 = vpop.f32.mrf.mxu0  ;;  %v14135_v38 = vld [vmem:[#allocation19 + $0x8bc] sm:$0xf0]  ;;  %v11725_v49 = vor.u32 %v13944_v15, %v11724_v39  ;;  %v13912_v43 = vld [vmem:[#allocation19 + $0x1c4] sm:$0xf0]  ;;  %v13137_v22 = vor.u32 %v14280_v18, %v13134_v13  ;;  %v11470_v4 = vld [vmem:[#allocation19 + $0xc8] sm:$0xf0] }
 0x74f   : > { %9007 = vmatpush.bf16.msrb.mxu1 %v12997_v40  ;;  %9024 = vmatpush.bf16.msra.mxu2 %v11465_v60  ;;  %9499 = vst [vmem:[%s16227_s25 + $0x8] sm:$0xff] %v9471_v44  ;;  %v13976_v40 = vld [vmem:[#allocation19 + $0x3c4] sm:$0xf0]  ;;  %v12485_v41 = vor.u32 %v14135_v38, %v12484_v55  ;;  %v14248_v54 = vld [vmem:[#allocation19 + $0xc4c] sm:$0xf] }
 0x750   : > { %9033 = vmatpush.bf16.msra.mxu3 %v13001_v1  ;;  %v8781_v9 = vpop.f32.mrf.mxu3  ;;  %v13388_v60 = vld [vmem:[#allocation19 + $0xf48] sm:$0xf]  ;;  %v11853_v26 = vor.u32 %v13976_v40, %v11852_v30  ;;  %v13006_v44 = vld [vmem:[#allocation19 + $0xcc8] sm:$0xf0]  ;;  %v14089_v55 = vld [vmem:[#allocation19 + $0x754] sm:$0xf] }
 0x751   : > { %8999 = vmatmul.bf16.vlgmr.msrb.gmra.mxu0 %v16156_v46  ;;  %v14360_v1 = vld [vmem:[#allocation19 + $0xfc4] sm:$0xf0]  ;;  %v13009_v38 = vor.u32 %v14248_v54, %v13006_v44  ;;  %v14216_v30 = vld [vmem:[#allocation19 + $0xb4c] sm:$0xf]  ;;  %v11990_v18 = vld [vmem:[#allocation19 + $0x4d0] sm:$0xf0] }
 0x752   : > { %9043 = vmatpush.bf16.msra.mxu0 %v12365_v23  ;;  %9025 = vmatmul.bf16.vlgmr.msra.gmra.mxu2 %v16156_v46  ;;  %v13960_v23 = vld [vmem:[#allocation19 + $0x34c] sm:$0xf]  ;;  %v13389_v59 = vor.u32 %v14360_v1, %v13388_v60  ;;  %v13132_v53 = vld [vmem:[#allocation19 + $0xd48] sm:$0xf]  ;;  %v12244_v1 = vld [vmem:[#allocation19 + $0x650] sm:$0xf] }
 0x753   : > { %9069 = vmatpush.bf16.msrb.mxu2 %v12369_v16  ;;  %9008 = vmatpush.bf16.msrb.mxu1 %v12869_v58  ;;  %v12489_v16 = vor.u32 %v14119_v32, %v12486_v5  ;;  %v11857_v20 = vor.u32 %v13960_v23, %v11854_v50  ;;  %v14296_v28 = vld [vmem:[#allocation19 + $0xdc4] sm:$0xf0]  ;;  %v12373_v32 = vor.u32 %v14105_v7, %v12372_v31  ;;  %v12878_v60 = vld [vmem:[#allocation19 + $0xbc8] sm:$0xf0]  ;;  %v14073_v23 = vld [vmem:[#allocation19 + $0x6cc] sm:$0xf0] }
 0x754   : > { %9034 = vmatpush.bf16.msra.mxu3 %v12873_v47  ;;  %v14328_v47 = vld [vmem:[#allocation19 + $0xec4] sm:$0xf0]  ;;  %v14057_v50 = vld [vmem:[#allocation19 + $0x654] sm:$0xf]  ;;  %v12881_v24 = vor.u32 %v14216_v30, %v12878_v60  ;;  %v14184_v39 = vld [vmem:[#allocation19 + $0xa4c] sm:$0xf] }
 0x755   : > { %v16260_v17 = vpop.f32.mrf.mxu2  ;;  %v13261_v27 = vor.u32 %v14328_v47, %v13260_v14  ;;  %v13880_v11 = vld [vmem:[#allocation19 + $0xc4] sm:$0xf0]  ;;  %v14041_v47 = vld [vmem:[#allocation19 + $0x5cc] sm:$0xf0]  ;;  %v13961_v44 = vld [vmem:[#allocation19 + $0x354] sm:$0xf] }
 0x756   : > { %9044 = vmatpush.bf16.msra.mxu0 %v12237_v3  ;;  %v8794_v58 = vpop.f32.mrf.mxu0  ;;  %v11726_v3 = vld [vmem:[#allocation19 + $0x2c8] sm:$0xf0]  ;;  %v13004_v45 = vld [vmem:[#allocation19 + $0xc48] sm:$0xf]  ;;  %v14361_v54 = vld [vmem:[#allocation19 + $0xfcc] sm:$0xf0] }
 0x757   : > { %9070 = vmatpush.bf16.msrb.mxu2 %v12241_v29  ;;  %9009 = vmatpush.bf16.msrb.mxu1 %v12741_v8  ;;  %v11729_v19 = vor.u32 %v13928_v35, %v11726_v3  ;;  %v11596_v29 = vld [vmem:[#allocation19 + $0x148] sm:$0xf]  ;;  %v12116_v58 = vld [vmem:[#allocation19 + $0x550] sm:$0xf]  ;;  %v14025_v35 = vld [vmem:[#allocation19 + $0x554] sm:$0xf] }
 0x758   : > { %9035 = vmatpush.bf16.msra.mxu3 %v12745_v10  ;;  %v11597_v25 = vor.u32 %v13912_v43, %v11596_v29  ;;  %v11468_v8 = vld [vmem:[#allocation19 + $0x48] sm:$0xf]  ;;  %v13133_v10 = vor.u32 %v14296_v28, %v13132_v53  ;;  %v12118_v3 = vld [vmem:[#allocation19 + $0x5d0] sm:$0xf0]  ;;  %v14152_v29 = vld [vmem:[#allocation19 + $0x94c] sm:$0xf] }
 0x759   : > { %v14264_v21 = vld [vmem:[#allocation19 + $0xcc4] sm:$0xf0]  ;;  %v12121_v43 = vor.u32 %v14025_v35, %v12118_v3  ;;  %v12622_v53 = vld [vmem:[#allocation19 + $0x9c8] sm:$0xf0]  ;;  %v14009_v28 = vld [vmem:[#allocation19 + $0x4cc] sm:$0xf0] }
 0x75a   : > { %9045 = vmatpush.bf16.msra.mxu0 %v12109_v42  ;;  %v11601_v42 = vor.u32 %v13896_v48, %v11598_v61  ;;  %v13005_v9 = vor.u32 %v14264_v21, %v13004_v45  ;;  %v12876_v5 = vld [vmem:[#allocation19 + $0xb48] sm:$0xf]  ;;  %v13993_v61 = vld [vmem:[#allocation19 + $0x454] sm:$0xf]  ;;  %v12494_v45 = vld [vmem:[#allocation19 + $0x8c8] sm:$0xf0] }
 0x75b   : > { %9071 = vmatpush.bf16.msrb.mxu2 %v12113_v37  ;;  %9010 = vmatpush.bf16.msrb.mxu1 %v12613_v34  ;;  %v13864_v37 = vld [vmem:[#allocation19 + $0x4c] sm:$0xf]  ;;  %v11469_v34 = vor.u32 %v13880_v11, %v11468_v8  ;;  %v12625_v8 = vor.u32 %v14152_v29, %v12622_v53  ;;  %v11993_v21 = vor.u32 %v13993_v61, %v11990_v18  ;;  %v11862_v31 = vld [vmem:[#allocation19 + $0x3d0] sm:$0xf0]  ;;  %v13268_v30 = vld [vmem:[#allocation19 + $0xe50] sm:$0xf] }
 0x75c   : > { %9036 = vmatpush.bf16.msra.mxu3 %v12617_v62  ;;  %v12374_v62 = vld [vmem:[#allocation19 + $0x7d0] sm:$0xf0]  ;;  %v14120_v11 = vld [vmem:[#allocation19 + $0x84c] sm:$0xf]  ;;  %v14265_v61 = vld [vmem:[#allocation19 + $0xccc] sm:$0xf0] }
 0x75d   : > { %v8820_v0 = vpop.f32.mrf.mxu2  ;;  %v12377_v40 = vor.u32 %v14089_v55, %v12374_v62  ;;  %v13398_v55 = vld [vmem:[#allocation19 + $0xfd0] sm:$0xf0]  ;;  %v12497_v62 = vor.u32 %v14120_v11, %v12494_v45  ;;  %v12380_v11 = vld [vmem:[#allocation19 + $0x758] sm:$0xf] }
 0x75e   : > { %9046 = vmatpush.bf16.msra.mxu0 %v11981_v63  ;;  %v11473_v63 = vor.u32 %v13864_v37, %v11470_v4  ;;  %v14136_v0 = vld [vmem:[#allocation19 + $0x8c4] sm:$0xf0]  ;;  %v13977_v37 = vld [vmem:[#allocation19 + $0x3cc] sm:$0xf0]  ;;  %v11606_v35 = vld [vmem:[#allocation19 + $0x1d0] sm:$0xf0] }
 0x75f   : > { %9072 = vmatpush.bf16.msrb.mxu2 %v11985_v33  ;;  %9011 = vmatpush.bf16.msrb.mxu1 %v12485_v41  ;;  %v16264_v56 = vpop.f32.mrf.mxu1  ;;  %v14232_v33 = vld [vmem:[#allocation19 + $0xbc4] sm:$0xf0]  ;;  %v12246_v41 = vld [vmem:[#allocation19 + $0x6d0] sm:$0xf0]  ;;  %v13396_v4 = vld [vmem:[#allocation19 + $0xf50] sm:$0xf] }
 0x760   : > { %9037 = vmatpush.bf16.msra.mxu3 %v12489_v16  ;;  %v12877_v12 = vor.u32 %v14232_v33, %v12876_v5  ;;  %v12249_v15 = vor.u32 %v14057_v50, %v12246_v41  ;;  %v11732_v5 = vld [vmem:[#allocation19 + $0x250] sm:$0xf]  ;;  %v11734_v50 = vld [vmem:[#allocation19 + $0x2d0] sm:$0xf0]  ;;  %v14106_v45 = vld [vmem:[#allocation19 + $0x7d4] sm:$0xf0] }
 0x761   : > { %v13945_v33 = vld [vmem:[#allocation19 + $0x2cc] sm:$0xf0]  ;;  %v14313_v41 = vld [vmem:[#allocation19 + $0xe54] sm:$0xf] }
 0x762   : > { %9047 = vmatpush.bf16.msra.mxu0 %v11853_v26  ;;  %9012 = vmatmul.bf16.vlgmr.msrb.gmra.mxu1 %v16162_v6  ;;  %v12245_v26 = vor.u32 %v14073_v23, %v12244_v1  ;;  %v14329_v1 = vld [vmem:[#allocation19 + $0xecc] sm:$0xf0]  ;;  %v13929_v23 = vld [vmem:[#allocation19 + $0x254] sm:$0xf] }
 0x763   : > { %9056 = vmatpush.bf16.msra.mxu1 %v13389_v59  ;;  %9073 = vmatpush.bf16.msrb.mxu2 %v11857_v20  ;;  %v12748_v59 = vld [vmem:[#allocation19 + $0xa48] sm:$0xf] }
 0x764   : > { %9082 = vmatpush.bf16.msrb.mxu3 %v13393_v51  ;;  %v14200_v20 = vld [vmem:[#allocation19 + $0xac4] sm:$0xf0]  ;;  %v12750_v51 = vld [vmem:[#allocation19 + $0xac8] sm:$0xf0] }
 0x765   : > { %9038 = vmatmul.bf16.vlgmr.msra.gmra.mxu3 %v16162_v6  ;;  %v12749_v57 = vor.u32 %v14200_v20, %v12748_v59  ;;  %v12753_v52 = vor.u32 %v14184_v39, %v12750_v51  ;;  %v13269_v59 = vor.u32 %v14329_v1, %v13268_v30  ;;  %v11737_v20 = vor.u32 %v13929_v23, %v11734_v50  ;;  %v11604_v39 = vld [vmem:[#allocation19 + $0x150] sm:$0xf]  ;;  %v14074_v30 = vld [vmem:[#allocation19 + $0x6d4] sm:$0xf0] }
 0x766   : > { %9048 = vmatpush.bf16.msra.mxu0 %v11725_v49  ;;  %v12117_v49 = vor.u32 %v14041_v47, %v12116_v58  ;;  %v14297_v58 = vld [vmem:[#allocation19 + $0xdcc] sm:$0xf0]  ;;  %v13897_v47 = vld [vmem:[#allocation19 + $0x154] sm:$0xf] }
 0x767   : > { %9057 = vmatpush.bf16.msra.mxu1 %v13261_v27  ;;  %9074 = vmatpush.bf16.msrb.mxu2 %v11729_v19  ;;  %v8807_v14 = vpop.f32.mrf.mxu1  ;;  %v12620_v27 = vld [vmem:[#allocation19 + $0x948] sm:$0xf] }
 0x768   : > { %9083 = vmatpush.bf16.msrb.mxu3 %v13265_v2  ;;  %v16266_v16 = vpop.f32.mrf.mxu3  ;;  %v14168_v19 = vld [vmem:[#allocation19 + $0x9c4] sm:$0xf0]  ;;  %v11988_v2 = vld [vmem:[#allocation19 + $0x450] sm:$0xf] }
 0x769   : > { %v12621_v13 = vor.u32 %v14168_v19, %v12620_v27  ;;  %v13140_v14 = vld [vmem:[#allocation19 + $0xd50] sm:$0xf] }
 0x76a   : > { %9049 = vmatpush.bf16.msra.mxu0 %v11597_v25  ;;  %v12492_v25 = vld [vmem:[#allocation19 + $0x848] sm:$0xf]  ;;  %v11476_v19 = vld [vmem:[#allocation19 + $0x50] sm:$0xf]  ;;  %v13141_v29 = vor.u32 %v14297_v58, %v13140_v14  ;;  %v12124_v58 = vld [vmem:[#allocation19 + $0x558] sm:$0xf] }
 0x76b   : > { %9058 = vmatpush.bf16.msra.mxu1 %v13133_v10  ;;  %9075 = vmatpush.bf16.msrb.mxu2 %v11601_v42  ;;  %v11989_v42 = vor.u32 %v14009_v28, %v11988_v2  ;;  %v12493_v7 = vor.u32 %v14136_v0, %v12492_v25  ;;  %v13881_v2 = vld [vmem:[#allocation19 + $0xcc] sm:$0xf0]  ;;  %v11478_v25 = vld [vmem:[#allocation19 + $0xd0] sm:$0xf0] }
 0x76c   : > { %9084 = vmatpush.bf16.msrb.mxu3 %v13137_v22  ;;  %v11860_v22 = vld [vmem:[#allocation19 + $0x350] sm:$0xf]  ;;  %v13014_v0 = vld [vmem:[#allocation19 + $0xcd0] sm:$0xf0] }
 0x76d   : > { %v13012_v28 = vld [vmem:[#allocation19 + $0xc50] sm:$0xf] }
 0x76e   : > { %9050 = vmatpush.bf16.msra.mxu0 %v11469_v34  ;;  %v16270_v48 = vpop.f32.mrf.mxu0  ;;  %v14345_v34 = vld [vmem:[#allocation19 + $0xf54] sm:$0xf] }
 0x76f   : > { %9059 = vmatpush.bf16.msra.mxu1 %v13005_v9  ;;  %9076 = vmatpush.bf16.msrb.mxu2 %v11473_v63  ;;  %v11861_v9 = vor.u32 %v13977_v37, %v11860_v22  ;;  %v13397_v63 = vor.u32 %v14361_v54, %v13396_v4  ;;  %v11477_v22 = vor.u32 %v13881_v2, %v11476_v19  ;;  %v14090_v37 = vld [vmem:[#allocation19 + $0x75c] sm:$0xf] }
 0x770   : > { %9085 = vmatpush.bf16.msrb.mxu3 %v13009_v38  ;;  %v8833_v10 = vpop.f32.mrf.mxu3  ;;  %v11865_v38 = vor.u32 %v13961_v44, %v11862_v31  ;;  %v12382_v4 = vld [vmem:[#allocation19 + $0x7d8] sm:$0xf0]  ;;  %v13013_v31 = vor.u32 %v14265_v61, %v13012_v28 }
 0x771   : > { %9051 = vmatmul.bf16.vlgmr.msra.gmra.mxu0 %v16156_v46 }
 0x772   : > { %9095 = vmatpush.bf16.msrb.mxu0 %v12373_v32  ;;  %9077 = vmatmul.bf16.vlgmr.msrb.gmra.mxu2 %v16156_v46 }
 0x773   : > { %9121 = vmatpush.bf16.msra.mxu2 %v12377_v40  ;;  %9060 = vmatpush.bf16.msra.mxu1 %v12877_v12  ;;  %v13401_v40 = vor.u32 %v14345_v34, %v13398_v55  ;;  %v13270_v12 = vld [vmem:[#allocation19 + $0xed0] sm:$0xf0]  ;;  %v12381_v34 = vor.u32 %v14106_v45, %v12380_v11  ;;  %v12884_v55 = vld [vmem:[#allocation19 + $0xb50] sm:$0xf] }
 0x774   : > { %9086 = vmatpush.bf16.msrb.mxu3 %v12881_v24  ;;  %v16274_v24 = vld [vmem:[#allocation20 + $0x8] sm:$0xff]  ;;  %v13273_v51 = vor.u32 %v14313_v41, %v13270_v12  ;;  %v12500_v11 = vld [vmem:[#allocation19 + $0x850] sm:$0xf] }
 0x775   : > { %v16272_v32 = vpop.f32.mrf.mxu2  ;;  %v5960_v3 = vperm.slane %v16274_v24, 1  ;;  %v5962_v44 = vperm.slane %v16274_v24, 3 }
 0x776   : > { %9096 = vmatpush.bf16.msrb.mxu0 %v12245_v26  ;;  %v8846_v60 = vpop.f32.mrf.mxu0  ;;  %v11733_v26 = vor.u32 %v13945_v33, %v11732_v5  ;;  %v12886_v5 = vld [vmem:[#allocation19 + $0xbd0] sm:$0xf0]  ;;  %v12252_v33 = vld [vmem:[#allocation19 + $0x658] sm:$0xf] }
 0x777   : > { %9122 = vmatpush.bf16.msra.mxu2 %v12249_v15  ;;  %9061 = vmatpush.bf16.msra.mxu1 %v12749_v57  ;;  %v13913_v15 = vld [vmem:[#allocation19 + $0x1cc] sm:$0xf0]  ;;  %v14281_v57 = vld [vmem:[#allocation19 + $0xd54] sm:$0xf]  ;;  %v8819_v10 = vadd.f32 %v16260_v17, %v5960_v3  ;;  %v8871_v1 = vadd.f32 %v16272_v32, %v5962_v44  ;;  %v12126_v3 = vld [vmem:[#allocation19 + $0x5d8] sm:$0xf0] }
 0x778   : > { %9087 = vmatpush.bf16.msrb.mxu3 %v12753_v52  ;;  %v13142_v52 = vld [vmem:[#allocation19 + $0xdd0] sm:$0xf0]  ;;  %v11605_v27 = vor.u32 %v13913_v15, %v11604_v39 }
 0x779   : > { %v13145_v18 = vor.u32 %v14281_v57, %v13142_v52  ;;  %v8832_v54 = vadd.f32 %v16266_v16, %v8819_v10  ;;  %v14058_v16 = vld [vmem:[#allocation19 + $0x65c] sm:$0xf] }
 0x77a   : > { %9097 = vmatpush.bf16.msrb.mxu0 %v12117_v49  ;;  %v5961_v49 = vperm.slane %v16274_v24, 2  ;;  %v13994_v10 = vld [vmem:[#allocation19 + $0x45c] sm:$0xf] }
 0x77b   : > { %9123 = vmatpush.bf16.msra.mxu2 %v12121_v43  ;;  %9062 = vmatpush.bf16.msra.mxu1 %v12621_v13  ;;  %v11609_v43 = vor.u32 %v13897_v47, %v11606_v35  ;;  %v13865_v13 = vld [vmem:[#allocation19 + $0x54] sm:$0xf]  ;;  %v9445_v60 = vrot.slane %v8832_v54, 6  ;;  %v14042_v47 = vld [vmem:[#allocation19 + $0x5d4] sm:$0xf0] }
 0x77c   : > { %9088 = vmatpush.bf16.msrb.mxu3 %v12625_v8  ;;  %v14249_v8 = vld [vmem:[#allocation19 + $0xc54] sm:$0xf]  ;;  %v14026_v35 = vld [vmem:[#allocation19 + $0x55c] sm:$0xf]  ;;  %v12125_v19 = vor.u32 %v14042_v47, %v12124_v58  ;;  %v13148_v58 = vld [vmem:[#allocation19 + $0xd58] sm:$0xf] }
 0x77d   : > { %v8872_v53 = vpop.f32.mrf.mxu2  ;;  %v13017_v17 = vor.u32 %v14249_v8, %v13014_v0  ;;  %v12129_v61 = vor.u32 %v14026_v35, %v12126_v3  ;;  %v12502_v54 = vld [vmem:[#allocation19 + $0x8d0] sm:$0xf0]  ;;  %v14298_v35 = vld [vmem:[#allocation19 + $0xdd4] sm:$0xf0]  ;;  %v13898_v3 = vld [vmem:[#allocation19 + $0x15c] sm:$0xf] }
 0x77e   : > { %9098 = vmatpush.bf16.msrb.mxu0 %v11989_v42  ;;  %v14153_v53 = vld [vmem:[#allocation19 + $0x954] sm:$0xf] }
 0x77f   : > { %9124 = vmatpush.bf16.msra.mxu2 %v11993_v21  ;;  %9063 = vmatpush.bf16.msra.mxu1 %v12493_v7  ;;  %v8857_v42 = vpop.f32.mrf.mxu1  ;;  %v5959_v21 = vperm.slane %v16274_v24, 0  ;;  %v11481_v7 = vor.u32 %v13865_v13, %v11478_v25  ;;  %v14010_v13 = vld [vmem:[#allocation19 + $0x4d4] sm:$0xf0] }
 0x780   : > { %9089 = vmatpush.bf16.msrb.mxu3 %v12497_v62  ;;  %v14233_v62 = vld [vmem:[#allocation19 + $0xbcc] sm:$0xf0] }
 0x781   : > { %v12885_v50 = vor.u32 %v14233_v62, %v12884_v55  ;;  %v8793_v39 = vadd.f32 %v16257_v36, %v5959_v21  ;;  %v13962_v55 = vld [vmem:[#allocation19 + $0x35c] sm:$0xf] }
 0x782   : > { %9099 = vmatpush.bf16.msrb.mxu0 %v11861_v9  ;;  %9064 = vmatmul.bf16.vlgmr.msra.gmra.mxu1 %v16162_v6  ;;  %v14217_v9 = vld [vmem:[#allocation19 + $0xb54] sm:$0xf]  ;;  %v11870_v62 = vld [vmem:[#allocation19 + $0x3d8] sm:$0xf0] }
 0x783   : > { %9108 = vmatpush.bf16.msrb.mxu1 %v13397_v63  ;;  %9125 = vmatpush.bf16.msra.mxu2 %v11865_v38  ;;  %v8845_v63 = vadd.f32 %v16270_v48, %v5961_v49  ;;  %v12385_v38 = vor.u32 %v14090_v37, %v12382_v4  ;;  %v12889_v41 = vor.u32 %v14217_v9, %v12886_v5  ;;  %v12756_v48 = vld [vmem:[#allocation19 + $0xa50] sm:$0xf]  ;;  %v14121_v4 = vld [vmem:[#allocation19 + $0x854] sm:$0xf] }
 0x784   : > { %9134 = vmatpush.bf16.msra.mxu3 %v13401_v40  ;;  %v12254_v40 = vld [vmem:[#allocation19 + $0x6d8] sm:$0xf0]  ;;  %v8806_v57 = vadd.f32 %v16264_v56, %v8793_v39  ;;  %v11996_v56 = vld [vmem:[#allocation19 + $0x458] sm:$0xf]  ;;  %v14137_v37 = vld [vmem:[#allocation19 + $0x8cc] sm:$0xf0]  ;;  %v12505_v5 = vor.u32 %v14121_v4, %v12502_v54 }
 0x785   : > { %9090 = vmatmul.bf16.vlgmr.msrb.gmra.mxu3 %v16162_v6  ;;  %v8858_v23 = vadd.f32 %v8857_v42, %v8845_v63  ;;  %v12257_v14 = vor.u32 %v14058_v16, %v12254_v40  ;;  %v11998_v42 = vld [vmem:[#allocation19 + $0x4d8] sm:$0xf0]  ;;  %v12501_v9 = vor.u32 %v14137_v37, %v12500_v11  ;;  %v11873_v16 = vor.u32 %v13962_v55, %v11870_v62  ;;  %v12260_v55 = vld [vmem:[#allocation19 + $0x660] sm:$0xf] }
 0x786   : > { %9100 = vmatpush.bf16.msrb.mxu0 %v11733_v26  ;;  %v12253_v26 = vor.u32 %v14074_v30, %v12252_v33  ;;  %v9472_v2 = vsel %vm9463_vm2, %v8806_v57, %v9445_v60  ;;  %v12001_v44 = vor.u32 %v13994_v10, %v11998_v42  ;;  %v14346_v63 = vld [vmem:[#allocation19 + $0xf5c] sm:$0xf]  ;;  %v11740_v60 = vld [vmem:[#allocation19 + $0x258] sm:$0xf]  ;;  %v12388_v42 = vld [vmem:[#allocation19 + $0x760] sm:$0xf] }
 0x787   : > { %9109 = vmatpush.bf16.msrb.mxu1 %v13269_v59  ;;  %9126 = vmatpush.bf16.msra.mxu2 %v11737_v20  ;;  %v14201_v59 = vld [vmem:[#allocation19 + $0xacc] sm:$0xf0]  ;;  %v14185_v20 = vld [vmem:[#allocation19 + $0xa54] sm:$0xf]  ;;  %v8859_v32 = vpop.f32.mrf.mxu1  ;;  %v9446_v52 = vrot.slane %v8858_v23, 4 }
 0x788   : > { %9135 = vmatpush.bf16.msra.mxu3 %v13273_v51  ;;  %v8883_v12 = vpop.f32.mrf.mxu3  ;;  %v12758_v51 = vld [vmem:[#allocation19 + $0xad0] sm:$0xf0]  ;;  %v13276_v23 = vld [vmem:[#allocation19 + $0xe58] sm:$0xf]  ;;  %v11614_v57 = vld [vmem:[#allocation19 + $0x1d8] sm:$0xf0] }
 0x789   : > { %v8884_v15 = vadd.f32 %v8883_v12, %v8871_v1  ;;  %v12761_v36 = vor.u32 %v14185_v20, %v12758_v51  ;;  %v13946_v1 = vld [vmem:[#allocation19 + $0x2d4] sm:$0xf0]  ;;  %v13278_v20 = vld [vmem:[#allocation19 + $0xed8] sm:$0xf0]  ;;  %v14075_v62 = vld [vmem:[#allocation19 + $0x6dc] sm:$0xf0] }
 0x78a   : > { %9101 = vmatpush.bf16.msrb.mxu0 %v11605_v27  ;;  %v12757_v27 = vor.u32 %v14201_v59, %v12756_v48  ;;  %v14330_v12 = vld [vmem:[#allocation19 + $0xed4] sm:$0xf0]  ;;  %v11742_v48 = vld [vmem:[#allocation19 + $0x2d8] sm:$0xf0]  ;;  %v11741_v39 = vor.u32 %v13946_v1, %v11740_v60 }
 0x78b   : > { %9110 = vmatpush.bf16.msrb.mxu1 %v13141_v29  ;;  %9127 = vmatpush.bf16.msra.mxu2 %v11609_v43  ;;  %v9447_v49 = vrot.slane %v8884_v15, 2  ;;  %v12628_v29 = vld [vmem:[#allocation19 + $0x950] sm:$0xf]  ;;  %v14314_v59 = vld [vmem:[#allocation19 + $0xe5c] sm:$0xf]  ;;  %v13277_v15 = vor.u32 %v14330_v12, %v13276_v23 }
 0x78c   : > { %9136 = vmatpush.bf16.msra.mxu3 %v13145_v18  ;;  %v14169_v43 = vld [vmem:[#allocation19 + $0x9cc] sm:$0xf0]  ;;  %v12630_v18 = vld [vmem:[#allocation19 + $0x9d0] sm:$0xf0]  ;;  %v11612_v32 = vld [vmem:[#allocation19 + $0x158] sm:$0xf]  ;;  %v13281_v47 = vor.u32 %v14314_v59, %v13278_v20 }
 0x78d   : > { %v9473_v28 = vsel %vm9465_vm3, %v9446_v52, %v9447_v49  ;;  %v12629_v0 = vor.u32 %v14169_v43, %v12628_v29  ;;  %v12633_v45 = vor.u32 %v14153_v53, %v12630_v18  ;;  %v13914_v51 = vld [vmem:[#allocation19 + $0x1d4] sm:$0xf0]  ;;  %v14282_v52 = vld [vmem:[#allocation19 + $0xd5c] sm:$0xf]  ;;  %v11617_v29 = vor.u32 %v13898_v3, %v11614_v57  ;;  %v12132_v12 = vld [vmem:[#allocation19 + $0x560] sm:$0xf] }
 0x78e   : > { %9102 = vmatpush.bf16.msrb.mxu0 %v11477_v22  ;;  %v9474_v25 = vsel %vm9467_vm4, %v9472_v2, %v9473_v28  ;;  %v16293_v8 = vpop.f32.mrf.mxu0  ;;  %v11997_v22 = vor.u32 %v14010_v13, %v11996_v56  ;;  %v13150_v49 = vld [vmem:[#allocation19 + $0xdd8] sm:$0xf0]  ;;  %v13882_v53 = vld [vmem:[#allocation19 + $0xd4] sm:$0xf0]  ;;  %v12134_v59 = vld [vmem:[#allocation19 + $0x5e0] sm:$0xf0] }
 0x78f   : > { %9111 = vmatpush.bf16.msrb.mxu1 %v13013_v31  ;;  %9128 = vmatpush.bf16.msra.mxu2 %v11481_v7  ;;  %9500 = vst [vmem:[%s16227_s25 + $0x10] sm:$0xff] %v9474_v25  ;;  %v11868_v31 = vld [vmem:[#allocation19 + $0x358] sm:$0xf]  ;;  %v13866_v18 = vld [vmem:[#allocation19 + $0x5c] sm:$0xf] }
 0x790   : > { %9137 = vmatpush.bf16.msra.mxu3 %v13017_v17  ;;  %v8885_v21 = vpop.f32.mrf.mxu3  ;;  %v13978_v7 = vld [vmem:[#allocation19 + $0x3d4] sm:$0xf0]  ;;  %v11486_v56 = vld [vmem:[#allocation19 + $0xd8] sm:$0xf0]  ;;  %v14011_v3 = vld [vmem:[#allocation19 + $0x4dc] sm:$0xf0] }
 0x791   : > { %9103 = vmatmul.bf16.vlgmr.msrb.gmra.mxu0 %v16156_v46  ;;  %v13404_v17 = vld [vmem:[#allocation19 + $0xf58] sm:$0xf]  ;;  %v11869_v33 = vor.u32 %v13978_v7, %v11868_v31  ;;  %v14250_v13 = vld [vmem:[#allocation19 + $0xc5c] sm:$0xf]  ;;  %v12390_v21 = vld [vmem:[#allocation19 + $0x7e0] sm:$0xf0]  ;;  %v11489_v37 = vor.u32 %v13866_v18, %v11486_v56 }
 0x792   : > { %9147 = vmatpush.bf16.msra.mxu0 %v12381_v34  ;;  %9129 = vmatmul.bf16.vlgmr.msra.gmra.mxu2 %v16156_v46  ;;  %v14362_v34 = vld [vmem:[#allocation19 + $0xfd4] sm:$0xf0]  ;;  %v13022_v10 = vld [vmem:[#allocation19 + $0xcd8] sm:$0xf0]  ;;  %v11876_v18 = vld [vmem:[#allocation19 + $0x360] sm:$0xf] }
 0x793   : > { %9173 = vmatpush.bf16.msrb.mxu2 %v12385_v38  ;;  %9112 = vmatpush.bf16.msrb.mxu1 %v12885_v50  ;;  %v13406_v38 = vld [vmem:[#allocation19 + $0xfd8] sm:$0xf0]  ;;  %v13405_v30 = vor.u32 %v14362_v34, %v13404_v17  ;;  %v13020_v2 = vld [vmem:[#allocation19 + $0xc58] sm:$0xf]  ;;  %v13025_v4 = vor.u32 %v14250_v13, %v13022_v10  ;;  %v13979_v56 = vld [vmem:[#allocation19 + $0x3dc] sm:$0xf0] }
 0x794   : > { %9138 = vmatpush.bf16.msra.mxu3 %v12889_v41  ;;  %v13409_v50 = vor.u32 %v14346_v63, %v13406_v38  ;;  %v14266_v28 = vld [vmem:[#allocation19 + $0xcd4] sm:$0xf0]  ;;  %v14218_v7 = vld [vmem:[#allocation19 + $0xb5c] sm:$0xf]  ;;  %v12262_v63 = vld [vmem:[#allocation19 + $0x6e0] sm:$0xf0] }
 0x795   : > { %v16296_v40 = vpop.f32.mrf.mxu2  ;;  %v14234_v31 = vld [vmem:[#allocation19 + $0xbd4] sm:$0xf0]  ;;  %v12894_v34 = vld [vmem:[#allocation19 + $0xbd8] sm:$0xf0]  ;;  %v13412_v13 = vld [vmem:[#allocation19 + $0xf60] sm:$0xf] }
 0x796   : > { %9148 = vmatpush.bf16.msra.mxu0 %v12253_v26  ;;  %v8898_v41 = vpop.f32.mrf.mxu0  ;;  %v13930_v26 = vld [vmem:[#allocation19 + $0x25c] sm:$0xf]  ;;  %v14202_v60 = vld [vmem:[#allocation19 + $0xad4] sm:$0xf0]  ;;  %v14363_v10 = vld [vmem:[#allocation19 + $0xfdc] sm:$0xf0] }
 0x797   : > { %9174 = vmatpush.bf16.msrb.mxu2 %v12257_v14  ;;  %9113 = vmatpush.bf16.msrb.mxu1 %v12757_v27  ;;  %v11745_v14 = vor.u32 %v13930_v26, %v11742_v48  ;;  %v11613_v27 = vor.u32 %v13914_v51, %v11612_v32  ;;  %v14186_v1 = vld [vmem:[#allocation19 + $0xa5c] sm:$0xf]  ;;  %v14043_v26 = vld [vmem:[#allocation19 + $0x5dc] sm:$0xf0]  ;;  %v14027_v48 = vld [vmem:[#allocation19 + $0x564] sm:$0xf] }
 0x798   : > { %9139 = vmatpush.bf16.msra.mxu3 %v12761_v36  ;;  %v11484_v36 = vld [vmem:[#allocation19 + $0x58] sm:$0xf]  ;;  %v12766_v41 = vld [vmem:[#allocation19 + $0xad8] sm:$0xf0] }
 0x799   : > { %v11485_v11 = vor.u32 %v13882_v53, %v11484_v36  ;;  %v14170_v32 = vld [vmem:[#allocation19 + $0x9d4] sm:$0xf0]  ;;  %v14154_v51 = vld [vmem:[#allocation19 + $0x95c] sm:$0xf] }
 0x79a   : > { %9149 = vmatpush.bf16.msra.mxu0 %v12125_v19  ;;  %v13149_v19 = vor.u32 %v14298_v35, %v13148_v58  ;;  %v12137_v58 = vor.u32 %v14027_v48, %v12134_v59  ;;  %v12004_v35 = vld [vmem:[#allocation19 + $0x460] sm:$0xf]  ;;  %v12508_v36 = vld [vmem:[#allocation19 + $0x858] sm:$0xf]  ;;  %v11622_v48 = vld [vmem:[#allocation19 + $0x1e0] sm:$0xf0] }
 0x79b   : > { %9175 = vmatpush.bf16.msrb.mxu2 %v12129_v61  ;;  %9114 = vmatpush.bf16.msrb.mxu1 %v12629_v0  ;;  %v13153_v61 = vor.u32 %v14282_v52, %v13150_v49  ;;  %v14107_v0 = vld [vmem:[#allocation19 + $0x7dc] sm:$0xf0]  ;;  %v13995_v52 = vld [vmem:[#allocation19 + $0x464] sm:$0xf]  ;;  %v14138_v53 = vld [vmem:[#allocation19 + $0x8d4] sm:$0xf0] }
 0x79c   : > { %9140 = vmatpush.bf16.msra.mxu3 %v12633_v45  ;;  %v14091_v45 = vld [vmem:[#allocation19 + $0x764] sm:$0xf]  ;;  %v12389_v54 = vor.u32 %v14107_v0, %v12388_v42  ;;  %v5964_v59 = vperm.slane %v16274_v24, 5 }
 0x79d   : > { %v8924_v43 = vpop.f32.mrf.mxu2  ;;  %v12393_v17 = vor.u32 %v14091_v45, %v12390_v21  ;;  %v12006_v49 = vld [vmem:[#allocation19 + $0x4e0] sm:$0xf0] }
 0x79e   : > { %9150 = vmatpush.bf16.msra.mxu0 %v11997_v22  ;;  %v13021_v22 = vor.u32 %v14266_v28, %v13020_v2  ;;  %v12005_v43 = vor.u32 %v14011_v3, %v12004_v35  ;;  %v14122_v2 = vld [vmem:[#allocation19 + $0x85c] sm:$0xf]  ;;  %v13963_v42 = vld [vmem:[#allocation19 + $0x364] sm:$0xf]  ;;  %v13883_v35 = vld [vmem:[#allocation19 + $0xdc] sm:$0xf0] }
 0x79f   : > { %9176 = vmatpush.bf16.msrb.mxu2 %v12001_v44  ;;  %9115 = vmatpush.bf16.msrb.mxu1 %v12501_v9  ;;  %v16300_v25 = vpop.f32.mrf.mxu1  ;;  %v12892_v44 = vld [vmem:[#allocation19 + $0xb58] sm:$0xf]  ;;  %v14059_v9 = vld [vmem:[#allocation19 + $0x664] sm:$0xf]  ;;  %v12510_v28 = vld [vmem:[#allocation19 + $0x8d8] sm:$0xf0] }
 0x7a0   : > { %9141 = vmatpush.bf16.msra.mxu3 %v12505_v5  ;;  %v12893_v38 = vor.u32 %v14234_v31, %v12892_v44  ;;  %v12897_v5 = vor.u32 %v14218_v7, %v12894_v34  ;;  %v12265_v23 = vor.u32 %v14059_v9, %v12262_v63  ;;  %v11878_v0 = vld [vmem:[#allocation19 + $0x3e0] sm:$0xf0]  ;;  %v11748_v31 = vld [vmem:[#allocation19 + $0x260] sm:$0xf] }
 0x7a1   : > { %v14347_v45 = vld [vmem:[#allocation19 + $0xf64] sm:$0xf]  ;;  %v13947_v7 = vld [vmem:[#allocation19 + $0x2dc] sm:$0xf0] }
 0x7a2   : > { %9151 = vmatpush.bf16.msra.mxu0 %v11869_v33  ;;  %9116 = vmatmul.bf16.vlgmr.msrb.gmra.mxu1 %v16162_v6  ;;  %v13414_v21 = vld [vmem:[#allocation19 + $0xfe0] sm:$0xf0]  ;;  %v13028_v3 = vld [vmem:[#allocation19 + $0xc60] sm:$0xf] }
 0x7a3   : > { %9160 = vmatpush.bf16.msra.mxu1 %v13405_v30  ;;  %9177 = vmatpush.bf16.msrb.mxu2 %v11873_v16  ;;  %v12261_v30 = vor.u32 %v14075_v62, %v12260_v55  ;;  %v12764_v16 = vld [vmem:[#allocation19 + $0xa58] sm:$0xf]  ;;  %v13417_v34 = vor.u32 %v14347_v45, %v13414_v21  ;;  %v14331_v62 = vld [vmem:[#allocation19 + $0xedc] sm:$0xf0]  ;;  %v13931_v9 = vld [vmem:[#allocation19 + $0x264] sm:$0xf] }
 0x7a4   : > { %9186 = vmatpush.bf16.msrb.mxu3 %v13409_v50  ;;  %v12765_v20 = vor.u32 %v14202_v60, %v12764_v16  ;;  %v11750_v63 = vld [vmem:[#allocation19 + $0x2e0] sm:$0xf0]  ;;  %v12900_v21 = vld [vmem:[#allocation19 + $0xb60] sm:$0xf] }
 0x7a5   : > { %9142 = vmatmul.bf16.vlgmr.msra.gmra.mxu3 %v16162_v6  ;;  %v11753_v60 = vor.u32 %v13931_v9, %v11750_v63 }
 0x7a6   : > { %9152 = vmatpush.bf16.msra.mxu0 %v11741_v39  ;;  %v12769_v39 = vor.u32 %v14186_v1, %v12766_v41  ;;  %v11620_v1 = vld [vmem:[#allocation19 + $0x160] sm:$0xf] }
 0x7a7   : > { %9161 = vmatpush.bf16.msra.mxu1 %v13277_v15  ;;  %9178 = vmatpush.bf16.msrb.mxu2 %v11745_v14  ;;  %v8911_v50 = vpop.f32.mrf.mxu1  ;;  %v12133_v15 = vor.u32 %v14043_v26, %v12132_v12  ;;  %v12636_v14 = vld [vmem:[#allocation19 + $0x958] sm:$0xf]  ;;  %v14299_v12 = vld [vmem:[#allocation19 + $0xddc] sm:$0xf0]  ;;  %v13899_v26 = vld [vmem:[#allocation19 + $0x164] sm:$0xf] }
 0x7a8   : > { %9187 = vmatpush.bf16.msrb.mxu3 %v13281_v47  ;;  %v16302_v33 = vpop.f32.mrf.mxu3  ;;  %v12638_v47 = vld [vmem:[#allocation19 + $0x9d8] sm:$0xf0]  ;;  %v13156_v50 = vld [vmem:[#allocation19 + $0xd60] sm:$0xf] }
 0x7aa   : > { %9153 = vmatpush.bf16.msra.mxu0 %v11613_v27  ;;  %v12637_v27 = vor.u32 %v14170_v32, %v12636_v14  ;;  %v11492_v32 = vld [vmem:[#allocation19 + $0x60] sm:$0xf] }
 0x7ab   : > { %9162 = vmatpush.bf16.msra.mxu1 %v13149_v19  ;;  %9179 = vmatpush.bf16.msrb.mxu2 %v11617_v29  ;;  %v12641_v19 = vor.u32 %v14154_v51, %v12638_v47  ;;  %v13157_v51 = vor.u32 %v14299_v12, %v13156_v50  ;;  %v12774_v50 = vld [vmem:[#allocation19 + $0xae0] sm:$0xf0]  ;;  %v14044_v12 = vld [vmem:[#allocation19 + $0x5e4] sm:$0xf0] }
 0x7ac   : > { %9188 = vmatpush.bf16.msrb.mxu3 %v13153_v61  ;;  %v12009_v61 = vor.u32 %v13995_v52, %v12006_v49  ;;  %v14267_v52 = vld [vmem:[#allocation19 + $0xcdc] sm:$0xf0] }
 0x7ae   : > { %9154 = vmatpush.bf16.msra.mxu0 %v11485_v11  ;;  %v16306_v57 = vpop.f32.mrf.mxu0  ;;  %v12509_v11 = vor.u32 %v14138_v53, %v12508_v36  ;;  %v11494_v36 = vld [vmem:[#allocation19 + $0xe0] sm:$0xf0] }
 0x7af   : > { %9163 = vmatpush.bf16.msra.mxu1 %v13021_v22  ;;  %9180 = vmatpush.bf16.msrb.mxu2 %v11489_v37  ;;  %v12513_v22 = vor.u32 %v14122_v2, %v12510_v28  ;;  %v11877_v37 = vor.u32 %v13979_v56, %v11876_v18  ;;  %v13030_v53 = vld [vmem:[#allocation19 + $0xce0] sm:$0xf0]  ;;  %v12396_v2 = vld [vmem:[#allocation19 + $0x768] sm:$0xf]  ;;  %v11493_v18 = vor.u32 %v13883_v35, %v11492_v32  ;;  %v14092_v56 = vld [vmem:[#allocation19 + $0x76c] sm:$0xf] }
 0x7b0   : > { %9189 = vmatpush.bf16.msrb.mxu3 %v13025_v4  ;;  %v8937_v29 = vpop.f32.mrf.mxu3  ;;  %v13413_v4 = vor.u32 %v14363_v10, %v13412_v13  ;;  %v14108_v28 = vld [vmem:[#allocation19 + $0x7e4] sm:$0xf0]  ;;  %v12398_v13 = vld [vmem:[#allocation19 + $0x7e8] sm:$0xf0]  ;;  %v12644_v32 = vld [vmem:[#allocation19 + $0x960] sm:$0xf] }
 0x7b1   : > { %9155 = vmatmul.bf16.vlgmr.msra.gmra.mxu0 %v16156_v46  ;;  %v8923_v29 = vadd.f32 %v16296_v40, %v5964_v59  ;;  %v12397_v45 = vor.u32 %v14108_v28, %v12396_v2 }
 0x7b2   : > { %9199 = vmatpush.bf16.msrb.mxu0 %v12389_v54  ;;  %9181 = vmatmul.bf16.vlgmr.msrb.gmra.mxu2 %v16156_v46  ;;  %v11881_v54 = vor.u32 %v13963_v42, %v11878_v0  ;;  %v5966_v42 = vperm.slane %v16274_v24, 7  ;;  %v13029_v0 = vor.u32 %v14267_v52, %v13028_v3  ;;  %v12646_v52 = vld [vmem:[#allocation19 + $0x9e0] sm:$0xf0] }
 0x7b3   : > { %9225 = vmatpush.bf16.msra.mxu2 %v12393_v17  ;;  %9164 = vmatpush.bf16.msra.mxu1 %v12893_v38  ;;  %v13284_v17 = vld [vmem:[#allocation19 + $0xe60] sm:$0xf]  ;;  %v14315_v38 = vld [vmem:[#allocation19 + $0xe64] sm:$0xf]  ;;  %v8936_v10 = vadd.f32 %v16302_v33, %v8923_v29  ;;  %v14060_v33 = vld [vmem:[#allocation19 + $0x66c] sm:$0xf] }
 0x7b4   : > { %9190 = vmatpush.bf16.msrb.mxu3 %v12897_v5  ;;  %v13286_v5 = vld [vmem:[#allocation19 + $0xee0] sm:$0xf0]  ;;  %v13285_v16 = vor.u32 %v14331_v62, %v13284_v17  ;;  %v14076_v17 = vld [vmem:[#allocation19 + $0x6e4] sm:$0xf0]  ;;  %v12014_v29 = vld [vmem:[#allocation19 + $0x4e8] sm:$0xf0] }
 0x7b5   : > { %v16308_v44 = vpop.f32.mrf.mxu2  ;;  %v13289_v41 = vor.u32 %v14315_v38, %v13286_v5 }
 0x7b6   : > { %9200 = vmatpush.bf16.msrb.mxu0 %v12261_v30  ;;  %v8950_v55 = vpop.f32.mrf.mxu0  ;;  %v11749_v30 = vor.u32 %v13947_v7, %v11748_v31  ;;  %v12902_v31 = vld [vmem:[#allocation19 + $0xbe0] sm:$0xf0]  ;;  %v12268_v7 = vld [vmem:[#allocation19 + $0x668] sm:$0xf] }
 0x7b7   : > { %9226 = vmatpush.bf16.msra.mxu2 %v12265_v23  ;;  %9165 = vmatpush.bf16.msra.mxu1 %v12765_v20  ;;  %v13915_v23 = vld [vmem:[#allocation19 + $0x1dc] sm:$0xf0]  ;;  %v14283_v20 = vld [vmem:[#allocation19 + $0xd64] sm:$0xf]  ;;  %v8975_v55 = vadd.f32 %v16308_v44, %v5966_v42  ;;  %v12269_v5 = vor.u32 %v14076_v17, %v12268_v7  ;;  %v11884_v42 = vld [vmem:[#allocation19 + $0x368] sm:$0xf] }
 0x7b8   : > { %9191 = vmatpush.bf16.msrb.mxu3 %v12769_v39  ;;  %v13158_v39 = vld [vmem:[#allocation19 + $0xde0] sm:$0xf0]  ;;  %v11621_v14 = vor.u32 %v13915_v23, %v11620_v1 }
 0x7b9   : > { %v13161_v49 = vor.u32 %v14283_v20, %v13158_v39 }
 0x7ba   : > { %9201 = vmatpush.bf16.msrb.mxu0 %v12133_v15  ;;  %v5965_v15 = vperm.slane %v16274_v24, 6 }
 0x7bb   : > { %9227 = vmatpush.bf16.msra.mxu2 %v12137_v58  ;;  %9166 = vmatpush.bf16.msra.mxu1 %v12637_v27  ;;  %v11625_v58 = vor.u32 %v13899_v26, %v11622_v48  ;;  %v13867_v27 = vld [vmem:[#allocation19 + $0x64] sm:$0xf]  ;;  %v14028_v26 = vld [vmem:[#allocation19 + $0x56c] sm:$0xf] }
 0x7bc   : > { %9192 = vmatpush.bf16.msrb.mxu3 %v12641_v19  ;;  %v14251_v19 = vld [vmem:[#allocation19 + $0xc64] sm:$0xf]  ;;  %v12142_v48 = vld [vmem:[#allocation19 + $0x5e8] sm:$0xf0] }
 0x7bd   : > { %v8976_v47 = vpop.f32.mrf.mxu2  ;;  %v13033_v40 = vor.u32 %v14251_v19, %v13030_v53  ;;  %v12145_v3 = vor.u32 %v14028_v26, %v12142_v48  ;;  %v13996_v19 = vld [vmem:[#allocation19 + $0x46c] sm:$0xf]  ;;  %v12516_v53 = vld [vmem:[#allocation19 + $0x860] sm:$0xf] }
 0x7be   : > { %9202 = vmatpush.bf16.msrb.mxu0 %v12005_v43  ;;  %v13900_v26 = vld [vmem:[#allocation19 + $0x16c] sm:$0xf] }
 0x7bf   : > { %9228 = vmatpush.bf16.msra.mxu2 %v12009_v61  ;;  %9167 = vmatpush.bf16.msra.mxu1 %v12509_v11  ;;  %v8961_v43 = vpop.f32.mrf.mxu1  ;;  %v5963_v61 = vperm.slane %v16274_v24, 4  ;;  %v11497_v11 = vor.u32 %v13867_v27, %v11494_v36  ;;  %v9448_v24 = vrot.slane %v8936_v10, 6  ;;  %v12017_v10 = vor.u32 %v13996_v19, %v12014_v29  ;;  %v11630_v48 = vld [vmem:[#allocation19 + $0x1e8] sm:$0xf0]  ;;  %v12404_v19 = vld [vmem:[#allocation19 + $0x770] sm:$0xf] }
 0x7c0   : > { %9193 = vmatpush.bf16.msrb.mxu3 %v12513_v22  ;;  %v14235_v22 = vld [vmem:[#allocation19 + $0xbdc] sm:$0xf0]  ;;  %v14109_v29 = vld [vmem:[#allocation19 + $0x7ec] sm:$0xf0] }
 0x7c1   : > { %v12901_v9 = vor.u32 %v14235_v22, %v12900_v21  ;;  %v11886_v21 = vld [vmem:[#allocation19 + $0x3e8] sm:$0xf0] }
 0x7c2   : > { %9203 = vmatpush.bf16.msrb.mxu0 %v11877_v37  ;;  %9168 = vmatmul.bf16.vlgmr.msra.gmra.mxu1 %v16162_v6  ;;  %v14219_v37 = vld [vmem:[#allocation19 + $0xb64] sm:$0xf] }
 0x7c3   : > { %9212 = vmatpush.bf16.msrb.mxu1 %v13413_v4  ;;  %9229 = vmatpush.bf16.msra.mxu2 %v11881_v54  ;;  %v8949_v4 = vadd.f32 %v16306_v57, %v5965_v15  ;;  %v12401_v54 = vor.u32 %v14092_v56, %v12398_v13  ;;  %v12905_v63 = vor.u32 %v14219_v37, %v12902_v31  ;;  %v12772_v57 = vld [vmem:[#allocation19 + $0xa60] sm:$0xf]  ;;  %v14123_v56 = vld [vmem:[#allocation19 + $0x864] sm:$0xf]  ;;  %v14348_v37 = vld [vmem:[#allocation19 + $0xf6c] sm:$0xf] }
 0x7c4   : > { %9238 = vmatpush.bf16.msra.mxu3 %v13417_v34  ;;  %v12270_v34 = vld [vmem:[#allocation19 + $0x6e8] sm:$0xf0]  ;;  %v12518_v13 = vld [vmem:[#allocation19 + $0x8e0] sm:$0xf0] }
 0x7c5   : > { %9194 = vmatmul.bf16.vlgmr.msrb.gmra.mxu3 %v16162_v6  ;;  %v8962_v62 = vadd.f32 %v8961_v43, %v8949_v4  ;;  %v12273_v23 = vor.u32 %v14060_v33, %v12270_v34  ;;  %v13422_v4 = vld [vmem:[#allocation19 + $0xfe8] sm:$0xf0]  ;;  %v11756_v34 = vld [vmem:[#allocation19 + $0x268] sm:$0xf] }
 0x7c6   : > { %9204 = vmatpush.bf16.msrb.mxu0 %v11749_v30  ;;  %v14203_v30 = vld [vmem:[#allocation19 + $0xadc] sm:$0xf0] }
 0x7c7   : > { %9213 = vmatpush.bf16.msrb.mxu1 %v13285_v16  ;;  %9230 = vmatpush.bf16.msra.mxu2 %v11753_v60  ;;  %v14187_v16 = vld [vmem:[#allocation19 + $0xa64] sm:$0xf]  ;;  %v8897_v60 = vadd.f32 %v16293_v8, %v5963_v61  ;;  %v8963_v44 = vpop.f32.mrf.mxu1  ;;  %v9449_v20 = vrot.slane %v8962_v62, 4  ;;  %v12773_v15 = vor.u32 %v14203_v30, %v12772_v57  ;;  %v13425_v62 = vor.u32 %v14348_v37, %v13422_v4  ;;  %v14316_v57 = vld [vmem:[#allocation19 + $0xe6c] sm:$0xf] }
 0x7c8   : > { %9239 = vmatpush.bf16.msra.mxu3 %v13289_v41  ;;  %v8987_v38 = vpop.f32.mrf.mxu3  ;;  %v12140_v41 = vld [vmem:[#allocation19 + $0x568] sm:$0xf]  ;;  %v12777_v8 = vor.u32 %v14187_v16, %v12774_v50  ;;  %v13294_v30 = vld [vmem:[#allocation19 + $0xee8] sm:$0xf0] }
 0x7c9   : > { %v8988_v1 = vadd.f32 %v8987_v38, %v8975_v55  ;;  %v8910_v59 = vadd.f32 %v16300_v25, %v8897_v60  ;;  %v12012_v25 = vld [vmem:[#allocation19 + $0x468] sm:$0xf]  ;;  %v13932_v38 = vld [vmem:[#allocation19 + $0x26c] sm:$0xf] }
 0x7ca   : > { %9205 = vmatpush.bf16.msrb.mxu0 %v11621_v14  ;;  %v12141_v14 = vor.u32 %v14044_v12, %v12140_v41  ;;  %v13292_v55 = vld [vmem:[#allocation19 + $0xe68] sm:$0xf]  ;;  %v13297_v41 = vor.u32 %v14316_v57, %v13294_v30 }
 0x7cb   : > { %9214 = vmatpush.bf16.msrb.mxu1 %v13157_v51  ;;  %9231 = vmatpush.bf16.msra.mxu2 %v11625_v58  ;;  %v9450_v39 = vrot.slane %v8988_v1, 2  ;;  %v14171_v51 = vld [vmem:[#allocation19 + $0x9dc] sm:$0xf0]  ;;  %v14155_v58 = vld [vmem:[#allocation19 + $0x964] sm:$0xf]  ;;  %v9475_v47 = vsel %vm9463_vm2, %v8910_v59, %v9448_v24 }
 0x7cc   : > { %9240 = vmatpush.bf16.msra.mxu3 %v13161_v49  ;;  %v14012_v49 = vld [vmem:[#allocation19 + $0x4e4] sm:$0xf0]  ;;  %v12645_v43 = vor.u32 %v14171_v51, %v12644_v32  ;;  %v12649_v2 = vor.u32 %v14155_v58, %v12646_v52  ;;  %v14284_v59 = vld [vmem:[#allocation19 + $0xd6c] sm:$0xf] }
 0x7cd   : > { %v9476_v35 = vsel %vm9465_vm3, %v9449_v20, %v9450_v39  ;;  %v12013_v61 = vor.u32 %v14012_v49, %v12012_v25  ;;  %v13948_v24 = vld [vmem:[#allocation19 + $0x2e4] sm:$0xf0]  ;;  %v13166_v20 = vld [vmem:[#allocation19 + $0xde8] sm:$0xf0] }
 0x7ce   : > { %9206 = vmatpush.bf16.msrb.mxu0 %v11493_v18  ;;  %v9477_v27 = vsel %vm9467_vm4, %v9475_v47, %v9476_v35  ;;  %v16327_v36 = vpop.f32.mrf.mxu0  ;;  %v14139_v18 = vld [vmem:[#allocation19 + $0x8dc] sm:$0xf0]  ;;  %v11757_v16 = vor.u32 %v13948_v24, %v11756_v34  ;;  %v13916_v44 = vld [vmem:[#allocation19 + $0x1e4] sm:$0xf0]  ;;  %v13169_v35 = vor.u32 %v14284_v59, %v13166_v20  ;;  %v11502_v52 = vld [vmem:[#allocation19 + $0xe8] sm:$0xf0] }
 0x7cf   : > { %9215 = vmatpush.bf16.msrb.mxu1 %v13029_v0  ;;  %9232 = vmatpush.bf16.msra.mxu2 %v11497_v11  ;;  %9501 = vst [vmem:[%s16227_s25 + $0x18] sm:$0xff] %v9477_v27  ;;  %v13980_v0 = vld [vmem:[#allocation19 + $0x3e4] sm:$0xf0]  ;;  %v12517_v22 = vor.u32 %v14139_v18, %v12516_v53  ;;  %v14252_v25 = vld [vmem:[#allocation19 + $0xc6c] sm:$0xf] }
 0x7d0   : > { %9241 = vmatpush.bf16.msra.mxu3 %v13033_v40  ;;  %v8989_v28 = vpop.f32.mrf.mxu3  ;;  %v13420_v11 = vld [vmem:[#allocation19 + $0xf68] sm:$0xf]  ;;  %v11885_v31 = vor.u32 %v13980_v0, %v11884_v42  ;;  %v13038_v27 = vld [vmem:[#allocation19 + $0xce8] sm:$0xf0]  ;;  %v14093_v53 = vld [vmem:[#allocation19 + $0x774] sm:$0xf] }
 0x7d1   : > { %9207 = vmatmul.bf16.vlgmr.msrb.gmra.mxu0 %v16156_v46  ;;  %v14364_v40 = vld [vmem:[#allocation19 + $0xfe4] sm:$0xf0]  ;;  %v13041_v18 = vor.u32 %v14252_v25, %v13038_v27  ;;  %v14220_v42 = vld [vmem:[#allocation19 + $0xb6c] sm:$0xf]  ;;  %v12022_v59 = vld [vmem:[#allocation19 + $0x4f0] sm:$0xf0] }
 0x7d2   : > { %9251 = vmatpush.bf16.msra.mxu0 %v12397_v45  ;;  %9233 = vmatmul.bf16.vlgmr.msra.gmra.mxu2 %v16156_v46  ;;  %v13964_v45 = vld [vmem:[#allocation19 + $0x36c] sm:$0xf]  ;;  %v13421_v7 = vor.u32 %v14364_v40, %v13420_v11  ;;  %v13164_v50 = vld [vmem:[#allocation19 + $0xd68] sm:$0xf]  ;;  %v12276_v40 = vld [vmem:[#allocation19 + $0x670] sm:$0xf] }
 0x7d3   : > { %9277 = vmatpush.bf16.msrb.mxu2 %v12401_v54  ;;  %9216 = vmatpush.bf16.msrb.mxu1 %v12901_v9  ;;  %v12521_v54 = vor.u32 %v14123_v56, %v12518_v13  ;;  %v11889_v17 = vor.u32 %v13964_v45, %v11886_v21  ;;  %v14300_v12 = vld [vmem:[#allocation19 + $0xde4] sm:$0xf0]  ;;  %v12405_v56 = vor.u32 %v14109_v29, %v12404_v19  ;;  %v12910_v11 = vld [vmem:[#allocation19 + $0xbe8] sm:$0xf0]  ;;  %v14077_v45 = vld [vmem:[#allocation19 + $0x6ec] sm:$0xf0] }
 0x7d4   : > { %9242 = vmatpush.bf16.msra.mxu3 %v12905_v63  ;;  %v14332_v63 = vld [vmem:[#allocation19 + $0xee4] sm:$0xf0]  ;;  %v14061_v21 = vld [vmem:[#allocation19 + $0x674] sm:$0xf]  ;;  %v12913_v4 = vor.u32 %v14220_v42, %v12910_v11  ;;  %v14188_v34 = vld [vmem:[#allocation19 + $0xa6c] sm:$0xf] }
 0x7d5   : > { %v16330_v33 = vpop.f32.mrf.mxu2  ;;  %v13293_v60 = vor.u32 %v14332_v63, %v13292_v55  ;;  %v13884_v51 = vld [vmem:[#allocation19 + $0xe4] sm:$0xf0]  ;;  %v14045_v63 = vld [vmem:[#allocation19 + $0x5ec] sm:$0xf0]  ;;  %v13965_v27 = vld [vmem:[#allocation19 + $0x374] sm:$0xf] }
 0x7d6   : > { %9252 = vmatpush.bf16.msra.mxu0 %v12269_v5  ;;  %v9002_v9 = vpop.f32.mrf.mxu0  ;;  %v11758_v5 = vld [vmem:[#allocation19 + $0x2e8] sm:$0xf0]  ;;  %v13036_v58 = vld [vmem:[#allocation19 + $0xc68] sm:$0xf]  ;;  %v14365_v25 = vld [vmem:[#allocation19 + $0xfec] sm:$0xf0] }
 0x7d7   : > { %9278 = vmatpush.bf16.msrb.mxu2 %v12273_v23  ;;  %9217 = vmatpush.bf16.msrb.mxu1 %v12773_v15  ;;  %v11761_v1 = vor.u32 %v13932_v38, %v11758_v5  ;;  %v11628_v23 = vld [vmem:[#allocation19 + $0x168] sm:$0xf]  ;;  %v12148_v9 = vld [vmem:[#allocation19 + $0x570] sm:$0xf]  ;;  %v14029_v38 = vld [vmem:[#allocation19 + $0x574] sm:$0xf] }
 0x7d8   : > { %9243 = vmatpush.bf16.msra.mxu3 %v12777_v8  ;;  %v11629_v39 = vor.u32 %v13916_v44, %v11628_v23  ;;  %v11500_v15 = vld [vmem:[#allocation19 + $0x68] sm:$0xf]  ;;  %v13165_v8 = vor.u32 %v14300_v12, %v13164_v50  ;;  %v12150_v5 = vld [vmem:[#allocation19 + $0x5f0] sm:$0xf0]  ;;  %v14156_v23 = vld [vmem:[#allocation19 + $0x96c] sm:$0xf] }
 0x7d9   : > { %v14268_v47 = vld [vmem:[#allocation19 + $0xce4] sm:$0xf0]  ;;  %v12153_v44 = vor.u32 %v14029_v38, %v12150_v5  ;;  %v12654_v50 = vld [vmem:[#allocation19 + $0x9e8] sm:$0xf0]  ;;  %v14013_v12 = vld [vmem:[#allocation19 + $0x4ec] sm:$0xf0] }
 0x7da   : > { %9253 = vmatpush.bf16.msra.mxu0 %v12141_v14  ;;  %v11633_v14 = vor.u32 %v13900_v26, %v11630_v48  ;;  %v13037_v28 = vor.u32 %v14268_v47, %v13036_v58  ;;  %v12908_v13 = vld [vmem:[#allocation19 + $0xb68] sm:$0xf]  ;;  %v13997_v48 = vld [vmem:[#allocation19 + $0x474] sm:$0xf]  ;;  %v12526_v58 = vld [vmem:[#allocation19 + $0x8e8] sm:$0xf0] }
 0x7db   : > { %9279 = vmatpush.bf16.msrb.mxu2 %v12145_v3  ;;  %9218 = vmatpush.bf16.msrb.mxu1 %v12645_v43  ;;  %v13868_v3 = vld [vmem:[#allocation19 + $0x6c] sm:$0xf]  ;;  %v11501_v43 = vor.u32 %v13884_v51, %v11500_v15  ;;  %v12657_v15 = vor.u32 %v14156_v23, %v12654_v50  ;;  %v12025_v47 = vor.u32 %v13997_v48, %v12022_v59  ;;  %v11894_v19 = vld [vmem:[#allocation19 + $0x3f0] sm:$0xf0]  ;;  %v13300_v42 = vld [vmem:[#allocation19 + $0xe70] sm:$0xf] }
 0x7dc   : > { %9244 = vmatpush.bf16.msra.mxu3 %v12649_v2  ;;  %v12406_v2 = vld [vmem:[#allocation19 + $0x7f0] sm:$0xf0]  ;;  %v14124_v51 = vld [vmem:[#allocation19 + $0x86c] sm:$0xf]  ;;  %v14269_v48 = vld [vmem:[#allocation19 + $0xcec] sm:$0xf0] }
 0x7dd   : > { %v9028_v32 = vpop.f32.mrf.mxu2  ;;  %v12409_v0 = vor.u32 %v14093_v53, %v12406_v2  ;;  %v13430_v53 = vld [vmem:[#allocation19 + $0xff0] sm:$0xf0]  ;;  %v12529_v2 = vor.u32 %v14124_v51, %v12526_v58  ;;  %v12412_v51 = vld [vmem:[#allocation19 + $0x778] sm:$0xf] }
 0x7de   : > { %9254 = vmatpush.bf16.msra.mxu0 %v12013_v61  ;;  %v11505_v61 = vor.u32 %v13868_v3, %v11502_v52  ;;  %v14140_v32 = vld [vmem:[#allocation19 + $0x8e4] sm:$0xf0]  ;;  %v13981_v3 = vld [vmem:[#allocation19 + $0x3ec] sm:$0xf0]  ;;  %v11638_v38 = vld [vmem:[#allocation19 + $0x1f0] sm:$0xf0] }
 0x7df   : > { %9280 = vmatpush.bf16.msrb.mxu2 %v12017_v10  ;;  %9219 = vmatpush.bf16.msrb.mxu1 %v12517_v22  ;;  %v16334_v49 = vpop.f32.mrf.mxu1  ;;  %v14236_v10 = vld [vmem:[#allocation19 + $0xbe4] sm:$0xf0]  ;;  %v12278_v22 = vld [vmem:[#allocation19 + $0x6f0] sm:$0xf0]  ;;  %v13428_v52 = vld [vmem:[#allocation19 + $0xf70] sm:$0xf] }
 0x7e0   : > { %9245 = vmatpush.bf16.msra.mxu3 %v12521_v54  ;;  %v12909_v37 = vor.u32 %v14236_v10, %v12908_v13  ;;  %v12281_v24 = vor.u32 %v14061_v21, %v12278_v22  ;;  %v11764_v13 = vld [vmem:[#allocation19 + $0x270] sm:$0xf]  ;;  %v11766_v21 = vld [vmem:[#allocation19 + $0x2f0] sm:$0xf0]  ;;  %v14110_v58 = vld [vmem:[#allocation19 + $0x7f4] sm:$0xf0] }
 0x7e1   : > { %v13949_v10 = vld [vmem:[#allocation19 + $0x2ec] sm:$0xf0]  ;;  %v14317_v22 = vld [vmem:[#allocation19 + $0xe74] sm:$0xf] }
 0x7e2   : > { %9255 = vmatpush.bf16.msra.mxu0 %v11885_v31  ;;  %9220 = vmatmul.bf16.vlgmr.msrb.gmra.mxu1 %v16162_v6  ;;  %v12277_v31 = vor.u32 %v14077_v45, %v12276_v40  ;;  %v14333_v40 = vld [vmem:[#allocation19 + $0xeec] sm:$0xf0]  ;;  %v13933_v45 = vld [vmem:[#allocation19 + $0x274] sm:$0xf] }
 0x7e3   : > { %9264 = vmatpush.bf16.msra.mxu1 %v13421_v7  ;;  %9281 = vmatpush.bf16.msrb.mxu2 %v11889_v17  ;;  %v12780_v7 = vld [vmem:[#allocation19 + $0xa68] sm:$0xf] }
 0x7e4   : > { %9290 = vmatpush.bf16.msrb.mxu3 %v13425_v62  ;;  %v14204_v17 = vld [vmem:[#allocation19 + $0xae4] sm:$0xf0]  ;;  %v12782_v62 = vld [vmem:[#allocation19 + $0xae8] sm:$0xf0] }
 0x7e5   : > { %9246 = vmatmul.bf16.vlgmr.msra.gmra.mxu3 %v16162_v6  ;;  %v12781_v57 = vor.u32 %v14204_v17, %v12780_v7  ;;  %v12785_v30 = vor.u32 %v14188_v34, %v12782_v62  ;;  %v13301_v7 = vor.u32 %v14333_v40, %v13300_v42  ;;  %v11769_v17 = vor.u32 %v13933_v45, %v11766_v21  ;;  %v11636_v34 = vld [vmem:[#allocation19 + $0x170] sm:$0xf]  ;;  %v14078_v42 = vld [vmem:[#allocation19 + $0x6f4] sm:$0xf0] }
 0x7e6   : > { %9256 = vmatpush.bf16.msra.mxu0 %v11757_v16  ;;  %v12149_v16 = vor.u32 %v14045_v63, %v12148_v9  ;;  %v14301_v9 = vld [vmem:[#allocation19 + $0xdec] sm:$0xf0]  ;;  %v13901_v63 = vld [vmem:[#allocation19 + $0x174] sm:$0xf] }
 0x7e7   : > { %9265 = vmatpush.bf16.msra.mxu1 %v13293_v60  ;;  %9282 = vmatpush.bf16.msrb.mxu2 %v11761_v1  ;;  %v9015_v55 = vpop.f32.mrf.mxu1  ;;  %v12652_v60 = vld [vmem:[#allocation19 + $0x968] sm:$0xf] }
 0x7e8   : > { %9291 = vmatpush.bf16.msrb.mxu3 %v13297_v41  ;;  %v16336_v54 = vpop.f32.mrf.mxu3  ;;  %v14172_v1 = vld [vmem:[#allocation19 + $0x9e4] sm:$0xf0]  ;;  %v12020_v41 = vld [vmem:[#allocation19 + $0x470] sm:$0xf] }
 0x7e9   : > { %v12653_v20 = vor.u32 %v14172_v1, %v12652_v60  ;;  %v13172_v55 = vld [vmem:[#allocation19 + $0xd70] sm:$0xf] }
 0x7ea   : > { %9257 = vmatpush.bf16.msra.mxu0 %v11629_v39  ;;  %v12524_v39 = vld [vmem:[#allocation19 + $0x868] sm:$0xf]  ;;  %v11508_v1 = vld [vmem:[#allocation19 + $0x70] sm:$0xf]  ;;  %v13173_v23 = vor.u32 %v14301_v9, %v13172_v55  ;;  %v12156_v9 = vld [vmem:[#allocation19 + $0x578] sm:$0xf] }
 0x7eb   : > { %9266 = vmatpush.bf16.msra.mxu1 %v13165_v8  ;;  %9283 = vmatpush.bf16.msrb.mxu2 %v11633_v14  ;;  %v12021_v14 = vor.u32 %v14013_v12, %v12020_v41  ;;  %v12525_v29 = vor.u32 %v14140_v32, %v12524_v39  ;;  %v13885_v41 = vld [vmem:[#allocation19 + $0xec] sm:$0xf0]  ;;  %v11510_v39 = vld [vmem:[#allocation19 + $0xf0] sm:$0xf0] }
 0x7ec   : > { %9292 = vmatpush.bf16.msrb.mxu3 %v13169_v35  ;;  %v11892_v35 = vld [vmem:[#allocation19 + $0x370] sm:$0xf]  ;;  %v13046_v32 = vld [vmem:[#allocation19 + $0xcf0] sm:$0xf0] }
 0x7ed   : > { %v13044_v12 = vld [vmem:[#allocation19 + $0xc70] sm:$0xf] }
 0x7ee   : > { %9258 = vmatpush.bf16.msra.mxu0 %v11501_v43  ;;  %v16340_v26 = vpop.f32.mrf.mxu0  ;;  %v14349_v43 = vld [vmem:[#allocation19 + $0xf74] sm:$0xf] }
 0x7ef   : > { %9267 = vmatpush.bf16.msra.mxu1 %v13037_v28  ;;  %9284 = vmatpush.bf16.msrb.mxu2 %v11505_v61  ;;  %v11893_v28 = vor.u32 %v13981_v3, %v11892_v35  ;;  %v13429_v61 = vor.u32 %v14365_v25, %v13428_v52  ;;  %v11509_v35 = vor.u32 %v13885_v41, %v11508_v1  ;;  %v14094_v3 = vld [vmem:[#allocation19 + $0x77c] sm:$0xf] }
 0x7f0   : > { %9293 = vmatpush.bf16.msrb.mxu3 %v13041_v18  ;;  %v9041_v8 = vpop.f32.mrf.mxu3  ;;  %v11897_v18 = vor.u32 %v13965_v27, %v11894_v19  ;;  %v12414_v52 = vld [vmem:[#allocation19 + $0x7f8] sm:$0xf0]  ;;  %v13045_v19 = vor.u32 %v14269_v48, %v13044_v12 }
 0x7f1   : > { %9259 = vmatmul.bf16.vlgmr.msra.gmra.mxu0 %v16156_v46 }
 0x7f2   : > { %9303 = vmatpush.bf16.msrb.mxu0 %v12405_v56  ;;  %9285 = vmatmul.bf16.vlgmr.msrb.gmra.mxu2 %v16156_v46 }
 0x7f3   : > { %9329 = vmatpush.bf16.msra.mxu2 %v12409_v0  ;;  %9268 = vmatpush.bf16.msra.mxu1 %v12909_v37  ;;  %v13433_v0 = vor.u32 %v14349_v43, %v13430_v53  ;;  %v13302_v37 = vld [vmem:[#allocation19 + $0xef0] sm:$0xf0]  ;;  %v12413_v43 = vor.u32 %v14110_v58, %v12412_v51  ;;  %v12916_v53 = vld [vmem:[#allocation19 + $0xb70] sm:$0xf] }
 0x7f4   : > { %9294 = vmatpush.bf16.msrb.mxu3 %v12913_v4  ;;  %v16344_v4 = vld [vmem:[#allocation20 + $0x10] sm:$0xff]  ;;  %v13305_v62 = vor.u32 %v14317_v22, %v13302_v37 }
 0x7f5   : > { %v16342_v56 = vpop.f32.mrf.mxu2  ;;  %v5968_v5 = vperm.slane %v16344_v4, 1  ;;  %v5970_v27 = vperm.slane %v16344_v4, 3  ;;  %v12532_v51 = vld [vmem:[#allocation19 + $0x870] sm:$0xf] }
 0x7f6   : > { %9304 = vmatpush.bf16.msrb.mxu0 %v12277_v31  ;;  %v9054_v11 = vpop.f32.mrf.mxu0  ;;  %v11765_v31 = vor.u32 %v13949_v10, %v11764_v13  ;;  %v12918_v13 = vld [vmem:[#allocation19 + $0xbf0] sm:$0xf0]  ;;  %v12284_v10 = vld [vmem:[#allocation19 + $0x678] sm:$0xf] }
 0x7f7   : > { %9330 = vmatpush.bf16.msra.mxu2 %v12281_v24  ;;  %9269 = vmatpush.bf16.msra.mxu1 %v12781_v57  ;;  %v13917_v24 = vld [vmem:[#allocation19 + $0x1ec] sm:$0xf0]  ;;  %v14285_v57 = vld [vmem:[#allocation19 + $0xd74] sm:$0xf]  ;;  %v9027_v8 = vadd.f32 %v16330_v33, %v5968_v5  ;;  %v9079_v40 = vadd.f32 %v16342_v56, %v5970_v27  ;;  %v12158_v5 = vld [vmem:[#allocation19 + $0x5f8] sm:$0xf0] }
 0x7f8   : > { %9295 = vmatpush.bf16.msrb.mxu3 %v12785_v30  ;;  %v13174_v30 = vld [vmem:[#allocation19 + $0xdf0] sm:$0xf0]  ;;  %v11637_v60 = vor.u32 %v13917_v24, %v11636_v34 }
 0x7f9   : > { %v13177_v59 = vor.u32 %v14285_v57, %v13174_v30  ;;  %v9040_v25 = vadd.f32 %v16336_v54, %v9027_v8  ;;  %v14062_v54 = vld [vmem:[#allocation19 + $0x67c] sm:$0xf] }
 0x7fa   : > { %9305 = vmatpush.bf16.msrb.mxu0 %v12149_v16  ;;  %v5969_v16 = vperm.slane %v16344_v4, 2  ;;  %v13998_v8 = vld [vmem:[#allocation19 + $0x47c] sm:$0xf] }
 0x7fb   : > { %9331 = vmatpush.bf16.msra.mxu2 %v12153_v44  ;;  %9270 = vmatpush.bf16.msra.mxu1 %v12653_v20  ;;  %v11641_v44 = vor.u32 %v13901_v63, %v11638_v38  ;;  %v13869_v20 = vld [vmem:[#allocation19 + $0x74] sm:$0xf]  ;;  %v9451_v11 = vrot.slane %v9040_v25, 6  ;;  %v14046_v63 = vld [vmem:[#allocation19 + $0x5f4] sm:$0xf0] }
 0x7fc   : > { %9296 = vmatpush.bf16.msrb.mxu3 %v12657_v15  ;;  %v14253_v15 = vld [vmem:[#allocation19 + $0xc74] sm:$0xf]  ;;  %v14030_v38 = vld [vmem:[#allocation19 + $0x57c] sm:$0xf]  ;;  %v12157_v1 = vor.u32 %v14046_v63, %v12156_v9  ;;  %v13180_v9 = vld [vmem:[#allocation19 + $0xd78] sm:$0xf] }
 0x7fd   : > { %v9080_v50 = vpop.f32.mrf.mxu2  ;;  %v13049_v33 = vor.u32 %v14253_v15, %v13046_v32  ;;  %v12161_v48 = vor.u32 %v14030_v38, %v12158_v5  ;;  %v12534_v25 = vld [vmem:[#allocation19 + $0x8f0] sm:$0xf0]  ;;  %v14302_v38 = vld [vmem:[#allocation19 + $0xdf4] sm:$0xf0]  ;;  %v13902_v5 = vld [vmem:[#allocation19 + $0x17c] sm:$0xf] }
 0x7fe   : > { %9306 = vmatpush.bf16.msrb.mxu0 %v12021_v14  ;;  %v14157_v50 = vld [vmem:[#allocation19 + $0x974] sm:$0xf] }
 0x7ff   : > { %9332 = vmatpush.bf16.msra.mxu2 %v12025_v47  ;;  %9271 = vmatpush.bf16.msra.mxu1 %v12525_v29  ;;  %v9065_v14 = vpop.f32.mrf.mxu1  ;;  %v5967_v47 = vperm.slane %v16344_v4, 0  ;;  %v11513_v29 = vor.u32 %v13869_v20, %v11510_v39  ;;  %v14014_v20 = vld [vmem:[#allocation19 + $0x4f4] sm:$0xf0] }
 0x800   : > { %9297 = vmatpush.bf16.msrb.mxu3 %v12529_v2  ;;  %v14237_v2 = vld [vmem:[#allocation19 + $0xbec] sm:$0xf0] }
 0x801   : > { %v12917_v21 = vor.u32 %v14237_v2, %v12916_v53  ;;  %v9001_v34 = vadd.f32 %v16327_v36, %v5967_v47  ;;  %v13966_v53 = vld [vmem:[#allocation19 + $0x37c] sm:$0xf] }
 0x802   : > { %9307 = vmatpush.bf16.msrb.mxu0 %v11893_v28  ;;  %9272 = vmatmul.bf16.vlgmr.msra.gmra.mxu1 %v16162_v6  ;;  %v14221_v28 = vld [vmem:[#allocation19 + $0xb74] sm:$0xf]  ;;  %v11902_v2 = vld [vmem:[#allocation19 + $0x3f8] sm:$0xf0] }
 0x803   : > { %9316 = vmatpush.bf16.msrb.mxu1 %v13429_v61  ;;  %9333 = vmatpush.bf16.msra.mxu2 %v11897_v18  ;;  %v9053_v61 = vadd.f32 %v16340_v26, %v5969_v16  ;;  %v12417_v18 = vor.u32 %v14094_v3, %v12414_v52  ;;  %v12921_v22 = vor.u32 %v14221_v28, %v12918_v13  ;;  %v12788_v26 = vld [vmem:[#allocation19 + $0xa70] sm:$0xf]  ;;  %v14125_v52 = vld [vmem:[#allocation19 + $0x874] sm:$0xf] }
 0x804   : > { %9342 = vmatpush.bf16.msra.mxu3 %v13433_v0  ;;  %v12286_v0 = vld [vmem:[#allocation19 + $0x6f8] sm:$0xf0]  ;;  %v9014_v57 = vadd.f32 %v16334_v49, %v9001_v34  ;;  %v12028_v49 = vld [vmem:[#allocation19 + $0x478] sm:$0xf]  ;;  %v14141_v3 = vld [vmem:[#allocation19 + $0x8ec] sm:$0xf0]  ;;  %v12537_v13 = vor.u32 %v14125_v52, %v12534_v25 }
 0x805   : > { %9298 = vmatmul.bf16.vlgmr.msrb.gmra.mxu3 %v16162_v6  ;;  %v9066_v45 = vadd.f32 %v9065_v14, %v9053_v61  ;;  %v12289_v55 = vor.u32 %v14062_v54, %v12286_v0  ;;  %v12030_v14 = vld [vmem:[#allocation19 + $0x4f8] sm:$0xf0]  ;;  %v12533_v28 = vor.u32 %v14141_v3, %v12532_v51  ;;  %v11905_v54 = vor.u32 %v13966_v53, %v11902_v2 }
 0x806   : > { %9308 = vmatpush.bf16.msrb.mxu0 %v11765_v31  ;;  %v12285_v31 = vor.u32 %v14078_v42, %v12284_v10  ;;  %v9478_v41 = vsel %vm9463_vm2, %v9014_v57, %v9451_v11  ;;  %v12033_v27 = vor.u32 %v13998_v8, %v12030_v14  ;;  %v14350_v61 = vld [vmem:[#allocation19 + $0xf7c] sm:$0xf]  ;;  %v11772_v11 = vld [vmem:[#allocation19 + $0x278] sm:$0xf] }
 0x807   : > { %9317 = vmatpush.bf16.msrb.mxu1 %v13301_v7  ;;  %9334 = vmatpush.bf16.msra.mxu2 %v11769_v17  ;;  %v14205_v7 = vld [vmem:[#allocation19 + $0xaec] sm:$0xf0]  ;;  %v14189_v17 = vld [vmem:[#allocation19 + $0xa74] sm:$0xf]  ;;  %v9067_v56 = vpop.f32.mrf.mxu1  ;;  %v9452_v30 = vrot.slane %v9066_v45, 4 }
 0x808   : > { %9343 = vmatpush.bf16.msra.mxu3 %v13305_v62  ;;  %v9091_v37 = vpop.f32.mrf.mxu3  ;;  %v12790_v62 = vld [vmem:[#allocation19 + $0xaf0] sm:$0xf0]  ;;  %v13308_v45 = vld [vmem:[#allocation19 + $0xe78] sm:$0xf]  ;;  %v11646_v57 = vld [vmem:[#allocation19 + $0x1f8] sm:$0xf0] }
 0x809   : > { %v9092_v24 = vadd.f32 %v9091_v37, %v9079_v40  ;;  %v12793_v36 = vor.u32 %v14189_v17, %v12790_v62  ;;  %v13950_v40 = vld [vmem:[#allocation19 + $0x2f4] sm:$0xf0]  ;;  %v13310_v17 = vld [vmem:[#allocation19 + $0xef8] sm:$0xf0] }
 0x80a   : > { %9309 = vmatpush.bf16.msrb.mxu0 %v11637_v60  ;;  %v12789_v60 = vor.u32 %v14205_v7, %v12788_v26  ;;  %v14334_v37 = vld [vmem:[#allocation19 + $0xef4] sm:$0xf0]  ;;  %v11774_v26 = vld [vmem:[#allocation19 + $0x2f8] sm:$0xf0]  ;;  %v11773_v34 = vor.u32 %v13950_v40, %v11772_v11 }
 0x80b   : > { %9318 = vmatpush.bf16.msrb.mxu1 %v13173_v23  ;;  %9335 = vmatpush.bf16.msra.mxu2 %v11641_v44  ;;  %v9453_v16 = vrot.slane %v9092_v24, 2  ;;  %v12660_v23 = vld [vmem:[#allocation19 + $0x970] sm:$0xf]  ;;  %v14318_v7 = vld [vmem:[#allocation19 + $0xe7c] sm:$0xf]  ;;  %v13309_v24 = vor.u32 %v14334_v37, %v13308_v45 }
 0x80c   : > { %9344 = vmatpush.bf16.msra.mxu3 %v13177_v59  ;;  %v14173_v44 = vld [vmem:[#allocation19 + $0x9ec] sm:$0xf0]  ;;  %v12662_v59 = vld [vmem:[#allocation19 + $0x9f0] sm:$0xf0]  ;;  %v11644_v56 = vld [vmem:[#allocation19 + $0x178] sm:$0xf]  ;;  %v13313_v63 = vor.u32 %v14318_v7, %v13310_v17 }
 0x80d   : > { %v9479_v12 = vsel %vm9465_vm3, %v9452_v30, %v9453_v16  ;;  %v12661_v32 = vor.u32 %v14173_v44, %v12660_v23  ;;  %v12665_v58 = vor.u32 %v14157_v50, %v12662_v59  ;;  %v13918_v62 = vld [vmem:[#allocation19 + $0x1f4] sm:$0xf0]  ;;  %v14286_v30 = vld [vmem:[#allocation19 + $0xd7c] sm:$0xf] }
 0x80e   : > { %9310 = vmatpush.bf16.msrb.mxu0 %v11509_v35  ;;  %v9480_v39 = vsel %vm9467_vm4, %v9478_v41, %v9479_v12  ;;  %v16363_v15 = vpop.f32.mrf.mxu0  ;;  %v12029_v35 = vor.u32 %v14014_v20, %v12028_v49  ;;  %v13182_v16 = vld [vmem:[#allocation19 + $0xdf8] sm:$0xf0]  ;;  %v11516_v44 = vld [vmem:[#allocation19 + $0x78] sm:$0xf] }
 0x80f   : > { %9319 = vmatpush.bf16.msrb.mxu1 %v13045_v19  ;;  %9336 = vmatpush.bf16.msra.mxu2 %v11513_v29  ;;  %9502 = vst [vmem:[%s16227_s25 + $0x20] sm:$0xff] %v9480_v39  ;;  %v11900_v19 = vld [vmem:[#allocation19 + $0x378] sm:$0xf]  ;;  %v13185_v12 = vor.u32 %v14286_v30, %v13182_v16  ;;  %v13870_v59 = vld [vmem:[#allocation19 + $0x7c] sm:$0xf] }
 0x810   : > { %9345 = vmatpush.bf16.msra.mxu3 %v13049_v33  ;;  %v9093_v47 = vpop.f32.mrf.mxu3  ;;  %v13982_v29 = vld [vmem:[#allocation19 + $0x3f4] sm:$0xf0]  ;;  %v11518_v49 = vld [vmem:[#allocation19 + $0xf8] sm:$0xf0] }
 0x811   : > { %9311 = vmatmul.bf16.vlgmr.msrb.gmra.mxu0 %v16156_v46  ;;  %v13436_v33 = vld [vmem:[#allocation19 + $0xf78] sm:$0xf]  ;;  %v11901_v10 = vor.u32 %v13982_v29, %v11900_v19  ;;  %v14254_v39 = vld [vmem:[#allocation19 + $0xc7c] sm:$0xf]  ;;  %v11521_v51 = vor.u32 %v13870_v59, %v11518_v49 }
 0x812   : > { %9355 = vmatpush.bf16.msra.mxu0 %v12413_v43  ;;  %9337 = vmatmul.bf16.vlgmr.msra.gmra.mxu2 %v16156_v46  ;;  %v14366_v43 = vld [vmem:[#allocation19 + $0xff4] sm:$0xf0]  ;;  %v13054_v8 = vld [vmem:[#allocation19 + $0xcf8] sm:$0xf0] }
 0x813   : > { %9381 = vmatpush.bf16.msrb.mxu2 %v12417_v18  ;;  %9320 = vmatpush.bf16.msrb.mxu1 %v12917_v21  ;;  %v13438_v18 = vld [vmem:[#allocation19 + $0xff8] sm:$0xf0]  ;;  %v13437_v42 = vor.u32 %v14366_v43, %v13436_v33  ;;  %v13886_v50 = vld [vmem:[#allocation19 + $0xf4] sm:$0xf0] }
 0x814   : > { %9346 = vmatpush.bf16.msra.mxu3 %v12921_v22  ;;  %v13441_v21 = vor.u32 %v14350_v61, %v13438_v18  ;;  %v13052_v41 = vld [vmem:[#allocation19 + $0xc78] sm:$0xf]  ;;  %v11517_v14 = vor.u32 %v13886_v50, %v11516_v44  ;;  %v14222_v3 = vld [vmem:[#allocation19 + $0xb7c] sm:$0xf] }
 0x815   : > { %v16366_v0 = vpop.f32.mrf.mxu2  ;;  %v12924_v47 = vld [vmem:[#allocation19 + $0xb78] sm:$0xf]  ;;  %v12926_v52 = vld [vmem:[#allocation19 + $0xbf8] sm:$0xf0] }
 0x816   : > { %9356 = vmatpush.bf16.msra.mxu0 %v12285_v31  ;;  %v9106_v22 = vpop.f32.mrf.mxu0  ;;  %v13934_v31 = vld [vmem:[#allocation19 + $0x27c] sm:$0xf]  ;;  %v12796_v29 = vld [vmem:[#allocation19 + $0xa78] sm:$0xf] }
 0x817   : > { %9382 = vmatpush.bf16.msrb.mxu2 %v12289_v55  ;;  %9321 = vmatpush.bf16.msrb.mxu1 %v12789_v60  ;;  %v11777_v55 = vor.u32 %v13934_v31, %v11774_v26  ;;  %v11645_v60 = vor.u32 %v13918_v62, %v11644_v56  ;;  %v14206_v33 = vld [vmem:[#allocation19 + $0xaf4] sm:$0xf0]  ;;  %v14190_v53 = vld [vmem:[#allocation19 + $0xa7c] sm:$0xf] }
 0x818   : > { %9347 = vmatpush.bf16.msra.mxu3 %v12793_v36  ;;  %v13181_v36 = vor.u32 %v14302_v38, %v13180_v9  ;;  %v12798_v2 = vld [vmem:[#allocation19 + $0xaf8] sm:$0xf0]  ;;  %v12668_v18 = vld [vmem:[#allocation19 + $0x978] sm:$0xf]  ;;  %v5974_v9 = vperm.slane %v16344_v4, 7 }
 0x819   : > { %v12801_v61 = vor.u32 %v14190_v53, %v12798_v2  ;;  %v14142_v22 = vld [vmem:[#allocation19 + $0x8f4] sm:$0xf0]  ;;  %v14126_v37 = vld [vmem:[#allocation19 + $0x87c] sm:$0xf] }
 0x81a   : > { %9357 = vmatpush.bf16.msra.mxu0 %v12157_v1  ;;  %v11649_v1 = vor.u32 %v13902_v5, %v11646_v57  ;;  %v12542_v31 = vld [vmem:[#allocation19 + $0x8f8] sm:$0xf0] }
 0x81b   : > { %9383 = vmatpush.bf16.msrb.mxu2 %v12161_v48  ;;  %9322 = vmatpush.bf16.msrb.mxu1 %v12661_v32  ;;  %v14270_v48 = vld [vmem:[#allocation19 + $0xcf4] sm:$0xf0]  ;;  %v12545_v26 = vor.u32 %v14126_v37, %v12542_v31 }
 0x81c   : > { %9348 = vmatpush.bf16.msra.mxu3 %v12665_v58  ;;  %v13053_v32 = vor.u32 %v14270_v48, %v13052_v41  ;;  %v13057_v58 = vor.u32 %v14254_v39, %v13054_v8 }
 0x81d   : > { %v9132_v23 = vpop.f32.mrf.mxu2 }
 0x81e   : > { %9358 = vmatpush.bf16.msra.mxu0 %v12029_v35  ;;  %v14238_v35 = vld [vmem:[#allocation19 + $0xbf4] sm:$0xf0] }
 0x81f   : > { %9384 = vmatpush.bf16.msrb.mxu2 %v12033_v27  ;;  %9323 = vmatpush.bf16.msrb.mxu1 %v12533_v28  ;;  %v16370_v20 = vpop.f32.mrf.mxu1  ;;  %v12925_v25 = vor.u32 %v14238_v35, %v12924_v47  ;;  %v12929_v27 = vor.u32 %v14222_v3, %v12926_v52  ;;  %v12797_v28 = vor.u32 %v14206_v33, %v12796_v29  ;;  %v5946_v47 = vld [vmem:[#allocation20 + $0x18] sm:$0xff] }
 0x820   : > { %9349 = vmatpush.bf16.msra.mxu3 %v12537_v13  ;;  %v14174_v13 = vld [vmem:[#allocation19 + $0x9f4] sm:$0xf0]  ;;  %v5976_v35 = vperm.slane %v5946_v47, 1  ;;  %v5977_v52 = vperm.slane %v5946_v47, 2  ;;  %v5975_v29 = vperm.slane %v5946_v47, 0 }
 0x821   : > { %v12669_v11 = vor.u32 %v14174_v13, %v12668_v18 }
 0x822   : > { %9359 = vmatpush.bf16.msra.mxu0 %v11901_v10  ;;  %9324 = vmatmul.bf16.vlgmr.msrb.gmra.mxu1 %v16162_v6  ;;  %v14158_v10 = vld [vmem:[#allocation19 + $0x97c] sm:$0xf] }
 0x823   : > { %9368 = vmatpush.bf16.msra.mxu1 %v13437_v42  ;;  %9385 = vmatpush.bf16.msrb.mxu2 %v11905_v54  ;;  %v12670_v42 = vld [vmem:[#allocation19 + $0x9f8] sm:$0xf0] }
 0x824   : > { %9394 = vmatpush.bf16.msrb.mxu3 %v13441_v21  ;;  %v12673_v40 = vor.u32 %v14158_v10, %v12670_v42  ;;  %v12540_v21 = vld [vmem:[#allocation19 + $0x878] sm:$0xf] }
 0x825   : > { %9350 = vmatmul.bf16.vlgmr.msra.gmra.mxu3 %v16162_v6 }
 0x826   : > { %9360 = vmatpush.bf16.msra.mxu0 %v11773_v34  ;;  %v5972_v34 = vperm.slane %v16344_v4, 5 }
 0x827   : > { %9369 = vmatpush.bf16.msra.mxu1 %v13309_v24  ;;  %9386 = vmatpush.bf16.msrb.mxu2 %v11777_v55  ;;  %v9119_v43 = vpop.f32.mrf.mxu1  ;;  %v5973_v55 = vperm.slane %v16344_v4, 6 }
 0x828   : > { %9395 = vmatpush.bf16.msrb.mxu3 %v13313_v63  ;;  %v9143_v19 = vpop.f32.mrf.mxu3  ;;  %v9131_v62 = vadd.f32 %v16366_v0, %v5972_v34  ;;  %v5971_v63 = vperm.slane %v16344_v4, 4 }
 0x82a   : > { %9361 = vmatpush.bf16.msra.mxu0 %v11645_v60  ;;  %v9144_v38 = vadd.f32 %v9143_v19, %v9131_v62  ;;  %v5978_v19 = vperm.slane %v5946_v47, 3 }
 0x82b   : > { %9370 = vmatpush.bf16.msra.mxu1 %v13181_v36  ;;  %9387 = vmatpush.bf16.msrb.mxu2 %v11649_v1 }
 0x82c   : > { %9396 = vmatpush.bf16.msrb.mxu3 %v13185_v12  ;;  %v9454_v60 = vrot.slane %v9144_v38, 6  ;;  %v5981_v38 = vperm.slane %v5946_v47, 6 }
 0x82e   : > { %9362 = vmatpush.bf16.msra.mxu0 %v11517_v14  ;;  %v9156_v54 = vpop.f32.mrf.mxu0 }
 0x82f   : > { %9371 = vmatpush.bf16.msra.mxu1 %v13053_v32  ;;  %9388 = vmatpush.bf16.msrb.mxu2 %v11521_v51  ;;  %v9157_v5 = vadd.f32 %v9156_v54, %v5973_v55 }
 0x830   : > { %9397 = vmatpush.bf16.msrb.mxu3 %v13057_v58  ;;  %v9145_v45 = vpop.f32.mrf.mxu3 }
 0x831   : > { %9363 = vmatmul.bf16.vlgmr.msra.gmra.mxu0 %v16156_v46 }
 0x832   : > { %9389 = vmatmul.bf16.vlgmr.msrb.gmra.mxu2 %v16156_v46  ;;  %v12541_v46 = vor.u32 %v14142_v22, %v12540_v21 }
 0x833   : > { %9372 = vmatpush.bf16.msra.mxu1 %v12925_v25 }
 0x834   : > { %9398 = vmatpush.bf16.msrb.mxu3 %v12929_v27 }
 0x835   : > { %v9182_v7 = vpop.f32.mrf.mxu2 }
 0x836   : > { %v9158_v17 = vpop.f32.mrf.mxu0  ;;  %v9183_v57 = vadd.f32 %v9182_v7, %v5974_v9  ;;  %v5980_v9 = vperm.slane %v5946_v47, 5 }
 0x837   : > { %9373 = vmatpush.bf16.msra.mxu1 %v12797_v28 }
 0x838   : > { %9399 = vmatpush.bf16.msrb.mxu3 %v12801_v61 }
 0x83b   : > { %9374 = vmatpush.bf16.msra.mxu1 %v12669_v11 }
 0x83c   : > { %9400 = vmatpush.bf16.msrb.mxu3 %v12673_v40 }
 0x83d   : > { %v9184_v24 = vpop.f32.mrf.mxu2 }
 0x83f   : > { %9375 = vmatpush.bf16.msra.mxu1 %v12541_v46  ;;  %v9169_v56 = vpop.f32.mrf.mxu1 }
 0x840   : > { %9401 = vmatpush.bf16.msrb.mxu3 %v12545_v26  ;;  %v9170_v30 = vadd.f32 %v9169_v56, %v9157_v5 }
 0x842   : > { %9376 = vmatmul.bf16.vlgmr.msra.gmra.mxu1 %v16162_v6  ;;  %v9455_v44 = vrot.slane %v9170_v30, 4  ;;  %v5982_v30 = vperm.slane %v5946_v47, 7 }
 0x843   : > { %9402 = vmatmul.bf16.vlgmr.msrb.gmra.mxu3 %v16162_v6  ;;  %v9105_v6 = vadd.f32 %v16363_v15, %v5971_v63 }
 0x845   : > { %v9118_v23 = vadd.f32 %v16370_v20, %v9105_v6 }
 0x847   : > { %v9171_v1 = vpop.f32.mrf.mxu1  ;;  %v9481_v0 = vsel %vm9463_vm2, %v9118_v23, %v9454_v60 }
 0x848   : > { %v9195_v16 = vpop.f32.mrf.mxu3 }
 0x849   : > { %v9196_v36 = vadd.f32 %v9195_v16, %v9183_v57  ;;  %v5979_v16 = vperm.slane %v5946_v47, 4 }
 0x84b   : > { %v9456_v50 = vrot.slane %v9196_v36, 2 }
 0x84d   : > { %v9482_v41 = vsel %vm9465_vm3, %v9455_v44, %v9456_v50 }
 0x84e   : > { %v9483_v4 = vsel %vm9467_vm4, %v9481_v0, %v9482_v41  ;;  %v9208_v12 = vpop.f32.mrf.mxu0 }
 0x84f   : > { %9503 = vst [vmem:[%s16227_s25 + $0x28] sm:$0xff] %v9483_v4  ;;  %v9209_v61 = vadd.f32 %v9208_v12, %v5975_v29 }
 0x850   : > { %v9197_v48 = vpop.f32.mrf.mxu3 }
 0x855   : > { %v9234_v59 = vpop.f32.mrf.mxu2 }
 0x856   : > { %v9210_v49 = vpop.f32.mrf.mxu0  ;;  %v9235_v27 = vadd.f32 %v9234_v59, %v5976_v35 }
 0x85d   : > { %v9236_v39 = vpop.f32.mrf.mxu2 }
 0x85f   : > { %v9221_v15 = vpop.f32.mrf.mxu1 }
 0x860   : > { %v9222_v42 = vadd.f32 %v9221_v15, %v9209_v61 }
 0x867   : > { %v9223_v14 = vpop.f32.mrf.mxu1 }
 0x868   : > { %v9247_v8 = vpop.f32.mrf.mxu3 }
 0x869   : > { %v9248_v33 = vadd.f32 %v9247_v8, %v9235_v27 }
 0x86b   : > { %v9457_v18 = vrot.slane %v9248_v33, 6 }
 0x86d   : > { %v9484_v40 = vsel %vm9463_vm2, %v9222_v42, %v9457_v18 }
 0x86e   : > { %v9260_v32 = vpop.f32.mrf.mxu0 }
 0x86f   : > { %v9261_v43 = vadd.f32 %v9260_v32, %v5977_v52 }
 0x870   : > { %v9249_v51 = vpop.f32.mrf.mxu3 }
 0x875   : > { %v9286_v20 = vpop.f32.mrf.mxu2 }
 0x876   : > { %v9262_v58 = vpop.f32.mrf.mxu0  ;;  %v9287_v53 = vadd.f32 %v9286_v20, %v5978_v19 }
 0x87d   : > { %v9288_v3 = vpop.f32.mrf.mxu2 }
 0x87f   : > { %v9273_v25 = vpop.f32.mrf.mxu1 }
 0x880   : > { %v9274_v2 = vadd.f32 %v9273_v25, %v9261_v43 }
 0x882   : > { %v9458_v54 = vrot.slane %v9274_v2, 4 }
 0x887   : > { %v9275_v10 = vpop.f32.mrf.mxu1 }
 0x888   : > { %v9299_v28 = vpop.f32.mrf.mxu3 }
 0x889   : > { %v9300_v13 = vadd.f32 %v9299_v28, %v9287_v53 }
 0x88b   : > { %v9459_v11 = vrot.slane %v9300_v13, 2 }
 0x88d   : > { %v9485_v45 = vsel %vm9465_vm3, %v9458_v54, %v9459_v11 }
 0x88e   : > { %v9486_v21 = vsel %vm9467_vm4, %v9484_v40, %v9485_v45  ;;  %v9312_v22 = vpop.f32.mrf.mxu0 }
 0x88f   : > { %9504 = vst [vmem:[%s16227_s25 + $0x30] sm:$0xff] %v9486_v21  ;;  %v9313_v44 = vadd.f32 %v9312_v22, %v5979_v16 }
 0x890   : > { %v9301_v37 = vpop.f32.mrf.mxu3 }
 0x895   : > { %v9338_v31 = vpop.f32.mrf.mxu2 }
 0x896   : > { %v9314_v46 = vpop.f32.mrf.mxu0  ;;  %v9339_v57 = vadd.f32 %v9338_v31, %v5980_v9 }
 0x89d   : > { %v9340_v26 = vpop.f32.mrf.mxu2 }
 0x89f   : > { %v9325_v7 = vpop.f32.mrf.mxu1 }
 0x8a0   : > { %v9326_v4 = vadd.f32 %v9325_v7, %v9313_v44 }
 0x8a7   : > { %v9327_v34 = vpop.f32.mrf.mxu1 }
 0x8a8   : > { %v9351_v17 = vpop.f32.mrf.mxu3 }
 0x8a9   : > { %v9352_v6 = vadd.f32 %v9351_v17, %v9339_v57 }
 0x8ab   : > { %v9460_v50 = vrot.slane %v9352_v6, 6 }
 0x8ad   : > { %v9487_v59 = vsel %vm9463_vm2, %v9326_v4, %v9460_v50 }
 0x8ae   : > { %v9364_v24 = vpop.f32.mrf.mxu0 }
 0x8af   : > { %v9365_v60 = vadd.f32 %v9364_v24, %v5981_v38 }
 0x8b0   : > { %v9353_v55 = vpop.f32.mrf.mxu3 }
 0x8b5   : > { %v9390_v56 = vpop.f32.mrf.mxu2 }
 0x8b6   : > { %v9366_v62 = vpop.f32.mrf.mxu0  ;;  %v9391_v36 = vadd.f32 %v9390_v56, %v5982_v30 }
 0x8bd   : > { %v9392_v63 = vpop.f32.mrf.mxu2 }
 0x8bf   : > { %v9377_v5 = vpop.f32.mrf.mxu1 }
 0x8c0   : > { %v9378_v1 = vadd.f32 %v9377_v5, %v9365_v60 }
 0x8c2   : > { %v9461_v12 = vrot.slane %v9378_v1, 4 }
 0x8c6   : > { %v9403_v23 = vpop.f32.mrf.mxu3 }
 0x8c7   : > { %v9404_v0 = vadd.f32 %v9403_v23, %v9391_v36  ;;  %v9379_v41 = vpop.f32.mrf.mxu1 }
 0x8c9   : > { %v9462_v48 = vrot.slane %v9404_v0, 2 }
 0x8cb   : > { %v9488_v49 = vsel %vm9465_vm3, %v9461_v12, %v9462_v48 }
 0x8cc   : > { %v9489_v39 = vsel %vm9467_vm4, %v9487_v59, %v9488_v49 }
 0x8cd   : > { %9505 = vst [vmem:[%s16227_s25 + $0x38] sm:$0xff] %v9489_v39 }
 0x8ce   : > { %v9405_v15 = vpop.f32.mrf.mxu3 }
 0x8cf   : > { %14928 = shalt.err (!%p14925_p8)
}
 0x8d0   : > { %14416 = dma.vmem_to_hbm [thread:$0]  (%p15122_p5), %s9521_s22, 1024, %s9523_s30, %s9507_s29  }
 0x8d1 PF: > { %s16465_s2 = sld [smem:[#allocation31_spill]]  ;;  %p14483_p9 = scmp.ge.s32.totalorder %s14991_s28, 2 }
 0x8d3   : > { %p14456_p10 = pnand %p14483_p9, %p15126_p6 }
 0x8d5   : > { %p14457_p11 = pneg %p14456_p10 }
 0x8d7   : > { %s9534_s1 = sand.u32 1, %s16465_s2  }
 0x8d8   : > { %s9535_s25 = scalar_lea.sflag [#allocation4], %s9534_s1 }
 0x8d9   : > { %14974 = dma.done.wait (%p14457_p11), %s9535_s25, 1024  }
 0x8da   : > { %14976 = vsyncadd (%p14457_p11), %s9535_s25, 4294966272  ;;  %s16467_s28 = sld [smem:[#allocation33_spill]]  ;;  %s16470_s25 = smov %s14983_s26 }
 0x8db   : > { %s16468_s4 = sld [smem:[#allocation32_spill]] }
 0x8dc   : > { %s16469_s27 = sld [smem:[#allocation34_spill]] }
 0x8e0   : > { %p30_p12 = scmp.ge.s32.totalorder %s16467_s28, 4  }
 0x8e1   : > { %s16471_s26 = smov %s16468_s4 }
 0x8e2   :  { %32 = sbr.rel (!%p30_p12) target bundleno = 15 (0xf), region = 156 }
 0x8e7   :  { %9541 = vsyncpa [#allocation3], 1 }
 0x8e8   :  { %9543 = vsyncpa [#allocation3 + $0x1], 1 }
 0x8e9   :  { %9544 = vsyncpa [#allocation6], 1 }
 0x8ea   :  { %9545 = vsyncpa [#allocation9], 1 }
 0x8eb   :  { %9546 = vsyncpa [#allocation12], 1 }
 0x8ec   :  { %9547 = vsyncpa [#allocation15], 1 }
 0x8ed   :  { %9548 = vsyncpa [#allocation18], 1 }
 0x8ee   :  { %9549 = vsyncpa [#allocation21], 1 }
 0x8ef   :  { %9550 = vsyncpa [#allocation4], 1 }
 0x8f0   :  { %9552 = vsyncpa [#allocation4 + $0x1], 1 }

</bundles_post_ra>
